<compile_context>
chip_gen: v6e
topology: v6e:2x2x1
jax: 0.10.0
libtpu: 0.0.40
codegen_flags: <defaults>
</compile_context>

<pallas_src>
import functools

import jax
import jax.numpy as jnp
from jax.experimental import pallas as pl
from jax.experimental.pallas import tpu as pltpu


def _conv_relu_kernel(x_ref, w_ref, b_ref, o_ref, *,
                      Hout, Wout, KH, KW, Cin, Cout, Bblk):
    """One batch-block per grid step.

    x_ref: (Bblk, Hout+KH-1, Wout+KW-1, Cin)  padded input tile (VMEM, bf16)
    w_ref: (KH*KW*Cin, Cout)                  im2col-ready weights (VMEM, bf16)
    b_ref: (1, Cout)                          bias (VMEM, f32)
    o_ref: (Bblk, Cout, Hout*Wout)            lane-dense output tile (VMEM, f32)
    """
    HW = Hout * Wout

    # im2col: concatenate the KH*KW statically shifted patches along the lane
    # axis -> a single (Bblk*HW, KH*KW*Cin) matrix, i.e. one MXU push instead
    # of KH*KW small K=Cin matmuls.
    cols = []
    for kh in range(KH):
        for kw in range(KW):
            patch = x_ref[:, kh:kh + Hout, kw:kw + Wout, :]      # (Bblk,Hout,Wout,Cin)
            cols.append(patch.reshape(Bblk * HW, Cin))
    col = jnp.concatenate(cols, axis=-1)                          # (Bblk*HW, KH*KW*Cin)

    # Single matmul, f32 accumulation on the MXU.
    acc = jnp.dot(col, w_ref[...], preferred_element_type=jnp.float32)
    # Bias + ReLU epilogue in f32 (native VALU on all generations).
    acc = jnp.maximum(acc + b_ref[0].astype(jnp.float32), 0.0)    # (Bblk*HW, Cout)

    # Lane-dense stores: (Cout, HW) with HW a multiple of 128 -> unmasked vst.
    for b in range(Bblk):
        o_ref[b] = acc[b * HW:(b + 1) * HW, :].T.astype(o_ref.dtype)


def basic_conv2d(x_nchw, weight, bias, *, padding=1, block_n=None,
                 compute_dtype=jnp.bfloat16, out_dtype=jnp.float32):
    """Conv2d(stride=1, padding=padding) + ReLU.

    x_nchw: (N, Cin, H, W)
    weight: (Cout, Cin, KH, KW)   (PyTorch layout)
    bias:   (Cout,)
    returns (N, Cout, H_out, W_out) with H_out = H + 2*padding - KH + 1
    """
    # TODO(synk): stride > 1 (e.g. GoogLeNet conv1 7x7/2) not implemented here.
    N, Cin, H, W = x_nchw.shape
    Cout, _, KH, KW = weight.shape
    Hout = H + 2 * padding - KH + 1
    Wout = W + 2 * padding - KW + 1
    Hp, Wp = H + 2 * padding, W + 2 * padding

    if block_n is None:
        block_n = next(b for b in (8, 4, 2, 1) if N % b == 0)
    assert N % block_n == 0

    # Glue in plain JAX: layout change + zero-padding + im2col weight relayout.
    # TODO(synk): fuse NCHW->NHWC + zero padding into the kernel (or relayout
    # once per network) to avoid extra HBM round trips of the activation.
    x_nhwc = jnp.transpose(x_nchw, (0, 2, 3, 1)).astype(compute_dtype)
    x_pad = jnp.pad(x_nhwc, ((0, 0), (padding, padding), (padding, padding), (0, 0)))
    # (Cout, Cin, KH, KW) -> (KH, KW, Cin, Cout) -> (KH*KW*Cin, Cout): matches
    # the in-kernel im2col column ordering (kh major, kw, then ci).
    w_mat = jnp.transpose(weight, (2, 3, 1, 0)).reshape(KH * KW * Cin, Cout)
    w_mat = w_mat.astype(compute_dtype)
    b2d = bias.reshape(1, Cout).astype(jnp.float32)

    kernel = functools.partial(_conv_relu_kernel, Hout=Hout, Wout=Wout,
                               KH=KH, KW=KW, Cin=Cin, Cout=Cout, Bblk=block_n)

    out_flat = pl.pallas_call(
        kernel,
        out_shape=jax.ShapeDtypeStruct((N, Cout, Hout * Wout), out_dtype),
        grid_spec=pltpu.PrefetchScalarGridSpec(
            num_scalar_prefetch=0,
            grid=(N // block_n,),
            in_specs=[
                pl.BlockSpec((block_n, Hp, Wp, Cin), lambda n: (n, 0, 0, 0)),
                pl.BlockSpec((KH * KW * Cin, Cout), lambda n: (0, 0)),
                pl.BlockSpec((1, Cout), lambda n: (0, 0)),
            ],
            out_specs=pl.BlockSpec((block_n, Cout, Hout * Wout),
                                   lambda n: (n, 0, 0)),
        ),
        compiler_params=pltpu.CompilerParams(
            dimension_semantics=("parallel",)),
    )(x_pad, w_mat, b2d)

    # Free reshape (no transpose): output was computed lane-dense as (Cout, H*W).
    return out_flat.reshape(N, Cout, Hout, Wout)


def _reference(x_nchw, weight, bias, padding):
    y = jax.lax.conv_general_dilated(
        x_nchw, weight, window_strides=(1, 1),
        padding=[(padding, padding), (padding, padding)],
        dimension_numbers=("NCHW", "OIHW", "NCHW"))
    y = y + bias.reshape(1, -1, 1, 1)
    return jnp.maximum(y, 0.0)


if __name__ == "__main__":
    # BasicConv2d(in_channels=4, out_channels=8, kernel_size=3, padding=1)
    N, Cin, H, W = 2, 4, 16, 16
    Cout, KH, KW, padding = 8, 3, 3, 1

    key = jax.random.PRNGKey(0)
    kx, kw, kb = jax.random.split(key, 3)
    x = jax.random.normal(kx, (N, Cin, H, W), dtype=jnp.float32)
    # Deterministic parameter init (kaiming-uniform-ish scale, like nn.Conv2d default).
    fan_in = Cin * KH * KW
    bound = 1.0 / jnp.sqrt(fan_in)
    weight = jax.random.uniform(kw, (Cout, Cin, KH, KW), jnp.float32, -bound, bound)
    bias = jax.random.uniform(kb, (Cout,), jnp.float32, -bound, bound)

    out = basic_conv2d(x, weight, bias, padding=padding)
    out = jax.block_until_ready(out)

    ref = _reference(x, weight, bias, padding)
    assert out.shape == ref.shape == (N, Cout, H, W)
    # bf16 inputs/weights with f32 accumulation -> relaxed tolerance vs. f32 ref.
    max_err = float(jnp.max(jnp.abs(out - ref)))
    assert jnp.allclose(out, ref, atol=5e-2, rtol=5e-2), f"max abs err {max_err}"

    print("KERNEL_OK")
</pallas_src>

<mosaic_0001>
module attributes {stable_mosaic.version = 11 : i64} {
  func.func @_conv_relu_kernel(%arg0: i32, %arg1: memref<2x18x18x4xbf16, #tpu.memory_space<vmem>>, %arg2: memref<36x8xbf16, #tpu.memory_space<vmem>>, %arg3: memref<1x8xf32, #tpu.memory_space<vmem>>, %arg4: memref<2x8x256xf32, #tpu.memory_space<vmem>>) attributes {dimension_semantics = [#tpu.dimension_semantics<parallel>], iteration_bounds = array<i64: 1>, scalar_prefetch = 0 : i64, scratch_operands = 0 : i64, tpu.core_type = #tpu.core_type<tc>, window_params = [{transform_indices = @transform_0, window_bounds = array<i64: 2, 18, 18, 4>}, {pipeline_mode = #tpu.pipeline_mode<synchronous>, transform_indices = @transform_1, window_bounds = array<i64: 36, 8>}, {pipeline_mode = #tpu.pipeline_mode<synchronous>, transform_indices = @transform_2, window_bounds = array<i64: 1, 8>}, {transform_indices = @transform_3, window_bounds = array<i64: 2, 8, 256>}]} {
    %c0 = arith.constant 0 : index
    %c0_0 = arith.constant 0 : index
    %c0_1 = arith.constant 0 : index
    %c0_2 = arith.constant 0 : index
    %0 = vector.load %arg1[%c0, %c0_0, %c0_1, %c0_2] : memref<2x18x18x4xbf16, #tpu.memory_space<vmem>>, vector<2x16x16x4xbf16>
    %1 = vector.shape_cast %0 : vector<2x16x16x4xbf16> to vector<512x4xbf16>
    %c0_3 = arith.constant 0 : index
    %c0_4 = arith.constant 0 : index
    %c1 = arith.constant 1 : index
    %c0_5 = arith.constant 0 : index
    %2 = vector.load %arg1[%c0_3, %c0_4, %c1, %c0_5] : memref<2x18x18x4xbf16, #tpu.memory_space<vmem>>, vector<2x16x16x4xbf16>
    %3 = vector.shape_cast %2 : vector<2x16x16x4xbf16> to vector<512x4xbf16>
    %c0_6 = arith.constant 0 : index
    %c0_7 = arith.constant 0 : index
    %c2 = arith.constant 2 : index
    %c0_8 = arith.constant 0 : index
    %4 = vector.load %arg1[%c0_6, %c0_7, %c2, %c0_8] : memref<2x18x18x4xbf16, #tpu.memory_space<vmem>>, vector<2x16x16x4xbf16>
    %5 = vector.shape_cast %4 : vector<2x16x16x4xbf16> to vector<512x4xbf16>
    %c0_9 = arith.constant 0 : index
    %c1_10 = arith.constant 1 : index
    %c0_11 = arith.constant 0 : index
    %c0_12 = arith.constant 0 : index
    %6 = vector.load %arg1[%c0_9, %c1_10, %c0_11, %c0_12] : memref<2x18x18x4xbf16, #tpu.memory_space<vmem>>, vector<2x16x16x4xbf16>
    %7 = vector.shape_cast %6 : vector<2x16x16x4xbf16> to vector<512x4xbf16>
    %c0_13 = arith.constant 0 : index
    %c1_14 = arith.constant 1 : index
    %c1_15 = arith.constant 1 : index
    %c0_16 = arith.constant 0 : index
    %8 = vector.load %arg1[%c0_13, %c1_14, %c1_15, %c0_16] : memref<2x18x18x4xbf16, #tpu.memory_space<vmem>>, vector<2x16x16x4xbf16>
    %9 = vector.shape_cast %8 : vector<2x16x16x4xbf16> to vector<512x4xbf16>
    %c0_17 = arith.constant 0 : index
    %c1_18 = arith.constant 1 : index
    %c2_19 = arith.constant 2 : index
    %c0_20 = arith.constant 0 : index
    %10 = vector.load %arg1[%c0_17, %c1_18, %c2_19, %c0_20] : memref<2x18x18x4xbf16, #tpu.memory_space<vmem>>, vector<2x16x16x4xbf16>
    %11 = vector.shape_cast %10 : vector<2x16x16x4xbf16> to vector<512x4xbf16>
    %c0_21 = arith.constant 0 : index
    %c2_22 = arith.constant 2 : index
    %c0_23 = arith.constant 0 : index
    %c0_24 = arith.constant 0 : index
    %12 = vector.load %arg1[%c0_21, %c2_22, %c0_23, %c0_24] : memref<2x18x18x4xbf16, #tpu.memory_space<vmem>>, vector<2x16x16x4xbf16>
    %13 = vector.shape_cast %12 : vector<2x16x16x4xbf16> to vector<512x4xbf16>
    %c0_25 = arith.constant 0 : index
    %c2_26 = arith.constant 2 : index
    %c1_27 = arith.constant 1 : index
    %c0_28 = arith.constant 0 : index
    %14 = vector.load %arg1[%c0_25, %c2_26, %c1_27, %c0_28] : memref<2x18x18x4xbf16, #tpu.memory_space<vmem>>, vector<2x16x16x4xbf16>
    %15 = vector.shape_cast %14 : vector<2x16x16x4xbf16> to vector<512x4xbf16>
    %c0_29 = arith.constant 0 : index
    %c2_30 = arith.constant 2 : index
    %c2_31 = arith.constant 2 : index
    %c0_32 = arith.constant 0 : index
    %16 = vector.load %arg1[%c0_29, %c2_30, %c2_31, %c0_32] : memref<2x18x18x4xbf16, #tpu.memory_space<vmem>>, vector<2x16x16x4xbf16>
    %17 = vector.shape_cast %16 : vector<2x16x16x4xbf16> to vector<512x4xbf16>
    %18 = tpu.concatenate %1, %3, %5, %7, %9, %11, %13, %15, %17 in 1 : vector<512x4xbf16>, vector<512x4xbf16>, vector<512x4xbf16>, vector<512x4xbf16>, vector<512x4xbf16>, vector<512x4xbf16>, vector<512x4xbf16>, vector<512x4xbf16>, vector<512x4xbf16> -> vector<512x36xbf16>
    %c0_33 = arith.constant 0 : index
    %c0_34 = arith.constant 0 : index
    %19 = vector.load %arg2[%c0_33, %c0_34] : memref<36x8xbf16, #tpu.memory_space<vmem>>, vector<36x8xbf16>
    %cst = arith.constant dense<0.000000e+00> : vector<512x8xf32>
    %20 = tpu.matmul %18, %19, %cst {dimension_numbers = #tpu.dot_dimension_numbers<[1], [0], [0], [1], [0, 0, 1, 1], [], []>} : vector<512x36xbf16>, vector<36x8xbf16>, vector<512x8xf32> -> vector<512x8xf32>
    %c0_35 = arith.constant 0 : index
    %c0_36 = arith.constant 0 : index
    %21 = vector.load %arg3[%c0_35, %c0_36] : memref<1x8xf32, #tpu.memory_space<vmem>>, vector<1x8xf32>
    %22 = vector.shape_cast %21 : vector<1x8xf32> to vector<8xf32>
    %23 = vector.shape_cast %22 : vector<8xf32> to vector<1x8xf32>
    %24 = vector.broadcast %23 : vector<1x8xf32> to vector<512x8xf32>
    %25 = arith.addf %20, %24 : vector<512x8xf32>
    %cst_37 = arith.constant 0.000000e+00 : f32
    %26 = vector.broadcast %cst_37 : f32 to vector<512x8xf32>
    %27 = arith.maximumf %25, %26 : vector<512x8xf32>
    %28 = vector.extract_strided_slice %27 {offsets = [0, 0], sizes = [256, 8], strides = [1, 1]} : vector<512x8xf32> to vector<256x8xf32>
    %29 = tpu.transpose %28, [1, 0] : vector<256x8xf32> -> vector<8x256xf32>
    %c0_38 = arith.constant 0 : index
    %c0_39 = arith.constant 0 : index
    %c0_40 = arith.constant 0 : index
    %30 = vector.load %arg4[%c0_38, %c0_39, %c0_40] : memref<2x8x256xf32, #tpu.memory_space<vmem>>, vector<1x8x256xf32>
    %31 = vector.shape_cast %30 : vector<1x8x256xf32> to vector<8x256xf32>
    %32 = vector.shape_cast %29 : vector<8x256xf32> to vector<1x8x256xf32>
    tpu.vector_store %arg4[%c0_38, %c0_39, %c0_40], %32 {strides = array<i32>} : memref<2x8x256xf32, #tpu.memory_space<vmem>>, vector<1x8x256xf32>,
    %33 = vector.extract_strided_slice %27 {offsets = [256, 0], sizes = [256, 8], strides = [1, 1]} : vector<512x8xf32> to vector<256x8xf32>
    %34 = tpu.transpose %33, [1, 0] : vector<256x8xf32> -> vector<8x256xf32>
    %c1_41 = arith.constant 1 : index
    %c0_42 = arith.constant 0 : index
    %c0_43 = arith.constant 0 : index
    %35 = vector.load %arg4[%c1_41, %c0_42, %c0_43] : memref<2x8x256xf32, #tpu.memory_space<vmem>>, vector<1x8x256xf32>
    %36 = vector.shape_cast %35 : vector<1x8x256xf32> to vector<8x256xf32>
    %37 = vector.shape_cast %34 : vector<8x256xf32> to vector<1x8x256xf32>
    tpu.vector_store %arg4[%c1_41, %c0_42, %c0_43], %37 {strides = array<i32>} : memref<2x8x256xf32, #tpu.memory_space<vmem>>, vector<1x8x256xf32>,
    return
  }
  func.func @transform_0(%arg0: i32) -> (i32, i32, i32, i32) {
    %c0_i32 = arith.constant 0 : i32
    %c0_i32_0 = arith.constant 0 : i32
    %c0_i32_1 = arith.constant 0 : i32
    %c0_i32_2 = arith.constant 0 : i32
    return %arg0, %c0_i32, %c0_i32_0, %c0_i32_1 : i32, i32, i32, i32
  }
  func.func @transform_1(%arg0: i32) -> (i32, i32) {
    %c0_i32 = arith.constant 0 : i32
    %c0_i32_0 = arith.constant 0 : i32
    %c0_i32_1 = arith.constant 0 : i32
    return %c0_i32, %c0_i32_0 : i32, i32
  }
  func.func @transform_2(%arg0: i32) -> (i32, i32) {
    %c0_i32 = arith.constant 0 : i32
    %c0_i32_0 = arith.constant 0 : i32
    %c0_i32_1 = arith.constant 0 : i32
    return %c0_i32, %c0_i32_0 : i32, i32
  }
  func.func @transform_3(%arg0: i32) -> (i32, i32, i32) {
    %c0_i32 = arith.constant 0 : i32
    %c0_i32_0 = arith.constant 0 : i32
    %c0_i32_1 = arith.constant 0 : i32
    return %arg0, %c0_i32, %c0_i32_0 : i32, i32, i32
  }
}

</mosaic_0001>

<bundles_post_ra>
// kernel: tpu_custom_call.1
= control target key start
LH: loop header
LB: loop body
LE: loop exit
PB: predicated region body
PF: predicated region fallthrough
CT: control target
= control target key end

     0   :  { %vm112_vm0 = vsmask.f32 3328  ;;  %vm113_vm1 = vsmask.f32 7440  ;;  %v12456_v22 = vmov 0  ;;  %s7307_s9 = smov 4   ;;  %s12344_s0 = inlined_call_operand.vmem [shape: bf16[2,18,18,4], index: 0, kind: input, shape index: {}]   ;;  %s12345_s1 = inlined_call_operand.vmem [shape: bf16[36,8], index: 1, kind: input, shape index: {}]   ;;  %s12346_s2 = inlined_call_operand.vmem [shape: f32[1,8], index: 2, kind: input, shape index: {}]   ;;  %s12347_s3 = inlined_call_operand.hbm [shape: f32[2,8,256], index: 3, kind: output, shape index: {}]  }
   0x1   :  { %v20_v0 = vld [vmem:[%s12344_s0 + $0x18] sm:$0xf]  ;;  %v21_v1 = vld [vmem:[%s12344_s0 + $0x1c] sm:$0xf]  ;;  %v82_v2 = vld [vmem:[%s12344_s0 + $0x20] sm:$0x1] }
   0x2   :  { %v164_v3 = vshrl.u32 %v20_v0, 16  ;;  %v167_v4 = vshll.u32 %v20_v0, 16  ;;  %v173_v5 = vshll.u32 %v21_v1, 16  ;;  %v177_v6 = vshrl.u32 %v21_v1, 16  ;;  %v16_v8 = vld [vmem:[%s12344_s0] sm:$0xf]  ;;  %vm7360_vm2 = vmor %vm112_vm0, %vm113_vm1 }
   0x3   :  { %v183_v7 = vshll.u32 %v82_v2, 16  ;;  %v17_v11 = vld [vmem:[%s12344_s0 + $0x4] sm:$0xf]  ;;  %v80_v12 = vld [vmem:[%s12344_s0 + $0x8] sm:$0x1]  ;;  %v116_v16 = vshrl.u32 %v16_v8, 16 }
   0x4   :  { %v166_v9 = vrot.slane %v164_v3, 4  ;;  %v169_v10 = vrot.slane %v167_v4, 5  ;;  %v175_v13 = vrot.slane %v173_v5, 5  ;;  %v179_v14 = vrot.slane %v177_v6, 4  ;;  %v22_v17 = vld [vmem:[%s12344_s0 + $0x24] sm:$0xf] }
   0x5   :  { %v185_v15 = vrot.slane %v183_v7, 5  ;;  %v119_v19 = vshll.u32 %v16_v8, 16  ;;  %v125_v20 = vshll.u32 %v17_v11, 16  ;;  %v129_v21 = vshrl.u32 %v17_v11, 16  ;;  %v23_v26 = vld [vmem:[%s12344_s0 + $0x28] sm:$0xf] }
   0x6   :  { %v170_v18 = vor.u32 %v169_v10, %v166_v9  ;;  %v12457_v22 = vsel %vm7360_vm2, 4294967295, %v12456_v22  ;;  %v180_v23 = vor.u32 %v179_v14, %v175_v13  ;;  %v118_v24 = vrot.slane %v116_v16, 4  ;;  %v83_v32 = vld [vmem:[%s12344_s0 + $0x2c] sm:$0x1]  ;;  %v19_v46 = vld [vmem:[%s12344_s0 + $0x10] sm:$0xf] }
   0x7   :  { %12458 = vst [vmem:[#allocation5_spill] sm:$0xff] %v12457_v22  ;;  %v135_v25 = vshll.u32 %v80_v12, 16  ;;  %v188_v27 = vshrl.u32 %v22_v17, 16  ;;  %v121_v29 = vrot.slane %v119_v19, 5  ;;  %v127_v30 = vrot.slane %v125_v20, 5 }
   0x8   :  { %v171_v28 = vrot.slane %v170_v18, 4  ;;  %v131_v31 = vrot.slane %v129_v21, 4  ;;  %v181_v33 = vrot.slane %v180_v23, 4  ;;  %v191_v36 = vshll.u32 %v22_v17, 16  ;;  %v18_v41 = vld [vmem:[%s12344_s0 + $0xc] sm:$0xf] }
   0x9   :  { %v137_v34 = vrot.slane %v135_v25, 5  ;;  %v190_v35 = vrot.slane %v188_v27, 4  ;;  %v122_v38 = vor.u32 %v121_v29, %v118_v24  ;;  %v197_v40 = vshll.u32 %v23_v26, 16  ;;  %v81_v54 = vld [vmem:[%s12344_s0 + $0x14] sm:$0x1] }
   0xa   :  { %v176_v37 = vsel %vm7360_vm2, %v171_v28, %v175_v13  ;;  %v132_v39 = vor.u32 %v131_v31, %v127_v30  ;;  %v186_v42 = vsel %vm7360_vm2, %v181_v33, %v185_v15  ;;  %v193_v43 = vrot.slane %v191_v36, 5  ;;  %v26_v60 = vld [vmem:[%s12344_s0 + $0x3c] sm:$0xf]  ;;  %v27_v1 = vld [vmem:[%s12344_s0 + $0x40] sm:$0xf] }
   0xb   :  { %v201_v44 = vshrl.u32 %v23_v26, 16  ;;  %v207_v45 = vshll.u32 %v83_v32, 16  ;;  %v6680_v47 = vcombine.low %v176_v37, %v186_v42  ;;  %v123_v48 = vrot.slane %v122_v38, 4  ;;  %v85_v8 = vld [vmem:[%s12344_s0 + $0x44] sm:$0x1] }
   0xc   :  { %v133_v49 = vrot.slane %v132_v39, 4  ;;  %v199_v50 = vrot.slane %v197_v40, 5  ;;  %v194_v51 = vor.u32 %v193_v43, %v190_v35  ;;  %v140_v55 = vshrl.u32 %v18_v41, 16  ;;  %v24_v15 = vld [vmem:[%s12344_s0 + $0x30] sm:$0xf] }
   0xd   :  { %v203_v52 = vrot.slane %v201_v44, 4  ;;  %v209_v53 = vrot.slane %v207_v45, 5  ;;  %3900 = vrot.lane.b32.xlu1 %v6680_v47, %s7307_s9  ;;  %v128_v56 = vsel %vm7360_vm2, %v123_v48, %v127_v30  ;;  %v143_v58 = vshll.u32 %v18_v41, 16  ;;  %v25_v20 = vld [vmem:[%s12344_s0 + $0x34] sm:$0xf] }
   0xe   :  { %v138_v57 = vsel %vm7360_vm2, %v133_v49, %v137_v34  ;;  %v149_v59 = vshll.u32 %v19_v46, 16  ;;  %v195_v62 = vrot.slane %v194_v51, 4  ;;  %v142_v0 = vrot.slane %v140_v55, 4  ;;  %v84_v32 = vld [vmem:[%s12344_s0 + $0x38] sm:$0x1] }
   0xf   :  { %v6678_v61 = vcombine.low %v128_v56, %v138_v57  ;;  %v204_v63 = vor.u32 %v203_v52, %v199_v50  ;;  %v145_v2 = vrot.slane %v143_v58, 5  ;;  %v153_v4 = vshrl.u32 %v19_v46, 16  ;;  %v30_v39 = vld [vmem:[%s12344_s0 + $0x54] sm:$0xf]  ;;  %v31_v44 = vld [vmem:[%s12344_s0 + $0x58] sm:$0xf] }
  0x10   :  { %v151_v3 = vrot.slane %v149_v59, 5  ;;  %v159_v5 = vshll.u32 %v81_v54, 16  ;;  %v200_v6 = vsel %vm7360_vm2, %v195_v62, %v199_v50  ;;  %v236_v9 = vshrl.u32 %v26_v60, 16  ;;  %v87_v51 = vld [vmem:[%s12344_s0 + $0x5c] sm:$0x1] }
  0x11   :  { %3896 = vrot.lane.b32.xlu0 %v6678_v61, %s7307_s9  ;;  %v205_v7 = vrot.slane %v204_v63, 4  ;;  %v239_v10 = vshll.u32 %v26_v60, 16  ;;  %v146_v11 = vor.u32 %v145_v2, %v142_v0  ;;  %v155_v12 = vrot.slane %v153_v4, 4  ;;  %v28_v58 = vld [vmem:[%s12344_s0 + $0x48] sm:$0xf] }
  0x12   :  { %v161_v13 = vrot.slane %v159_v5, 5  ;;  %v245_v14 = vshll.u32 %v27_v1, 16  ;;  %v238_v17 = vrot.slane %v236_v9, 4  ;;  %v249_v19 = vshrl.u32 %v27_v1, 16  ;;  %v29_v63 = vld [vmem:[%s12344_s0 + $0x4c] sm:$0xf] }
  0x13   :  { %v210_v16 = vsel %vm7360_vm2, %v205_v7, %v209_v53  ;;  %v241_v18 = vrot.slane %v239_v10, 5  ;;  %v147_v23 = vrot.slane %v146_v11, 4  ;;  %v156_v24 = vor.u32 %v155_v12, %v151_v3  ;;  %v86_v11 = vld [vmem:[%s12344_s0 + $0x50] sm:$0x1] }
  0x14   :  { %v6681_v21 = vcombine.low %v200_v6, %v210_v16  ;;  %v247_v25 = vrot.slane %v245_v14, 5  ;;  %v251_v27 = vrot.slane %v249_v19, 4  ;;  %v255_v28 = vshll.u32 %v85_v8, 16 }
  0x15   :  { %v242_v26 = vor.u32 %v241_v18, %v238_v17  ;;  %v212_v29 = vshrl.u32 %v24_v15, 16  ;;  %v152_v30 = vsel %vm7360_vm2, %v147_v23, %v151_v3  ;;  %v157_v31 = vrot.slane %v156_v24, 4  ;;  %v35_v18 = vld [vmem:[%s12344_s0 + $0x70] sm:$0xf] }
  0x16   :  { %3902 = vrot.lane.b32.xlu1 %v6681_v21, %s7307_s9  ;;  %v215_v33 = vshll.u32 %v24_v15, 16  ;;  %v221_v34 = vshll.u32 %v25_v20, 16  ;;  %v252_v36 = vor.u32 %v251_v27, %v247_v25  ;;  %v257_v37 = vrot.slane %v255_v28, 5 }
  0x17   :  { %v243_v35 = vrot.slane %v242_v26, 4  ;;  %v214_v38 = vrot.slane %v212_v29, 4  ;;  %v162_v40 = vsel %vm7360_vm2, %v157_v31, %v161_v13  ;;  %v225_v43 = vshrl.u32 %v25_v20, 16  ;;  %v34_v13 = vld [vmem:[%s12344_s0 + $0x6c] sm:$0xf] }
  0x18   :  { %v217_v41 = vrot.slane %v215_v33, 5  ;;  %v223_v42 = vrot.slane %v221_v34, 5  ;;  %v6679_v45 = vcombine.low %v152_v30, %v162_v40  ;;  %v253_v47 = vrot.slane %v252_v36, 4  ;;  %v89_v30 = vld [vmem:[%s12344_s0 + $0x74] sm:$0x1] }
  0x19   :  { %v248_v46 = vsel %vm7360_vm2, %v243_v35, %v247_v25  ;;  %v231_v48 = vshll.u32 %v84_v32, 16  ;;  %v227_v50 = vrot.slane %v225_v43, 4  ;;  %v284_v52 = vshrl.u32 %v30_v39, 16  ;;  %v32_v33 = vld [vmem:[%s12344_s0 + $0x60] sm:$0xf] }
  0x1a   :  { %v218_v49 = vor.u32 %v217_v41, %v214_v38  ;;  %v287_v53 = vshll.u32 %v30_v39, 16  ;;  %3898 = vrot.lane.b32.xlu0 %v6679_v45, %s7307_s9  ;;  %v258_v54 = vsel %vm7360_vm2, %v253_v47, %v257_v37  ;;  %v293_v56 = vshll.u32 %v31_v44, 16  ;;  %v33_v38 = vld [vmem:[%s12344_s0 + $0x64] sm:$0xf] }
  0x1b   :  { %v233_v55 = vrot.slane %v231_v48, 5  ;;  %v297_v57 = vshrl.u32 %v31_v44, 16  ;;  %v6683_v59 = vcombine.low %v248_v46, %v258_v54  ;;  %v228_v61 = vor.u32 %v227_v50, %v223_v42  ;;  %v88_v46 = vld [vmem:[%s12344_s0 + $0x68] sm:$0x1] }
  0x1c   :  { %v219_v60 = vrot.slane %v218_v49, 4  ;;  %v286_v62 = vrot.slane %v284_v52, 4  ;;  %v289_v0 = vrot.slane %v287_v53, 5  ;;  %v295_v1 = vrot.slane %v293_v56, 5  ;;  %v38_v52 = vld [vmem:[%s12344_s0 + $0x84] sm:$0xf] }
  0x1d   :  { %v299_v2 = vrot.slane %v297_v57, 4  ;;  %v303_v3 = vshll.u32 %v87_v51, 16  ;;  %3906 = vrot.lane.b32.xlu1 %v6683_v59, %s7307_s9  ;;  %v229_v5 = vrot.slane %v228_v61, 4  ;;  %v260_v6 = vshrl.u32 %v28_v58, 16  ;;  %v39_v61 = vld [vmem:[%s12344_s0 + $0x88] sm:$0xf] }
  0x1e   :  { %v224_v4 = vsel %vm7360_vm2, %v219_v60, %v223_v42  ;;  %v263_v7 = vshll.u32 %v28_v58, 16  ;;  %v290_v8 = vor.u32 %v289_v0, %v286_v62  ;;  %v269_v12 = vshll.u32 %v29_v63, 16 }
  0x1f   :  { %v300_v9 = vor.u32 %v299_v2, %v295_v1  ;;  %v305_v10 = vrot.slane %v303_v3, 5  ;;  %v234_v14 = vsel %vm7360_vm2, %v229_v5, %v233_v55  ;;  %v262_v15 = vrot.slane %v260_v6, 4  ;;  %v91_v5 = vld [vmem:[%s12344_s0 + $0x8c] sm:$0x1] }
  0x20   :  { %v265_v16 = vrot.slane %v263_v7, 5  ;;  %v273_v17 = vshrl.u32 %v29_v63, 16  ;;  %v6682_v19 = vcombine.low %v224_v4, %v234_v14  ;;  %v291_v20 = vrot.slane %v290_v8, 4 }
  0x21   :  { %v301_v21 = vrot.slane %v300_v9, 4  ;;  %v271_v23 = vrot.slane %v269_v12, 5  ;;  %v279_v26 = vshll.u32 %v86_v11, 16  ;;  %v332_v27 = vshrl.u32 %v34_v13, 16  ;;  %v36_v11 = vld [vmem:[%s12344_s0 + $0x78] sm:$0xf] }
  0x22   :  { %v266_v24 = vor.u32 %v265_v16, %v262_v15  ;;  %v275_v25 = vrot.slane %v273_v17, 4  ;;  %3904 = vrot.lane.b32.xlu0 %v6682_v19, %s7307_s9  ;;  %v296_v28 = vsel %vm7360_vm2, %v291_v20, %v295_v1  ;;  %v335_v31 = vshll.u32 %v34_v13, 16  ;;  %v37_v16 = vld [vmem:[%s12344_s0 + $0x7c] sm:$0xf] }
  0x23   :  { %v306_v29 = vsel %vm7360_vm2, %v301_v21, %v305_v10  ;;  %v341_v32 = vshll.u32 %v35_v18, 16  ;;  %v281_v37 = vrot.slane %v279_v26, 5  ;;  %v334_v39 = vrot.slane %v332_v27, 4 }
  0x24   :  { %v6685_v34 = vcombine.low %v296_v28, %v306_v29  ;;  %v267_v35 = vrot.slane %v266_v24, 4  ;;  %v276_v36 = vor.u32 %v275_v25, %v271_v23  ;;  %v337_v40 = vrot.slane %v335_v31, 5  ;;  %v90_v25 = vld [vmem:[%s12344_s0 + $0x80] sm:$0x1]  ;;  %v42_v31 = vld [vmem:[%s12344_s0 + $0x9c] sm:$0xf] }
  0x25   :  { %v343_v41 = vrot.slane %v341_v32, 5  ;;  %v345_v42 = vshrl.u32 %v35_v18, 16  ;;  %v351_v45 = vshll.u32 %v89_v30, 16  ;;  %v308_v47 = vshrl.u32 %v32_v33, 16 }
  0x26   :  { %3910 = vrot.lane.b32.xlu1 %v6685_v34, %s7307_s9  ;;  %v272_v43 = vsel %vm7360_vm2, %v267_v35, %v271_v23  ;;  %v277_v44 = vrot.slane %v276_v36, 4  ;;  %v338_v48 = vor.u32 %v337_v40, %v334_v39  ;;  %v311_v50 = vshll.u32 %v32_v33, 16  ;;  %v43_v36 = vld [vmem:[%s12344_s0 + $0xa0] sm:$0xf] }
  0x27   :  { %v347_v49 = vrot.slane %v345_v42, 4  ;;  %v317_v51 = vshll.u32 %v33_v38, 16  ;;  %v353_v54 = vrot.slane %v351_v45, 5  ;;  %v310_v55 = vrot.slane %v308_v47, 4 }
  0x28   :  { %v282_v53 = vsel %vm7360_vm2, %v277_v44, %v281_v37  ;;  %v321_v56 = vshrl.u32 %v33_v38, 16  ;;  %v339_v58 = vrot.slane %v338_v48, 4  ;;  %v313_v60 = vrot.slane %v311_v50, 5  ;;  %v40_v50 = vld [vmem:[%s12344_s0 + $0x90] sm:$0xf] }
  0x29   :  { %v6684_v57 = vcombine.low %v272_v43, %v282_v53  ;;  %v348_v59 = vor.u32 %v347_v49, %v343_v41  ;;  %v319_v62 = vrot.slane %v317_v51, 5  ;;  %v327_v0 = vshll.u32 %v88_v46, 16  ;;  %v93_v43 = vld [vmem:[%s12344_s0 + $0xa4] sm:$0x1] }
  0x2a   :  { %v323_v63 = vrot.slane %v321_v56, 4  ;;  %v380_v1 = vshrl.u32 %v38_v52, 16  ;;  %v344_v2 = vsel %vm7360_vm2, %v339_v58, %v343_v41  ;;  %v314_v4 = vor.u32 %v313_v60, %v310_v55  ;;  %v41_v55 = vld [vmem:[%s12344_s0 + $0x94] sm:$0xf] }
  0x2b   :  { %3908 = vrot.lane.b32.xlu0 %v6684_v57, %s7307_s9  ;;  %v349_v3 = vrot.slane %v348_v59, 4  ;;  %v383_v6 = vshll.u32 %v38_v52, 16  ;;  %v329_v8 = vrot.slane %v327_v0, 5  ;;  %v389_v10 = vshll.u32 %v39_v61, 16 }
  0x2c   :  { %v324_v7 = vor.u32 %v323_v63, %v319_v62  ;;  %v382_v9 = vrot.slane %v380_v1, 4  ;;  %v315_v13 = vrot.slane %v314_v4, 4  ;;  %v393_v15 = vshrl.u32 %v39_v61, 16 }
  0x2d   :  { %v354_v12 = vsel %vm7360_vm2, %v349_v3, %v353_v54  ;;  %v385_v14 = vrot.slane %v383_v6, 5  ;;  %v391_v19 = vrot.slane %v389_v10, 5  ;;  %v399_v20 = vshll.u32 %v91_v5, 16 }
  0x2e   :  { %v6687_v17 = vcombine.low %v344_v2, %v354_v12  ;;  %v325_v18 = vrot.slane %v324_v7, 4  ;;  %v320_v21 = vsel %vm7360_vm2, %v315_v13, %v319_v62  ;;  %v395_v24 = vrot.slane %v393_v15, 4  ;;  %v92_v2 = vld [vmem:[%s12344_s0 + $0x98] sm:$0x1] }
  0x2f   :  { %v386_v23 = vor.u32 %v385_v14, %v382_v9  ;;  %v356_v26 = vshrl.u32 %v36_v11, 16  ;;  %v401_v28 = vrot.slane %v399_v20, 5  ;;  %v359_v29 = vshll.u32 %v36_v11, 16  ;;  %v46_v9 = vld [vmem:[%s12344_s0 + $0xb4] sm:$0xf] }
  0x30   :  { %3914 = vrot.lane.b32.xlu1 %v6687_v17, %s7307_s9  ;;  %v330_v27 = vsel %vm7360_vm2, %v325_v18, %v329_v8  ;;  %v365_v30 = vshll.u32 %v37_v16, 16  ;;  %v396_v34 = vor.u32 %v395_v24, %v391_v19  ;;  %v369_v39 = vshrl.u32 %v37_v16, 16  ;;  %v47_v14 = vld [vmem:[%s12344_s0 + $0xb8] sm:$0xf] }
  0x31   :  { %v6686_v32 = vcombine.low %v320_v21, %v330_v27  ;;  %v387_v33 = vrot.slane %v386_v23, 4  ;;  %v358_v35 = vrot.slane %v356_v26, 4  ;;  %v361_v37 = vrot.slane %v359_v29, 5  ;;  %v95_v21 = vld [vmem:[%s12344_s0 + $0xbc] sm:$0x1] }
  0x32   :  { %v367_v38 = vrot.slane %v365_v30, 5  ;;  %v375_v40 = vshll.u32 %v90_v25, 16  ;;  %v397_v42 = vrot.slane %v396_v34, 4  ;;  %v428_v44 = vshrl.u32 %v42_v31, 16  ;;  %v44_v29 = vld [vmem:[%s12344_s0 + $0xa8] sm:$0xf] }
  0x33   :  { %3912 = vrot.lane.b32.xlu0 %v6686_v32, %s7307_s9  ;;  %v392_v41 = vsel %vm7360_vm2, %v387_v33, %v391_v19  ;;  %v431_v45 = vshll.u32 %v42_v31, 16  ;;  %v362_v46 = vor.u32 %v361_v37, %v358_v35  ;;  %v371_v47 = vrot.slane %v369_v39, 4  ;;  %v7548_v34 = vld [vmem:[%s12344_s0 + $0xac] sm:$0xf] }
  0x34   :  { %v377_v48 = vrot.slane %v375_v40, 5  ;;  %v437_v49 = vshll.u32 %v43_v36, 16  ;;  %v402_v51 = vsel %vm7360_vm2, %v397_v42, %v401_v28  ;;  %v430_v52 = vrot.slane %v428_v44, 4 }
  0x35   :  { %v433_v53 = vrot.slane %v431_v45, 5  ;;  %v441_v54 = vshrl.u32 %v43_v36, 16  ;;  %v6689_v56 = vcombine.low %v392_v41, %v402_v51  ;;  %v363_v57 = vrot.slane %v362_v46, 4  ;;  %v7556_v46 = vld [vmem:[%s12344_s0 + $0xb0] sm:$0x1] }
  0x36   :  { %v372_v58 = vor.u32 %v371_v47, %v367_v38  ;;  %v439_v59 = vrot.slane %v437_v49, 5  ;;  %v447_v62 = vshll.u32 %v93_v43, 16  ;;  %v404_v63 = vshrl.u32 %v40_v50, 16 }
  0x37   :  { %v434_v60 = vor.u32 %v433_v53, %v430_v52  ;;  %v443_v61 = vrot.slane %v441_v54, 4  ;;  %3918 = vrot.lane.b32.xlu1 %v6689_v56, %s7307_s9  ;;  %v368_v0 = vsel %vm7360_vm2, %v363_v57, %v367_v38  ;;  %v407_v3 = vshll.u32 %v40_v50, 16  ;;  %v7568_v53 = vld [vmem:[%s12344_s0 + $0xe8] sm:$0xf] }
  0x38   :  { %v373_v1 = vrot.slane %v372_v58, 4  ;;  %v413_v4 = vshll.u32 %v41_v55, 16  ;;  %v449_v7 = vrot.slane %v447_v62, 5  ;;  %v406_v8 = vrot.slane %v404_v63, 4 }
  0x39   :  { %v435_v5 = vrot.slane %v434_v60, 4  ;;  %v444_v6 = vor.u32 %v443_v61, %v439_v59  ;;  %v409_v11 = vrot.slane %v407_v3, 5  ;;  %v417_v13 = vshrl.u32 %v41_v55, 16  ;;  %v48_v3 = vld [vmem:[%s12344_s0 + $0xd8] sm:$0xf] }
  0x3a   :  { %v378_v10 = vsel %vm7360_vm2, %v373_v1, %v377_v48  ;;  %v415_v12 = vrot.slane %v413_v4, 5  ;;  %v423_v18 = vshll.u32 %v92_v2, 16  ;;  %v476_v23 = vshrl.u32 %v46_v9, 16  ;;  %v50_v48 = vld [vmem:[%s12344_s0 + $0xe4] sm:$0xf] }
  0x3b   :  { %v6688_v15 = vcombine.low %v368_v0, %v378_v10  ;;  %v440_v16 = vsel %vm7360_vm2, %v435_v5, %v439_v59  ;;  %v445_v17 = vrot.slane %v444_v6, 4  ;;  %v410_v19 = vor.u32 %v409_v11, %v406_v8  ;;  %v7579_v0 = vld [vmem:[%s12344_s0 + $0xec] sm:$0x1]  ;;  %v7588_v8 = vld [vmem:[%s12344_s0 + $0xdc] sm:$0xf] }
  0x3c   :  { %v419_v20 = vrot.slane %v417_v13, 4  ;;  %v479_v24 = vshll.u32 %v46_v9, 16  ;;  %v425_v26 = vrot.slane %v423_v18, 5  ;;  %v485_v27 = vshll.u32 %v47_v14, 16 }
  0x3d   :  { %3916 = vrot.lane.b32.xlu0 %v6688_v15, %s7307_s9  ;;  %v450_v25 = vsel %vm7360_vm2, %v445_v17, %v449_v7  ;;  %v489_v28 = vshrl.u32 %v47_v14, 16  ;;  %v411_v31 = vrot.slane %v410_v19, 4  ;;  %v478_v33 = vrot.slane %v476_v23, 4  ;;  %v54_v23 = vld [vmem:[%s12344_s0 + $0xfc] sm:$0xf] }
  0x3e   :  { %v6691_v30 = vcombine.low %v440_v16, %v450_v25  ;;  %v420_v32 = vor.u32 %v419_v20, %v415_v12  ;;  %v481_v35 = vrot.slane %v479_v24, 5  ;;  %v487_v36 = vrot.slane %v485_v27, 5  ;;  %v7598_v16 = vld [vmem:[%s12344_s0 + $0xe0] sm:$0x1] }
  0x3f   :  { %v491_v37 = vrot.slane %v489_v28, 4  ;;  %v495_v38 = vshll.u32 %v95_v21, 16  ;;  %v416_v39 = vsel %vm7360_vm2, %v411_v31, %v415_v12  ;;  %v452_v41 = vshrl.u32 %v44_v29, 16 }
  0x40   :  { %3922 = vrot.lane.b32.xlu1 %v6691_v30, %s7307_s9  ;;  %v421_v40 = vrot.slane %v420_v32, 4  ;;  %v455_v42 = vshll.u32 %v44_v29, 16  ;;  %v482_v43 = vor.u32 %v481_v35, %v478_v33  ;;  %v461_v47 = vshll.u32 %v7548_v34, 16  ;;  %v7610_v32 = vld [vmem:[%s12344_s0 + $0x100] sm:$0xf] }
  0x41   :  { %v492_v44 = vor.u32 %v491_v37, %v487_v36  ;;  %v497_v45 = vrot.slane %v495_v38, 5  ;;  %v454_v50 = vrot.slane %v452_v41, 4  ;;  %v465_v52 = vshrl.u32 %v7548_v34, 16  ;;  %v7619_v41 = vld [vmem:[%s12344_s0 + $0x104] sm:$0x1] }
  0x42   :  { %v426_v49 = vsel %vm7360_vm2, %v421_v40, %v425_v26  ;;  %v457_v51 = vrot.slane %v455_v42, 5  ;;  %v483_v55 = vrot.slane %v482_v43, 4  ;;  %v463_v57 = vrot.slane %v461_v47, 5 }
  0x43   :  { %v6690_v54 = vcombine.low %v416_v39, %v426_v49  ;;  %v493_v56 = vrot.slane %v492_v44, 4  ;;  %v467_v59 = vrot.slane %v465_v52, 4  ;;  %v471_v60 = vshll.u32 %v7556_v46, 16 }
  0x44   :  { %v458_v58 = vor.u32 %v457_v51, %v454_v50  ;;  %v524_v61 = vshrl.u32 %v50_v48, 16  ;;  %v488_v62 = vsel %vm7360_vm2, %v483_v55, %v487_v36  ;;  %v527_v1 = vshll.u32 %v50_v48, 16  ;;  %v52_v48 = vld [vmem:[%s12344_s0 + $0xf0] sm:$0xf] }
  0x45   :  { %3920 = vrot.lane.b32.xlu0 %v6690_v54, %s7307_s9  ;;  %v498_v63 = vsel %vm7360_vm2, %v493_v56, %v497_v45  ;;  %v533_v2 = vshll.u32 %v7568_v53, 16  ;;  %v468_v6 = vor.u32 %v467_v59, %v463_v57  ;;  %v473_v7 = vrot.slane %v471_v60, 5  ;;  %v7631_v54 = vld [vmem:[%s12344_s0 + $0xf4] sm:$0xf] }
  0x46   :  { %v6693_v4 = vcombine.low %v488_v62, %v498_v63  ;;  %v459_v5 = vrot.slane %v458_v58, 4  ;;  %v526_v9 = vrot.slane %v524_v61, 4  ;;  %v529_v10 = vrot.slane %v527_v1, 5  ;;  %v7639_v62 = vld [vmem:[%s12344_s0 + $0xf8] sm:$0x1] }
  0x47   :  { %v535_v11 = vrot.slane %v533_v2, 5  ;;  %v537_v12 = vshrl.u32 %v7568_v53, 16  ;;  %v469_v14 = vrot.slane %v468_v6, 4  ;;  %v543_v15 = vshll.u32 %v7579_v0, 16 }
  0x48   :  { %3926 = vrot.lane.b32.xlu1 %v6693_v4, %s7307_s9  ;;  %v464_v13 = vsel %vm7360_vm2, %v459_v5, %v463_v57  ;;  %v500_v17 = vshrl.u32 %v48_v3, 16  ;;  %v530_v18 = vor.u32 %v529_v10, %v526_v9  ;;  %v503_v20 = vshll.u32 %v48_v3, 16  ;;  %v58_v5 = vld [vmem:[%s12344_s0 + $0x114] sm:$0xf] }
  0x49   :  { %v539_v19 = vrot.slane %v537_v12, 4  ;;  %v509_v21 = vshll.u32 %v7588_v8, 16  ;;  %v474_v24 = vsel %vm7360_vm2, %v469_v14, %v473_v7  ;;  %v545_v25 = vrot.slane %v543_v15, 5 }
  0x4a   :  { %v502_v26 = vrot.slane %v500_v17, 4  ;;  %v513_v27 = vshrl.u32 %v7588_v8, 16  ;;  %v6692_v28 = vcombine.low %v464_v13, %v474_v24  ;;  %v531_v29 = vrot.slane %v530_v18, 4 }
  0x4b   :  { %v540_v30 = vor.u32 %v539_v19, %v535_v11  ;;  %v505_v31 = vrot.slane %v503_v20, 5  ;;  %v511_v33 = vrot.slane %v509_v21, 5  ;;  %v519_v36 = vshll.u32 %v7598_v16, 16  ;;  %v7661_v19 = vld [vmem:[%s12344_s0 + $0x11c] sm:$0x1] }
  0x4c   :  { %v515_v35 = vrot.slane %v513_v27, 4  ;;  %v572_v37 = vshrl.u32 %v54_v23, 16  ;;  %3924 = vrot.lane.b32.xlu0 %v6692_v28, %s7307_s9  ;;  %v536_v38 = vsel %vm7360_vm2, %v531_v29, %v535_v11  ;;  %v575_v42 = vshll.u32 %v54_v23, 16  ;;  %v7651_v11 = vld [vmem:[%s12344_s0 + $0x118] sm:$0xf] }
  0x4d   :  { %v541_v39 = vrot.slane %v540_v30, 4  ;;  %v506_v40 = vor.u32 %v505_v31, %v502_v26  ;;  %v521_v44 = vrot.slane %v519_v36, 5  ;;  %v581_v47 = vshll.u32 %v7610_v32, 16  ;;  %v56_v27 = vld [vmem:[%s12344_s0 + $0x108] sm:$0xf] }
  0x4e   :  { %v516_v43 = vor.u32 %v515_v35, %v511_v33  ;;  %v574_v45 = vrot.slane %v572_v37, 4  ;;  %v577_v51 = vrot.slane %v575_v42, 5  ;;  %v585_v52 = vshrl.u32 %v7610_v32, 16 }
  0x4f   :  { %v546_v49 = vsel %vm7360_vm2, %v541_v39, %v545_v25  ;;  %v507_v50 = vrot.slane %v506_v40, 4  ;;  %v583_v57 = vrot.slane %v581_v47, 5  ;;  %v591_v58 = vshll.u32 %v7619_v41, 16  ;;  %v7682_v47 = vld [vmem:[%s12344_s0 + $0x110] sm:$0x1] }
  0x50   :  { %v6695_v55 = vcombine.low %v536_v38, %v546_v49  ;;  %v517_v56 = vrot.slane %v516_v43, 4  ;;  %v578_v60 = vor.u32 %v577_v51, %v574_v45  ;;  %v587_v61 = vrot.slane %v585_v52, 4 }
  0x51   :  { %v512_v59 = vsel %vm7360_vm2, %v507_v50, %v511_v33  ;;  %v548_v63 = vshrl.u32 %v52_v48, 16  ;;  %v593_v2 = vrot.slane %v591_v58, 5  ;;  %v551_v3 = vshll.u32 %v52_v48, 16  ;;  %v7673_v33 = vld [vmem:[%s12344_s0 + $0x10c] sm:$0xf] }
  0x52   :  { %3930 = vrot.lane.b32.xlu1 %v6695_v55, %s7307_s9  ;;  %v522_v1 = vsel %vm7360_vm2, %v517_v56, %v521_v44  ;;  %v557_v4 = vshll.u32 %v7631_v54, 16  ;;  %v579_v7 = vrot.slane %v578_v60, 4  ;;  %v588_v9 = vor.u32 %v587_v61, %v583_v57  ;;  %v62_v56 = vld [vmem:[%s12344_s0 + $0x12c] sm:$0xf]  ;;  %v7694_v61 = vld [vmem:[%s12344_s0 + $0x130] sm:$0xf] }
  0x53   :  { %v6694_v6 = vcombine.low %v512_v59, %v522_v1  ;;  %v550_v10 = vrot.slane %v548_v63, 4  ;;  %v553_v12 = vrot.slane %v551_v3, 5  ;;  %v561_v14 = vshrl.u32 %v7631_v54, 16 }
  0x54   :  { %v559_v13 = vrot.slane %v557_v4, 5  ;;  %v567_v15 = vshll.u32 %v7639_v62, 16  ;;  %v584_v17 = vsel %vm7360_vm2, %v579_v7, %v583_v57  ;;  %v589_v18 = vrot.slane %v588_v9, 4 }
  0x55   :  { %3928 = vrot.lane.b32.xlu0 %v6694_v6, %s7307_s9  ;;  %v620_v20 = vshrl.u32 %v58_v5, 16  ;;  %v623_v21 = vshll.u32 %v58_v5, 16  ;;  %v554_v23 = vor.u32 %v553_v12, %v550_v10  ;;  %v563_v24 = vrot.slane %v561_v14, 4  ;;  %v7702_v6 = vld [vmem:[%s12344_s0 + $0x134] sm:$0x1] }
  0x56   :  { %v569_v25 = vrot.slane %v567_v15, 5  ;;  %v629_v26 = vshll.u32 %v7651_v11, 16  ;;  %v594_v28 = vsel %vm7360_vm2, %v589_v18, %v593_v2  ;;  %v633_v31 = vshrl.u32 %v7651_v11, 16  ;;  %v60_v15 = vld [vmem:[%s12344_s0 + $0x120] sm:$0xf] }
  0x57   :  { %v622_v29 = vrot.slane %v620_v20, 4  ;;  %v625_v30 = vrot.slane %v623_v21, 5  ;;  %v6697_v35 = vcombine.low %v584_v17, %v594_v28  ;;  %v555_v36 = vrot.slane %v554_v23, 4  ;;  %v7715_v23 = vld [vmem:[%s12344_s0 + $0x124] sm:$0xf] }
  0x58   :  { %v564_v37 = vor.u32 %v563_v24, %v559_v13  ;;  %v631_v38 = vrot.slane %v629_v26, 5  ;;  %v635_v40 = vrot.slane %v633_v31, 4  ;;  %v639_v42 = vshll.u32 %v7661_v19, 16 }
  0x59   :  { %v626_v39 = vor.u32 %v625_v30, %v622_v29  ;;  %v596_v43 = vshrl.u32 %v56_v27, 16  ;;  %3934 = vrot.lane.b32.xlu1 %v6697_v35, %s7307_s9  ;;  %v560_v44 = vsel %vm7360_vm2, %v555_v36, %v559_v13  ;;  %v599_v48 = vshll.u32 %v56_v27, 16 }
  0x5a   :  { %v565_v45 = vrot.slane %v564_v37, 4  ;;  %v605_v49 = vshll.u32 %v7673_v33, 16  ;;  %v636_v51 = vor.u32 %v635_v40, %v631_v38  ;;  %v641_v52 = vrot.slane %v639_v42, 5  ;;  %v66_v40 = vld [vmem:[%s12344_s0 + $0x144] sm:$0xf] }
  0x5b   :  { %v627_v50 = vrot.slane %v626_v39, 4  ;;  %v598_v55 = vrot.slane %v596_v43, 4  ;;  %v601_v58 = vrot.slane %v599_v48, 5  ;;  %v609_v60 = vshrl.u32 %v7673_v33, 16  ;;  %v7736_v48 = vld [vmem:[%s12344_s0 + $0x148] sm:$0xf] }
  0x5c   :  { %v570_v57 = vsel %vm7360_vm2, %v565_v45, %v569_v25  ;;  %v607_v59 = vrot.slane %v605_v49, 5  ;;  %v637_v2 = vrot.slane %v636_v51, 4  ;;  %v615_v3 = vshll.u32 %v7682_v47, 16 }
  0x5d   :  { %v6696_v63 = vcombine.low %v560_v44, %v570_v57  ;;  %v632_v1 = vsel %vm7360_vm2, %v627_v50, %v631_v38  ;;  %v602_v4 = vor.u32 %v601_v58, %v598_v55  ;;  %v611_v5 = vrot.slane %v609_v60, 4  ;;  %v7724_v38 = vld [vmem:[%s12344_s0 + $0x128] sm:$0x1] }
  0x5e   :  { %v668_v7 = vshrl.u32 %v62_v56, 16  ;;  %v671_v9 = vshll.u32 %v62_v56, 16  ;;  %v642_v10 = vsel %vm7360_vm2, %v637_v2, %v641_v52  ;;  %v617_v12 = vrot.slane %v615_v3, 5  ;;  %v64_v3 = vld [vmem:[%s12344_s0 + $0x138] sm:$0xf] }
  0x5f   :  { %3932 = vrot.lane.b32.xlu0 %v6696_v63, %s7307_s9  ;;  %v677_v13 = vshll.u32 %v7694_v61, 16  ;;  %v681_v14 = vshrl.u32 %v7694_v61, 16  ;;  %v6699_v17 = vcombine.low %v632_v1, %v642_v10  ;;  %v603_v18 = vrot.slane %v602_v4, 4  ;;  %v7747_v63 = vld [vmem:[%s12344_s0 + $0x14c] sm:$0x1] }
  0x60   :  { %v612_v20 = vor.u32 %v611_v5, %v607_v59  ;;  %v670_v21 = vrot.slane %v668_v7, 4  ;;  %v673_v24 = vrot.slane %v671_v9, 5  ;;  %v687_v27 = vshll.u32 %v7702_v6, 16  ;;  %v7756_v10 = vld [vmem:[%s12344_s0 + $0x13c] sm:$0xf] }
  0x61   :  { %v679_v25 = vrot.slane %v677_v13, 5  ;;  %v683_v26 = vrot.slane %v681_v14, 4  ;;  %3938 = vrot.lane.b32.xlu1 %v6699_v17, %s7307_s9  ;;  %v608_v28 = vsel %vm7360_vm2, %v603_v18, %v607_v59  ;;  %v644_v30 = vshrl.u32 %v60_v15, 16 }
  0x62   :  { %v613_v29 = vrot.slane %v612_v20, 4  ;;  %v647_v31 = vshll.u32 %v60_v15, 16  ;;  %v674_v35 = vor.u32 %v673_v24, %v670_v21  ;;  %v689_v37 = vrot.slane %v687_v27, 5  ;;  %v7766_v21 = vld [vmem:[%s12344_s0 + $0x140] sm:$0x1] }
  0x63   :  { %v684_v36 = vor.u32 %v683_v26, %v679_v25  ;;  %v653_v39 = vshll.u32 %v7715_v23, 16  ;;  %v646_v43 = vrot.slane %v644_v30, 4  ;;  %v657_v45 = vshrl.u32 %v7715_v23, 16 }
  0x64   :  { %v618_v42 = vsel %vm7360_vm2, %v613_v29, %v617_v12  ;;  %v649_v44 = vrot.slane %v647_v31, 5  ;;  %v675_v50 = vrot.slane %v674_v35, 4  ;;  %v663_v57 = vshll.u32 %v7724_v38, 16  ;;  %v70_v29 = vld [vmem:[%s12344_s0 + $0x15c] sm:$0xf] }
  0x65   :  { %v6698_v49 = vcombine.low %v608_v28, %v618_v42  ;;  %v685_v51 = vrot.slane %v684_v36, 4  ;;  %v655_v52 = vrot.slane %v653_v39, 5  ;;  %v659_v56 = vrot.slane %v657_v45, 4 }
  0x66   :  { %v650_v55 = vor.u32 %v649_v44, %v646_v43  ;;  %v716_v58 = vshrl.u32 %v66_v40, 16  ;;  %v680_v59 = vsel %vm7360_vm2, %v675_v50, %v679_v25  ;;  %v719_v1 = vshll.u32 %v66_v40, 16  ;;  %v7778_v43 = vld [vmem:[%s12344_s0 + $0x160] sm:$0xf] }
  0x67   :  { %3936 = vrot.lane.b32.xlu0 %v6698_v49, %s7307_s9  ;;  %v690_v60 = vsel %vm7360_vm2, %v685_v51, %v689_v37  ;;  %v725_v2 = vshll.u32 %v7736_v48, 16  ;;  %v660_v7 = vor.u32 %v659_v56, %v655_v52  ;;  %v665_v9 = vrot.slane %v663_v57, 5  ;;  %v7787_v56 = vld [vmem:[%s12344_s0 + $0x164] sm:$0x1] }
  0x68   :  { %v6701_v4 = vcombine.low %v680_v59, %v690_v60  ;;  %v651_v5 = vrot.slane %v650_v55, 4  ;;  %v718_v12 = vrot.slane %v716_v58, 4  ;;  %v721_v13 = vrot.slane %v719_v1, 5 }
  0x69   :  { %v727_v14 = vrot.slane %v725_v2, 5  ;;  %v729_v15 = vshrl.u32 %v7736_v48, 16  ;;  %v661_v18 = vrot.slane %v660_v7, 4  ;;  %v735_v20 = vshll.u32 %v7747_v63, 16  ;;  %v68_v2 = vld [vmem:[%s12344_s0 + $0x150] sm:$0xf] }
  0x6a   :  { %3942 = vrot.lane.b32.xlu1 %v6701_v4, %s7307_s9  ;;  %v656_v17 = vsel %vm7360_vm2, %v651_v5, %v655_v52  ;;  %v692_v24 = vshrl.u32 %v64_v3, 16  ;;  %v722_v25 = vor.u32 %v721_v13, %v718_v12  ;;  %v695_v27 = vshll.u32 %v64_v3, 16 }
  0x6b   :  { %v731_v26 = vrot.slane %v729_v15, 4  ;;  %v701_v28 = vshll.u32 %v7756_v10, 16  ;;  %v666_v30 = vsel %vm7360_vm2, %v661_v18, %v665_v9  ;;  %v737_v31 = vrot.slane %v735_v20, 5  ;;  %v7799_v9 = vld [vmem:[%s12344_s0 + $0x154] sm:$0xf] }
  0x6c   :  { %v694_v35 = vrot.slane %v692_v24, 4  ;;  %v705_v36 = vshrl.u32 %v7756_v10, 16  ;;  %v6700_v37 = vcombine.low %v656_v17, %v666_v30  ;;  %v723_v39 = vrot.slane %v722_v25, 4  ;;  %v7807_v24 = vld [vmem:[%s12344_s0 + $0x158] sm:$0x1] }
  0x6d   :  { %v732_v40 = vor.u32 %v731_v26, %v727_v14  ;;  %v697_v42 = vrot.slane %v695_v27, 5  ;;  %v703_v44 = vrot.slane %v701_v28, 5  ;;  %v711_v49 = vshll.u32 %v7766_v21, 16  ;;  %v74_v30 = vld [vmem:[%s12344_s0 + $0x174] sm:$0xf] }
  0x6e   :  { %v707_v45 = vrot.slane %v705_v36, 4  ;;  %v764_v50 = vshrl.u32 %v70_v29, 16  ;;  %3940 = vrot.lane.b32.xlu0 %v6700_v37, %s7307_s9  ;;  %v728_v51 = vsel %vm7360_vm2, %v723_v39, %v727_v14  ;;  %v767_v57 = vshll.u32 %v70_v29, 16  ;;  %v7819_v39 = vld [vmem:[%s12344_s0 + $0x178] sm:$0xf] }
  0x6f   :  { %v733_v52 = vrot.slane %v732_v40, 4  ;;  %v698_v55 = vor.u32 %v697_v42, %v694_v35  ;;  %v713_v59 = vrot.slane %v711_v49, 5  ;;  %v773_v1 = vshll.u32 %v7778_v43, 16 }
  0x70   :  { %v708_v58 = vor.u32 %v707_v45, %v703_v44  ;;  %v766_v60 = vrot.slane %v764_v50, 4  ;;  %v769_v5 = vrot.slane %v767_v57, 5  ;;  %v777_v7 = vshrl.u32 %v7778_v43, 16 }
  0x71   :  { %v738_v3 = vsel %vm7360_vm2, %v733_v52, %v737_v31  ;;  %v699_v4 = vrot.slane %v698_v55, 4  ;;  %v775_v14 = vrot.slane %v773_v1, 5  ;;  %v783_v15 = vshll.u32 %v7787_v56, 16  ;;  %v72_v1 = vld [vmem:[%s12344_s0 + $0x168] sm:$0xf] }
  0x72   :  { %v6703_v12 = vcombine.low %v728_v51, %v738_v3  ;;  %v709_v13 = vrot.slane %v708_v58, 4  ;;  %v770_v18 = vor.u32 %v769_v5, %v766_v60  ;;  %v779_v20 = vrot.slane %v777_v7, 4  ;;  %v7829_v51 = vld [vmem:[%s12344_s0 + $0x17c] sm:$0x1]  ;;  %v7841_v7 = vld [vmem:[%s12344_s0 + $0x16c] sm:$0xf] }
  0x73   :  { %v704_v17 = vsel %vm7360_vm2, %v699_v4, %v703_v44  ;;  %v740_v25 = vshrl.u32 %v68_v2, 16  ;;  %v785_v27 = vrot.slane %v783_v15, 5  ;;  %v743_v28 = vshll.u32 %v68_v2, 16 }
  0x74   :  { %3946 = vrot.lane.b32.xlu1 %v6703_v12, %s7307_s9  ;;  %v714_v26 = vsel %vm7360_vm2, %v709_v13, %v713_v59  ;;  %v749_v29 = vshll.u32 %v7799_v9, 16  ;;  %v771_v35 = vrot.slane %v770_v18, 4  ;;  %v780_v36 = vor.u32 %v779_v20, %v775_v14 }
  0x75   :  { %v6702_v31 = vcombine.low %v704_v17, %v714_v26  ;;  %v742_v37 = vrot.slane %v740_v25, 4  ;;  %v745_v40 = vrot.slane %v743_v28, 5  ;;  %v753_v44 = vshrl.u32 %v7799_v9, 16  ;;  %v7850_v28 = vld [vmem:[%s12344_s0 + $0x170] sm:$0x1] }
  0x76   :  { %v751_v42 = vrot.slane %v749_v29, 5  ;;  %v759_v45 = vshll.u32 %v7807_v24, 16  ;;  %v776_v49 = vsel %vm7360_vm2, %v771_v35, %v775_v14  ;;  %v781_v50 = vrot.slane %v780_v36, 4 }
  0x77   :  { %3944 = vrot.lane.b32.xlu0 %v6702_v31, %s7307_s9  ;;  %v812_v52 = vshrl.u32 %v74_v30, 16  ;;  %v815_v55 = vshll.u32 %v74_v30, 16  ;;  %v746_v57 = vor.u32 %v745_v40, %v742_v37  ;;  %v755_v58 = vrot.slane %v753_v44, 4  ;;  %v78_v40 = vld [vmem:[%s12344_s0 + $0x18c] sm:$0xf] }
  0x78   :  { %v761_v59 = vrot.slane %v759_v45, 5  ;;  %v821_v60 = vshll.u32 %v7819_v39, 16  ;;  %v786_v2 = vsel %vm7360_vm2, %v781_v50, %v785_v27  ;;  %v825_v5 = vshrl.u32 %v7819_v39, 16  ;;  %v7862_v50 = vld [vmem:[%s12344_s0 + $0x190] sm:$0xf] }
  0x79   :  { %v814_v3 = vrot.slane %v812_v52, 4  ;;  %v817_v4 = vrot.slane %v815_v55, 5  ;;  %v6705_v12 = vcombine.low %v776_v49, %v786_v2  ;;  %v747_v13 = vrot.slane %v746_v57, 4 }
  0x7a   :  { %v756_v14 = vor.u32 %v755_v58, %v751_v42  ;;  %v823_v15 = vrot.slane %v821_v60, 5  ;;  %v827_v18 = vrot.slane %v825_v5, 4  ;;  %v831_v20 = vshll.u32 %v7829_v51, 16  ;;  %v76_v60 = vld [vmem:[%s12344_s0 + $0x180] sm:$0xf] }
  0x7b   :  { %v818_v17 = vor.u32 %v817_v4, %v814_v3  ;;  %v788_v25 = vshrl.u32 %v72_v1, 16  ;;  %3950 = vrot.lane.b32.xlu1 %v6705_v12, %s7307_s9  ;;  %v752_v26 = vsel %vm7360_vm2, %v747_v13, %v751_v42  ;;  %v791_v29 = vshll.u32 %v72_v1, 16  ;;  %v7878_v5 = vld [vmem:[%s12344_s0 + $0x184] sm:$0xf] }
  0x7c   :  { %v757_v27 = vrot.slane %v756_v14, 4  ;;  %v797_v30 = vshll.u32 %v7841_v7, 16  ;;  %v828_v35 = vor.u32 %v827_v18, %v823_v15  ;;  %v833_v36 = vrot.slane %v831_v20, 5 }
  0x7d   :  { %v819_v31 = vrot.slane %v818_v17, 4  ;;  %v790_v37 = vrot.slane %v788_v25, 4  ;;  %v793_v44 = vrot.slane %v791_v29, 5  ;;  %v801_v49 = vshrl.u32 %v7841_v7, 16 }
  0x7e   :  { %v762_v42 = vsel %vm7360_vm2, %v757_v27, %v761_v59  ;;  %v799_v45 = vrot.slane %v797_v30, 5  ;;  %v829_v57 = vrot.slane %v828_v35, 4  ;;  %v807_v58 = vshll.u32 %v7850_v28, 16  ;;  %v7870_v59 = vld [vmem:[%s12344_s0 + $0x194] sm:$0x1] }
  0x7f   :  { %v6704_v52 = vcombine.low %v752_v26, %v762_v42  ;;  %v824_v55 = vsel %vm7360_vm2, %v819_v31, %v823_v15  ;;  %v794_v1 = vor.u32 %v793_v44, %v790_v37  ;;  %v803_v2 = vrot.slane %v801_v49, 4  ;;  %v7892_v49 = vld [vmem:[%s12344_s0 + $0x188] sm:$0x1] }
  0x80   :  { %v860_v3 = vshrl.u32 %v78_v40, 16  ;;  %v863_v4 = vshll.u32 %v78_v40, 16  ;;  %v834_v12 = vsel %vm7360_vm2, %v829_v57, %v833_v36  ;;  %v809_v13 = vrot.slane %v807_v58, 5 }
  0x81   :  { %3948 = vrot.lane.b32.xlu0 %v6704_v52, %s7307_s9  ;;  %v869_v14 = vshll.u32 %v7862_v50, 16  ;;  %v873_v15 = vshrl.u32 %v7862_v50, 16  ;;  %v6707_v17 = vcombine.low %v824_v55, %v834_v12  ;;  %v795_v18 = vrot.slane %v794_v1, 4 }
  0x82   :  { %v804_v20 = vor.u32 %v803_v2, %v799_v45  ;;  %v862_v25 = vrot.slane %v860_v3, 4  ;;  %v865_v26 = vrot.slane %v863_v4, 5  ;;  %v879_v30 = vshll.u32 %v7870_v59, 16 }
  0x83   :  { %v871_v27 = vrot.slane %v869_v14, 5  ;;  %v875_v29 = vrot.slane %v873_v15, 4  ;;  %3954 = vrot.lane.b32.xlu1 %v6707_v17, %s7307_s9  ;;  %v800_v31 = vsel %vm7360_vm2, %v795_v18, %v799_v45  ;;  %v836_v36 = vshrl.u32 %v76_v60, 16 }
  0x84   :  { %v805_v35 = vrot.slane %v804_v20, 4  ;;  %v839_v37 = vshll.u32 %v76_v60, 16  ;;  %v866_v40 = vor.u32 %v865_v26, %v862_v25  ;;  %v881_v44 = vrot.slane %v879_v30, 5  ;;  %v884_v60 = vld [vmem:[%s12344_s0 + $0xc] sm:$0xe] }
  0x85   :  { %v876_v42 = vor.u32 %v875_v29, %v871_v27  ;;  %v845_v52 = vshll.u32 %v7878_v5, 16  ;;  %v838_v57 = vrot.slane %v836_v36, 4  ;;  %v849_v45 = vshrl.u32 %v7878_v5, 16 }
  0x86   :  { %v810_v55 = vsel %vm7360_vm2, %v805_v35, %v809_v13  ;;  %v841_v58 = vrot.slane %v839_v37, 5  ;;  %v867_v2 = vrot.slane %v866_v40, 4 }
  0x87   :  { %v6706_v1 = vcombine.low %v800_v31, %v810_v55  ;;  %v877_v3 = vrot.slane %v876_v42, 4  ;;  %v847_v4 = vrot.slane %v845_v52, 5 }
  0x88   :  { %8 = vsyncpa [#allocation3], 0  ;;  %v842_v12 = vor.u32 %v841_v58, %v838_v57  ;;  %v851_v14 = vrot.slane %v849_v45, 4  ;;  %v855_v15 = vshll.u32 %v7892_v49, 16  ;;  %vm1011_vm3 = vcmask 1042432   ;;  %s7308_s26 = smov 8  }
  0x89   :  { %v883_v13 = vld [vmem:[%s12344_s0] sm:$0xe]  ;;  %3952 = vrot.lane.b32.xlu0 %v6706_v1, %s7307_s9  ;;  %v872_v17 = vsel %vm7360_vm2, %v867_v2, %v871_v27  ;;  %v882_v18 = vsel %vm7360_vm2, %v877_v3, %v881_v44  ;;  %vm1012_vm4 = vcmask 1046532   ;;  %v6295_v20 = vrot.slane %v884_v60, 9  ;;  %v886_v25 = vld [vmem:[%s12344_s0 + $0x24] sm:$0xe] }
  0x8a   :  { %v6709_v26 = vcombine.low %v872_v17, %v882_v18  ;;  %v843_v29 = vrot.slane %v842_v12, 4  ;;  %v852_v30 = vor.u32 %v851_v14, %v847_v4  ;;  %v857_v31 = vrot.slane %v855_v15, 5  ;;  %vm7913_vm5 = vmor %vm1011_vm3, %vm1012_vm4  ;;  %v7920_v27 = vld [vmem:[%s12344_s0 + $0x10] sm:$0xf]  ;;  %v7193_v37 = vld [vmem:[%s12344_s0 + $0x14] sm:$0x1] }
  0x8b   :  { %v12459_v35 = vmov 0  ;;  %v1023_v36 = vrot.slane %v7920_v27, 5  ;;  %v1026_v40 = vrot.slane %v7193_v37, 5  ;;  %v6294_v42 = vrot.slane %v883_v13, 9  ;;  %v7929_v44 = vld [vmem:[%s12344_s0 + $0x4] sm:$0xf] }
  0x8c   :  { %v12460_v35 = vsel %vm7913_vm5, 4294967295, %v12459_v35  ;;  %v1016_v52 = vrot.slane %v7929_v44, 5  ;;  %v885_v55 = vld [vmem:[%s12344_s0 + $0x18] sm:$0xe]  ;;  %3958 = vrot.lane.b32.xlu1 %v6709_v26, %s7307_s9  ;;  %v848_v57 = vsel %vm7360_vm2, %v843_v29, %v847_v4  ;;  %v853_v58 = vrot.slane %v852_v30, 4  ;;  %s7309_s28 = smov 12  }
  0x8d   :  { %12461 = vst [vmem:[#allocation6_spill] sm:$0xff] %v12460_v35  ;;  %v7195_v45 = vld [vmem:[%s12344_s0 + $0x8] sm:$0x1]  ;;  %v6297_v1 = vrot.slane %v886_v25, 9  ;;  %v1024_v2 = vsel %vm7913_vm5, %v6295_v20, %v1023_v36  ;;  %v1025_v3 = vrot.slane %v1023_v36, 4  ;;  %v6296_v20 = vrot.slane %v885_v55, 9 }
  0x8e   :  { %v1019_v60 = vrot.slane %v7195_v45, 5  ;;  %v1017_v12 = vsel %vm7913_vm5, %v6294_v42, %v1016_v52  ;;  %v1018_v14 = vrot.slane %v1016_v52, 4  ;;  %v858_v15 = vsel %vm7360_vm2, %v853_v58, %v857_v31  ;;  %v7950_v4 = vld [vmem:[%s12344_s0 + $0x28] sm:$0xf]  ;;  %v7197_v17 = vld [vmem:[%s12344_s0 + $0x2c] sm:$0x1] }
  0x8f   :  { %v1037_v13 = vrot.slane %v7950_v4, 5  ;;  %v1040_v18 = vrot.slane %v7197_v17, 5  ;;  %v888_v25 = vld [vmem:[%s12344_s0 + $0x3c] sm:$0xe]  ;;  %v6708_v26 = vcombine.low %v848_v57, %v858_v15  ;;  %v1027_v29 = vsel %vm7913_vm5, %v1025_v3, %v1026_v40  ;;  %v887_v37 = vld [vmem:[%s12344_s0 + $0x30] sm:$0xe] }
  0x90   :  { %v1020_v30 = vsel %vm7913_vm5, %v1018_v14, %v1019_v60  ;;  %v7966_v31 = vld [vmem:[%s12344_s0 + $0x1c] sm:$0xf]  ;;  %v6711_v42 = vcombine.low %v1024_v2, %v1027_v29  ;;  %v7199_v45 = vld [vmem:[%s12344_s0 + $0x20] sm:$0x1]  ;;  %v6299_v3 = vrot.slane %v888_v25, 9  ;;  %v6298_v17 = vrot.slane %v887_v37, 9 }
  0x91   :  { %v1030_v36 = vrot.slane %v7966_v31, 5  ;;  %v6710_v52 = vcombine.low %v1017_v12, %v1020_v30  ;;  %v1038_v55 = vsel %vm7913_vm5, %v6297_v1, %v1037_v13  ;;  %v1039_v40 = vrot.slane %v1037_v13, 4  ;;  %3956 = vrot.lane.b32.xlu0 %v6708_v26, %s7307_s9  ;;  %v890_v2 = vld [vmem:[%s12344_s0 + $0x54] sm:$0xe]  ;;  %v7989_v12 = vld [vmem:[%s12344_s0 + $0x40] sm:$0xf] }
  0x92   :  { %v1033_v60 = vrot.slane %v7199_v45, 5  ;;  %4058 = vrot.lane.b32.xlu1 %v6711_v42, %s7308_s26  ;;  %v1051_v14 = vrot.slane %v7989_v12, 5  ;;  %v7201_v15 = vld [vmem:[%s12344_s0 + $0x44] sm:$0x1]  ;;  %v7203_v29 = vld [vmem:[%s12344_s0 + $0x38] sm:$0x1] }
  0x93   :  { %v1031_v57 = vsel %vm7913_vm5, %v6296_v20, %v1030_v36  ;;  %v1032_v58 = vrot.slane %v1030_v36, 4  ;;  %v1041_v1 = vsel %vm7913_vm5, %v1039_v40, %v1040_v18  ;;  %v1054_v13 = vrot.slane %v7201_v15, 5  ;;  %v8000_v18 = vld [vmem:[%s12344_s0 + $0x34] sm:$0xf]  ;;  %v889_v36 = vld [vmem:[%s12344_s0 + $0x48] sm:$0xe] }
  0x94   :  { %v6713_v20 = vcombine.low %v1038_v55, %v1041_v1  ;;  %v1044_v26 = vrot.slane %v8000_v18, 5  ;;  %v1047_v30 = vrot.slane %v7203_v29, 5  ;;  %v1052_v42 = vsel %vm7913_vm5, %v6299_v3, %v1051_v14  ;;  %v8032_v15 = vld [vmem:[%s12344_s0 + $0x4c] sm:$0xf]  ;;  %s7310_s23 = smov 16   ;;  %s7311_s12 = smov 20  }
  0x95   :  { %v1034_v25 = vsel %vm7913_vm5, %v1032_v58, %v1033_v60  ;;  %v1053_v55 = vrot.slane %v1051_v14, 4  ;;  %v6301_v40 = vrot.slane %v890_v2, 9  ;;  %4056 = vrot.lane.b32.xlu0 %v6710_v52, %s7308_s26  ;;  %v8017_v60 = vld [vmem:[%s12344_s0 + $0x58] sm:$0xf]  ;;  %v892_v52 = vld [vmem:[%s12344_s0 + $0x6c] sm:$0xe] }
  0x96   :  { %v6712_v37 = vcombine.low %v1031_v57, %v1034_v25  ;;  %v1045_v58 = vsel %vm7913_vm5, %v6298_v17, %v1044_v26  ;;  %v1046_v45 = vrot.slane %v1044_v26, 4  ;;  %12462 = vst [vmem:[#allocation7_spill] sm:$0xff] %v8017_v60  ;;  %v1065_v1 = vrot.slane %v8017_v60, 5  ;;  %v7205_v57 = vld [vmem:[%s12344_s0 + $0x5c] sm:$0x1]  ;;  %4062 = vrot.lane.b32.xlu1 %v6713_v20, %s7308_s26  ;;  %12463 = vst [vmem:[#allocation8_spill] sm:$0xff] %v8032_v15 }
  0x97   :  { %v1068_v3 = vrot.slane %v7205_v57, 5  ;;  %v1055_v2 = vsel %vm7913_vm5, %v1053_v55, %v1054_v13  ;;  %v6300_v14 = vrot.slane %v889_v36, 9  ;;  %v1058_v17 = vrot.slane %v8032_v15, 5  ;;  %v7207_v25 = vld [vmem:[%s12344_s0 + $0x50] sm:$0x1]  ;;  %s7312_s7 = smov 24  }
  0x98   :  { %v1061_v26 = vrot.slane %v7207_v25, 5  ;;  %v891_v20 = vld [vmem:[%s12344_s0 + $0x60] sm:$0xe]  ;;  %v6715_v29 = vcombine.low %v1052_v42, %v1055_v2  ;;  %v1048_v13 = vsel %vm7913_vm5, %v1046_v45, %v1047_v30  ;;  %v1066_v36 = vsel %vm7913_vm5, %v6301_v40, %v1065_v1  ;;  %v894_v25 = vld [vmem:[%s12344_s0 + $0x84] sm:$0xe]  ;;  %s7313_s15 = smov 28  }
  0x99   :  { %v1067_v55 = vrot.slane %v1065_v1, 4  ;;  %v6714_v57 = vcombine.low %v1045_v58, %v1048_v13  ;;  %v1059_v22 = vsel %vm7913_vm5, %v6300_v14, %v1058_v17  ;;  %v1060_v15 = vrot.slane %v1058_v17, 4  ;;  %4060 = vrot.lane.b32.xlu0 %v6712_v37, %s7308_s26  ;;  %v8056_v30 = vld [vmem:[%s12344_s0 + $0x70] sm:$0xf]  ;;  %v7209_v58 = vld [vmem:[%s12344_s0 + $0x74] sm:$0x1] }
  0x9a   :  { %v6303_v60 = vrot.slane %v892_v52, 9  ;;  %12464 = vst [vmem:[#allocation9_spill] sm:$0xff] %v8056_v30  ;;  %v1079_v40 = vrot.slane %v8056_v30, 5  ;;  %v1082_v45 = vrot.slane %v7209_v58, 5  ;;  %v6302_v1 = vrot.slane %v891_v20, 9  ;;  %4066 = vrot.lane.b32.xlu1 %v6715_v29, %s7308_s26  ;;  %s7314_s27 = smov 32  }
  0x9b   :  { %v1069_v42 = vsel %vm7913_vm5, %v1067_v55, %v1068_v3  ;;  %v1062_v37 = vsel %vm7913_vm5, %v1060_v15, %v1061_v26  ;;  %v8068_v3 = vld [vmem:[%s12344_s0 + $0x64] sm:$0xf]  ;;  %v7211_v14 = vld [vmem:[%s12344_s0 + $0x68] sm:$0x1]  ;;  %v893_v20 = vld [vmem:[%s12344_s0 + $0x78] sm:$0xe] }
  0x9c   :  { %v6717_v52 = vcombine.low %v1066_v36, %v1069_v42  ;;  %12465 = vst [vmem:[#allocation10_spill] sm:$0xff] %v8068_v3  ;;  %v1072_v2 = vrot.slane %v8068_v3, 5  ;;  %v1075_v17 = vrot.slane %v7211_v14, 5  ;;  %v6716_v29 = vcombine.low %v1059_v22, %v1062_v37  ;;  %v8084_v42 = vld [vmem:[%s12344_s0 + $0x88] sm:$0xf] }
  0x9d   :  { %v1080_v15 = vsel %vm7913_vm5, %v6303_v60, %v1079_v40  ;;  %v1081_v26 = vrot.slane %v1079_v40, 4  ;;  %v6305_v13 = vrot.slane %v894_v25, 9  ;;  %12466 = vst [vmem:[#allocation11_spill] sm:$0xff] %v8084_v42  ;;  %v1093_v58 = vrot.slane %v8084_v42, 5  ;;  %v7213_v22 = vld [vmem:[%s12344_s0 + $0x8c] sm:$0x1]  ;;  %4064 = vrot.lane.b32.xlu0 %v6714_v57, %s7308_s26 }
  0x9e   :  { %v1073_v36 = vsel %vm7913_vm5, %v6302_v1, %v1072_v2  ;;  %v1074_v55 = vrot.slane %v1072_v2, 4  ;;  %v1096_v37 = vrot.slane %v7213_v22, 5  ;;  %v896_v60 = vld [vmem:[%s12344_s0 + $0x9c] sm:$0xe]  ;;  %v6304_v40 = vrot.slane %v893_v20, 9  ;;  %4070 = vrot.lane.b32.xlu1 %v6717_v52, %s7308_s26 }
  0x9f   :  { %v1083_v25 = vsel %vm7913_vm5, %v1081_v26, %v1082_v45  ;;  %v8099_v1 = vld [vmem:[%s12344_s0 + $0x7c] sm:$0xf]  ;;  %v7215_v14 = vld [vmem:[%s12344_s0 + $0x80] sm:$0x1]  ;;  %v1095_v45 = vrot.slane %v1093_v58, 4  ;;  %v6307_v30 = vrot.slane %v896_v60, 9 }
  0xa0   :  { %12467 = vst [vmem:[#allocation12_spill] sm:$0xff] %v8099_v1  ;;  %v1086_v2 = vrot.slane %v8099_v1, 5  ;;  %v1089_v22 = vrot.slane %v7215_v14, 5  ;;  %v6719_v42 = vcombine.low %v1080_v15, %v1083_v25  ;;  %v1076_v57 = vsel %vm7913_vm5, %v1074_v55, %v1075_v17  ;;  %v895_v20 = vld [vmem:[%s12344_s0 + $0x90] sm:$0xe] }
  0xa1   :  { %v6718_v26 = vcombine.low %v1073_v36, %v1076_v57  ;;  %v1094_v1 = vsel %vm7913_vm5, %v6305_v13, %v1093_v58  ;;  %v898_v14 = vld [vmem:[%s12344_s0 + $0xb4] sm:$0xe]  ;;  %v1097_v52 = vsel %vm7913_vm5, %v1095_v45, %v1096_v37  ;;  %v8123_v15 = vld [vmem:[%s12344_s0 + $0xa0] sm:$0xf]  ;;  %v7217_v13 = vld [vmem:[%s12344_s0 + $0xa4] sm:$0x1]  ;;  %4068 = vrot.lane.b32.xlu0 %v6716_v29, %s7308_s26 }
  0xa2   :  { %v1088_v3 = vrot.slane %v1086_v2, 4  ;;  %v1087_v17 = vsel %vm7913_vm5, %v6304_v40, %v1086_v2  ;;  %12468 = vst [vmem:[#allocation13_spill] sm:$0xff] %v8123_v15  ;;  %v1107_v36 = vrot.slane %v8123_v15, 5  ;;  %v1110_v55 = vrot.slane %v7217_v13, 5  ;;  %v8135_v60 = vld [vmem:[%s12344_s0 + $0x94] sm:$0xf]  ;;  %4074 = vrot.lane.b32.xlu1 %v6719_v42, %s7308_s26 }
  0xa3   :  { %v6306_v37 = vrot.slane %v895_v20, 9  ;;  %12469 = vst [vmem:[#allocation14_spill] sm:$0xff] %v8135_v60  ;;  %v1100_v25 = vrot.slane %v8135_v60, 5  ;;  %v7219_v40 = vld [vmem:[%s12344_s0 + $0x98] sm:$0x1]  ;;  %v6721_v57 = vcombine.low %v1094_v1, %v1097_v52  ;;  %v6309_v45 = vrot.slane %v898_v14, 9 }
  0xa4   :  { %v1090_v58 = vsel %vm7913_vm5, %v1088_v3, %v1089_v22  ;;  %v1103_v2 = vrot.slane %v7219_v40, 5  ;;  %v1109_v29 = vrot.slane %v1107_v36, 4  ;;  %v897_v3 = vld [vmem:[%s12344_s0 + $0xa8] sm:$0xe]  ;;  %v1108_v22 = vsel %vm7913_vm5, %v6307_v30, %v1107_v36  ;;  %v8150_v13 = vld [vmem:[%s12344_s0 + $0xb8] sm:$0xf]  ;;  %v8162_v36 = vpop.permute.xlu1 %3900 }
  0xa5   :  { %v1102_v20 = vrot.slane %v1100_v25, 4  ;;  %12470 = vst [vmem:[#allocation15_spill] sm:$0xff] %v8150_v13  ;;  %v1121_v40 = vrot.slane %v8150_v13, 5  ;;  %v7221_v42 = vld [vmem:[%s12344_s0 + $0xbc] sm:$0x1]  ;;  %v6720_v14 = vcombine.low %v1087_v17, %v1090_v58  ;;  %v1114_v60 = vrot.slane %v7548_v34, 5  ;;  %4072 = vrot.lane.b32.xlu0 %v6718_v26, %s7308_s26 }
  0xa6   :  { %v1124_v1 = vrot.slane %v7221_v42, 5  ;;  %v1111_v52 = vsel %vm7913_vm5, %v1109_v29, %v1110_v55  ;;  %v900_v30 = vld [vmem:[%s12344_s0 + $0xe4] sm:$0xe]  ;;  %v1101_v13 = vsel %vm7913_vm5, %v6306_v37, %v1100_v25  ;;  %v6308_v58 = vrot.slane %v897_v3, 9  ;;  %v899_v34 = vld [vmem:[%s12344_s0 + $0xd8] sm:$0xe]  ;;  %4078 = vrot.lane.b32.xlu1 %v6721_v57, %s7308_s26 }
  0xa7   :  { %v1104_v42 = vsel %vm7913_vm5, %v1102_v20, %v1103_v2  ;;  %v1123_v17 = vrot.slane %v1121_v40, 4  ;;  %v6723_v55 = vcombine.low %v1108_v22, %v1111_v52  ;;  %v1122_v29 = vsel %vm7913_vm5, %v6309_v45, %v1121_v40  ;;  %v902_v37 = vld [vmem:[%s12344_s0 + $0xfc] sm:$0xe] }
  0xa8   :  { %v1116_v15 = vrot.slane %v1114_v60, 4  ;;  %v1117_v26 = vrot.slane %v7556_v46, 5  ;;  %v6311_v2 = vrot.slane %v900_v30, 9  ;;  %v1135_v3 = vrot.slane %v7568_v53, 5  ;;  %v901_v46 = vld [vmem:[%s12344_s0 + $0xf0] sm:$0xe] }
  0xa9   :  { %v1125_v25 = vsel %vm7913_vm5, %v1123_v17, %v1124_v1  ;;  %v1138_v20 = vrot.slane %v7579_v0, 5  ;;  %v6722_v57 = vcombine.low %v1101_v13, %v1104_v42  ;;  %v6310_v22 = vrot.slane %v899_v34, 9  ;;  %4076 = vrot.lane.b32.xlu0 %v6720_v14, %s7308_s26  ;;  %v8191_v17 = vpop.permute.xlu0 %3896  ;;  %v904_v14 = vld [vmem:[%s12344_s0 + $0x114] sm:$0xe]  ;;  %v8201_v42 = vpop.permute.xlu1 %3902 }
  0xaa   :  { %v1128_v52 = vrot.slane %v7588_v8, 5  ;;  %v1131_v45 = vrot.slane %v7598_v16, 5  ;;  %v6725_v40 = vcombine.low %v1122_v29, %v1125_v25  ;;  %v1115_v1 = vsel %vm7913_vm5, %v6308_v58, %v1114_v60  ;;  %4082 = vrot.lane.b32.xlu1 %v6723_v55, %s7308_s26 }
  0xab   :  { %v1137_v30 = vrot.slane %v1135_v3, 4  ;;  %v6313_v53 = vrot.slane %v902_v37, 9  ;;  %v1118_v0 = vsel %vm7913_vm5, %v1116_v15, %v1117_v26  ;;  %v1149_v16 = vrot.slane %v7610_v32, 5 }
  0xac   :  { %v1130_v8 = vrot.slane %v1128_v52, 4  ;;  %v1152_v13 = vrot.slane %v7619_v41, 5  ;;  %v1136_v60 = vsel %vm7913_vm5, %v6311_v2, %v1135_v3  ;;  %v6312_v34 = vrot.slane %v901_v46, 9  ;;  %v906_v46 = vld [vmem:[%s12344_s0 + $0x12c] sm:$0xe] }
  0xad   :  { %v1139_v58 = vsel %vm7913_vm5, %v1137_v30, %v1138_v20  ;;  %v1142_v15 = vrot.slane %v7631_v54, 5  ;;  %v1129_v32 = vsel %vm7913_vm5, %v6310_v22, %v1128_v52  ;;  %v1151_v55 = vrot.slane %v1149_v16, 4  ;;  %4080 = vrot.lane.b32.xlu0 %v6722_v57, %s7308_s26  ;;  %v903_v54 = vld [vmem:[%s12344_s0 + $0x108] sm:$0xe] }
  0xae   :  { %v1132_v41 = vsel %vm7913_vm5, %v1130_v8, %v1131_v45  ;;  %v1145_v29 = vrot.slane %v7639_v62, 5  ;;  %v6724_v26 = vcombine.low %v1115_v1, %v1118_v0  ;;  %v1150_v37 = vsel %vm7913_vm5, %v6313_v53, %v1149_v16  ;;  %4086 = vrot.lane.b32.xlu1 %v6725_v40, %s7308_s26  ;;  %v8230_v1 = vpop.permute.xlu0 %3898  ;;  %v8234_v0 = vpop.permute.xlu1 %3906 }
  0xaf   :  { %v1144_v25 = vrot.slane %v1142_v15, 4  ;;  %v6315_v2 = vrot.slane %v904_v14, 9  ;;  %v6727_v3 = vcombine.low %v1136_v60, %v1139_v58  ;;  %v1153_v20 = vsel %vm7913_vm5, %v1151_v55, %v1152_v13  ;;  %v905_v13 = vld [vmem:[%s12344_s0 + $0x120] sm:$0xe] }
  0xb0   :  { %v1163_v62 = vrot.slane %v7651_v11, 5  ;;  %v1166_v57 = vrot.slane %v7661_v19, 5  ;;  %v6726_v22 = vcombine.low %v1129_v32, %v1132_v41  ;;  %v1143_v52 = vsel %vm7913_vm5, %v6312_v34, %v1142_v15 }
  0xb1   :  { %v1156_v45 = vrot.slane %v7673_v33, 5  ;;  %v6729_v40 = vcombine.low %v1150_v37, %v1153_v20  ;;  %v1146_v30 = vsel %vm7913_vm5, %v1144_v25, %v1145_v29  ;;  %v6314_v11 = vrot.slane %v903_v54, 9  ;;  %4084 = vrot.lane.b32.xlu0 %v6724_v26, %s7308_s26  ;;  %v907_v26 = vld [vmem:[%s12344_s0 + $0x138] sm:$0xe] }
  0xb2   :  { %v1165_v53 = vrot.slane %v1163_v62, 4  ;;  %v1164_v19 = vsel %vm7913_vm5, %v6315_v2, %v1163_v62  ;;  %v1159_v8 = vrot.slane %v7682_v47, 5  ;;  %v1177_v16 = vrot.slane %v7694_v61, 5  ;;  %4090 = vrot.lane.b32.xlu1 %v6727_v3, %s7308_s26  ;;  %v908_v47 = vld [vmem:[%s12344_s0 + $0x144] sm:$0xe]  ;;  %v8262_v2 = vpop.permute.xlu0 %3904  ;;  %v8271_v62 = vpop.permute.xlu1 %3910 }
  0xb3   :  { %v1158_v33 = vrot.slane %v1156_v45, 4  ;;  %v6317_v60 = vrot.slane %v906_v46, 9  ;;  %v1180_v58 = vrot.slane %v7702_v6, 5  ;;  %v1170_v34 = vrot.slane %v7715_v23, 5 }
  0xb4   :  { %v1167_v14 = vsel %vm7913_vm5, %v1165_v53, %v1166_v57  ;;  %v6728_v15 = vcombine.low %v1143_v52, %v1146_v30  ;;  %v1179_v61 = vrot.slane %v1177_v16, 4  ;;  %v1157_v41 = vsel %vm7913_vm5, %v6314_v11, %v1156_v45  ;;  %v909_v11 = vld [vmem:[%s12344_s0 + $0x150] sm:$0xe] }
  0xb5   :  { %v6731_v32 = vcombine.low %v1164_v19, %v1167_v14  ;;  %v6316_v55 = vrot.slane %v905_v13, 9  ;;  %v1173_v29 = vrot.slane %v7724_v38, 5  ;;  %4088 = vrot.lane.b32.xlu0 %v6726_v22, %s7308_s26  ;;  %v1160_v6 = vsel %vm7913_vm5, %v1158_v33, %v1159_v8  ;;  %v7222_v19 = vld [vmem:[%s12344_s0 + $0x18] sm:$0xf]  ;;  %v7223_v14 = vld [vmem:[%s12344_s0] sm:$0xf] }
  0xb6   :  { %v1172_v23 = vrot.slane %v1170_v34, 4  ;;  %v6319_v37 = vrot.slane %v908_v47, 9  ;;  %v1191_v25 = vrot.slane %v7736_v48, 5  ;;  %4094 = vrot.lane.b32.xlu1 %v6729_v40, %s7308_s26  ;;  %v1178_v38 = vsel %vm7913_vm5, %v6317_v60, %v1177_v16  ;;  %v910_v48 = vld [vmem:[%s12344_s0 + $0x15c] sm:$0xe] }
  0xb7   :  { %v1181_v54 = vsel %vm7913_vm5, %v1179_v61, %v1180_v58  ;;  %v1194_v3 = vrot.slane %v7747_v63, 5  ;;  %v1184_v20 = vrot.slane %v7756_v10, 5  ;;  %v6318_v22 = vrot.slane %v907_v26, 9  ;;  %v8311_v61 = vpop.permute.xlu1 %3914 }
  0xb8   :  { %v1193_v57 = vrot.slane %v1191_v25, 4  ;;  %v6730_v52 = vcombine.low %v1157_v41, %v1160_v6  ;;  %v1171_v45 = vsel %vm7913_vm5, %v6316_v55, %v1170_v34  ;;  %v1187_v40 = vrot.slane %v7766_v21, 5  ;;  %v8305_v34 = vpop.permute.xlu0 %3908  ;;  %v911_v6 = vld [vmem:[%s12344_s0 + $0x168] sm:$0xe] }
  0xb9   :  { %v1186_v46 = vrot.slane %v1184_v20, 4  ;;  %4092 = vrot.lane.b32.xlu0 %v6728_v15, %s7308_s26  ;;  %v6733_v63 = vcombine.low %v1178_v38, %v1181_v54  ;;  %v1174_v10 = vsel %vm7913_vm5, %v1172_v23, %v1173_v29  ;;  %v1192_v30 = vsel %vm7913_vm5, %v6319_v37, %v1191_v25  ;;  %v7224_v54 = vld [vmem:[%s12344_s0 + $0x24] sm:$0xf] }
  0xba   :  { %v1205_v53 = vrot.slane %v7778_v43, 5  ;;  %4098 = vrot.lane.b32.xlu1 %v6731_v32, %s7308_s26  ;;  %v1195_v21 = vsel %vm7913_vm5, %v1193_v57, %v1194_v3  ;;  %v6648_v33 = vcombine.low %v7222_v19, %v7966_v31  ;;  %v6321_v8 = vrot.slane %v910_v48, 9  ;;  %v912_v43 = vld [vmem:[%s12344_s0 + $0x174] sm:$0xe]  ;;  %v7225_v57 = vld [vmem:[%s12344_s0 + $0xc] sm:$0xf] }
  0xbb   :  { %v1208_v16 = vrot.slane %v7787_v56, 5  ;;  %v1185_v13 = vsel %vm7913_vm5, %v6318_v22, %v1184_v20  ;;  %vm5144_vm6 = vcmask 31744   ;;  %v6646_v60 = vcombine.low %v7223_v14, %v7929_v44  ;;  %v7227_v19 = vld [vmem:[%s12344_s0 + $0x30] sm:$0xf]  ;;  %v7229_v14 = vld [vmem:[%s12344_s0 + $0x48] sm:$0xf] }
  0xbc   :  { %v1207_v58 = vrot.slane %v1205_v53, 4  ;;  %v1188_v56 = vsel %vm7913_vm5, %v1186_v46, %v1187_v40  ;;  %v6320_v31 = vrot.slane %v909_v11, 9  ;;  %v1198_v47 = vrot.slane %v7799_v9, 5 }
  0xbd   :  { %v1201_v15 = vrot.slane %v7807_v24, 5  ;;  %4096 = vrot.lane.b32.xlu0 %v6730_v52, %s7308_s26  ;;  %v6732_v32 = vcombine.low %v1171_v45, %v1174_v10  ;;  %v6735_v41 = vcombine.low %v1192_v30, %v1195_v21  ;;  %v6323_v55 = vrot.slane %v912_v43, 9  ;;  %v8364_v10 = vpop.permute.xlu1 %3918 }
  0xbe   :  { %v1219_v44 = vrot.slane %v7819_v39, 5  ;;  %4102 = vrot.lane.b32.xlu1 %v6733_v63, %s7308_s26  ;;  %v1206_v29 = vsel %vm7913_vm5, %v6321_v8, %v1205_v53  ;;  %v1209_v26 = vsel %vm7913_vm5, %v1207_v58, %v1208_v16  ;;  %v1200_v9 = vrot.slane %v1198_v47, 4 }
  0xbf   :  { %v1222_v24 = vrot.slane %v7829_v51, 5  ;;  %v6734_v23 = vcombine.low %v1185_v13, %v1188_v56  ;;  %v8326_v37 = vsel %vm5144_vm6, %v6648_v33, %v8162_v36  ;;  %v8330_v39 = vsel %vm5144_vm6, %v6646_v60, %v8191_v17  ;;  %v914_v17 = vld [vmem:[%s12344_s0 + $0x18c] sm:$0xe] }
  0xc0   :  { %v1221_v25 = vrot.slane %v1219_v44, 4  ;;  %v1199_v38 = vsel %vm7913_vm5, %v6320_v31, %v1198_v47  ;;  %v1202_v51 = vsel %vm7913_vm5, %v1200_v9, %v1201_v15  ;;  %v6649_v3 = vcombine.low %v7224_v54, %v7950_v4  ;;  %v8354_v4 = vpop.permute.xlu0 %3912 }
  0xc1   :  { %v1212_v36 = vrot.slane %v7841_v7, 5  ;;  %4100 = vrot.lane.b32.xlu0 %v6732_v32, %s7308_s26  ;;  %v6737_v20 = vcombine.low %v1206_v29, %v1209_v26  ;;  %v6647_v22 = vcombine.low %v7225_v57, %v7920_v27  ;;  %v1220_v48 = vsel %vm7913_vm5, %v6323_v55, %v1219_v44  ;;  %v913_v7 = vld [vmem:[%s12344_s0 + $0x180] sm:$0xe]  ;;  %v7226_v27 = vld [vmem:[%s12344_s0 + $0x3c] sm:$0xf]  ;;  %v8417_v26 = vpop.permute.xlu1 %3922 }
  0xc2   :  { %v6322_v52 = vrot.slane %v911_v6, 9  ;;  %4106 = vrot.lane.b32.xlu1 %v6735_v41, %s7308_s26  ;;  %v1223_v45 = vsel %vm7913_vm5, %v1221_v25, %v1222_v24  ;;  %v1215_v40 = vrot.slane %v7850_v28, 5  ;;  %v6651_v63 = vcombine.low %v7226_v27, %v7989_v12  ;;  %v8440_v25 = vld [vmem:[%s12344_s0 + $0xc] sm:$0xf] }
  0xc3   :  { %v1214_v46 = vrot.slane %v1212_v36, 4  ;;  %v6736_v30 = vcombine.low %v1199_v38, %v1202_v51  ;;  %v6325_v53 = vrot.slane %v914_v17, 9  ;;  %v1233_v11 = vrot.slane %v7862_v50, 5  ;;  %v7228_v50 = vld [vmem:[%s12344_s0 + $0x54] sm:$0xf] }
  0xc4   :  { %v1236_v21 = vrot.slane %v7870_v59, 5  ;;  %v6650_v28 = vcombine.low %v7227_v19, %v8000_v18  ;;  %v6324_v33 = vrot.slane %v913_v7, 9  ;;  %v1226_v8 = vrot.slane %v7878_v5, 5  ;;  %v12471_v59 = vld [vmem:[#allocation7_spill] sm:$0xff]  ;;  %v12472_v18 = vld [vmem:[#allocation8_spill] sm:$0xff]  ;;  %v8406_v55 = vpop.permute.xlu0 %3916 }
  0xc5   :  { %v1229_v16 = vrot.slane %v7892_v49, 5  ;;  %4104 = vrot.lane.b32.xlu0 %v6734_v23, %s7308_s26  ;;  %v6739_v12 = vcombine.low %v1220_v48, %v1223_v45  ;;  %v1235_v43 = vrot.slane %v1233_v11, 4  ;;  %v6653_v13 = vcombine.low %v7228_v50, %v12471_v59  ;;  %v8386_v5 = vld [vmem:[%s12344_s0 + $0x18] sm:$0xf]  ;;  %v8435_v23 = vld [vmem:[%s12344_s0 + $0x1c] sm:$0xf] }
  0xc6   :  { %v6652_v60 = vcombine.low %v7229_v14, %v12472_v18  ;;  %4110 = vrot.lane.b32.xlu1 %v6737_v20, %s7308_s26  ;;  %v1213_v49 = vsel %vm7913_vm5, %v6322_v52, %v1212_v36  ;;  %v1216_v58 = vsel %vm7913_vm5, %v1214_v46, %v1215_v40  ;;  %v1228_v56 = vrot.slane %v1226_v8, 4  ;;  %12473 = vst [vmem:[#allocation7_spill] sm:$0xff] %v8435_v23  ;;  %v8450_v51 = vld [vmem:[%s12344_s0 + $0x30] sm:$0xf]  ;;  %v12475_v48 = vld [vmem:[#allocation9_spill] sm:$0xff]  ;;  %v12476_v45 = vld [vmem:[#allocation10_spill] sm:$0xff] }
  0xc7   :  { %v1360_v31 = vshrl.u32 %v8386_v5, 16  ;;  %v8396_v47 = vsel %vm5144_vm6, %v6649_v3, %v8201_v42  ;;  %v8400_v15 = vsel %vm5144_vm6, %v6647_v22, %v8230_v1  ;;  %v1234_v32 = vsel %vm7913_vm5, %v6325_v53, %v1233_v11  ;;  %v8455_v3 = vld [vmem:[%s12344_s0 + $0x10] sm:$0xf]  ;;  %v7230_v22 = vld [vmem:[%s12344_s0 + $0x6c] sm:$0xf] }
  0xc8   :  { %v1237_v41 = vsel %vm7913_vm5, %v1235_v43, %v1236_v21  ;;  %v8410_v44 = vsel %vm5144_vm6, %v6651_v63, %v8234_v0  ;;  %v1227_v42 = vsel %vm7913_vm5, %v6324_v33, %v1226_v8  ;;  %v1230_v29 = vsel %vm7913_vm5, %v1228_v56, %v1229_v16  ;;  %12474 = vst [vmem:[#allocation8_spill] sm:$0xff] %v8455_v3  ;;  %v7231_v7 = vld [vmem:[%s12344_s0 + $0x60] sm:$0xf]  ;;  %v8479_v53 = vld [vmem:[%s12344_s0 + $0x34] sm:$0xf]  ;;  %v8481_v21 = vpop.permute.xlu0 %3920 }
  0xc9   :  { %v1363_v1 = vshll.u32 %v8386_v5, 16  ;;  %4108 = vrot.lane.b32.xlu0 %v6736_v30, %s7308_s26  ;;  %v6738_v9 = vcombine.low %v1213_v49, %v1216_v58  ;;  %v8422_v24 = vsel %vm5144_vm6, %v6650_v28, %v8262_v2  ;;  %v8426_v0 = vsel %vm5144_vm6, %v6653_v13, %v8271_v62  ;;  %12477 = vst [vmem:[#allocation9_spill] sm:$0xff] %v8479_v53  ;;  %v6330_v16 = vld [vmem:[%s12344_s0 + $0x24] sm:$0xf]  ;;  %v8500_v59 = vld [vmem:[%s12344_s0 + $0x28] sm:$0xf] }
  0xca   :  { %v8430_v6 = vsel %vm5144_vm6, %v6652_v60, %v8305_v34  ;;  %4114 = vrot.lane.b32.xlu1 %v6739_v12, %s7308_s26  ;;  %v6741_v2 = vcombine.low %v1234_v32, %v1237_v41  ;;  %v8443_v38 = vrot.slane %v1360_v31, 4  ;;  %v6740_v54 = vcombine.low %v1227_v42, %v1230_v29  ;;  %v8491_v12 = vpop.permute.xlu1 %3926  ;;  %12478 = vst [vmem:[#allocation10_spill] sm:$0xff] %v8500_v59 }
  0xcb   :  { %v1336_v36 = vshrl.u32 %v8440_v25, 16  ;;  %v1339_v17 = vshll.u32 %v8440_v25, 16  ;;  %v1408_v20 = vshrl.u32 %v8450_v51, 16  ;;  %v8460_v57 = vrot.slane %v1363_v1, 5 }
  0xcc   :  { %v6655_v52 = vcombine.low %v7230_v22, %v12475_v48  ;;  %v6654_v46 = vcombine.low %v7231_v7, %v12476_v45  ;;  %v1411_v40 = vshll.u32 %v8450_v51, 16  ;;  %v6743_v27 = vcombine.low %v8386_v5, %v8435_v23  ;;  %v8538_v22 = vpop.permute.xlu0 %3924 }
  0xcd   :  { %4112 = vrot.lane.b32.xlu0 %v6738_v9, %s7308_s26  ;;  %v1410_v11 = vrot.slane %v1408_v20, 4  ;;  %v6742_v19 = vcombine.low %v8440_v25, %v8455_v3  ;;  %v1417_v33 = vshll.u32 %v8479_v53, 16  ;;  %v1421_v8 = vshrl.u32 %v8479_v53, 16  ;;  %v7232_v9 = vld [vmem:[%s12344_s0 + $0x84] sm:$0xf]  ;;  %v12481_v25 = vld [vmem:[#allocation11_spill] sm:$0xff] }
  0xce   :  { %4118 = vrot.lane.b32.xlu1 %v6741_v2, %s7308_s26  ;;  %v1413_v28 = vrot.slane %v1411_v40, 5  ;;  %v8493_v43 = vrot.slane %v1336_v36, 4  ;;  %v8495_v50 = vrot.slane %v1339_v17, 5  ;;  %v1384_v13 = vshrl.u32 %v6330_v16, 16  ;;  %v12482_v36 = vld [vmem:[#allocation12_spill] sm:$0xff] }
  0xcf   :  { %v1387_v14 = vshll.u32 %v6330_v16, 16  ;;  %v8504_v18 = vsel %vm5144_vm6, %v6655_v52, %v8311_v61  ;;  %v8508_v60 = vsel %vm5144_vm6, %v6654_v46, %v8354_v4  ;;  %v1393_v5 = vshll.u32 %v8500_v59, 16  ;;  %v6336_v61 = vld [vmem:[%s12344_s0 + $0x48] sm:$0xf]  ;;  %v8536_v20 = vld [vmem:[%s12344_s0 + $0x4c] sm:$0xf]  ;;  %v8545_v46 = vpop.permute.xlu1 %3930 }
  0xd0   :  { %12479 = vst [vmem:[#allocation16_spill] sm:$0xff] %v8504_v18  ;;  %12480 = vst [vmem:[#allocation17_spill] sm:$0xff] %v8508_v60  ;;  %v1397_v49 = vshrl.u32 %v8500_v59, 16  ;;  %v1414_v58 = vor.u32 %v1413_v28, %v1410_v11  ;;  %v1386_v31 = vrot.slane %v1384_v13, 4  ;;  %v8518_v4 = vrot.slane %v1417_v33, 5 }
  0xd1   :  { %4116 = vrot.lane.b32.xlu0 %v6740_v54, %s7308_s26  ;;  %v1389_v32 = vrot.slane %v1387_v14, 5  ;;  %v8520_v41 = vrot.slane %v1421_v8, 4  ;;  %v6745_v42 = vcombine.low %v8450_v51, %v8479_v53  ;;  %v1456_v29 = vshrl.u32 %v6336_v61, 16  ;;  %v7233_v54 = vld [vmem:[%s12344_s0 + $0x78] sm:$0xf]  ;;  %12483 = vst [vmem:[#allocation11_spill] sm:$0xff] %v8536_v20 }
  0xd2   :  { %4250 = vrot.lane.b32.xlu1 %v6743_v27, %s7309_s28  ;;  %v6657_v2 = vcombine.low %v7232_v9, %v12481_v25  ;;  %v6656_v17 = vcombine.low %v7233_v54, %v12482_v36  ;;  %v1459_v51 = vshll.u32 %v6336_v61, 16  ;;  %v8540_v52 = vrot.slane %v1393_v5, 5  ;;  %v6334_v33 = vld [vmem:[%s12344_s0 + $0x3c] sm:$0xf]  ;;  %v8587_v36 = vpop.permute.xlu0 %3928 }
  0xd3   :  { %v1390_v48 = vor.u32 %v1389_v32, %v1386_v31  ;;  %v8542_v7 = vrot.slane %v1397_v49, 4  ;;  %v6744_v45 = vcombine.low %v6330_v16, %v8500_v59  ;;  %v8548_v40 = vrot.slane %v1414_v58, 4  ;;  %v6340_v32 = vld [vmem:[%s12344_s0 + $0x60] sm:$0xf] }
  0xd4   :  { %v1458_v27 = vrot.slane %v1456_v29, 4  ;;  %v1461_v11 = vrot.slane %v1459_v51, 5  ;;  %v1465_v28 = vshll.u32 %v8536_v20, 16  ;;  %v1469_v8 = vshrl.u32 %v8536_v20, 16 }
  0xd5   :  { %4248 = vrot.lane.b32.xlu0 %v6742_v19, %s7309_s28  ;;  %v6747_v16 = vcombine.low %v6336_v61, %v8536_v20  ;;  %v8560_v19 = vld [vmem:[%s12344_s0 + $0x40] sm:$0xf]  ;;  %v1432_v13 = vshrl.u32 %v6334_v33, 16  ;;  %v1435_v14 = vshll.u32 %v6334_v33, 16  ;;  %v8564_v5 = vsel %vm5144_vm6, %v6657_v2, %v8364_v10  ;;  %v8581_v10 = vld [vmem:[%s12344_s0 + $0x64] sm:$0xf] }
  0xd6   :  { %4254 = vrot.lane.b32.xlu1 %v6745_v42, %s7309_s28  ;;  %12484 = vst [vmem:[#allocation12_spill] sm:$0xff] %v8560_v19  ;;  %12485 = vst [vmem:[#allocation18_spill] sm:$0xff] %v8564_v5  ;;  %v8568_v49 = vsel %vm5144_vm6, %v6656_v17, %v8406_v55  ;;  %v1441_v58 = vshll.u32 %v8560_v19, 16  ;;  %v1445_v31 = vshrl.u32 %v8560_v19, 16  ;;  %v8575_v61 = vrot.slane %v1390_v48, 4  ;;  %v8642_v34 = vpop.permute.xlu0 %3932 }
  0xd7   :  { %12486 = vst [vmem:[#allocation19_spill] sm:$0xff] %v8568_v49  ;;  %v1434_v29 = vrot.slane %v1432_v13, 4  ;;  %v1437_v9 = vrot.slane %v1435_v14, 5  ;;  %12487 = vst [vmem:[#allocation20_spill] sm:$0xff] %v8581_v10  ;;  %v1462_v55 = vor.u32 %v1461_v11, %v1458_v27  ;;  %v8584_v25 = vrot.slane %v1465_v28, 5  ;;  %v12488_v13 = vld [vmem:[#allocation13_spill] sm:$0xff]  ;;  %v8597_v11 = vpop.permute.xlu1 %3934 }
  0xd8   :  { %v6746_v2 = vcombine.low %v6334_v33, %v8560_v19  ;;  %v1504_v54 = vshrl.u32 %v6340_v32, 16  ;;  %v8589_v17 = vrot.slane %v1469_v8, 4  ;;  %v7234_v48 = vld [vmem:[%s12344_s0 + $0x9c] sm:$0xf]  ;;  %v1507_v27 = vshll.u32 %v6340_v32, 16 }
  0xd9   :  { %4252 = vrot.lane.b32.xlu0 %v6744_v45, %s7309_s28  ;;  %v6659_v45 = vcombine.low %v7234_v48, %v12488_v13  ;;  %v8599_v28 = vrot.slane %v1441_v58, 5  ;;  %v8601_v33 = vrot.slane %v1445_v31, 4  ;;  %v7235_v8 = vld [vmem:[%s12344_s0 + $0x90] sm:$0xf]  ;;  %v6749_v51 = vcombine.low %v6340_v32, %v8581_v10  ;;  %v6338_v42 = vld [vmem:[%s12344_s0 + $0x54] sm:$0xf] }
  0xda   :  { %4258 = vrot.lane.b32.xlu1 %v6747_v16, %s7309_s28  ;;  %v12489_v16 = vld [vmem:[#allocation14_spill] sm:$0xff]  ;;  %v8614_v48 = vld [vmem:[%s12344_s0 + $0x58] sm:$0xf]  ;;  %v1438_v58 = vor.u32 %v1437_v9, %v1434_v29  ;;  %v1506_v31 = vrot.slane %v1504_v54, 4  ;;  %v1509_v13 = vrot.slane %v1507_v27, 5  ;;  %v1513_v1 = vshll.u32 %v8581_v10, 16 }
  0xdb   :  { %v6658_v14 = vcombine.low %v7235_v8, %v12489_v16  ;;  %12490 = vst [vmem:[#allocation13_spill] sm:$0xff] %v8614_v48  ;;  %v8617_v56 = vrot.slane %v1462_v55, 4  ;;  %v1517_v32 = vshrl.u32 %v8581_v10, 16  ;;  %v1480_v8 = vshrl.u32 %v6338_v42, 16  ;;  %v6344_v55 = vld [vmem:[%s12344_s0 + $0x78] sm:$0xf]  ;;  %v8648_v20 = vpop.permute.xlu1 %3938 }
  0xdc   :  { %v1483_v16 = vshll.u32 %v6338_v42, 16  ;;  %v8623_v30 = vsel %vm5144_vm6, %v6659_v45, %v8417_v26  ;;  %v1489_v29 = vshll.u32 %v8614_v48, 16  ;;  %v1493_v9 = vshrl.u32 %v8614_v48, 16 }
  0xdd   :  { %4256 = vrot.lane.b32.xlu0 %v6746_v2, %s7309_s28  ;;  %12491 = vst [vmem:[#allocation14_spill] sm:$0xff] %v8623_v30  ;;  %v6748_v54 = vcombine.low %v6338_v42, %v8614_v48  ;;  %v8634_v2 = vsel %vm5144_vm6, %v6658_v14, %v8481_v21  ;;  %v1482_v26 = vrot.slane %v1480_v8, 4  ;;  %v8644_v42 = vrot.slane %v1438_v58, 4  ;;  %v7236_v8 = vld [vmem:[%s12344_s0 + $0xb4] sm:$0xf] }
  0xde   :  { %4262 = vrot.lane.b32.xlu1 %v6749_v51, %s7309_s28  ;;  %12492 = vst [vmem:[#allocation21_spill] sm:$0xff] %v8634_v2  ;;  %v1485_v45 = vrot.slane %v1483_v16, 5  ;;  %v8640_v51 = vld [vmem:[%s12344_s0 + $0x7c] sm:$0xf]  ;;  %v1510_v63 = vor.u32 %v1509_v13, %v1506_v31  ;;  %v8646_v62 = vrot.slane %v1513_v1, 5  ;;  %v1552_v19 = vshrl.u32 %v6344_v55, 16 }
  0xdf   :  { %12493 = vst [vmem:[#allocation22_spill] sm:$0xff] %v8640_v51  ;;  %v8650_v21 = vrot.slane %v1517_v32, 4  ;;  %v12494_v16 = vld [vmem:[#allocation15_spill] sm:$0xff]  ;;  %v1555_v58 = vshll.u32 %v6344_v55, 16  ;;  %v8658_v10 = vrot.slane %v1489_v29, 5  ;;  %v8660_v1 = vrot.slane %v1493_v9, 4 }
  0xe0   :  { %v6661_v27 = vcombine.low %v7236_v8, %v12494_v16  ;;  %v7237_v31 = vld [vmem:[%s12344_s0 + $0xa8] sm:$0xf]  ;;  %v7238_v13 = vld [vmem:[%s12344_s0 + $0xac] sm:$0xf]  ;;  %v8675_v29 = vld [vmem:[%s12344_s0 + $0x70] sm:$0xf]  ;;  %v1486_v9 = vor.u32 %v1485_v45, %v1482_v26  ;;  %v8692_v45 = vpop.permute.xlu0 %3936 }
  0xe1   :  { %4260 = vrot.lane.b32.xlu0 %v6748_v54, %s7309_s28  ;;  %12495 = vst [vmem:[#allocation15_spill] sm:$0xff] %v8660_v1  ;;  %v6660_v32 = vcombine.low %v7237_v31, %v7238_v13  ;;  %v6751_v54 = vcombine.low %v6344_v55, %v8640_v51  ;;  %v6342_v8 = vld [vmem:[%s12344_s0 + $0x6c] sm:$0xf]  ;;  %12496 = vst [vmem:[#allocation23_spill] sm:$0xff] %v8675_v29  ;;  %v1554_v16 = vrot.slane %v1552_v19, 4  ;;  %v1557_v14 = vrot.slane %v1555_v58, 5 }
  0xe2   :  { %v1561_v48 = vshll.u32 %v8640_v51, 16  ;;  %v8678_v59 = vrot.slane %v1510_v63, 4  ;;  %v1565_v31 = vshrl.u32 %v8640_v51, 16  ;;  %v1528_v55 = vshrl.u32 %v6342_v8, 16  ;;  %v6348_v63 = vld [vmem:[%s12344_s0 + $0x90] sm:$0xf] }
  0xe3   :  { %4266 = vrot.lane.b32.xlu1 %v6751_v54, %s7309_s28  ;;  %v1531_v13 = vshll.u32 %v6342_v8, 16  ;;  %v8684_v53 = vsel %vm5144_vm6, %v6661_v27, %v8491_v12  ;;  %v1537_v35 = vshll.u32 %v8675_v29, 16  ;;  %v1541_v26 = vshrl.u32 %v8675_v29, 16  ;;  %v7240_v54 = vld [vmem:[%s12344_s0 + $0xe8] sm:$0xf] }
  0xe4   :  { %12497 = vst [vmem:[#allocation24_spill] sm:$0xff] %v8684_v53  ;;  %v6750_v19 = vcombine.low %v6342_v8, %v8675_v29  ;;  %v8696_v58 = vsel %vm5144_vm6, %v6660_v32, %v8538_v22  ;;  %v1530_v12 = vrot.slane %v1528_v55, 4  ;;  %v8702_v53 = vld [vmem:[%s12344_s0 + $0x94] sm:$0xf]  ;;  %v8704_v8 = vpop.permute.xlu1 %3942  ;;  %v8706_v2 = vrot.slane %v1486_v9, 4  ;;  %v8744_v60 = vpop.permute.xlu0 %3940 }
  0xe5   :  { %12498 = vst [vmem:[#allocation25_spill] sm:$0xff] %v8696_v58  ;;  %v1533_v27 = vrot.slane %v1531_v13, 5  ;;  %12499 = vst [vmem:[#allocation26_spill] sm:$0xff] %v8702_v53  ;;  %v1558_v30 = vor.u32 %v1557_v14, %v1554_v16  ;;  %v8708_v49 = vrot.slane %v1561_v48, 5  ;;  %v1600_v22 = vshrl.u32 %v6348_v63, 16 }
  0xe6   :  { %12500 = vst [vmem:[#allocation27_spill] sm:$0xff] %v8706_v2  ;;  %4264 = vrot.lane.b32.xlu0 %v6750_v19, %s7309_s28  ;;  %v8711_v32 = vrot.slane %v1565_v31, 4  ;;  %v7239_v13 = vld [vmem:[%s12344_s0 + $0xe4] sm:$0xf]  ;;  %v1603_v51 = vshll.u32 %v6348_v63, 16  ;;  %v8720_v14 = vrot.slane %v1537_v35, 5  ;;  %v6753_v55 = vcombine.low %v6348_v63, %v8702_v53 }
  0xe7   :  { %12501 = vst [vmem:[#allocation28_spill] sm:$0xff] %v8708_v49  ;;  %v6663_v9 = vcombine.low %v7239_v13, %v7240_v54  ;;  %v8722_v48 = vrot.slane %v1541_v26, 4  ;;  %v7241_v16 = vld [vmem:[%s12344_s0 + $0xd8] sm:$0xf]  ;;  %v7242_v31 = vld [vmem:[%s12344_s0 + $0xdc] sm:$0xf]  ;;  %v1534_v26 = vor.u32 %v1533_v27, %v1530_v12 }
  0xe8   :  { %12502 = vst [vmem:[#allocation29_spill] sm:$0xff] %v8711_v32  ;;  %12503 = vst [vmem:[#allocation30_spill] sm:$0xff] %v8720_v14  ;;  %v6662_v19 = vcombine.low %v7241_v16, %v7242_v31  ;;  %v6346_v54 = vld [vmem:[%s12344_s0 + $0x84] sm:$0xf]  ;;  %v8737_v35 = vld [vmem:[%s12344_s0 + $0x88] sm:$0xf]  ;;  %4270 = vrot.lane.b32.xlu1 %v6753_v55, %s7309_s28 }
  0xe9   :  { %12504 = vst [vmem:[#allocation31_spill] sm:$0xff] %v8722_v48  ;;  %12505 = vst [vmem:[#allocation32_spill] sm:$0xff] %v8737_v35  ;;  %v1602_v13 = vrot.slane %v1600_v22, 4  ;;  %v1605_v29 = vrot.slane %v1603_v51, 5  ;;  %v1609_v58 = vshll.u32 %v8702_v53, 16  ;;  %v8740_v5 = vrot.slane %v1558_v30, 4  ;;  %v8756_v22 = vpop.permute.xlu1 %3946 }
  0xea   :  { %v1613_v16 = vshrl.u32 %v8702_v53, 16  ;;  %v1576_v63 = vshrl.u32 %v6346_v54, 16  ;;  %v1579_v31 = vshll.u32 %v6346_v54, 16  ;;  %v8748_v48 = vsel %vm5144_vm6, %v6663_v9, %v8545_v46  ;;  %v6352_v30 = vld [vmem:[%s12344_s0 + $0xa8] sm:$0xf]  ;;  %v8802_v53 = vpop.permute.xlu0 %3944 }
  0xeb   :  { %12506 = vst [vmem:[#allocation33_spill] sm:$0xff] %v8740_v5  ;;  %12507 = vst [vmem:[#allocation34_spill] sm:$0xff] %v8748_v48  ;;  %v1585_v12 = vshll.u32 %v8737_v35, 16  ;;  %v1589_v51 = vshrl.u32 %v8737_v35, 16  ;;  %v6752_v27 = vcombine.low %v6346_v54, %v8737_v35  ;;  %v8760_v55 = vsel %vm5144_vm6, %v6662_v19, %v8587_v36  ;;  %v8766_v48 = vld [vmem:[%s12344_s0 + $0xac] sm:$0xf] }
  0xec   :  { %12508 = vst [vmem:[#allocation35_spill] sm:$0xff] %v8760_v55  ;;  %v1578_v46 = vrot.slane %v1576_v63, 4  ;;  %v1581_v9 = vrot.slane %v1579_v31, 5  ;;  %12509 = vst [vmem:[#allocation36_spill] sm:$0xff] %v8766_v48  ;;  %v8768_v54 = vrot.slane %v1534_v26, 4  ;;  %v1606_v18 = vor.u32 %v1605_v29, %v1602_v13 }
  0xed   :  { %v8770_v32 = vrot.slane %v1609_v58, 5  ;;  %4268 = vrot.lane.b32.xlu0 %v6752_v27, %s7309_s28  ;;  %v1648_v5 = vshrl.u32 %v6352_v30, 16  ;;  %v8773_v49 = vrot.slane %v1613_v16, 4  ;;  %v7243_v19 = vld [vmem:[%s12344_s0 + $0xfc] sm:$0xf]  ;;  %v1651_v31 = vshll.u32 %v6352_v30, 16 }
  0xee   :  { %12510 = vst [vmem:[#allocation37_spill] sm:$0xff] %v8768_v54  ;;  %v7244_v63 = vld [vmem:[%s12344_s0 + $0x100] sm:$0xf]  ;;  %v8782_v29 = vrot.slane %v1585_v12, 5  ;;  %v8784_v58 = vrot.slane %v1589_v51, 4  ;;  %v6755_v36 = vcombine.low %v6352_v30, %v8766_v48  ;;  %v1582_v51 = vor.u32 %v1581_v9, %v1578_v46 }
  0xef   :  { %12511 = vst [vmem:[#allocation38_spill] sm:$0xff] %v8770_v32  ;;  %12512 = vst [vmem:[#allocation39_spill] sm:$0xff] %v8773_v49  ;;  %v6665_v26 = vcombine.low %v7243_v19, %v7244_v63  ;;  %v7245_v13 = vld [vmem:[%s12344_s0 + $0xf0] sm:$0xf]  ;;  %v7246_v16 = vld [vmem:[%s12344_s0 + $0xf4] sm:$0xf] }
  0xf0   :  { %12513 = vst [vmem:[#allocation40_spill] sm:$0xff] %v8782_v29  ;;  %12514 = vst [vmem:[#allocation41_spill] sm:$0xff] %v8784_v58  ;;  %v6664_v27 = vcombine.low %v7245_v13, %v7246_v16  ;;  %v6350_v19 = vld [vmem:[%s12344_s0 + $0x9c] sm:$0xf]  ;;  %v8799_v12 = vld [vmem:[%s12344_s0 + $0xa0] sm:$0xf]  ;;  %4274 = vrot.lane.b32.xlu1 %v6755_v36, %s7309_s28  ;;  %v8808_v58 = vpop.permute.xlu1 %3950 }
  0xf1   :  { %12515 = vst [vmem:[#allocation42_spill] sm:$0xff] %v8799_v12  ;;  %v1650_v63 = vrot.slane %v1648_v5, 4  ;;  %v1653_v14 = vrot.slane %v1651_v31, 5  ;;  %v1657_v35 = vshll.u32 %v8766_v48, 16  ;;  %v8804_v55 = vrot.slane %v1606_v18, 4 }
  0xf2   :  { %v1661_v30 = vshrl.u32 %v8766_v48, 16  ;;  %v1624_v13 = vshrl.u32 %v6350_v19, 16  ;;  %v1627_v16 = vshll.u32 %v6350_v19, 16  ;;  %v8812_v29 = vsel %vm5144_vm6, %v6665_v26, %v8597_v11  ;;  %v6356_v18 = vld [vmem:[%s12344_s0 + $0xc0] sm:$0xf] }
  0xf3   :  { %12516 = vst [vmem:[#allocation43_spill] sm:$0xff] %v8804_v55  ;;  %12517 = vst [vmem:[#allocation44_spill] sm:$0xff] %v8812_v29  ;;  %v1633_v5 = vshll.u32 %v8799_v12, 16  ;;  %v1637_v46 = vshrl.u32 %v8799_v12, 16  ;;  %v6754_v9 = vcombine.low %v6350_v19, %v8799_v12  ;;  %v8822_v36 = vsel %vm5144_vm6, %v6664_v27, %v8642_v34  ;;  %v8828_v11 = vld [vmem:[%s12344_s0 + $0xc4] sm:$0xf] }
  0xf4   :  { %12518 = vst [vmem:[#allocation45_spill] sm:$0xff] %v8822_v36  ;;  %v1626_v49 = vrot.slane %v1624_v13, 4  ;;  %v1629_v55 = vrot.slane %v1627_v16, 5  ;;  %12519 = vst [vmem:[#allocation46_spill] sm:$0xff] %v8828_v11  ;;  %v8830_v26 = vrot.slane %v1582_v51, 4  ;;  %v1654_v19 = vor.u32 %v1653_v14, %v1650_v63 }
  0xf5   :  { %v8832_v29 = vrot.slane %v1657_v35, 5  ;;  %4272 = vrot.lane.b32.xlu0 %v6754_v9, %s7309_s28  ;;  %v1696_v32 = vshrl.u32 %v6356_v18, 16  ;;  %v8835_v54 = vrot.slane %v1661_v30, 4  ;;  %v7247_v27 = vld [vmem:[%s12344_s0 + $0x114] sm:$0xf]  ;;  %v1699_v16 = vshll.u32 %v6356_v18, 16  ;;  %v8866_v36 = vpop.permute.xlu1 %3954 }
  0xf6   :  { %12520 = vst [vmem:[#allocation47_spill] sm:$0xff] %v8830_v26  ;;  %v7248_v13 = vld [vmem:[%s12344_s0 + $0x118] sm:$0xf]  ;;  %v8844_v14 = vrot.slane %v1633_v5, 5  ;;  %v8846_v35 = vrot.slane %v1637_v46, 4  ;;  %v6757_v34 = vcombine.low %v6356_v18, %v8828_v11  ;;  %v8863_v46 = vpop.permute.xlu0 %3948  ;;  %v1705_v48 = vshll.u32 %v8828_v11, 16 }
  0xf7   :  { %12521 = vst [vmem:[#allocation48_spill] sm:$0xff] %v8832_v29  ;;  %12522 = vst [vmem:[#allocation49_spill] sm:$0xff] %v8835_v54  ;;  %v6667_v51 = vcombine.low %v7247_v27, %v7248_v13  ;;  %v7249_v63 = vld [vmem:[%s12344_s0 + $0x108] sm:$0xf]  ;;  %v7250_v30 = vld [vmem:[%s12344_s0 + $0x10c] sm:$0xf]  ;;  %v1630_v13 = vor.u32 %v1629_v55, %v1626_v49 }
  0xf8   :  { %12523 = vst [vmem:[#allocation50_spill] sm:$0xff] %v8844_v14  ;;  %12524 = vst [vmem:[#allocation51_spill] sm:$0xff] %v8846_v35  ;;  %v6666_v9 = vcombine.low %v7249_v63, %v7250_v30  ;;  %v6354_v27 = vld [vmem:[%s12344_s0 + $0xb4] sm:$0xf]  ;;  %v8861_v5 = vld [vmem:[%s12344_s0 + $0xb8] sm:$0xf]  ;;  %4278 = vrot.lane.b32.xlu1 %v6757_v34, %s7309_s28 }
  0xf9   :  { %12525 = vst [vmem:[#allocation52_spill] sm:$0xff] %v8861_v5  ;;  %v1698_v31 = vrot.slane %v1696_v32, 4  ;;  %v1701_v12 = vrot.slane %v1699_v16, 5  ;;  %v8868_v63 = vrot.slane %v1654_v19, 4  ;;  %v1709_v18 = vshrl.u32 %v8828_v11, 16 }
  0xfa   :  { %v1672_v30 = vshrl.u32 %v6354_v27, 16  ;;  %v1675_v35 = vshll.u32 %v6354_v27, 16  ;;  %v8874_v14 = vsel %vm5144_vm6, %v6667_v51, %v8648_v20  ;;  %v1681_v49 = vshll.u32 %v8861_v5, 16  ;;  %v6360_v19 = vld [vmem:[%s12344_s0 + $0xf0] sm:$0xf] }
  0xfb   :  { %12526 = vst [vmem:[#allocation53_spill] sm:$0xff] %v8868_v63  ;;  %12527 = vst [vmem:[#allocation54_spill] sm:$0xff] %v8874_v14  ;;  %v1685_v32 = vshrl.u32 %v8861_v5, 16  ;;  %v6756_v55 = vcombine.low %v6354_v27, %v8861_v5  ;;  %v8884_v16 = vsel %vm5144_vm6, %v6666_v9, %v8692_v45  ;;  %v8890_v20 = vld [vmem:[%s12344_s0 + $0xf4] sm:$0xf]  ;;  %v8892_v51 = vrot.slane %v1630_v13, 4 }
  0xfc   :  { %12528 = vst [vmem:[#allocation55_spill] sm:$0xff] %v8884_v16  ;;  %v1674_v54 = vrot.slane %v1672_v30, 4  ;;  %v1677_v63 = vrot.slane %v1675_v35, 5  ;;  %12529 = vst [vmem:[#allocation56_spill] sm:$0xff] %v8890_v20  ;;  %v1702_v27 = vor.u32 %v1701_v12, %v1698_v31  ;;  %v8894_v14 = vrot.slane %v1705_v48, 5  ;;  %v8906_v12 = vpop.permute.xlu0 %3952 }
  0xfd   :  { %12530 = vst [vmem:[#allocation57_spill] sm:$0xff] %v8892_v51  ;;  %4276 = vrot.lane.b32.xlu0 %v6756_v55, %s7309_s28  ;;  %v1744_v29 = vshrl.u32 %v6360_v19, 16  ;;  %v8897_v26 = vrot.slane %v1709_v18, 4  ;;  %v7251_v35 = vld [vmem:[%s12344_s0 + $0x12c] sm:$0xf]  ;;  %v1747_v30 = vshll.u32 %v6360_v19, 16  ;;  %v6759_v34 = vcombine.low %v6360_v19, %v8890_v20 }
  0xfe   :  { %12531 = vst [vmem:[#allocation58_spill] sm:$0xff] %v8894_v14  ;;  %v7252_v9 = vld [vmem:[%s12344_s0 + $0x130] sm:$0xf]  ;;  %v8908_v48 = vrot.slane %v1681_v49, 5  ;;  %v8910_v31 = vrot.slane %v1685_v32, 4  ;;  %v8927_v32 = vpop.permute.xlu1 %3958  ;;  %v1753_v16 = vshll.u32 %v8890_v20, 16 }
  0xff   :  { %12532 = vst [vmem:[#allocation59_spill] sm:$0xff] %v8897_v26  ;;  %v6669_v13 = vcombine.low %v7251_v35, %v7252_v9  ;;  %v7253_v18 = vld [vmem:[%s12344_s0 + $0x120] sm:$0xf]  ;;  %v7254_v55 = vld [vmem:[%s12344_s0 + $0x124] sm:$0xf]  ;;  %v1678_v9 = vor.u32 %v1677_v63, %v1674_v54  ;;  %v1746_v5 = vrot.slane %v1744_v29, 4  ;;  %4282 = vrot.lane.b32.xlu1 %v6759_v34, %s7309_s28 }
 0x100   :  { %12533 = vst [vmem:[#allocation60_spill] sm:$0xff] %v8908_v48  ;;  %12534 = vst [vmem:[#allocation61_spill] sm:$0xff] %v8910_v31  ;;  %v6668_v45 = vcombine.low %v7253_v18, %v7254_v55  ;;  %v6358_v35 = vld [vmem:[%s12344_s0 + $0xe4] sm:$0xf]  ;;  %v8925_v49 = vld [vmem:[%s12344_s0 + $0xe8] sm:$0xf] }
 0x101   :  { %12535 = vst [vmem:[#allocation62_spill] sm:$0xff] %v8925_v49  ;;  %v1749_v11 = vrot.slane %v1747_v30, 5  ;;  %v8930_v31 = vrot.slane %v1702_v27, 4  ;;  %v1757_v19 = vshrl.u32 %v8890_v20, 16  ;;  %v1720_v18 = vshrl.u32 %v6358_v35, 16 }
 0x102   :  { %v1723_v55 = vshll.u32 %v6358_v35, 16  ;;  %v8936_v48 = vsel %vm5144_vm6, %v6669_v13, %v8704_v8  ;;  %v1729_v26 = vshll.u32 %v8925_v49, 16  ;;  %v1733_v54 = vshrl.u32 %v8925_v49, 16  ;;  %v6364_v63 = vld [vmem:[%s12344_s0 + $0x108] sm:$0xf] }
 0x103   :  { %12536 = vst [vmem:[#allocation63_spill] sm:$0xff] %v8930_v31  ;;  %12537 = vst [vmem:[#allocation64_spill] sm:$0xff] %v8936_v48  ;;  %v6758_v29 = vcombine.low %v6358_v35, %v8925_v49  ;;  %v8946_v27 = vsel %vm5144_vm6, %v6668_v45, %v8744_v60  ;;  %v1722_v30 = vrot.slane %v1720_v18, 4  ;;  %v8952_v8 = vld [vmem:[%s12344_s0 + $0x10c] sm:$0xf]  ;;  %v8954_v13 = vrot.slane %v1678_v9, 4  ;;  %v8959_v51 = vpop.permute.xlu0 %3956 }
 0x104   :  { %12538 = vst [vmem:[#allocation65_spill] sm:$0xff] %v8946_v27  ;;  %v1725_v31 = vrot.slane %v1723_v55, 5  ;;  %12539 = vst [vmem:[#allocation66_spill] sm:$0xff] %v8952_v8  ;;  %v1750_v35 = vor.u32 %v1749_v11, %v1746_v5  ;;  %v8956_v48 = vrot.slane %v1753_v16, 5  ;;  %v1792_v14 = vshrl.u32 %v6364_v63, 16  ;;  %v8970_v16 = vpop.permute.xlu1 %4058 }
 0x105   :  { %12540 = vst [vmem:[#allocation67_spill] sm:$0xff] %v8954_v13  ;;  %4280 = vrot.lane.b32.xlu0 %v6758_v29, %s7309_s28  ;;  %v8961_v60 = vrot.slane %v1757_v19, 4  ;;  %v7255_v18 = vld [vmem:[%s12344_s0 + $0x144] sm:$0xf]  ;;  %v7256_v9 = vld [vmem:[%s12344_s0 + $0x148] sm:$0xf]  ;;  %v6761_v49 = vcombine.low %v6364_v63, %v8952_v8 }
 0x106   :  { %12541 = vst [vmem:[#allocation68_spill] sm:$0xff] %v8956_v48  ;;  %v6671_v11 = vcombine.low %v7255_v18, %v7256_v9  ;;  %v1795_v5 = vshll.u32 %v6364_v63, 16  ;;  %v8972_v55 = vrot.slane %v1729_v26, 5  ;;  %v8974_v29 = vrot.slane %v1733_v54, 4  ;;  %v7257_v19 = vld [vmem:[%s12344_s0 + $0x138] sm:$0xf] }
 0x107   :  { %12542 = vst [vmem:[#allocation69_spill] sm:$0xff] %v8961_v60  ;;  %v7258_v45 = vld [vmem:[%s12344_s0 + $0x13c] sm:$0xf]  ;;  %v8989_v26 = vld [vmem:[%s12344_s0 + $0x100] sm:$0xf]  ;;  %v1726_v54 = vor.u32 %v1725_v31, %v1722_v30  ;;  %v1794_v9 = vrot.slane %v1792_v14, 4  ;;  %4286 = vrot.lane.b32.xlu1 %v6761_v49, %s7309_s28 }
 0x108   :  { %12543 = vst [vmem:[#allocation70_spill] sm:$0xff] %v8972_v55  ;;  %12544 = vst [vmem:[#allocation71_spill] sm:$0xff] %v8974_v29  ;;  %v6670_v34 = vcombine.low %v7257_v19, %v7258_v45  ;;  %v6362_v18 = vld [vmem:[%s12344_s0 + $0xfc] sm:$0xf]  ;;  %v1797_v20 = vrot.slane %v1795_v5, 5  ;;  %v1801_v27 = vshll.u32 %v8952_v8, 16  ;;  %v8996_v55 = vpop.permute.xlu0 %4056  ;;  %v9000_v60 = vsel %vm5144_vm6, %v6671_v11, %v8756_v22  ;;  %v9008_v5 = vpop.permute.xlu1 %4062 }
 0x109   :  { %12545 = vst [vmem:[#allocation72_spill] sm:$0xff] %v8989_v26  ;;  %v8992_v29 = vrot.slane %v1750_v35, 4  ;;  %v1805_v45 = vshrl.u32 %v8952_v8, 16  ;;  %v1768_v63 = vshrl.u32 %v6362_v18, 16  ;;  %v1771_v19 = vshll.u32 %v6362_v18, 16  ;;  %12547 = vst [vmem:[#allocation74_spill] sm:$0xff] %v9000_v60 }
 0x10a   :  { %v1777_v31 = vshll.u32 %v8989_v26, 16  ;;  %v1781_v14 = vshrl.u32 %v8989_v26, 16  ;;  %v6760_v30 = vcombine.low %v6362_v18, %v8989_v26  ;;  %v6368_v35 = vld [vmem:[%s12344_s0 + $0x120] sm:$0xf]  ;;  %v9012_v49 = vsel %vm5144_vm6, %v6670_v34, %v8802_v53  ;;  %v9018_v60 = vld [vmem:[%s12344_s0 + $0x124] sm:$0xf] }
 0x10b   :  { %12546 = vst [vmem:[#allocation73_spill] sm:$0xff] %v8992_v29  ;;  %12548 = vst [vmem:[#allocation75_spill] sm:$0xff] %v9012_v49  ;;  %v1770_v22 = vrot.slane %v1768_v63, 4  ;;  %v1773_v11 = vrot.slane %v1771_v19, 5  ;;  %v9020_v18 = vrot.slane %v1726_v54, 4  ;;  %v1798_v48 = vor.u32 %v1797_v20, %v1794_v9 }
 0x10c   :  { %12549 = vst [vmem:[#allocation76_spill] sm:$0xff] %v9018_v60  ;;  %v9022_v13 = vrot.slane %v1801_v27, 5  ;;  %4284 = vrot.lane.b32.xlu0 %v6760_v30, %s7309_s28  ;;  %v1840_v1 = vshrl.u32 %v6368_v35, 16  ;;  %v9025_v2 = vrot.slane %v1805_v45, 4  ;;  %v7259_v34 = vld [vmem:[%s12344_s0 + $0x15c] sm:$0xf]  ;;  %v9034_v20 = vpop.permute.xlu0 %4060  ;;  %v6763_v53 = vcombine.low %v6368_v35, %v9018_v60 }
 0x10d   :  { %12550 = vst [vmem:[#allocation77_spill] sm:$0xff] %v9020_v18  ;;  %v7260_v63 = vld [vmem:[%s12344_s0 + $0x160] sm:$0xf]  ;;  %v1843_v19 = vshll.u32 %v6368_v35, 16  ;;  %v9036_v27 = vrot.slane %v1777_v31, 5  ;;  %v9038_v9 = vrot.slane %v1781_v14, 4  ;;  %v9055_v14 = vpop.permute.xlu1 %4066 }
 0x10e   :  { %12551 = vst [vmem:[#allocation78_spill] sm:$0xff] %v9022_v13  ;;  %12552 = vst [vmem:[#allocation79_spill] sm:$0xff] %v9025_v2  ;;  %v6673_v54 = vcombine.low %v7259_v34, %v7260_v63  ;;  %v7261_v45 = vld [vmem:[%s12344_s0 + $0x150] sm:$0xf]  ;;  %v7262_v30 = vld [vmem:[%s12344_s0 + $0x154] sm:$0xf]  ;;  %v1774_v63 = vor.u32 %v1773_v11, %v1770_v22  ;;  %4290 = vrot.lane.b32.xlu1 %v6763_v53, %s7309_s28 }
 0x10f   :  { %12553 = vst [vmem:[#allocation80_spill] sm:$0xff] %v9036_v27  ;;  %12554 = vst [vmem:[#allocation81_spill] sm:$0xff] %v9038_v9  ;;  %v6672_v29 = vcombine.low %v7261_v45, %v7262_v30  ;;  %v6366_v34 = vld [vmem:[%s12344_s0 + $0x114] sm:$0xf]  ;;  %v9053_v31 = vld [vmem:[%s12344_s0 + $0x118] sm:$0xf] }
 0x110   :  { %12555 = vst [vmem:[#allocation82_spill] sm:$0xff] %v9053_v31  ;;  %v1842_v8 = vrot.slane %v1840_v1, 4  ;;  %v1845_v26 = vrot.slane %v1843_v19, 5  ;;  %v1849_v49 = vshll.u32 %v9018_v60, 16  ;;  %v9058_v9 = vrot.slane %v1798_v48, 4  ;;  %v9072_v11 = vpop.permute.xlu0 %4064 }
 0x111   :  { %v1853_v35 = vshrl.u32 %v9018_v60, 16  ;;  %v1816_v45 = vshrl.u32 %v6366_v34, 16  ;;  %v1819_v30 = vshll.u32 %v6366_v34, 16  ;;  %v9064_v27 = vsel %vm5144_vm6, %v6673_v54, %v8808_v58  ;;  %v6372_v48 = vld [vmem:[%s12344_s0 + $0x138] sm:$0xf] }
 0x112   :  { %12556 = vst [vmem:[#allocation83_spill] sm:$0xff] %v9058_v9  ;;  %12557 = vst [vmem:[#allocation84_spill] sm:$0xff] %v9064_v27  ;;  %v1825_v2 = vshll.u32 %v9053_v31, 16  ;;  %v1829_v22 = vshrl.u32 %v9053_v31, 16  ;;  %v6762_v1 = vcombine.low %v6366_v34, %v9053_v31  ;;  %v9076_v53 = vsel %vm5144_vm6, %v6672_v29, %v8863_v46  ;;  %v9082_v27 = vld [vmem:[%s12344_s0 + $0x13c] sm:$0xf]  ;;  %v9084_v34 = vpop.permute.xlu1 %4070 }
 0x113   :  { %12558 = vst [vmem:[#allocation85_spill] sm:$0xff] %v9076_v53  ;;  %v1818_v58 = vrot.slane %v1816_v45, 4  ;;  %v1821_v54 = vrot.slane %v1819_v30, 5  ;;  %12559 = vst [vmem:[#allocation86_spill] sm:$0xff] %v9082_v27  ;;  %v9086_v9 = vrot.slane %v1774_v63, 4  ;;  %v1846_v13 = vor.u32 %v1845_v26, %v1842_v8 }
 0x114   :  { %v9088_v18 = vrot.slane %v1849_v49, 5  ;;  %4288 = vrot.lane.b32.xlu0 %v6762_v1, %s7309_s28  ;;  %v1888_v46 = vshrl.u32 %v6372_v48, 16  ;;  %v9091_v29 = vrot.slane %v1853_v35, 4  ;;  %v7263_v30 = vld [vmem:[%s12344_s0 + $0x174] sm:$0xf]  ;;  %v1891_v60 = vshll.u32 %v6372_v48, 16 }
 0x115   :  { %12560 = vst [vmem:[#allocation87_spill] sm:$0xff] %v9086_v9  ;;  %v7264_v19 = vld [vmem:[%s12344_s0 + $0x178] sm:$0xf]  ;;  %v9100_v8 = vrot.slane %v1825_v2, 5  ;;  %v9102_v26 = vrot.slane %v1829_v22, 4  ;;  %v6765_v45 = vcombine.low %v6372_v48, %v9082_v27  ;;  %v9119_v22 = vpop.permute.xlu0 %4068  ;;  %v1901_v48 = vshrl.u32 %v9082_v27, 16 }
 0x116   :  { %12561 = vst [vmem:[#allocation88_spill] sm:$0xff] %v9088_v18  ;;  %12562 = vst [vmem:[#allocation89_spill] sm:$0xff] %v9091_v29  ;;  %v6675_v63 = vcombine.low %v7263_v30, %v7264_v19  ;;  %v7265_v49 = vld [vmem:[%s12344_s0 + $0x168] sm:$0xf]  ;;  %v7266_v35 = vld [vmem:[%s12344_s0 + $0x16c] sm:$0xf]  ;;  %v1822_v30 = vor.u32 %v1821_v54, %v1818_v58 }
 0x117   :  { %12563 = vst [vmem:[#allocation90_spill] sm:$0xff] %v9100_v8  ;;  %12564 = vst [vmem:[#allocation91_spill] sm:$0xff] %v9102_v26  ;;  %v6674_v1 = vcombine.low %v7265_v49, %v7266_v35  ;;  %v6370_v19 = vld [vmem:[%s12344_s0 + $0x12c] sm:$0xf]  ;;  %v9117_v2 = vld [vmem:[%s12344_s0 + $0x130] sm:$0xf]  ;;  %v9122_v8 = vpop.permute.xlu1 %4074  ;;  %4294 = vrot.lane.b32.xlu1 %v6765_v45, %s7309_s28 }
 0x118   :  { %12565 = vst [vmem:[#allocation92_spill] sm:$0xff] %v9117_v2  ;;  %v1890_v31 = vrot.slane %v1888_v46, 4  ;;  %v1893_v53 = vrot.slane %v1891_v60, 5  ;;  %v1897_v26 = vshll.u32 %v9082_v27, 16  ;;  %12566 = vst [vmem:[#allocation93_spill] sm:$0xff] %v9122_v8  ;;  %v9124_v49 = vrot.slane %v1846_v13, 4 }
 0x119   :  { %v1864_v35 = vshrl.u32 %v6370_v19, 16  ;;  %v1867_v29 = vshll.u32 %v6370_v19, 16  ;;  %v9130_v18 = vsel %vm5144_vm6, %v6675_v63, %v8866_v36  ;;  %v1873_v58 = vshll.u32 %v9117_v2, 16  ;;  %v6376_v13 = vld [vmem:[%s12344_s0 + $0x150] sm:$0xf]  ;;  %v9148_v63 = vpop.permute.xlu0 %4072 }
 0x11a   :  { %12567 = vst [vmem:[#allocation94_spill] sm:$0xff] %v9124_v49  ;;  %12568 = vst [vmem:[#allocation95_spill] sm:$0xff] %v9130_v18  ;;  %v1877_v60 = vshrl.u32 %v9117_v2, 16  ;;  %v6764_v54 = vcombine.low %v6370_v19, %v9117_v2  ;;  %v9140_v46 = vsel %vm5144_vm6, %v6674_v1, %v8906_v12  ;;  %v9146_v36 = vld [vmem:[%s12344_s0 + $0x154] sm:$0xf]  ;;  %v9150_v19 = vrot.slane %v1822_v30, 4 }
 0x11b   :  { %12569 = vst [vmem:[#allocation96_spill] sm:$0xff] %v9140_v46  ;;  %v1866_v49 = vrot.slane %v1864_v35, 4  ;;  %v1869_v9 = vrot.slane %v1867_v29, 5  ;;  %12570 = vst [vmem:[#allocation97_spill] sm:$0xff] %v9146_v36  ;;  %v1894_v18 = vor.u32 %v1893_v53, %v1890_v31  ;;  %v9152_v8 = vrot.slane %v1897_v26, 5  ;;  %v9155_v1 = vpop.permute.xlu1 %4078 }
 0x11c   :  { %12571 = vst [vmem:[#allocation98_spill] sm:$0xff] %v9150_v19  ;;  %4292 = vrot.lane.b32.xlu0 %v6764_v54, %s7309_s28  ;;  %v1936_v12 = vshrl.u32 %v6376_v13, 16  ;;  %12573 = vst [vmem:[#allocation100_spill] sm:$0xff] %v9155_v1  ;;  %v9157_v45 = vrot.slane %v1901_v48, 4  ;;  %v7267_v29 = vld [vmem:[%s12344_s0 + $0x18c] sm:$0xf] }
 0x11d   :  { %12572 = vst [vmem:[#allocation99_spill] sm:$0xff] %v9152_v8  ;;  %v7268_v35 = vld [vmem:[%s12344_s0 + $0x190] sm:$0xf]  ;;  %v7269_v31 = vld [vmem:[%s12344_s0 + $0x180] sm:$0xf]  ;;  %v1939_v48 = vshll.u32 %v6376_v13, 16  ;;  %v1870_v8 = vor.u32 %v1869_v9, %v1866_v49  ;;  %v9186_v1 = vpop.permute.xlu0 %4076 }
 0x11e   :  { %12574 = vst [vmem:[#allocation101_spill] sm:$0xff] %v9157_v45  ;;  %v6677_v30 = vcombine.low %v7267_v29, %v7268_v35  ;;  %v7270_v53 = vld [vmem:[%s12344_s0 + $0x184] sm:$0xf]  ;;  %v9174_v27 = vrot.slane %v1873_v58, 5  ;;  %v9176_v46 = vrot.slane %v1877_v60, 4  ;;  %v6767_v35 = vcombine.low %v6376_v13, %v9146_v36 }
 0x11f   :  { %v6676_v26 = vcombine.low %v7269_v31, %v7270_v53  ;;  %v6374_v54 = vld [vmem:[%s12344_s0 + $0x144] sm:$0xf]  ;;  %v9183_v45 = vld [vmem:[%s12344_s0 + $0x148] sm:$0xf]  ;;  %v1938_v31 = vrot.slane %v1936_v12, 4  ;;  %v1941_v53 = vrot.slane %v1939_v48, 5  ;;  %v9192_v2 = vpop.permute.xlu1 %4082 }
 0x120   :  { %12575 = vst [vmem:[#allocation102_spill] sm:$0xff] %v9174_v27  ;;  %12576 = vst [vmem:[#allocation103_spill] sm:$0xff] %v9176_v46  ;;  %v1945_v19 = vshll.u32 %v9146_v36, 16  ;;  %v9188_v58 = vrot.slane %v1894_v18, 4  ;;  %v1949_v60 = vshrl.u32 %v9146_v36, 16  ;;  %4298 = vrot.lane.b32.xlu1 %v6767_v35, %s7309_s28  ;;  %v1912_v29 = vshrl.u32 %v6374_v54, 16 }
 0x121   :  { %12577 = vst [vmem:[#allocation104_spill] sm:$0xff] %v9183_v45  ;;  %v1915_v13 = vshll.u32 %v6374_v54, 16  ;;  %v9196_v46 = vsel %vm5144_vm6, %v6677_v30, %v8927_v32  ;;  %v9200_v9 = vsel %vm5144_vm6, %v6676_v26, %v8959_v51  ;;  %v1921_v49 = vshll.u32 %v9183_v45, 16  ;;  %v6380_v12 = vld [vmem:[%s12344_s0 + $0x168] sm:$0xf] }
 0x122   :  { %12578 = vst [vmem:[#allocation105_spill] sm:$0xff] %v9188_v58  ;;  %12579 = vst [vmem:[#allocation106_spill] sm:$0xff] %v9196_v46  ;;  %v6766_v18 = vcombine.low %v6374_v54, %v9183_v45  ;;  %v1914_v35 = vrot.slane %v1912_v29, 4  ;;  %v1925_v58 = vshrl.u32 %v9183_v45, 16  ;;  %v9212_v32 = vld [vmem:[%s12344_s0 + $0x16c] sm:$0xf]  ;;  %v1942_v30 = vor.u32 %v1941_v53, %v1938_v31 }
 0x123   :  { %12580 = vst [vmem:[#allocation107_spill] sm:$0xff] %v9200_v9  ;;  %v1917_v27 = vrot.slane %v1915_v13, 5  ;;  %12581 = vst [vmem:[#allocation108_spill] sm:$0xff] %v9212_v32  ;;  %v9214_v51 = vrot.slane %v1870_v8, 4  ;;  %v9216_v26 = vrot.slane %v1945_v19, 5  ;;  %v1984_v54 = vshrl.u32 %v6380_v12, 16  ;;  %v9219_v9 = vpop.permute.xlu0 %4080  ;;  %v9226_v46 = vpop.permute.xlu1 %4086 }
 0x124   :  { %4296 = vrot.lane.b32.xlu0 %v6766_v18, %s7309_s28  ;;  %v9221_v48 = vrot.slane %v1949_v60, 4  ;;  %vm5241_vm7 = vcmask 64512   ;;  %v1987_v13 = vshll.u32 %v6380_v12, 16  ;;  %v6378_v36 = vld [vmem:[%s12344_s0 + $0x15c] sm:$0xf]  ;;  %v9228_v8 = vrot.slane %v1921_v49, 5 }
 0x125   :  { %12582 = vst [vmem:[#allocation109_spill] sm:$0xff] %v9214_v51  ;;  %12583 = vst [vmem:[#allocation110_spill] sm:$0xff] %v9216_v26  ;;  %v1918_v29 = vor.u32 %v1917_v27, %v1914_v35  ;;  %v6769_v31 = vcombine.low %v6380_v12, %v9212_v32  ;;  %v9235_v53 = vld [vmem:[%s12344_s0 + $0x160] sm:$0xf]  ;;  %v1960_v27 = vshrl.u32 %v6378_v36, 16  ;;  %v9237_v60 = vrot.slane %v1925_v58, 4 }
 0x126   :  { %12584 = vst [vmem:[#allocation111_spill] sm:$0xff] %v9221_v48  ;;  %12585 = vst [vmem:[#allocation112_spill] sm:$0xff] %v9228_v8  ;;  %v1986_v18 = vrot.slane %v1984_v54, 4  ;;  %v1989_v35 = vrot.slane %v1987_v13, 5  ;;  %v1993_v48 = vshll.u32 %v9212_v32, 16  ;;  %v9240_v26 = vrot.slane %v1942_v30, 4 }
 0x127   :  { %12586 = vst [vmem:[#allocation113_spill] sm:$0xff] %v9235_v53  ;;  %12587 = vst [vmem:[#allocation114_spill] sm:$0xff] %v9237_v60  ;;  %v9245_v49 = vsel %vm5241_vm7, %v8400_v15, %v8970_v16  ;;  %v1997_v12 = vshrl.u32 %v9212_v32, 16  ;;  %4302 = vrot.lane.b32.xlu1 %v6769_v31, %s7309_s28  ;;  %v1963_v19 = vshll.u32 %v6378_v36, 16  ;;  %v9249_v45 = vpop.permute.xlu0 %4084  ;;  %v9251_v58 = vrot.slane %v1918_v29, 4  ;;  %v9268_v29 = vpop.permute.xlu1 %4090 }
 0x128   :  { %12588 = vst [vmem:[#allocation115_spill] sm:$0xff] %v9240_v26  ;;  %12589 = vst [vmem:[#allocation116_spill] sm:$0xff] %v9245_v49  ;;  %v9256_v54 = vsel %vm5241_vm7, %v8330_v39, %v8996_v55  ;;  %v6768_v13 = vcombine.low %v6378_v36, %v9235_v53  ;;  %v6384_v15 = vld [vmem:[%s12344_s0 + $0x180] sm:$0xf]  ;;  %v9266_v16 = vld [vmem:[%s12344_s0 + $0x184] sm:$0xf]  ;;  %v1990_v30 = vor.u32 %v1989_v35, %v1986_v18 }
 0x129   :  { %12590 = vst [vmem:[#allocation117_spill] sm:$0xff] %v9251_v58  ;;  %12591 = vst [vmem:[#allocation118_spill] sm:$0xff] %v9256_v54  ;;  %v1962_v31 = vrot.slane %v1960_v27, 4  ;;  %v1965_v49 = vrot.slane %v1963_v19, 5  ;;  %v1969_v39 = vshll.u32 %v9235_v53, 16  ;;  %v1973_v55 = vshrl.u32 %v9235_v53, 16 }
 0x12a   :  { %12592 = vst [vmem:[#allocation119_spill] sm:$0xff] %v9266_v16  ;;  %v9272_v32 = vrot.slane %v1993_v48, 5  ;;  %4300 = vrot.lane.b32.xlu0 %v6768_v13, %s7309_s28  ;;  %v2032_v36 = vshrl.u32 %v6384_v15, 16  ;;  %v2035_v54 = vshll.u32 %v6384_v15, 16  ;;  %v9275_v60 = vrot.slane %v1997_v12, 4 }
 0x12b   :  { %v9281_v27 = vsel %vm5241_vm7, %v8396_v47, %v9008_v5  ;;  %v6771_v19 = vcombine.low %v6384_v15, %v9266_v16  ;;  %v6382_v48 = vld [vmem:[%s12344_s0 + $0x174] sm:$0xf]  ;;  %v9287_v18 = vpop.permute.xlu0 %4088  ;;  %v2041_v12 = vshll.u32 %v9266_v16, 16  ;;  %v9293_v58 = vld [vmem:[%s12344_s0 + $0x178] sm:$0xf]  ;;  %v9295_v47 = vpop.permute.xlu1 %4094  ;;  %v1966_v5 = vor.u32 %v1965_v49, %v1962_v31 }
 0x12c   :  { %12593 = vst [vmem:[#allocation120_spill] sm:$0xff] %v9272_v32  ;;  %12594 = vst [vmem:[#allocation121_spill] sm:$0xff] %v9275_v60  ;;  %v2034_v35 = vrot.slane %v2032_v36, 4  ;;  %v2037_v13 = vrot.slane %v2035_v54, 5  ;;  %v2008_v53 = vshrl.u32 %v6382_v48, 16  ;;  %v9297_v15 = vrot.slane %v1969_v39, 5 }
 0x12d   :  { %12595 = vst [vmem:[#allocation122_spill] sm:$0xff] %v9281_v27  ;;  %12596 = vst [vmem:[#allocation123_spill] sm:$0xff] %v9293_v58  ;;  %v9299_v27 = vrot.slane %v1973_v55, 4  ;;  %4306 = vrot.lane.b32.xlu1 %v6771_v19, %s7309_s28  ;;  %v2011_v60 = vshll.u32 %v6382_v48, 16  ;;  %v9302_v36 = vrot.slane %v1990_v30, 4  ;;  %v9307_v54 = vsel %vm5241_vm7, %v8326_v37, %v9034_v20 }
 0x12e   :  { %12598 = vst [vmem:[#allocation125_spill] sm:$0xff] %v9307_v54  ;;  %v2045_v32 = vshrl.u32 %v9266_v16, 16  ;;  %v2010_v8 = vrot.slane %v2008_v53, 4  ;;  %v2038_v26 = vor.u32 %v2037_v13, %v2034_v35  ;;  %v2017_v49 = vshll.u32 %v9293_v58, 16  ;;  %v6388_v39 = vld [vmem:[%s12344_s0 + $0x198] sm:$0xf] }
 0x12f   :  { %12597 = vst [vmem:[#allocation124_spill] sm:$0xff] %v9299_v27  ;;  %v2013_v51 = vrot.slane %v2011_v60, 5  ;;  %v6770_v31 = vcombine.low %v6382_v48, %v9293_v58  ;;  %v9318_v30 = vld [vmem:[%s12344_s0 + $0x19c] sm:$0xf]  ;;  %v9320_v37 = vpop.permute.xlu0 %4092  ;;  %v9322_v20 = vrot.slane %v2041_v12, 5  ;;  %v2021_v60 = vshrl.u32 %v9293_v58, 16  ;;  %v9326_v19 = vpop.permute.xlu1 %4098 }
 0x130   :  { %12599 = vst [vmem:[#allocation126_spill] sm:$0xff] %v9318_v30  ;;  %v2080_v55 = vshrl.u32 %v6388_v39, 16  ;;  %v9328_v48 = vrot.slane %v1966_v5, 4  ;;  %v2083_v13 = vshll.u32 %v6388_v39, 16  ;;  %v2089_v54 = vshll.u32 %v9318_v30, 16 }
 0x131   :  { %12600 = vst [vmem:[#allocation127_spill] sm:$0xff] %v9322_v20  ;;  %v2014_v35 = vor.u32 %v2013_v51, %v2010_v8  ;;  %4304 = vrot.lane.b32.xlu0 %v6770_v31, %s7309_s28  ;;  %v6386_v12 = vld [vmem:[%s12344_s0 + $0x18c] sm:$0xf]  ;;  %v9335_v20 = vrot.slane %v2045_v32, 4  ;;  %v2093_v53 = vshrl.u32 %v9318_v30, 16  ;;  %v6773_v16 = vcombine.low %v6388_v39, %v9318_v30 }
 0x132   :  { %12601 = vst [vmem:[#allocation128_spill] sm:$0xff] %v9328_v48  ;;  %v9342_v5 = vld [vmem:[%s12344_s0 + $0x190] sm:$0xf]  ;;  %v2056_v51 = vshrl.u32 %v6386_v12, 16  ;;  %v9344_v8 = vrot.slane %v2038_v26, 4  ;;  %v9346_v31 = vrot.slane %v2017_v49, 5  ;;  %v9352_v32 = vsel %vm5241_vm7, %v8410_v44, %v9055_v14 }
 0x133   :  { %12602 = vst [vmem:[#allocation129_spill] sm:$0xff] %v9335_v20  ;;  %12603 = vst [vmem:[#allocation130_spill] sm:$0xff] %v9342_v5  ;;  %v9354_v20 = vpop.permute.xlu0 %4096  ;;  %v9356_v39 = vrot.slane %v2021_v60, 4  ;;  %v9361_v48 = vsel %vm5241_vm7, %v8422_v24, %v9072_v11  ;;  %v9363_v26 = vrot.slane %v2080_v55, 4  ;;  %v2085_v49 = vrot.slane %v2083_v13, 5  ;;  %4310 = vrot.lane.b32.xlu1 %v6773_v16, %s7309_s28 }
 0x134   :  { %12604 = vst [vmem:[#allocation131_spill] sm:$0xff] %v9352_v32  ;;  %12606 = vst [vmem:[#allocation133_spill] sm:$0xff] %v9361_v48  ;;  %v9366_v27 = vrot.slane %v2014_v35, 4  ;;  %v9368_v58 = vrot.slane %v2089_v54, 5  ;;  %v6772_v14 = vcombine.low %v6386_v12, %v9342_v5  ;;  %v9375_v60 = vld [vmem:[%s12344_s0 + $0x20] sm:$0x1]  ;;  %v9382_v35 = vpop.permute.xlu1 %4102  ;;  %v1366_v13 = vor.u32 %v8460_v57, %v8443_v38 }
 0x135   :  { %12605 = vst [vmem:[#allocation132_spill] sm:$0xff] %v9356_v39  ;;  %v9377_v24 = vrot.slane %v2093_v53, 4  ;;  %v9379_v11 = vrot.slane %v2056_v51, 4  ;;  %v2059_v55 = vshll.u32 %v6386_v12, 16  ;;  %v2065_v16 = vshll.u32 %v9342_v5, 16 }
 0x136   :  { %12607 = vst [vmem:[#allocation134_spill] sm:$0xff] %v9368_v58  ;;  %v2069_v54 = vshrl.u32 %v9342_v5, 16  ;;  %4308 = vrot.lane.b32.xlu0 %v6772_v14, %s7309_s28  ;;  %v7271_v44 = vld [vmem:[%s12344_s0 + $0x1c] sm:$0xf]  ;;  %v12609_v51 = vshrl.u32 %v8435_v23, 16  ;;  %v2086_v48 = vor.u32 %v2085_v49, %v9363_v26  ;;  %v1379_v32 = vshll.u32 %v9375_v60, 16 }
 0x137   :  { %12608 = vst [vmem:[#allocation135_spill] sm:$0xff] %v9377_v24  ;;  %v1369_v53 = vshll.u32 %v7271_v44, 16  ;;  %v9396_v12 = vld [vmem:[%s12344_s0 + $0x14] sm:$0x1]  ;;  %v1342_v38 = vor.u32 %v8495_v50, %v8493_v43  ;;  %v9403_v57 = vpop.permute.xlu0 %4100  ;;  %v1367_v44 = vrot.slane %v1366_v13, 4  ;;  %v12610_v58 = vshrl.u32 %v8455_v3, 16 }
 0x138   :  { %v1375_v30 = vrot.slane %v12609_v51, 4  ;;  %v7272_v51 = vld [vmem:[%s12344_s0 + $0x10] sm:$0xf]  ;;  %v9410_v26 = vrot.slane %v2059_v55, 5  ;;  %v9412_v49 = vrot.slane %v2065_v16, 5  ;;  %v9417_v43 = vsel %vm5241_vm7, %v8426_v0, %v9084_v34 }
 0x139   :  { %v1371_v24 = vrot.slane %v1369_v53, 5  ;;  %v1345_v23 = vshll.u32 %v7272_v51, 16  ;;  %v1351_v39 = vrot.slane %v12610_v58, 4  ;;  %12611 = vst [vmem:[#allocation136_spill] sm:$0xff] %v9417_v43  ;;  %v1355_v50 = vshll.u32 %v9396_v12, 16 }
 0x13a   :  { %v9423_v13 = vld [vmem:[%s12344_s0 + $0x38] sm:$0x1]  ;;  %v1381_v51 = vrot.slane %v1379_v32, 5  ;;  %v1343_v14 = vrot.slane %v1342_v38, 4  ;;  %v9428_v55 = vld [vmem:[%s12344_s0 + $0x2c] sm:$0x1]  ;;  %v9435_v0 = vsel %vm5241_vm7, %v8430_v6, %v9119_v22  ;;  %v1396_v6 = vsel %vm7360_vm2, %v8575_v61, %v8540_v52 }
 0x13b   :  { %v1376_v53 = vor.u32 %v1375_v30, %v1371_v24  ;;  %v1347_v58 = vrot.slane %v1345_v23, 5  ;;  %12612 = vst [vmem:[#allocation137_spill] sm:$0xff] %v9428_v55  ;;  %v9430_v16 = vrot.slane %v2069_v54, 4  ;;  %12613 = vst [vmem:[#allocation138_spill] sm:$0xff] %v9435_v0  ;;  %v1372_v5 = vsel %vm7360_vm2, %v1367_v44, %v1371_v24  ;;  %v9443_v30 = vpop.permute.xlu1 %4106  ;;  %v9455_v24 = vpop.permute.xlu0 %4104 }
 0x13c   :  { %v1420_v23 = vsel %vm7360_vm2, %v8548_v40, %v8518_v4  ;;  %v1357_v43 = vrot.slane %v1355_v50, 5  ;;  %v1424_v54 = vor.u32 %v8520_v41, %v8518_v4  ;;  %v1427_v3 = vshll.u32 %v9423_v13, 16  ;;  %v9464_v50 = vld [vmem:[%s12344_s0 + $0x50] sm:$0x1] }
 0x13d   :  { %v1377_v32 = vrot.slane %v1376_v53, 4  ;;  %v1352_v38 = vor.u32 %v1351_v39, %v1347_v58  ;;  %v1400_v22 = vor.u32 %v8542_v7, %v8540_v52  ;;  %v1403_v40 = vshll.u32 %v9428_v55, 16 }
 0x13e   :  { %v1348_v4 = vsel %vm7360_vm2, %v1343_v14, %v1347_v58  ;;  %v1425_v44 = vrot.slane %v1424_v54, 4  ;;  %v1429_v53 = vrot.slane %v1427_v3, 5  ;;  %v9466_v0 = vrot.slane %v2086_v48, 4 }
 0x13f   :  { %v1382_v39 = vsel %vm7360_vm2, %v1377_v32, %v1381_v51  ;;  %v1353_v41 = vrot.slane %v1352_v38, 4  ;;  %v1401_v52 = vrot.slane %v1400_v22, 4  ;;  %v1405_v7 = vrot.slane %v1403_v40, 5 }
 0x140   :  { %v6775_v61 = vcombine.low %v1372_v5, %v1382_v39  ;;  %v1468_v14 = vsel %vm7360_vm2, %v8617_v56, %v8584_v25  ;;  %v1472_v51 = vor.u32 %v8589_v17, %v8584_v25  ;;  %v9479_v5 = vld [vmem:[%s12344_s0 + $0x44] sm:$0x1]  ;;  %v1430_v48 = vsel %vm7360_vm2, %v1425_v44, %v1429_v53  ;;  %v9490_v25 = vld [vmem:[%s12344_s0 + $0x68] sm:$0x1]  ;;  %v9492_v17 = vpop.permute.xlu1 %4110  ;;  %v12615_v44 = vld [vmem:[#allocation27_spill] sm:$0xff] }
 0x141   :  { %v1358_v55 = vsel %vm7360_vm2, %v1353_v41, %v1357_v43  ;;  %v1406_v43 = vsel %vm7360_vm2, %v1401_v52, %v1405_v7  ;;  %v1475_v56 = vshll.u32 %v9464_v50, 16  ;;  %v6777_v58 = vcombine.low %v1420_v23, %v1430_v48  ;;  %v12616_v53 = vld [vmem:[#allocation15_spill] sm:$0xff]  ;;  %v9531_v7 = vld [vmem:[%s12344_s0 + $0x80] sm:$0x1] }
 0x142   :  { %4410 = vrot.lane.b32.xlu1 %v6775_v61, %s7310_s23  ;;  %v6774_v3 = vcombine.low %v1348_v4, %v1358_v55  ;;  %v6776_v32 = vcombine.low %v1396_v6, %v1406_v43  ;;  %v1473_v38 = vrot.slane %v1472_v51, 4  ;;  %v1444_v55 = vsel %vm7360_vm2, %v8644_v42, %v8599_v28  ;;  %v9504_v4 = vpop.permute.xlu0 %4108 }
 0x143   :  { %v2062_v54 = vor.u32 %v9410_v26, %v9379_v11  ;;  %v1477_v22 = vrot.slane %v1475_v56, 5  ;;  %v1448_v40 = vor.u32 %v8601_v33, %v8599_v28  ;;  %v1451_v39 = vshll.u32 %v9479_v5, 16  ;;  %v9517_v28 = vld [vmem:[%s12344_s0 + $0x5c] sm:$0x1] }
 0x144   :  { %4408 = vrot.lane.b32.xlu0 %v6774_v3, %s7310_s23  ;;  %v1516_v42 = vsel %vm7360_vm2, %v8678_v59, %v8646_v62  ;;  %v1520_v11 = vor.u32 %v8650_v21, %v8646_v62  ;;  %v1523_v26 = vshll.u32 %v9490_v25, 16  ;;  %v1492_v59 = vsel %vm7360_vm2, %v12615_v44, %v8658_v10  ;;  %v9545_v43 = vpop.permute.xlu1 %4114  ;;  %v12629_v3 = vld [vmem:[#allocation43_spill] sm:$0xff] }
 0x145   :  { %v1478_v33 = vsel %vm7360_vm2, %v1473_v38, %v1477_v22  ;;  %v1449_v6 = vrot.slane %v1448_v40, 4  ;;  %v1453_v41 = vrot.slane %v1451_v39, 5  ;;  %v1496_v52 = vor.u32 %v12616_v53, %v8658_v10  ;;  %v9543_v10 = vld [vmem:[%s12344_s0 + $0x74] sm:$0x1]  ;;  %v12618_v22 = vld [vmem:[#allocation33_spill] sm:$0xff] }
 0x146   :  { %4414 = vrot.lane.b32.xlu1 %v6777_v58, %s7310_s23  ;;  %v6779_v62 = vcombine.low %v1468_v14, %v1478_v33  ;;  %v1521_v21 = vrot.slane %v1520_v11, 4  ;;  %v1525_v61 = vrot.slane %v1523_v26, 5  ;;  %v9533_v51 = vrot.slane %v2062_v54, 4  ;;  %v12617_v54 = vld [vmem:[#allocation28_spill] sm:$0xff]  ;;  %v12619_v11 = vld [vmem:[#allocation29_spill] sm:$0xff] }
 0x147   :  { %v1454_v48 = vsel %vm7360_vm2, %v1449_v6, %v1453_v41  ;;  %v1499_v14 = vshll.u32 %v9517_v28, 16  ;;  %v1497_v38 = vrot.slane %v1496_v52, 4  ;;  %v1568_v26 = vor.u32 %v12619_v11, %v12617_v54  ;;  %v9557_v6 = vpop.permute.xlu0 %4112  ;;  %v12621_v41 = vld [vmem:[#allocation16_spill] sm:$0xff] }
 0x148   :  { %4412 = vrot.lane.b32.xlu0 %v6776_v32, %s7310_s23  ;;  %v6778_v56 = vcombine.low %v1444_v55, %v1454_v48  ;;  %v1526_v58 = vsel %vm7360_vm2, %v1521_v21, %v1525_v61  ;;  %v1564_v32 = vsel %vm7360_vm2, %v12618_v22, %v12617_v54  ;;  %v1571_v33 = vshll.u32 %v9531_v7, 16  ;;  %v12620_v55 = vld [vmem:[#allocation93_spill] sm:$0xff]  ;;  %v12622_v21 = vld [vmem:[#allocation30_spill] sm:$0xff]  ;;  %v9574_v48 = vld [vmem:[%s12344_s0 + $0x98] sm:$0x1] }
 0x149   :  { %v6781_v40 = vcombine.low %v1516_v42, %v1526_v58  ;;  %v1501_v39 = vrot.slane %v1499_v14, 5  ;;  %v9562_v44 = vsel %vm5241_vm7, %v12621_v41, %v12620_v55  ;;  %v12623_v61 = vld [vmem:[#allocation37_spill] sm:$0xff]  ;;  %v12624_v42 = vld [vmem:[#allocation31_spill] sm:$0xff]  ;;  %v1547_v52 = vshll.u32 %v9543_v10, 16  ;;  %12625 = vst [vmem:[#allocation5_spill] sm:$0xff] %v9574_v48 }
 0x14a   :  { %4418 = vrot.lane.b32.xlu1 %v6779_v62, %s7310_s23  ;;  %v1540_v53 = vsel %vm7360_vm2, %v12623_v61, %v12622_v21  ;;  %v1544_v62 = vor.u32 %v12624_v42, %v12622_v21  ;;  %v12626_v14 = vld [vmem:[#allocation17_spill] sm:$0xff]  ;;  %v1569_v22 = vrot.slane %v1568_v26, 4  ;;  %v1573_v11 = vrot.slane %v1571_v33, 5  ;;  %v9587_v55 = vld [vmem:[%s12344_s0 + $0x8c] sm:$0x1]  ;;  %v12631_v33 = vld [vmem:[#allocation40_spill] sm:$0xff] }
 0x14b   :  { %v9579_v58 = vsel %vm5241_vm7, %v12626_v14, %v9148_v63  ;;  %v1502_v54 = vsel %vm7360_vm2, %v1497_v38, %v1501_v39  ;;  %12627 = vst [vmem:[#allocation27_spill] sm:$0xff] %v9587_v55  ;;  %v1549_v61 = vrot.slane %v1547_v52, 5  ;;  %v12628_v42 = vld [vmem:[#allocation38_spill] sm:$0xff]  ;;  %v12630_v38 = vld [vmem:[#allocation39_spill] sm:$0xff]  ;;  %v1619_v26 = vshll.u32 %v9574_v48, 16 }
 0x14c   :  { %4416 = vrot.lane.b32.xlu0 %v6778_v56, %s7310_s23  ;;  %v6780_v41 = vcombine.low %v1492_v59, %v1502_v54  ;;  %v1545_v21 = vrot.slane %v1544_v62, 4  ;;  %v1612_v63 = vsel %vm7360_vm2, %v12629_v3, %v12628_v42  ;;  %v1574_v56 = vsel %vm7360_vm2, %v1569_v22, %v1573_v11  ;;  %v12632_v14 = vld [vmem:[#allocation47_spill] sm:$0xff]  ;;  %v9603_v62 = vpop.permute.xlu1 %4118  ;;  %v12643_v48 = vld [vmem:[#allocation50_spill] sm:$0xff] }
 0x14d   :  { %v1616_v39 = vor.u32 %v12630_v38, %v12628_v42  ;;  %v1588_v59 = vsel %vm7360_vm2, %v12632_v14, %v12631_v33  ;;  %v6783_v52 = vcombine.low %v1564_v32, %v1574_v56  ;;  %v1595_v22 = vshll.u32 %v9587_v55, 16  ;;  %v9613_v11 = vld [vmem:[%s12344_s0 + $0xb0] sm:$0x1]  ;;  %v12634_v42 = vld [vmem:[#allocation100_spill] sm:$0xff]  ;;  %v12635_v38 = vld [vmem:[#allocation18_spill] sm:$0xff] }
 0x14e   :  { %4422 = vrot.lane.b32.xlu1 %v6781_v40, %s7310_s23  ;;  %v1550_v3 = vsel %vm7360_vm2, %v1545_v21, %v1549_v61  ;;  %v12633_v40 = vld [vmem:[#allocation41_spill] sm:$0xff]  ;;  %v9618_v14 = vsel %vm5241_vm7, %v12635_v38, %v12634_v42  ;;  %v1621_v21 = vrot.slane %v1619_v26, 5  ;;  %v12640_v38 = vld [vmem:[#allocation48_spill] sm:$0xff]  ;;  %vm5306_vm8 = vcmask 97280  }
 0x14f   :  { %v1592_v54 = vor.u32 %v12633_v40, %v12631_v33  ;;  %12636 = vst [vmem:[#allocation15_spill] sm:$0xff] %v9618_v14  ;;  %v6782_v32 = vcombine.low %v1540_v53, %v1550_v3  ;;  %v1617_v56 = vrot.slane %v1616_v39, 4  ;;  %v9624_v61 = vld [vmem:[%s12344_s0 + $0xa4] sm:$0x1]  ;;  %v9626_v33 = vpop.permute.xlu0 %4116  ;;  %v12638_v40 = vld [vmem:[#allocation19_spill] sm:$0xff]  ;;  %v1597_v42 = vrot.slane %v1595_v22, 5 }
 0x150   :  { %4420 = vrot.lane.b32.xlu0 %v6780_v41, %s7310_s23  ;;  %12637 = vst [vmem:[#allocation28_spill] sm:$0xff] %v9624_v61  ;;  %v9631_v23 = vsel %vm5241_vm7, %v12638_v40, %v9186_v1  ;;  %v12641_v14 = vld [vmem:[#allocation53_spill] sm:$0xff]  ;;  %v1667_v3 = vshll.u32 %v9613_v11, 16  ;;  %vm5371_vm9 = vcmask 130048   ;;  %vm5436_vm10 = vcmask 162816  }
 0x151   :  { %12639 = vst [vmem:[#allocation33_spill] sm:$0xff] %v9631_v23  ;;  %v1593_v55 = vrot.slane %v1592_v54, 4  ;;  %v1660_v53 = vsel %vm7360_vm2, %v12641_v14, %v12640_v38  ;;  %v1622_v41 = vsel %vm7360_vm2, %v1617_v56, %v1621_v21  ;;  %v12642_v39 = vld [vmem:[#allocation49_spill] sm:$0xff]  ;;  %v12645_v14 = vld [vmem:[#allocation51_spill] sm:$0xff]  ;;  %v1643_v23 = vshll.u32 %v9624_v61, 16  ;;  %v12647_v21 = vld [vmem:[#allocation14_spill] sm:$0xff] }
 0x152   :  { %4426 = vrot.lane.b32.xlu1 %v6783_v52, %s7310_s23  ;;  %v1664_v26 = vor.u32 %v12642_v39, %v12640_v38  ;;  %v12644_v1 = vld [vmem:[#allocation57_spill] sm:$0xff]  ;;  %v6785_v22 = vcombine.low %v1612_v63, %v1622_v41  ;;  %v1640_v52 = vor.u32 %v12645_v14, %v12643_v48  ;;  %v9655_v56 = vld [vmem:[%s12344_s0 + $0xc8] sm:$0x1]  ;;  %v9660_v38 = vsel %vm5241_vm7, %v12647_v21, %v9192_v2  ;;  %v12653_v61 = vld [vmem:[#allocation63_spill] sm:$0xff] }
 0x153   :  { %v1636_v54 = vsel %vm7360_vm2, %v12644_v1, %v12643_v48  ;;  %v1598_v40 = vsel %vm7360_vm2, %v1593_v55, %v1597_v42  ;;  %12646 = vst [vmem:[#allocation29_spill] sm:$0xff] %v9655_v56  ;;  %12648 = vst [vmem:[#allocation93_spill] sm:$0xff] %v9660_v38  ;;  %v1669_v55 = vrot.slane %v1667_v3, 5  ;;  %v9666_v48 = vld [vmem:[%s12344_s0 + $0xbc] sm:$0x1]  ;;  %v9668_v42 = vpop.permute.xlu1 %4250  ;;  %v12650_v39 = vld [vmem:[#allocation21_spill] sm:$0xff] }
 0x154   :  { %4424 = vrot.lane.b32.xlu0 %v6782_v32, %s7310_s23  ;;  %v6784_v63 = vcombine.low %v1588_v59, %v1598_v40  ;;  %v1665_v41 = vrot.slane %v1664_v26, 4  ;;  %12649 = vst [vmem:[#allocation16_spill] sm:$0xff] %v9666_v48  ;;  %v9673_v1 = vsel %vm5241_vm7, %v12650_v39, %v9219_v9  ;;  %v1641_v14 = vrot.slane %v1640_v52, 4  ;;  %v12652_v21 = vld [vmem:[#allocation58_spill] sm:$0xff]  ;;  %v12654_v26 = vld [vmem:[#allocation59_spill] sm:$0xff]  ;;  %v12655_v38 = vld [vmem:[#allocation60_spill] sm:$0xff]  ;;  %v9689_v52 = vpop.permute.xlu0 %4248 }
 0x155   :  { %12651 = vst [vmem:[#allocation30_spill] sm:$0xff] %v9673_v1  ;;  %v1645_v2 = vrot.slane %v1643_v23, 5  ;;  %v1708_v59 = vsel %vm7360_vm2, %v12653_v61, %v12652_v21  ;;  %v1712_v3 = vor.u32 %v12654_v26, %v12652_v21  ;;  %v1715_v40 = vshll.u32 %v9655_v56, 16  ;;  %v12656_v9 = vld [vmem:[#allocation67_spill] sm:$0xff]  ;;  %v12659_v21 = vld [vmem:[#allocation24_spill] sm:$0xff] }
 0x156   :  { %4430 = vrot.lane.b32.xlu1 %v6785_v22, %s7310_s23  ;;  %v1670_v32 = vsel %vm7360_vm2, %v1665_v41, %v1669_v55  ;;  %v1684_v23 = vsel %vm7360_vm2, %v12656_v9, %v12655_v38  ;;  %v12657_v22 = vld [vmem:[#allocation61_spill] sm:$0xff]  ;;  %v1691_v41 = vshll.u32 %v9666_v48, 16  ;;  %v9699_v55 = vld [vmem:[%s12344_s0 + $0xf8] sm:$0x1]  ;;  %v9704_v26 = vsel %vm5241_vm7, %v12659_v21, %v9226_v46  ;;  %v12666_v21 = vld [vmem:[#allocation70_spill] sm:$0xff] }
 0x157   :  { %v6787_v39 = vcombine.low %v1660_v53, %v1670_v32  ;;  %v1646_v61 = vsel %vm7360_vm2, %v1641_v14, %v1645_v2  ;;  %v1688_v1 = vor.u32 %v12657_v22, %v12655_v38  ;;  %12658 = vst [vmem:[#allocation37_spill] sm:$0xff] %v9699_v55  ;;  %v1713_v32 = vrot.slane %v1712_v3, 4  ;;  %v9710_v38 = vld [vmem:[%s12344_s0 + $0xec] sm:$0x1]  ;;  %v12661_v2 = vld [vmem:[#allocation25_spill] sm:$0xff]  ;;  %v12663_v56 = vld [vmem:[#allocation68_spill] sm:$0xff] }
 0x158   :  { %4428 = vrot.lane.b32.xlu0 %v6784_v63, %s7310_s23  ;;  %v6786_v53 = vcombine.low %v1636_v54, %v1646_v61  ;;  %v1717_v14 = vrot.slane %v1715_v40, 5  ;;  %12660 = vst [vmem:[#allocation31_spill] sm:$0xff] %v9710_v38  ;;  %v9715_v9 = vsel %vm5241_vm7, %v12661_v2, %v9249_v45  ;;  %v1693_v48 = vrot.slane %v1691_v41, 5  ;;  %v12664_v46 = vld [vmem:[#allocation73_spill] sm:$0xff]  ;;  %v9731_v41 = vpop.permute.xlu1 %4254 }
 0x159   :  { %12662 = vst [vmem:[#allocation17_spill] sm:$0xff] %v9715_v9  ;;  %v1689_v22 = vrot.slane %v1688_v1, 4  ;;  %v1756_v63 = vsel %vm7360_vm2, %v12664_v46, %v12663_v56  ;;  %v12665_v3 = vld [vmem:[#allocation69_spill] sm:$0xff]  ;;  %v1763_v61 = vshll.u32 %v9699_v55, 16  ;;  %v12678_v55 = vld [vmem:[#allocation80_spill] sm:$0xff]  ;;  %vm5501_vm11 = vcmask 195584  }
 0x15a   :  { %4434 = vrot.lane.b32.xlu1 %v6787_v39, %s7310_s23  ;;  %v1718_v54 = vsel %vm7360_vm2, %v1713_v32, %v1717_v14  ;;  %v1760_v40 = vor.u32 %v12665_v3, %v12663_v56  ;;  %v12667_v45 = vld [vmem:[#allocation77_spill] sm:$0xff]  ;;  %v12668_v39 = vld [vmem:[#allocation71_spill] sm:$0xff]  ;;  %v1739_v32 = vshll.u32 %v9710_v38, 16  ;;  %v12670_v14 = vld [vmem:[#allocation34_spill] sm:$0xff]  ;;  %vm5566_vm12 = vcmask 228352  }
 0x15b   :  { %v1732_v1 = vsel %vm7360_vm2, %v12667_v45, %v12666_v21  ;;  %v6789_v2 = vcombine.low %v1708_v59, %v1718_v54  ;;  %v1694_v46 = vsel %vm7360_vm2, %v1689_v22, %v1693_v48  ;;  %v1736_v9 = vor.u32 %v12668_v39, %v12666_v21  ;;  %v9741_v56 = vld [vmem:[%s12344_s0 + $0x110] sm:$0x1]  ;;  %v9752_v22 = vld [vmem:[%s12344_s0 + $0x104] sm:$0x1]  ;;  %v9754_v21 = vpop.permute.xlu0 %4252 }
 0x15c   :  { %12669 = vst [vmem:[#allocation38_spill] sm:$0xff] %v9741_v56  ;;  %v9746_v3 = vsel %vm5241_vm7, %v12670_v14, %v9268_v29  ;;  %4432 = vrot.lane.b32.xlu0 %v6786_v53, %s7310_s23  ;;  %v6788_v59 = vcombine.low %v1684_v23, %v1694_v46  ;;  %v1761_v54 = vrot.slane %v1760_v40, 4  ;;  %v1765_v48 = vrot.slane %v1763_v61, 5  ;;  %12672 = vst [vmem:[#allocation39_spill] sm:$0xff] %v9752_v22  ;;  %v12673_v45 = vld [vmem:[#allocation35_spill] sm:$0xff]  ;;  %v12675_v14 = vld [vmem:[#allocation78_spill] sm:$0xff] }
 0x15d   :  { %12671 = vst [vmem:[#allocation43_spill] sm:$0xff] %v9746_v3  ;;  %v9759_v39 = vsel %vm5241_vm7, %v12673_v45, %v9287_v18  ;;  %v1737_v38 = vrot.slane %v1736_v9, 4  ;;  %v1741_v29 = vrot.slane %v1739_v32, 5  ;;  %v12676_v3 = vld [vmem:[#allocation83_spill] sm:$0xff]  ;;  %v1811_v46 = vshll.u32 %v9741_v56, 16 }
 0x15e   :  { %12674 = vst [vmem:[#allocation40_spill] sm:$0xff] %v9759_v39  ;;  %v1804_v23 = vsel %vm7360_vm2, %v12676_v3, %v12675_v14  ;;  %4438 = vrot.lane.b32.xlu1 %v6789_v2, %s7310_s23  ;;  %v1766_v53 = vsel %vm7360_vm2, %v1761_v54, %v1765_v48  ;;  %v12677_v40 = vld [vmem:[#allocation79_spill] sm:$0xff]  ;;  %v12680_v3 = vld [vmem:[#allocation81_spill] sm:$0xff]  ;;  %v1787_v39 = vshll.u32 %v9752_v22, 16  ;;  %v6411_v54 = vld [vmem:[%s12344_s0 + $0x128] sm:$0x1] }
 0x15f   :  { %v1808_v61 = vor.u32 %v12677_v40, %v12675_v14  ;;  %v12679_v18 = vld [vmem:[#allocation87_spill] sm:$0xff]  ;;  %v6791_v32 = vcombine.low %v1756_v63, %v1766_v53  ;;  %v1742_v45 = vsel %vm7360_vm2, %v1737_v38, %v1741_v29  ;;  %v1784_v2 = vor.u32 %v12680_v3, %v12678_v55  ;;  %v12681_v48 = vld [vmem:[#allocation44_spill] sm:$0xff]  ;;  %v9792_v38 = vpop.permute.xlu1 %4258  ;;  %v12683_v29 = vld [vmem:[#allocation45_spill] sm:$0xff] }
 0x160   :  { %v1780_v9 = vsel %vm7360_vm2, %v12679_v18, %v12678_v55  ;;  %v9786_v14 = vsel %vm5241_vm7, %v12681_v48, %v9295_v47  ;;  %4436 = vrot.lane.b32.xlu0 %v6788_v59, %s7310_s23  ;;  %v6790_v63 = vcombine.low %v1732_v1, %v1742_v45  ;;  %v1813_v40 = vrot.slane %v1811_v46, 5  ;;  %v6410_v55 = vld [vmem:[%s12344_s0 + $0x11c] sm:$0x1]  ;;  %v12686_v48 = vld [vmem:[#allocation94_spill] sm:$0xff] }
 0x161   :  { %12682 = vst [vmem:[#allocation47_spill] sm:$0xff] %v9786_v14  ;;  %v1809_v53 = vrot.slane %v1808_v61, 4  ;;  %v9797_v18 = vsel %vm5241_vm7, %v12683_v29, %v9320_v37  ;;  %v1785_v3 = vrot.slane %v1784_v2, 4  ;;  %v1789_v56 = vrot.slane %v1787_v39, 5  ;;  %v12685_v47 = vld [vmem:[#allocation88_spill] sm:$0xff]  ;;  %v12687_v61 = vld [vmem:[#allocation89_spill] sm:$0xff]  ;;  %v9812_v39 = vpop.permute.xlu0 %4256 }
 0x162   :  { %12684 = vst [vmem:[#allocation41_spill] sm:$0xff] %v9797_v18  ;;  %v1852_v1 = vsel %vm7360_vm2, %v12686_v48, %v12685_v47  ;;  %4442 = vrot.lane.b32.xlu1 %v6791_v32, %s7310_s23  ;;  %v1856_v46 = vor.u32 %v12687_v61, %v12685_v47  ;;  %v1859_v45 = vshll.u32 %v6411_v54, 16  ;;  %v12688_v22 = vld [vmem:[#allocation90_spill] sm:$0xff]  ;;  %v12690_v32 = vld [vmem:[#allocation91_spill] sm:$0xff]  ;;  %v1835_v18 = vshll.u32 %v6410_v55, 16 }
 0x163   :  { %v1814_v59 = vsel %vm7360_vm2, %v1809_v53, %v1813_v40  ;;  %v12689_v14 = vld [vmem:[#allocation98_spill] sm:$0xff]  ;;  %v1790_v29 = vsel %vm7360_vm2, %v1785_v3, %v1789_v56  ;;  %v1832_v48 = vor.u32 %v12690_v32, %v12688_v22  ;;  %v6413_v53 = vld [vmem:[%s12344_s0 + $0x140] sm:$0x1]  ;;  %v6412_v56 = vld [vmem:[%s12344_s0 + $0x134] sm:$0x1]  ;;  %vm5788_vm13 = vcmask 1041408  }
 0x164   :  { %v1828_v37 = vsel %vm7360_vm2, %v12689_v14, %v12688_v22  ;;  %v6793_v2 = vcombine.low %v1804_v23, %v1814_v59  ;;  %v12691_v54 = vld [vmem:[#allocation54_spill] sm:$0xff]  ;;  %4440 = vrot.lane.b32.xlu0 %v6790_v63, %s7310_s23  ;;  %v6792_v14 = vcombine.low %v1780_v9, %v1790_v29  ;;  %v1857_v23 = vrot.slane %v1856_v46, 4  ;;  %v12692_v22 = vld [vmem:[#allocation55_spill] sm:$0xff]  ;;  %v12695_v32 = vld [vmem:[#allocation105_spill] sm:$0xff] }
 0x165   :  { %v9824_v40 = vsel %vm5241_vm7, %v12691_v54, %v9326_v19  ;;  %v1861_v47 = vrot.slane %v1859_v45, 5  ;;  %v9833_v55 = vsel %vm5241_vm7, %v12692_v22, %v9354_v20  ;;  %v1833_v3 = vrot.slane %v1832_v48, 4  ;;  %v12694_v61 = vld [vmem:[#allocation99_spill] sm:$0xff]  ;;  %v12696_v63 = vld [vmem:[#allocation101_spill] sm:$0xff]  ;;  %v12697_v29 = vld [vmem:[#allocation102_spill] sm:$0xff] }
 0x166   :  { %12693 = vst [vmem:[#allocation100_spill] sm:$0xff] %v9833_v55  ;;  %v1837_v59 = vrot.slane %v1835_v18, 5  ;;  %v1900_v19 = vsel %vm7360_vm2, %v12695_v32, %v12694_v61  ;;  %4446 = vrot.lane.b32.xlu1 %v6793_v2, %s7310_s23  ;;  %v1904_v46 = vor.u32 %v12696_v63, %v12694_v61  ;;  %v1907_v45 = vshll.u32 %v6413_v53, 16  ;;  %v12698_v54 = vld [vmem:[#allocation109_spill] sm:$0xff]  ;;  %v9848_v18 = vpop.permute.xlu1 %4262  ;;  %v12699_v2 = vld [vmem:[#allocation103_spill] sm:$0xff]  ;;  %v12700_v53 = vld [vmem:[#allocation64_spill] sm:$0xff] }
 0x167   :  { %v1862_v9 = vsel %vm7360_vm2, %v1857_v23, %v1861_v47  ;;  %v1876_v20 = vsel %vm7360_vm2, %v12698_v54, %v12697_v29  ;;  %v1880_v32 = vor.u32 %v12699_v2, %v12697_v29  ;;  %v1883_v55 = vshll.u32 %v6412_v56, 16  ;;  %v6415_v23 = vld [vmem:[%s12344_s0 + $0x158] sm:$0x1]  ;;  %v12702_v56 = vld [vmem:[#allocation65_spill] sm:$0xff]  ;;  %v12704_v2 = vld [vmem:[#allocation115_spill] sm:$0xff] }
 0x168   :  { %v6795_v48 = vcombine.low %v1852_v1, %v1862_v9  ;;  %v1838_v22 = vsel %vm7360_vm2, %v1833_v3, %v1837_v59  ;;  %v9860_v47 = vsel %vm5241_vm7, %v12700_v53, %v9382_v35  ;;  %4444 = vrot.lane.b32.xlu0 %v6792_v14, %s7310_s23  ;;  %v1905_v1 = vrot.slane %v1904_v46, 4  ;;  %v6414_v3 = vld [vmem:[%s12344_s0 + $0x14c] sm:$0x1]  ;;  %v9866_v59 = vpop.permute.xlu0 %4260  ;;  %v12705_v46 = vld [vmem:[#allocation111_spill] sm:$0xff]  ;;  %v12706_v53 = vld [vmem:[#allocation112_spill] sm:$0xff] }
 0x169   :  { %12701 = vst [vmem:[#allocation18_spill] sm:$0xff] %v9860_v47  ;;  %v6794_v61 = vcombine.low %v1828_v37, %v1838_v22  ;;  %v1909_v9 = vrot.slane %v1907_v45, 5  ;;  %v9871_v63 = vsel %vm5241_vm7, %v12702_v56, %v9403_v57  ;;  %v1881_v29 = vrot.slane %v1880_v32, 4  ;;  %v12703_v35 = vld [vmem:[#allocation110_spill] sm:$0xff]  ;;  %v12707_v47 = vld [vmem:[#allocation117_spill] sm:$0xff] }
 0x16a   :  { %v1885_v54 = vrot.slane %v1883_v55, 5  ;;  %v1948_v37 = vsel %vm7360_vm2, %v12704_v2, %v12703_v35  ;;  %4450 = vrot.lane.b32.xlu1 %v6795_v48, %s7310_s23  ;;  %v1952_v45 = vor.u32 %v12705_v46, %v12703_v35  ;;  %v1955_v22 = vshll.u32 %v6415_v23, 16  ;;  %v12708_v56 = vld [vmem:[#allocation114_spill] sm:$0xff] }
 0x16b   :  { %v1910_v14 = vsel %vm7360_vm2, %v1905_v1, %v1909_v9  ;;  %v1924_v57 = vsel %vm7360_vm2, %v12707_v47, %v12706_v53  ;;  %v1928_v2 = vor.u32 %v12708_v56, %v12706_v53  ;;  %v1931_v48 = vshll.u32 %v6414_v3, 16  ;;  %v6417_v1 = vld [vmem:[%s12344_s0 + $0x170] sm:$0x1]  ;;  %v12709_v9 = vld [vmem:[#allocation74_spill] sm:$0xff] }
 0x16c   :  { %v6797_v55 = vcombine.low %v1900_v19, %v1910_v14  ;;  %v1886_v32 = vsel %vm7360_vm2, %v1881_v29, %v1885_v54  ;;  %v9896_v23 = vsel %vm5241_vm7, %v12709_v9, %v9443_v30  ;;  %4448 = vrot.lane.b32.xlu0 %v6794_v61, %s7310_s23  ;;  %v1953_v19 = vrot.slane %v1952_v45, 4  ;;  %v9899_v14 = vpop.permute.xlu1 %4266  ;;  %v12710_v29 = vld [vmem:[#allocation75_spill] sm:$0xff]  ;;  %v12711_v54 = vld [vmem:[#allocation84_spill] sm:$0xff]  ;;  %v9923_v56 = vpop.permute.xlu0 %4264 }
 0x16d   :  { %v6796_v47 = vcombine.low %v1876_v20, %v1886_v32  ;;  %v1957_v35 = vrot.slane %v1955_v22, 5  ;;  %v9904_v3 = vsel %vm5241_vm7, %v12710_v29, %v9455_v24  ;;  %v9909_v46 = vsel %vm5241_vm7, %v12711_v54, %v9492_v17  ;;  %v6416_v20 = vld [vmem:[%s12344_s0 + $0x164] sm:$0x1]  ;;  %v12712_v45 = vld [vmem:[#allocation120_spill] sm:$0xff] }
 0x16e   :  { %v1929_v53 = vrot.slane %v1928_v2, 4  ;;  %v1933_v30 = vrot.slane %v1931_v48, 5  ;;  %4454 = vrot.lane.b32.xlu1 %v6797_v55, %s7310_s23  ;;  %v1996_v24 = vsel %vm7360_vm2, %v9302_v36, %v12712_v45  ;;  %v12713_v22 = vld [vmem:[#allocation121_spill] sm:$0xff]  ;;  %v2003_v32 = vshll.u32 %v6417_v1, 16  ;;  %v12714_v55 = vld [vmem:[#allocation128_spill] sm:$0xff] }
 0x16f   :  { %v1958_v61 = vsel %vm7360_vm2, %v1953_v19, %v1957_v35  ;;  %v2000_v17 = vor.u32 %v12713_v22, %v12712_v45  ;;  %v1972_v9 = vsel %vm7360_vm2, %v12714_v55, %v9297_v15  ;;  %v12715_v19 = vld [vmem:[#allocation124_spill] sm:$0xff]  ;;  %v6419_v36 = vld [vmem:[%s12344_s0 + $0x188] sm:$0x1]  ;;  %v1979_v54 = vshll.u32 %v6416_v20, 16 }
 0x170   :  { %v6799_v2 = vcombine.low %v1948_v37, %v1958_v61  ;;  %v1934_v48 = vsel %vm7360_vm2, %v1929_v53, %v1933_v30  ;;  %v1976_v35 = vor.u32 %v12715_v19, %v9297_v15  ;;  %4452 = vrot.lane.b32.xlu0 %v6796_v47, %s7310_s23  ;;  %v2005_v37 = vrot.slane %v2003_v32, 5  ;;  %v6418_v53 = vld [vmem:[%s12344_s0 + $0x17c] sm:$0x1]  ;;  %v12716_v30 = vld [vmem:[#allocation85_spill] sm:$0xff]  ;;  %v12717_v15 = vld [vmem:[#allocation95_spill] sm:$0xff]  ;;  %v9959_v55 = vpop.permute.xlu1 %4270 }
 0x171   :  { %v6798_v1 = vcombine.low %v1924_v57, %v1934_v48  ;;  %v2001_v29 = vrot.slane %v2000_v17, 4  ;;  %v9943_v61 = vsel %vm5241_vm7, %v12716_v30, %v9504_v4  ;;  %v9948_v45 = vsel %vm5241_vm7, %v12717_v15, %v9545_v43  ;;  %v12718_v47 = vld [vmem:[#allocation127_spill] sm:$0xff]  ;;  %v12719_v4 = vld [vmem:[#allocation129_spill] sm:$0xff]  ;;  %v9978_v30 = vpop.permute.xlu0 %4268 }
 0x172   :  { %v1977_v22 = vrot.slane %v1976_v35, 4  ;;  %v2044_v57 = vsel %vm7360_vm2, %v9344_v8, %v12718_v47  ;;  %4458 = vrot.lane.b32.xlu1 %v6799_v2, %s7310_s23  ;;  %v1981_v17 = vrot.slane %v1979_v54, 5  ;;  %v2048_v32 = vor.u32 %v12719_v4, %v12718_v47  ;;  %v12720_v8 = vld [vmem:[#allocation132_spill] sm:$0xff]  ;;  %v6420_v47 = vld [vmem:[%s12344_s0 + $0x194] sm:$0x1] }
 0x173   :  { %v2006_v20 = vsel %vm7360_vm2, %v2001_v29, %v2005_v37  ;;  %v2051_v48 = vshll.u32 %v6419_v36, 16  ;;  %v2020_v19 = vsel %vm7360_vm2, %v9366_v27, %v9346_v31  ;;  %v2024_v35 = vor.u32 %v12720_v8, %v9346_v31  ;;  %v6421_v29 = vld [vmem:[%s12344_s0 + $0x1a0] sm:$0x1]  ;;  %v12721_v37 = vld [vmem:[#allocation96_spill] sm:$0xff]  ;;  %v6422_v8 = vld [vmem:[%s12344_s0 + $0xc] sm:$0xe] }
 0x174   :  { %v6801_v43 = vcombine.low %v1996_v24, %v2006_v20  ;;  %v2027_v2 = vshll.u32 %v6418_v53, 16  ;;  %v9973_v36 = vsel %vm5241_vm7, %v12721_v37, %v9557_v6  ;;  %4456 = vrot.lane.b32.xlu0 %v6798_v1, %s7310_s23  ;;  %v1982_v24 = vsel %vm7360_vm2, %v1977_v22, %v1981_v17  ;;  %v12722_v1 = vld [vmem:[#allocation134_spill] sm:$0xff]  ;;  %v12723_v20 = vld [vmem:[#allocation135_spill] sm:$0xff]  ;;  %v6423_v4 = vld [vmem:[%s12344_s0 + $0x18] sm:$0xe]  ;;  %v10007_v37 = vpop.permute.xlu1 %4274 }
 0x175   :  { %v2049_v54 = vrot.slane %v2048_v32, 4  ;;  %v2053_v27 = vrot.slane %v2051_v48, 5  ;;  %v6800_v31 = vcombine.low %v1972_v9, %v1982_v24  ;;  %v2025_v53 = vrot.slane %v2024_v35, 4  ;;  %v12724_v24 = vld [vmem:[#allocation106_spill] sm:$0xff] }
 0x176   :  { %v2029_v15 = vrot.slane %v2027_v2, 5  ;;  %4462 = vrot.lane.b32.xlu1 %v6801_v43, %s7310_s23  ;;  %v2092_v22 = vsel %vm7360_vm2, %v9466_v0, %v12722_v1  ;;  %v2096_v17 = vor.u32 %v12723_v20, %v12722_v1  ;;  %v2099_v9 = vshll.u32 %v6421_v29, 16  ;;  %v10027_v1 = vpop.permute.xlu0 %4272 }
 0x177   :  { %v2054_v6 = vsel %vm7360_vm2, %v2049_v54, %v2053_v27  ;;  %v2068_v43 = vsel %vm7360_vm2, %v9533_v51, %v9412_v49  ;;  %v2072_v0 = vor.u32 %v9430_v16, %v9412_v49  ;;  %v2075_v29 = vshll.u32 %v6420_v47, 16  ;;  %v12725_v51 = vld [vmem:[#allocation107_spill] sm:$0xff] }
 0x178   :  { %v6803_v32 = vcombine.low %v2044_v57, %v2054_v6  ;;  %v2030_v48 = vsel %vm7360_vm2, %v2025_v53, %v2029_v15  ;;  %4460 = vrot.lane.b32.xlu0 %v6800_v31, %s7310_s23  ;;  %v2097_v2 = vrot.slane %v2096_v17, 4  ;;  %v2101_v57 = vrot.slane %v2099_v9, 5  ;;  %v12726_v53 = vld [vmem:[#allocation7_spill] sm:$0xff] }
 0x179   :  { %v6802_v35 = vcombine.low %v2020_v19, %v2030_v48  ;;  %v10012_v54 = vsel %vm5241_vm7, %v12724_v24, %v9603_v62  ;;  %v10017_v49 = vsel %vm5241_vm7, %v12725_v51, %v9626_v33  ;;  %v2073_v16 = vrot.slane %v2072_v0, 4  ;;  %v6425_v62 = vld [vmem:[%s12344_s0 + $0x30] sm:$0xe]  ;;  %v12728_v33 = vld [vmem:[#allocation116_spill] sm:$0xff] }
 0x17a   :  { %v6455_v27 = vrot.slane %v6423_v4, 9  ;;  %4466 = vrot.lane.b32.xlu1 %v6803_v32, %s7310_s23  ;;  %v2102_v19 = vsel %vm7360_vm2, %v2097_v2, %v2101_v57  ;;  %v2077_v31 = vrot.slane %v2075_v29, 5  ;;  %v12727_v15 = vrot.slane %v12726_v53, 5  ;;  %v12731_v48 = vld [vmem:[#allocation8_spill] sm:$0xff]  ;;  %v6424_v2 = vld [vmem:[%s12344_s0 + $0x24] sm:$0xe] }
 0x17b   :  { %v6454_v6 = vrot.slane %v6422_v8, 9  ;;  %v10032_v20 = vsel %vm5306_vm8, %v12728_v33, %v9668_v42  ;;  %v6805_v17 = vcombine.low %v2092_v22, %v2102_v19  ;;  %v12732_v0 = vrot.slane %v12731_v48, 5  ;;  %v12733_v57 = vld [vmem:[#allocation118_spill] sm:$0xff] }
 0x17c   :  { %v2242_v47 = vrot.slane %v12727_v15, 4  ;;  %v12729_v9 = vmov %v12727_v15  ;;  %v10046_v29 = vsel %vm5306_vm8, %v12733_v57, %v9689_v52  ;;  %v12734_v42 = vld [vmem:[#allocation122_spill] sm:$0xff]  ;;  %4464 = vrot.lane.b32.xlu0 %v6802_v35, %s7310_s23  ;;  %v2078_v24 = vsel %vm7360_vm2, %v2073_v16, %v2077_v31  ;;  %v12738_v31 = vld [vmem:[#allocation9_spill] sm:$0xff] }
 0x17d   :  { %v2241_v32 = vsel %vm7913_vm5, %v6455_v27, %v12729_v9  ;;  %v2235_v8 = vrot.slane %v12732_v0, 4  ;;  %v10051_v22 = vsel %vm5306_vm8, %v12734_v42, %v9731_v41  ;;  %v12735_v51 = vrot.slane %v9375_v60, 5  ;;  %v6427_v16 = vld [vmem:[%s12344_s0 + $0x48] sm:$0xe]  ;;  %v12744_v57 = vld [vmem:[#allocation137_spill] sm:$0xff] }
 0x17e   :  { %v6804_v19 = vcombine.low %v2068_v43, %v2078_v24  ;;  %v12736_v53 = vmov %v12732_v0  ;;  %v12737_v15 = vrot.slane %v9396_v12, 5  ;;  %v6457_v35 = vrot.slane %v6425_v62, 9  ;;  %4470 = vrot.lane.b32.xlu1 %v6805_v17, %s7310_s23  ;;  %v12740_v12 = vld [vmem:[#allocation125_spill] sm:$0xff]  ;;  %v12742_v17 = vld [vmem:[#allocation10_spill] sm:$0xff] }
 0x17f   :  { %v2244_v27 = vsel %vm7913_vm5, %v2242_v47, %v12735_v51  ;;  %v2234_v52 = vsel %vm7913_vm5, %v6454_v6, %v12736_v53  ;;  %v12739_v43 = vrot.slane %v12738_v31, 5  ;;  %v2257_v33 = vrot.slane %v9423_v13, 5  ;;  %v10075_v6 = vpop.permute.xlu1 %4278  ;;  %v6426_v13 = vld [vmem:[%s12344_s0 + $0x3c] sm:$0xe]  ;;  %v10099_v53 = vpop.permute.xlu0 %4276  ;;  %v12746_v31 = vld [vmem:[#allocation11_spill] sm:$0xff] }
 0x180   :  { %v2237_v41 = vsel %vm7913_vm5, %v2235_v8, %v12737_v15  ;;  %v6807_v60 = vcombine.low %v2241_v32, %v2244_v27  ;;  %v6456_v9 = vrot.slane %v6424_v2, 9  ;;  %v10080_v48 = vsel %vm5306_vm8, %v12740_v12, %v9754_v21  ;;  %4468 = vrot.lane.b32.xlu0 %v6804_v19, %s7310_s23 }
 0x181   :  { %v2256_v47 = vrot.slane %v12739_v43, 4  ;;  %v12741_v62 = vmov %v12739_v43  ;;  %v12743_v32 = vrot.slane %v12742_v17, 5  ;;  %v2250_v42 = vrot.slane %v12744_v57, 5  ;;  %v6428_v17 = vld [vmem:[%s12344_s0 + $0x54] sm:$0xe] }
 0x182   :  { %v2255_v0 = vsel %vm7913_vm5, %v6457_v35, %v12741_v62  ;;  %v6806_v2 = vcombine.low %v2234_v52, %v2237_v41  ;;  %v6459_v27 = vrot.slane %v6427_v16, 9  ;;  %v12747_v43 = vrot.slane %v12746_v31, 5  ;;  %v6429_v52 = vld [vmem:[%s12344_s0 + $0x60] sm:$0xe]  ;;  %v12748_v41 = vld [vmem:[#allocation131_spill] sm:$0xff]  ;;  %4570 = vrot.lane.b32.xlu1 %v6807_v60, %s7311_s12  ;;  %v12751_v62 = vld [vmem:[#allocation12_spill] sm:$0xff] }
 0x183   :  { %v2249_v8 = vrot.slane %v12743_v32, 4  ;;  %v2258_v21 = vsel %vm7913_vm5, %v2256_v47, %v2257_v33  ;;  %v12745_v24 = vmov %v12743_v32  ;;  %v2271_v19 = vrot.slane %v9464_v50, 5  ;;  %v12753_v32 = vld [vmem:[#allocation133_spill] sm:$0xff] }
 0x184   :  { %v2248_v51 = vsel %vm7913_vm5, %v6456_v9, %v12745_v24  ;;  %v6809_v15 = vcombine.low %v2255_v0, %v2258_v21  ;;  %v2270_v12 = vrot.slane %v12747_v43, 4  ;;  %v10112_v47 = vsel %vm5306_vm8, %v12748_v41, %v9792_v38  ;;  %4568 = vrot.lane.b32.xlu0 %v6806_v2, %s7311_s12 }
 0x185   :  { %v2251_v35 = vsel %vm7913_vm5, %v2249_v8, %v2250_v42  ;;  %12749 = vst [vmem:[#allocation19_spill] sm:$0xff] %v10112_v47  ;;  %v12750_v16 = vmov %v12747_v43  ;;  %v6458_v9 = vrot.slane %v6426_v13, 9  ;;  %v12752_v50 = vrot.slane %v12751_v62, 5 }
 0x186   :  { %v2269_v33 = vsel %vm7913_vm5, %v6459_v27, %v12750_v16  ;;  %v10127_v38 = vsel %vm5306_vm8, %v12753_v32, %v9812_v39  ;;  %v6808_v8 = vcombine.low %v2248_v51, %v2251_v35  ;;  %v2272_v60 = vsel %vm7913_vm5, %v2270_v12, %v2271_v19  ;;  %v12756_v27 = vld [vmem:[#allocation20_spill] sm:$0xff]  ;;  %v10142_v51 = vpop.permute.xlu1 %4282  ;;  %v12758_v12 = vld [vmem:[#allocation13_spill] sm:$0xff]  ;;  %4574 = vrot.lane.b32.xlu1 %v6809_v15, %s7311_s12 }
 0x187   :  { %v2263_v0 = vrot.slane %v12752_v50, 4  ;;  %12754 = vst [vmem:[#allocation48_spill] sm:$0xff] %v10127_v38  ;;  %v2264_v57 = vrot.slane %v9479_v5, 5  ;;  %v6811_v42 = vcombine.low %v2269_v33, %v2272_v60  ;;  %v12755_v13 = vmov %v12752_v50  ;;  %v6431_v39 = vld [vmem:[%s12344_s0 + $0x78] sm:$0xe] }
 0x188   :  { %v2262_v21 = vsel %vm7913_vm5, %v6458_v9, %v12755_v13  ;;  %v6461_v24 = vrot.slane %v6429_v52, 9  ;;  %v12757_v31 = vrot.slane %v12756_v27, 5  ;;  %v2285_v2 = vrot.slane %v9490_v25, 5  ;;  %v12760_v52 = vld [vmem:[#allocation136_spill] sm:$0xff]  ;;  %v6430_v25 = vld [vmem:[%s12344_s0 + $0x6c] sm:$0xe]  ;;  %4572 = vrot.lane.b32.xlu0 %v6808_v8, %s7311_s12 }
 0x189   :  { %v2265_v5 = vsel %vm7913_vm5, %v2263_v0, %v2264_v57  ;;  %v6460_v35 = vrot.slane %v6428_v17, 9  ;;  %v12759_v19 = vrot.slane %v12758_v12, 5  ;;  %v10152_v16 = vsel %vm5306_vm8, %v12760_v52, %v9848_v18  ;;  %v10163_v0 = vpop.permute.xlu0 %4280  ;;  %v12762_v17 = vld [vmem:[#allocation138_spill] sm:$0xff] }
 0x18a   :  { %v2284_v43 = vrot.slane %v12757_v31, 4  ;;  %v6810_v33 = vcombine.low %v2262_v21, %v2265_v5  ;;  %v12761_v9 = vmov %v12757_v31  ;;  %v2278_v50 = vrot.slane %v9517_v28, 5  ;;  %v12764_v21 = vld [vmem:[#allocation22_spill] sm:$0xff]  ;;  %v6433_v31 = vld [vmem:[%s12344_s0 + $0x90] sm:$0xe]  ;;  %4578 = vrot.lane.b32.xlu1 %v6811_v42, %s7311_s12  ;;  %v12772_v42 = vld [vmem:[#allocation5_spill] sm:$0xff] }
 0x18b   :  { %v2277_v41 = vrot.slane %v12759_v19, 4  ;;  %v2283_v62 = vsel %vm7913_vm5, %v6461_v24, %v12761_v9  ;;  %v10168_v18 = vsel %vm5306_vm8, %v12762_v17, %v9866_v59  ;;  %v12763_v32 = vmov %v12759_v19  ;;  %v6432_v19 = vld [vmem:[%s12344_s0 + $0x84] sm:$0xe]  ;;  %v12770_v17 = vld [vmem:[#allocation26_spill] sm:$0xff] }
 0x18c   :  { %v2286_v15 = vsel %vm7913_vm5, %v2284_v43, %v2285_v2  ;;  %v2276_v60 = vsel %vm7913_vm5, %v6460_v35, %v12763_v32  ;;  %v6463_v28 = vrot.slane %v6431_v39, 9  ;;  %v12765_v24 = vrot.slane %v12764_v21, 5  ;;  %v12767_v2 = vld [vmem:[#allocation23_spill] sm:$0xff]  ;;  %4576 = vrot.lane.b32.xlu0 %v6810_v33, %s7311_s12 }
 0x18d   :  { %v6813_v57 = vcombine.low %v2283_v62, %v2286_v15  ;;  %v2279_v13 = vsel %vm7913_vm5, %v2277_v41, %v2278_v50  ;;  %v2299_v59 = vrot.slane %v9531_v7, 5  ;;  %v6462_v8 = vrot.slane %v6430_v25, 9  ;;  %v10208_v62 = vpop.permute.xlu1 %4286 }
 0x18e   :  { %v2298_v27 = vrot.slane %v12765_v24, 4  ;;  %v6812_v43 = vcombine.low %v2276_v60, %v2279_v13  ;;  %v12766_v5 = vmov %v12765_v24  ;;  %v12768_v35 = vrot.slane %v12767_v2, 5  ;;  %v10225_v24 = vpop.permute.xlu0 %4284  ;;  %v6434_v2 = vld [vmem:[%s12344_s0 + $0x9c] sm:$0xe] }
 0x18f   :  { %v2297_v39 = vsel %vm7913_vm5, %v6463_v28, %v12766_v5  ;;  %v10197_v7 = vsel %vm5306_vm8, %v9562_v44, %v9899_v14  ;;  %v10202_v41 = vsel %vm5306_vm8, %v9579_v58, %v9923_v56  ;;  %v2292_v9 = vrot.slane %v9543_v10, 5  ;;  %v6435_v56 = vld [vmem:[%s12344_s0 + $0xa8] sm:$0xe]  ;;  %v12773_v28 = vld [vmem:[#allocation32_spill] sm:$0xff]  ;;  %4582 = vrot.lane.b32.xlu1 %v6813_v57, %s7311_s12  ;;  %v6437_v57 = vld [vmem:[%s12344_s0 + $0xc0] sm:$0xe] }
 0x190   :  { %v2291_v12 = vrot.slane %v12768_v35, 4  ;;  %v2300_v52 = vsel %vm7913_vm5, %v2298_v27, %v2299_v59  ;;  %v12769_v25 = vmov %v12768_v35  ;;  %v6465_v14 = vrot.slane %v6433_v31, 9  ;;  %v12775_v27 = vld [vmem:[#allocation15_spill] sm:$0xff]  ;;  %v12778_v35 = vld [vmem:[#allocation33_spill] sm:$0xff]  ;;  %4580 = vrot.lane.b32.xlu0 %v6812_v43, %s7311_s12  ;;  %v12786_v43 = vld [vmem:[#allocation30_spill] sm:$0xff] }
 0x191   :  { %v6815_v50 = vcombine.low %v2297_v39, %v2300_v52  ;;  %v2290_v44 = vsel %vm7913_vm5, %v6462_v8, %v12769_v25  ;;  %v12771_v15 = vrot.slane %v12770_v17, 5  ;;  %v2313_v32 = vrot.slane %v12772_v42, 5  ;;  %v12777_v39 = vld [vmem:[#allocation27_spill] sm:$0xff] }
 0x192   :  { %v2293_v10 = vsel %vm7913_vm5, %v2291_v12, %v2292_v9  ;;  %v6464_v60 = vrot.slane %v6432_v19, 9  ;;  %v12774_v13 = vrot.slane %v12773_v28, 5  ;;  %v10230_v59 = vsel %vm5306_vm8, %v12775_v27, %v9959_v55 }
 0x193   :  { %v2312_v58 = vrot.slane %v12771_v15, 4  ;;  %v6814_v31 = vcombine.low %v2290_v44, %v2293_v10  ;;  %v12776_v5 = vmov %v12771_v15  ;;  %v2306_v8 = vrot.slane %v12777_v39, 5  ;;  %v12787_v39 = vld [vmem:[#allocation28_spill] sm:$0xff]  ;;  %4586 = vrot.lane.b32.xlu1 %v6815_v50, %s7311_s12 }
 0x194   :  { %v2305_v21 = vrot.slane %v12774_v13, 4  ;;  %v2311_v33 = vsel %vm7913_vm5, %v6465_v14, %v12776_v5  ;;  %v10243_v12 = vsel %vm5306_vm8, %v12778_v35, %v9978_v30  ;;  %v12779_v19 = vmov %v12774_v13  ;;  %v12780_v14 = vld [vmem:[#allocation36_spill] sm:$0xff]  ;;  %v4291_v13 = vpop.permute.xlu1 %4290 }
 0x195   :  { %v2314_v55 = vsel %vm7913_vm5, %v2312_v58, %v2313_v32  ;;  %v2304_v52 = vsel %vm7913_vm5, %v6464_v60, %v12779_v19  ;;  %v6467_v9 = vrot.slane %v6435_v56, 9  ;;  %v12781_v17 = vrot.slane %v12780_v14, 5  ;;  %v12783_v32 = vld [vmem:[#allocation42_spill] sm:$0xff]  ;;  %4584 = vrot.lane.b32.xlu0 %v6814_v31, %s7311_s12 }
 0x196   :  { %v6817_v25 = vcombine.low %v2311_v33, %v2314_v55  ;;  %v2307_v44 = vsel %vm7913_vm5, %v2305_v21, %v2306_v8  ;;  %v2327_v30 = vrot.slane %v9613_v11, 5  ;;  %v6466_v42 = vrot.slane %v6434_v2, 9  ;;  %v6436_v11 = vld [vmem:[%s12344_s0 + $0xb4] sm:$0xe]  ;;  %v12785_v21 = vld [vmem:[#allocation93_spill] sm:$0xff] }
 0x197   :  { %v2326_v15 = vrot.slane %v12781_v17, 4  ;;  %v6816_v58 = vcombine.low %v2304_v52, %v2307_v44  ;;  %v12782_v10 = vmov %v12781_v17  ;;  %v12784_v60 = vrot.slane %v12783_v32, 5  ;;  %v12789_v52 = vld [vmem:[#allocation46_spill] sm:$0xff]  ;;  %v12791_v17 = vld [vmem:[#allocation29_spill] sm:$0xff] }
 0x198   :  { %v2325_v56 = vsel %vm7913_vm5, %v6467_v9, %v12782_v10  ;;  %v10273_v27 = vsel %vm5306_vm8, %v12785_v21, %v10007_v37  ;;  %v10278_v5 = vsel %vm5306_vm8, %v12786_v43, %v10027_v1  ;;  %v2320_v8 = vrot.slane %v12787_v39, 5  ;;  %v4289_v37 = vpop.permute.xlu0 %4288  ;;  %v6439_v1 = vld [vmem:[%s12344_s0 + $0xf0] sm:$0xe]  ;;  %v12796_v43 = vld [vmem:[#allocation17_spill] sm:$0xff]  ;;  %4590 = vrot.lane.b32.xlu1 %v6817_v25, %s7311_s12 }
 0x199   :  { %v2319_v28 = vrot.slane %v12784_v60, 4  ;;  %v2328_v33 = vsel %vm7913_vm5, %v2326_v15, %v2327_v30  ;;  %v12788_v35 = vmov %v12784_v60  ;;  %v6469_v19 = vrot.slane %v6437_v57, 9  ;;  %v12792_v30 = vld [vmem:[#allocation52_spill] sm:$0xff]  ;;  %4588 = vrot.lane.b32.xlu0 %v6816_v58, %s7311_s12  ;;  %v12810_v58 = vld [vmem:[#allocation47_spill] sm:$0xff] }
 0x19a   :  { %v6819_v2 = vcombine.low %v2325_v56, %v2328_v33  ;;  %v2318_v55 = vsel %vm7913_vm5, %v6466_v42, %v12788_v35  ;;  %v12790_v9 = vrot.slane %v12789_v52, 5  ;;  %v2341_v50 = vrot.slane %v12791_v17, 5 }
 0x19b   :  { %v2321_v14 = vsel %vm7913_vm5, %v2319_v28, %v2320_v8  ;;  %v6468_v15 = vrot.slane %v6436_v11, 9  ;;  %v12793_v10 = vrot.slane %v12792_v30, 5  ;;  %v10301_v57 = vsel %vm5306_vm8, %v9704_v26, %v10075_v6  ;;  %v12795_v28 = vld [vmem:[#allocation16_spill] sm:$0xff]  ;;  %v6438_v11 = vld [vmem:[%s12344_s0 + $0xe4] sm:$0xe] }
 0x19c   :  { %v2340_v44 = vrot.slane %v12790_v9, 4  ;;  %v6818_v42 = vcombine.low %v2318_v55, %v2321_v14  ;;  %v12794_v32 = vmov %v12790_v9  ;;  %v2334_v21 = vrot.slane %v12795_v28, 5  ;;  %v4295_v55 = vpop.permute.xlu1 %4294  ;;  %v12800_v9 = vld [vmem:[#allocation37_spill] sm:$0xff]  ;;  %v12806_v28 = vld [vmem:[#allocation40_spill] sm:$0xff]  ;;  %4594 = vrot.lane.b32.xlu1 %v6819_v2, %s7311_s12  ;;  %v10395_v2 = vld [vmem:[%s12344_s0 + $0xf0] sm:$0xf] }
 0x19d   :  { %v2333_v56 = vrot.slane %v12793_v10, 4  ;;  %v2339_v60 = vsel %vm7913_vm5, %v6469_v19, %v12794_v32  ;;  %v10315_v33 = vsel %vm5306_vm8, %v12796_v43, %v10099_v53  ;;  %v12797_v6 = vmov %v12793_v10  ;;  %v12798_v19 = vld [vmem:[#allocation56_spill] sm:$0xff]  ;;  %v12804_v32 = vld [vmem:[#allocation43_spill] sm:$0xff] }
 0x19e   :  { %v2342_v26 = vsel %vm7913_vm5, %v2340_v44, %v2341_v50  ;;  %v2332_v31 = vsel %vm7913_vm5, %v6468_v15, %v12797_v6  ;;  %v6471_v39 = vrot.slane %v6439_v1, 9  ;;  %v12799_v52 = vrot.slane %v12798_v19, 5  ;;  %v10332_v44 = vld [vmem:[%s12344_s0 + $0x18] sm:$0xf]  ;;  %v12802_v15 = vld [vmem:[#allocation62_spill] sm:$0xff]  ;;  %4592 = vrot.lane.b32.xlu0 %v6818_v42, %s7311_s12 }
 0x19f   :  { %v6821_v8 = vcombine.low %v2339_v60, %v2342_v26  ;;  %v2335_v35 = vsel %vm7913_vm5, %v2333_v56, %v2334_v21  ;;  %v2355_v14 = vrot.slane %v12800_v9, 5  ;;  %v6470_v50 = vrot.slane %v6438_v11, 9  ;;  %v6440_v56 = vld [vmem:[%s12344_s0 + $0xfc] sm:$0xe]  ;;  %v4293_v11 = vpop.permute.xlu0 %4292  ;;  %v12808_v26 = vld [vmem:[#allocation31_spill] sm:$0xff] }
 0x1a0   :  { %v2354_v53 = vrot.slane %v12799_v52, 4  ;;  %v6820_v17 = vcombine.low %v2332_v31, %v2335_v35  ;;  %v12801_v1 = vmov %v12799_v52  ;;  %v12803_v30 = vrot.slane %v12802_v15, 5 }
 0x1a1   :  { %v2353_v25 = vsel %vm7913_vm5, %v6471_v39, %v12801_v1  ;;  %v10346_v60 = vsel %vm5306_vm8, %v12804_v32, %v10142_v51  ;;  %v10351_v21 = vsel %vm5306_vm8, %v12806_v28, %v10163_v0  ;;  %v2348_v6 = vrot.slane %v12808_v26, 5  ;;  %v10366_v0 = vld [vmem:[%s12344_s0 + $0x24] sm:$0xf]  ;;  %v10384_v1 = vld [vmem:[%s12344_s0 + $0x1c] sm:$0xf]  ;;  %4598 = vrot.lane.b32.xlu1 %v6821_v8, %s7311_s12 }
 0x1a2   :  { %v2347_v10 = vrot.slane %v12803_v30, 4  ;;  %12805 = vst [vmem:[#allocation53_spill] sm:$0xff] %v10346_v60  ;;  %12807 = vst [vmem:[#allocation49_spill] sm:$0xff] %v10351_v21  ;;  %v2356_v43 = vsel %vm7913_vm5, %v2354_v53, %v2355_v14  ;;  %v12809_v39 = vmov %v12803_v30  ;;  %v2553_v35 = vshrl.u32 %v10332_v44, 16  ;;  %v12812_v53 = vld [vmem:[#allocation41_spill] sm:$0xff]  ;;  %v12815_v30 = vld [vmem:[#allocation72_spill] sm:$0xff]  ;;  %4596 = vrot.lane.b32.xlu0 %v6820_v17, %s7311_s12 }
 0x1a3   :  { %v6823_v31 = vcombine.low %v2353_v25, %v2356_v43  ;;  %v2346_v51 = vsel %vm7913_vm5, %v6470_v50, %v12809_v39  ;;  %v2556_v19 = vshll.u32 %v10332_v44, 16  ;;  %v10371_v52 = vsel %vm5306_vm8, %v12810_v58, %v10208_v62  ;;  %v10440_v8 = vld [vmem:[%s12344_s0 + $0xfc] sm:$0xf]  ;;  %v10486_v60 = vld [vmem:[%s12344_s0 + $0xf8] sm:$0x1] }
 0x1a4   :  { %12811 = vst [vmem:[#allocation50_spill] sm:$0xff] %v10371_v52  ;;  %v10376_v9 = vsel %vm5306_vm8, %v12812_v53, %v10225_v24  ;;  %v2349_v14 = vsel %vm7913_vm5, %v2347_v10, %v2348_v6  ;;  %v6472_v25 = vrot.slane %v6440_v56, 9  ;;  %v10388_v62 = vsel %vm5306_vm8, %v9824_v40, %v4291_v13  ;;  %v4299_v10 = vpop.permute.xlu1 %4298  ;;  %v12818_v13 = vld [vmem:[#allocation39_spill] sm:$0xff]  ;;  %v12819_v6 = vld [vmem:[#allocation100_spill] sm:$0xff] }
 0x1a5   :  { %12813 = vst [vmem:[#allocation57_spill] sm:$0xff] %v10376_v9  ;;  %12814 = vst [vmem:[#allocation51_spill] sm:$0xff] %v10388_v62  ;;  %v6822_v50 = vcombine.low %v2346_v51, %v2349_v14  ;;  %v2555_v15 = vrot.slane %v2553_v35, 4  ;;  %v12816_v24 = vrot.slane %v12815_v30, 5  ;;  %v2558_v28 = vrot.slane %v2556_v19, 5  ;;  %v12821_v51 = vld [vmem:[#allocation18_spill] sm:$0xff]  ;;  %4602 = vrot.lane.b32.xlu1 %v6823_v31, %s7311_s12 }
 0x1a6   :  { %v2362_v43 = vrot.slane %v12818_v13, 5  ;;  %v2577_v26 = vshrl.u32 %v10366_v0, 16  ;;  %v10408_v39 = vsel %vm5306_vm8, %v12819_v6, %v4289_v37  ;;  %v10412_v35 = vsel %vm5306_vm8, %v12821_v51, %v4295_v55  ;;  %v10418_v19 = vld [vmem:[%s12344_s0 + $0x28] sm:$0xf]  ;;  %v10426_v37 = vpop.permute.xlu0 %4296  ;;  %v10435_v30 = vld [vmem:[%s12344_s0 + $0x20] sm:$0x1] }
 0x1a7   :  { %v2361_v32 = vrot.slane %v12816_v24, 4  ;;  %v12817_v56 = vmov %v12816_v24  ;;  %12820 = vst [vmem:[#allocation14_spill] sm:$0xff] %v10408_v39  ;;  %v2566_v42 = vshrl.u32 %v10384_v1, 16  ;;  %v2580_v58 = vshll.u32 %v10366_v0, 16  ;;  %v10463_v51 = vld [vmem:[%s12344_s0 + $0x100] sm:$0xf]  ;;  %4600 = vrot.lane.b32.xlu0 %v6822_v50, %s7311_s12 }
 0x1a8   :  { %v10402_v40 = vsel %vm7913_vm5, %v6472_v25, %v12817_v56  ;;  %v10424_v53 = vsel %vm5306_vm8, %v9871_v63, %v4293_v11  ;;  %v2937_v14 = vshrl.u32 %v10395_v2, 16  ;;  %v2940_v25 = vshll.u32 %v10395_v2, 16  ;;  %v10450_v56 = vld [vmem:[%s12344_s0 + $0xf4] sm:$0xf] }
 0x1a9   :  { %12822 = vst [vmem:[#allocation21_spill] sm:$0xff] %v10424_v53  ;;  %v2363_v55 = vsel %vm7913_vm5, %v2361_v32, %v2362_v43  ;;  %v10444_v63 = vsel %vm5306_vm8, %v9896_v23, %v4299_v10  ;;  %v2579_v24 = vrot.slane %v2577_v26, 4  ;;  %v2582_v32 = vrot.slane %v2580_v58, 5 }
 0x1aa   :  { %12823 = vst [vmem:[#allocation58_spill] sm:$0xff] %v10444_v63  ;;  %v6824_v11 = vcombine.low %v10402_v40, %v2363_v55  ;;  %v6838_v13 = vcombine.low %v10332_v44, %v10384_v1  ;;  %v2590_v43 = vshrl.u32 %v10418_v19, 16  ;;  %v6839_v23 = vcombine.low %v10366_v0, %v10418_v19  ;;  %v10467_v44 = vpop.permute.xlu1 %4302  ;;  %v10479_v31 = vpop.permute.xlu0 %4300 }
 0x1ab   :  { %v2559_v10 = vor.u32 %v2558_v28, %v2555_v15  ;;  %v2562_v40 = vshll.u32 %v10384_v1, 16  ;;  %v2568_v26 = vrot.slane %v2566_v42, 4  ;;  %v2572_v6 = vshll.u32 %v10435_v30, 16  ;;  %v10474_v28 = vld [vmem:[%s12344_s0 + $0x2c] sm:$0x1] }
 0x1ac   :  { %v2961_v17 = vshrl.u32 %v10440_v8, 16  ;;  %v2939_v58 = vrot.slane %v2937_v14, 4  ;;  %v2942_v55 = vrot.slane %v2940_v25, 5  ;;  %v2950_v0 = vshrl.u32 %v10450_v56, 16  ;;  %4760 = vrot.lane.b32.xlu1 %v6838_v13, %s7312_s7  ;;  %4604 = vrot.lane.b32.xlu0 %v6824_v11, %s7311_s12 }
 0x1ad   :  { %v2964_v15 = vshll.u32 %v10440_v8, 16  ;;  %v6854_v42 = vcombine.low %v10395_v2, %v10450_v56  ;;  %v2560_v39 = vrot.slane %v2559_v10, 4  ;;  %v2564_v62 = vrot.slane %v2562_v40, 5 }
 0x1ae   :  { %v2583_v9 = vor.u32 %v2582_v32, %v2579_v24  ;;  %v2574_v14 = vrot.slane %v2572_v6, 5  ;;  %v2974_v25 = vshrl.u32 %v10463_v51, 16  ;;  %v2586_v52 = vshll.u32 %v10418_v19, 16  ;;  %v10498_v63 = vpop.permute.xlu1 %4306 }
 0x1af   :  { %v2592_v21 = vrot.slane %v2590_v43, 4  ;;  %v2569_v38 = vor.u32 %v2568_v26, %v2564_v62  ;;  %v2963_v2 = vrot.slane %v2961_v17, 4  ;;  %v2596_v24 = vshll.u32 %v10474_v28, 16  ;;  %v6582_v43 = vld [vmem:[%s12344_s0 + $0x18] sm:$0xe] }
 0x1b0   :  { %v2584_v10 = vrot.slane %v2583_v9, 4  ;;  %v2966_v50 = vrot.slane %v2964_v15, 5  ;;  %v2588_v32 = vrot.slane %v2586_v52, 5  ;;  %v2943_v40 = vor.u32 %v2942_v55, %v2939_v58  ;;  %4762 = vrot.lane.b32.xlu1 %v6839_v23, %s7312_s7  ;;  %4792 = vrot.lane.b32.xlu0 %v6854_v42, %s7312_s7 }
 0x1b1   :  { %v2946_v6 = vshll.u32 %v10450_v56, 16  ;;  %v2565_v47 = vsel %vm7360_vm2, %v2560_v39, %v2564_v62  ;;  %v2570_v26 = vrot.slane %v2569_v38, 4  ;;  %v2952_v17 = vrot.slane %v2950_v0, 4  ;;  %v10509_v39 = vld [vmem:[%s12344_s0 + $0x104] sm:$0x1] }
 0x1b2   :  { %v2956_v9 = vshll.u32 %v10486_v60, 16  ;;  %v2593_v13 = vor.u32 %v2592_v21, %v2588_v32  ;;  %v2598_v52 = vrot.slane %v2596_v24, 5  ;;  %v2944_v58 = vrot.slane %v2943_v40, 4  ;;  %v10512_v21 = vpop.permute.xlu0 %4304 }
 0x1b3   :  { %v2948_v55 = vrot.slane %v2946_v6, 5  ;;  %v2575_v15 = vsel %vm7360_vm2, %v2570_v26, %v2574_v14  ;;  %v6855_v53 = vcombine.low %v10440_v8, %v10463_v51  ;;  %v2589_v38 = vsel %vm7360_vm2, %v2584_v10, %v2588_v32  ;;  %v6583_v6 = vld [vmem:[%s12344_s0 + $0x24] sm:$0xe] }
 0x1b4   :  { %v6614_v62 = vrot.slane %v6582_v43, 9  ;;  %v6870_v11 = vcombine.low %v2565_v47, %v2575_v15  ;;  %v2594_v0 = vrot.slane %v2593_v13, 4  ;;  %v2958_v24 = vrot.slane %v2956_v9, 5 }
 0x1b5   :  { %v2949_v14 = vsel %vm7360_vm2, %v2944_v58, %v2948_v55  ;;  %v2953_v8 = vor.u32 %v2952_v17, %v2948_v55  ;;  %v3450_v40 = vrot.slane %v10384_v1, 5  ;;  %v3453_v10 = vrot.slane %v10435_v30, 5  ;;  %4794 = vrot.lane.b32.xlu0 %v6855_v53, %s7312_s7 }
 0x1b6   :  { %v2967_v32 = vor.u32 %v2966_v50, %v2963_v2  ;;  %v2599_v47 = vsel %vm7360_vm2, %v2594_v0, %v2598_v52  ;;  %v2970_v23 = vshll.u32 %v10463_v51, 16  ;;  %v2976_v43 = vrot.slane %v2974_v25, 4  ;;  %4920 = vrot.lane.b32.xlu1 %v6870_v11, %s7313_s15  ;;  %v10529_v2 = vpop.permute.xlu1 %4310  ;;  %v6598_v25 = vld [vmem:[%s12344_s0 + $0xf0] sm:$0xe]  ;;  %v10544_v11 = vpop.permute.xlu0 %4308 }
 0x1b7   :  { %v2980_v26 = vshll.u32 %v10509_v39, 16  ;;  %v6871_v17 = vcombine.low %v2589_v38, %v2599_v47  ;;  %v2954_v9 = vrot.slane %v2953_v8, 4  ;;  %v3451_v1 = vsel %vm7913_vm5, %v6614_v62, %v3450_v40  ;;  %v6441_v62 = vld [vmem:[%s12344_s0 + $0x108] sm:$0xe] }
 0x1b8   :  { %v3452_v30 = vrot.slane %v3450_v40, 4  ;;  %v2968_v42 = vrot.slane %v2967_v32, 4  ;;  %v2972_v50 = vrot.slane %v2970_v23, 5  ;;  %v6615_v52 = vrot.slane %v6583_v6, 9  ;;  %v12824_v23 = vld [vmem:[#allocation66_spill] sm:$0xff] }
 0x1b9   :  { %v2982_v13 = vrot.slane %v2980_v26, 5  ;;  %v2959_v58 = vsel %vm7360_vm2, %v2954_v9, %v2958_v24  ;;  %v3457_v15 = vrot.slane %v10418_v19, 5  ;;  %v3460_v38 = vrot.slane %v10474_v28, 5 }
 0x1ba   :  { %v3454_v55 = vsel %vm7913_vm5, %v3452_v30, %v3453_v10  ;;  %v6886_v0 = vcombine.low %v2949_v14, %v2959_v58  ;;  %v2973_v24 = vsel %vm7360_vm2, %v2968_v42, %v2972_v50  ;;  %v2977_v40 = vor.u32 %v2976_v43, %v2972_v50  ;;  %4922 = vrot.lane.b32.xlu1 %v6871_v17, %s7313_s15  ;;  %v6599_v43 = vld [vmem:[%s12344_s0 + $0xfc] sm:$0xe] }
 0x1bb   :  { %v6902_v8 = vcombine.low %v3451_v1, %v3454_v55  ;;  %v3458_v10 = vsel %vm7913_vm5, %v6615_v52, %v3457_v15  ;;  %v3459_v19 = vrot.slane %v3457_v15, 4  ;;  %v6630_v32 = vrot.slane %v6598_v25, 9  ;;  %v12826_v1 = vld [vmem:[#allocation38_spill] sm:$0xff]  ;;  %v10593_v25 = vld [vmem:[%s12344_s0 + $0x30] sm:$0xf] }
 0x1bc   :  { %v3562_v28 = vrot.slane %v10450_v56, 5  ;;  %v2978_v6 = vrot.slane %v2977_v40, 4  ;;  %v3565_v53 = vrot.slane %v10486_v60, 5  ;;  %v6473_v47 = vrot.slane %v6441_v62, 9  ;;  %4952 = vrot.lane.b32.xlu0 %v6886_v0, %s7313_s15  ;;  %v10609_v0 = vld [vmem:[%s12344_s0 + $0x10c] sm:$0xf] }
 0x1bd   :  { %v12825_v14 = vrot.slane %v12824_v23, 5  ;;  %v10561_v9 = vsel %vm5306_vm8, %v9904_v3, %v10426_v37  ;;  %v3461_v56 = vsel %vm7913_vm5, %v3459_v19, %v3460_v38  ;;  %v2369_v30 = vrot.slane %v12826_v1, 5  ;;  %v10577_v3 = vpop.permute.xlu1 %4410 }
 0x1be   :  { %v3564_v17 = vrot.slane %v3562_v28, 4  ;;  %v10569_v60 = vsel %vm5306_vm8, %v9909_v46, %v10467_v44  ;;  %v10574_v42 = vsel %vm5306_vm8, %v9943_v61, %v10479_v31  ;;  %v2983_v37 = vsel %vm7360_vm2, %v2978_v6, %v2982_v13  ;;  %v10586_v46 = vld [vmem:[%s12344_s0 + $0x108] sm:$0xf]  ;;  %v10595_v13 = vpop.permute.xlu0 %4408  ;;  %5080 = vrot.lane.b32.xlu1 %v6902_v8, %s7314_s27 }
 0x1bf   :  { %v2368_v26 = vrot.slane %v12825_v14, 4  ;;  %v3563_v50 = vsel %vm7913_vm5, %v6630_v32, %v3562_v28  ;;  %v6887_v44 = vcombine.low %v2973_v24, %v2983_v37  ;;  %v6903_v52 = vcombine.low %v3458_v10, %v3461_v56  ;;  %v10656_v56 = vld [vmem:[%s12344_s0 + $0x118] sm:$0xf] }
 0x1c0   :  { %v3566_v61 = vsel %vm7913_vm5, %v3564_v17, %v3565_v53  ;;  %v6631_v31 = vrot.slane %v6599_v43, 9  ;;  %v12827_v58 = vmov %v12825_v14  ;;  %v3569_v38 = vrot.slane %v10463_v51, 5  ;;  %v10644_v53 = vld [vmem:[%s12344_s0 + $0x3c] sm:$0xf] }
 0x1c1   :  { %v2367_v55 = vsel %vm7913_vm5, %v6473_v47, %v12827_v58  ;;  %v2370_v15 = vsel %vm7913_vm5, %v2368_v26, %v2369_v30  ;;  %v3572_v62 = vrot.slane %v10509_v39, 5  ;;  %v10614_v8 = vsel %vm5306_vm8, %v9948_v45, %v10498_v63  ;;  %v10626_v39 = vld [vmem:[%s12344_s0 + $0x34] sm:$0xf]  ;;  %4954 = vrot.lane.b32.xlu0 %v6887_v44, %s7313_s15  ;;  %v10629_v10 = vpop.permute.xlu1 %4414 }
 0x1c2   :  { %v10619_v24 = vsel %vm5306_vm8, %v9973_v36, %v10512_v21  ;;  %v2985_v40 = vshrl.u32 %v10586_v46, 16  ;;  %v2988_v51 = vshll.u32 %v10586_v46, 16  ;;  %v6918_v45 = vcombine.low %v3563_v50, %v3566_v61  ;;  %v10635_v36 = vld [vmem:[%s12344_s0 + $0x114] sm:$0xf]  ;;  %v10646_v47 = vpop.permute.xlu0 %4412  ;;  %5082 = vrot.lane.b32.xlu1 %v6903_v52, %s7314_s27  ;;  %v10665_v50 = vld [vmem:[%s12344_s0 + $0x40] sm:$0xf] }
 0x1c3   :  { %12828 = vst [vmem:[#allocation63_spill] sm:$0xff] %v10619_v24  ;;  %v3571_v63 = vrot.slane %v3569_v38, 4  ;;  %v2601_v19 = vshrl.u32 %v10593_v25, 16  ;;  %v6825_v21 = vcombine.low %v2367_v55, %v2370_v15  ;;  %v3570_v32 = vsel %vm7913_vm5, %v6631_v31, %v3569_v38  ;;  %v10679_v38 = vld [vmem:[%s12344_s0 + $0x110] sm:$0x1] }
 0x1c4   :  { %v2998_v28 = vshrl.u32 %v10609_v0, 16  ;;  %v2604_v6 = vshll.u32 %v10593_v25, 16  ;;  %v2987_v14 = vrot.slane %v2985_v40, 4  ;;  %v2990_v26 = vrot.slane %v2988_v51, 5 }
 0x1c5   :  { %v3573_v23 = vsel %vm7913_vm5, %v3571_v63, %v3572_v62  ;;  %v6856_v43 = vcombine.low %v10586_v46, %v10609_v0  ;;  %v2603_v17 = vrot.slane %v2601_v19, 4  ;;  %v2614_v1 = vshrl.u32 %v10626_v39, 16  ;;  %5112 = vrot.lane.b32.xlu0 %v6918_v45, %s7314_s27  ;;  %v10668_v46 = vpop.permute.xlu1 %4418  ;;  %v10688_v19 = vld [vmem:[%s12344_s0 + $0x38] sm:$0x1] }
 0x1c6   :  { %v6840_v30 = vcombine.low %v10593_v25, %v10626_v39  ;;  %v3009_v37 = vshrl.u32 %v10635_v36, 16  ;;  %12829 = vst [vmem:[#allocation59_spill] sm:$0xff] %v10668_v46  ;;  %v6919_v44 = vcombine.low %v3570_v32, %v3573_v23  ;;  %v2606_v52 = vrot.slane %v2604_v6, 5  ;;  %v10681_v62 = vpop.permute.xlu0 %4416  ;;  %4606 = vrot.lane.b32.xlu1 %v6825_v21, %s7311_s12 }
 0x1c7   :  { %v3012_v61 = vshll.u32 %v10635_v36, 16  ;;  %v2625_v31 = vshrl.u32 %v10644_v53, 16  ;;  %v3022_v25 = vshrl.u32 %v10656_v56, 16  ;;  %v6857_v55 = vcombine.low %v10635_v36, %v10656_v56  ;;  %12830 = vst [vmem:[#allocation60_spill] sm:$0xff] %v10681_v62 }
 0x1c8   :  { %v3011_v58 = vrot.slane %v3009_v37, 4  ;;  %v2628_v15 = vshll.u32 %v10644_v53, 16  ;;  %v2638_v45 = vshrl.u32 %v10665_v50, 16  ;;  %v2991_v63 = vor.u32 %v2990_v26, %v2987_v14 }
 0x1c9   :  { %v3014_v40 = vrot.slane %v3012_v61, 5  ;;  %v2627_v51 = vrot.slane %v2625_v31, 4  ;;  %v6841_v32 = vcombine.low %v10644_v53, %v10665_v50  ;;  %v2994_v6 = vshll.u32 %v10609_v0, 16  ;;  %5114 = vrot.lane.b32.xlu0 %v6919_v44, %s7314_s27  ;;  %v4423_v21 = vpop.permute.xlu1 %4422 }
 0x1ca   :  { %v2630_v36 = vrot.slane %v2628_v15, 5  ;;  %v3000_v23 = vrot.slane %v2998_v28, 4  ;;  %v2992_v37 = vrot.slane %v2991_v63, 4  ;;  %v3004_v61 = vshll.u32 %v10679_v38, 16  ;;  %v4421_v46 = vpop.permute.xlu0 %4420  ;;  %4796 = vrot.lane.b32.xlu1 %v6856_v43, %s7312_s7 }
 0x1cb   :  { %v2607_v31 = vor.u32 %v2606_v52, %v2603_v17  ;;  %v2610_v14 = vshll.u32 %v10626_v39, 16  ;;  %v10698_v26 = vsel %vm5371_vm9, %v10152_v16, %v4423_v21  ;;  %v2996_v15 = vrot.slane %v2994_v6, 5  ;;  %v10705_v17 = vld [vmem:[%s12344_s0 + $0x11c] sm:$0x1] }
 0x1cc   :  { %v2616_v62 = vrot.slane %v2614_v1, 4  ;;  %v2620_v53 = vshll.u32 %v10688_v19, 16  ;;  %v3006_v28 = vrot.slane %v3004_v61, 5  ;;  %v3015_v52 = vor.u32 %v3014_v40, %v3011_v58 }
 0x1cd   :  { %v2608_v44 = vrot.slane %v2607_v31, 4  ;;  %v2612_v24 = vrot.slane %v2610_v14, 5  ;;  %v10709_v16 = vsel %vm5371_vm9, %v10168_v18, %v4421_v46  ;;  %v2997_v1 = vsel %vm7360_vm2, %v2992_v37, %v2996_v15  ;;  %4764 = vrot.lane.b32.xlu0 %v6840_v30, %s7312_s7  ;;  %v4427_v43 = vpop.permute.xlu1 %4426 }
 0x1ce   :  { %v3001_v63 = vor.u32 %v3000_v23, %v2996_v15  ;;  %v2622_v6 = vrot.slane %v2620_v53, 5  ;;  %v3016_v31 = vrot.slane %v3015_v52, 4  ;;  %v3018_v14 = vshll.u32 %v10656_v56, 16  ;;  %v4425_v23 = vpop.permute.xlu0 %4424  ;;  %4798 = vrot.lane.b32.xlu1 %v6857_v55, %s7312_s7  ;;  %v6600_v55 = vld [vmem:[%s12344_s0 + $0x108] sm:$0xe] }
 0x1cf   :  { %v2613_v21 = vsel %vm7360_vm2, %v2608_v44, %v2612_v24  ;;  %v2617_v61 = vor.u32 %v2616_v62, %v2612_v24  ;;  %v10719_v58 = vsel %vm5371_vm9, %v10197_v7, %v4427_v43  ;;  %v3024_v46 = vrot.slane %v3022_v25, 4  ;;  %v10733_v25 = vld [vmem:[%s12344_s0 + $0x44] sm:$0x1] }
 0x1d0   :  { %v3002_v18 = vrot.slane %v3001_v63, 4  ;;  %v3028_v40 = vshll.u32 %v10705_v17, 16  ;;  %v3020_v37 = vrot.slane %v3018_v14, 5  ;;  %v2631_v15 = vor.u32 %v2630_v36, %v2627_v51 }
 0x1d1   :  { %v2618_v30 = vrot.slane %v2617_v61, 4  ;;  %v2634_v53 = vshll.u32 %v10665_v50, 16  ;;  %v10726_v24 = vsel %vm5371_vm9, %v10202_v41, %v4425_v23  ;;  %v2640_v44 = vrot.slane %v2638_v45, 4  ;;  %4766 = vrot.lane.b32.xlu0 %v6841_v32, %s7312_s7  ;;  %v4431_v51 = vpop.permute.xlu1 %4430  ;;  %v6601_v23 = vld [vmem:[%s12344_s0 + $0x114] sm:$0xe] }
 0x1d2   :  { %v3007_v7 = vsel %vm7360_vm2, %v3002_v18, %v3006_v28  ;;  %v3030_v62 = vrot.slane %v3028_v40, 5  ;;  %v3021_v28 = vsel %vm7360_vm2, %v3016_v31, %v3020_v37  ;;  %v3025_v52 = vor.u32 %v3024_v46, %v3020_v37  ;;  %v4429_v14 = vpop.permute.xlu0 %4428  ;;  %v6584_v31 = vld [vmem:[%s12344_s0 + $0x30] sm:$0xe] }
 0x1d3   :  { %v6888_v36 = vcombine.low %v2997_v1, %v3007_v7  ;;  %v2623_v41 = vsel %vm7360_vm2, %v2618_v30, %v2622_v6  ;;  %v10745_v63 = vsel %vm5371_vm9, %v10230_v59, %v4431_v51  ;;  %v2632_v43 = vrot.slane %v2631_v15, 4 }
 0x1d4   :  { %12831 = vst [vmem:[#allocation67_spill] sm:$0xff] %v10745_v63  ;;  %v6872_v45 = vcombine.low %v2613_v21, %v2623_v41  ;;  %v2636_v61 = vrot.slane %v2634_v53, 5  ;;  %v3026_v32 = vrot.slane %v3025_v52, 4  ;;  %v2644_v1 = vshll.u32 %v10733_v25, 16  ;;  %v6585_v52 = vld [vmem:[%s12344_s0 + $0x3c] sm:$0xe] }
 0x1d5   :  { %4956 = vrot.lane.b32.xlu1 %v6888_v36, %s7313_s15  ;;  %v6632_v18 = vrot.slane %v6600_v55, 9  ;;  %v3576_v6 = vrot.slane %v10609_v0, 5  ;;  %v10755_v59 = vsel %vm5371_vm9, %v10243_v12, %v4429_v14  ;;  %v3579_v40 = vrot.slane %v10679_v38, 5  ;;  %v4435_v0 = vpop.permute.xlu1 %4434 }
 0x1d6   :  { %v2637_v21 = vsel %vm7360_vm2, %v2632_v43, %v2636_v61  ;;  %v2641_v46 = vor.u32 %v2640_v44, %v2636_v61  ;;  %4924 = vrot.lane.b32.xlu0 %v6872_v45, %s7313_s15  ;;  %v3031_v30 = vsel %vm7360_vm2, %v3026_v32, %v3030_v62  ;;  %v2646_v37 = vrot.slane %v2644_v1, 5  ;;  %v4433_v55 = vpop.permute.xlu0 %4432 }
 0x1d7   :  { %v3577_v12 = vsel %vm7913_vm5, %v6632_v18, %v3576_v6  ;;  %v3578_v15 = vrot.slane %v3576_v6, 4  ;;  %v10770_v53 = vsel %vm5371_vm9, %v10273_v27, %v4435_v0  ;;  %v6889_v38 = vcombine.low %v3021_v28, %v3031_v30 }
 0x1d8   :  { %12832 = vst [vmem:[#allocation61_spill] sm:$0xff] %v10770_v53  ;;  %v2642_v7 = vrot.slane %v2641_v46, 4  ;;  %v6616_v44 = vrot.slane %v6584_v31, 9  ;;  %v3464_v36 = vrot.slane %v10626_v39, 5  ;;  %v3467_v62 = vrot.slane %v10688_v19, 5 }
 0x1d9   :  { %v3580_v51 = vsel %vm7913_vm5, %v3578_v15, %v3579_v40  ;;  %v6633_v41 = vrot.slane %v6601_v23, 9  ;;  %v10781_v27 = vsel %vm5371_vm9, %v10278_v5, %v4433_v55  ;;  %4958 = vrot.lane.b32.xlu1 %v6889_v38, %s7313_s15  ;;  %v3583_v43 = vrot.slane %v10656_v56, 5  ;;  %v6443_v39 = vld [vmem:[%s12344_s0 + $0x120] sm:$0xe]  ;;  %v4439_v61 = vpop.permute.xlu1 %4438 }
 0x1da   :  { %12833 = vst [vmem:[#allocation24_spill] sm:$0xff] %v10781_v27  ;;  %v2647_v28 = vsel %vm7360_vm2, %v2642_v7, %v2646_v37  ;;  %v6920_v45 = vcombine.low %v3577_v12, %v3580_v51  ;;  %v3465_v14 = vsel %vm7913_vm5, %v6616_v44, %v3464_v36  ;;  %v3466_v32 = vrot.slane %v3464_v36, 4  ;;  %v4437_v31 = vpop.permute.xlu0 %4436  ;;  %v12836_v37 = vld [vmem:[#allocation76_spill] sm:$0xff]  ;;  %v7273_v36 = vld [vmem:[%s12344_s0 + $0x128] sm:$0x1] }
 0x1db   :  { %v6873_v19 = vcombine.low %v2637_v21, %v2647_v28  ;;  %v3586_v5 = vrot.slane %v10705_v17, 5  ;;  %v10795_v1 = vsel %vm5371_vm9, %v10301_v57, %v4439_v61  ;;  %v3584_v18 = vsel %vm7913_vm5, %v6633_v41, %v3583_v43  ;;  %v6442_v57 = vld [vmem:[%s12344_s0 + $0x114] sm:$0xe] }
 0x1dc   :  { %12834 = vst [vmem:[#allocation25_spill] sm:$0xff] %v10795_v1  ;;  %v3585_v56 = vrot.slane %v3583_v43, 4  ;;  %v6617_v6 = vrot.slane %v6585_v52, 9  ;;  %v3468_v21 = vsel %vm7913_vm5, %v3466_v32, %v3467_v62  ;;  %v3471_v46 = vrot.slane %v10665_v50, 5  ;;  %v7274_v43 = vld [vmem:[%s12344_s0 + $0x11c] sm:$0x1] }
 0x1dd   :  { %4926 = vrot.lane.b32.xlu0 %v6873_v19, %s7313_s15  ;;  %v3474_v40 = vrot.slane %v10733_v25, 5  ;;  %v6475_v17 = vrot.slane %v6443_v39, 9  ;;  %v10809_v23 = vsel %vm5371_vm9, %v10315_v33, %v4437_v31  ;;  %5116 = vrot.lane.b32.xlu1 %v6920_v45, %s7314_s27  ;;  %v6904_v0 = vcombine.low %v3465_v14, %v3468_v21  ;;  %v10819_v25 = vld [vmem:[%s12344_s0 + $0x120] sm:$0xf]  ;;  %v10826_v33 = vpop.permute.xlu1 %4442 }
 0x1de   :  { %12835 = vst [vmem:[#allocation68_spill] sm:$0xff] %v10809_v23  ;;  %v3587_v30 = vsel %vm7913_vm5, %v3585_v56, %v3586_v5  ;;  %v12837_v12 = vrot.slane %v12836_v37, 5  ;;  %v10824_v15 = vsel %vm5306_vm8, %v10012_v54, %v10529_v2  ;;  %v3472_v7 = vsel %vm7913_vm5, %v6617_v6, %v3471_v46  ;;  %v12839_v54 = vld [vmem:[#allocation82_spill] sm:$0xff]  ;;  %v10840_v28 = vpop.permute.xlu0 %4440  ;;  %v10864_v6 = vld [vmem:[%s12344_s0 + $0x124] sm:$0xf] }
 0x1df   :  { %v6921_v38 = vcombine.low %v3584_v18, %v3587_v30  ;;  %v3473_v44 = vrot.slane %v3471_v46, 4  ;;  %v2383_v62 = vrot.slane %v7273_v36, 5  ;;  %v6474_v41 = vrot.slane %v6442_v57, 9 }
 0x1e0   :  { %v2382_v50 = vrot.slane %v12837_v12, 4  ;;  %v12838_v55 = vmov %v12837_v12  ;;  %v12840_v2 = vrot.slane %v12839_v54, 5  ;;  %v2376_v39 = vrot.slane %v7274_v43, 5 }
 0x1e1   :  { %v2381_v51 = vsel %vm7913_vm5, %v6475_v17, %v12838_v55  ;;  %5084 = vrot.lane.b32.xlu0 %v6904_v0, %s7314_s27  ;;  %v3475_v45 = vsel %vm7913_vm5, %v3473_v44, %v3474_v40  ;;  %v3033_v19 = vshrl.u32 %v10819_v25, 16  ;;  %v3036_v61 = vshll.u32 %v10819_v25, 16  ;;  %5118 = vrot.lane.b32.xlu1 %v6921_v38, %s7314_s27  ;;  %v10879_v21 = vpop.permute.xlu1 %4446  ;;  %v10886_v17 = vld [vmem:[%s12344_s0 + $0x4c] sm:$0xf]  ;;  %v10904_v0 = vld [vmem:[%s12344_s0 + $0x54] sm:$0xf] }
 0x1e2   :  { %v2375_v52 = vrot.slane %v12840_v2, 4  ;;  %v10852_v14 = vsel %vm5306_vm8, %v10017_v49, %v10544_v11  ;;  %v6905_v32 = vcombine.low %v3472_v7, %v3475_v45  ;;  %v2384_v5 = vsel %vm7913_vm5, %v2382_v50, %v2383_v62  ;;  %v6494_v49 = vld [vmem:[%s12344_s0 + $0x48] sm:$0xf]  ;;  %v10907_v30 = vpop.permute.xlu0 %4444  ;;  %v10922_v44 = vld [vmem:[%s12344_s0 + $0x58] sm:$0xf] }
 0x1e3   :  { %v12841_v18 = vmov %v12840_v2  ;;  %v10872_v11 = vsel %vm5371_vm9, %v10032_v20, %v10577_v3  ;;  %v10877_v31 = vsel %vm5371_vm9, %v10046_v29, %v10595_v13  ;;  %v6827_v46 = vcombine.low %v2381_v51, %v2384_v5  ;;  %v6528_v20 = vld [vmem:[%s12344_s0 + $0x12c] sm:$0xf]  ;;  %v10934_v45 = vld [vmem:[%s12344_s0 + $0x128] sm:$0x1]  ;;  %v10943_v5 = vld [vmem:[%s12344_s0 + $0x50] sm:$0x1] }
 0x1e4   :  { %v2374_v56 = vsel %vm7913_vm5, %v6474_v41, %v12841_v18  ;;  %v2377_v40 = vsel %vm7913_vm5, %v2375_v52, %v2376_v39  ;;  %v10894_v29 = vsel %vm5371_vm9, %v10051_v22, %v10629_v10  ;;  %v10899_v3 = vsel %vm5371_vm9, %v10080_v48, %v10646_v47  ;;  %v10913_v48 = vld [vmem:[%s12344_s0 + $0x130] sm:$0xf] }
 0x1e5   :  { %v3035_v13 = vrot.slane %v3033_v19, 4  ;;  %v3038_v57 = vrot.slane %v3036_v61, 5  ;;  %5086 = vrot.lane.b32.xlu0 %v6905_v32, %s7314_s27  ;;  %v6826_v37 = vcombine.low %v2374_v56, %v2377_v40  ;;  %v3046_v22 = vshrl.u32 %v10864_v6, 16  ;;  %4610 = vrot.lane.b32.xlu1 %v6827_v46, %s7311_s12  ;;  %v10924_v55 = vpop.permute.xlu1 %4450 }
 0x1e6   :  { %v2649_v10 = vshrl.u32 %v6494_v49, 16  ;;  %v2652_v12 = vshll.u32 %v6494_v49, 16  ;;  %v6858_v47 = vcombine.low %v10819_v25, %v10864_v6  ;;  %v2662_v50 = vshrl.u32 %v10886_v17, 16  ;;  %v10937_v43 = vpop.permute.xlu0 %4448 }
 0x1e7   :  { %v3057_v38 = vshrl.u32 %v6528_v20, 16  ;;  %v3060_v7 = vshll.u32 %v6528_v20, 16  ;;  %v6842_v62 = vcombine.low %v6494_v49, %v10886_v17  ;;  %v2673_v41 = vshrl.u32 %v10904_v0, 16 }
 0x1e8   :  { %v2651_v51 = vrot.slane %v2649_v10, 4  ;;  %v2654_v36 = vrot.slane %v2652_v12, 5  ;;  %v3070_v25 = vshrl.u32 %v10913_v48, 16  ;;  %v6859_v2 = vcombine.low %v6528_v20, %v10913_v48 }
 0x1e9   :  { %v3059_v54 = vrot.slane %v3057_v38, 4  ;;  %v2676_v52 = vshll.u32 %v10904_v0, 16  ;;  %4608 = vrot.lane.b32.xlu0 %v6826_v37, %s7311_s12  ;;  %v3062_v39 = vrot.slane %v3060_v7, 5  ;;  %v2675_v19 = vrot.slane %v2673_v41, 4  ;;  %4800 = vrot.lane.b32.xlu1 %v6858_v47, %s7312_s7  ;;  %v4455_v40 = vpop.permute.xlu1 %4454 }
 0x1ea   :  { %v2686_v61 = vshrl.u32 %v10922_v44, 16  ;;  %v3039_v32 = vor.u32 %v3038_v57, %v3035_v13  ;;  %v6843_v56 = vcombine.low %v10904_v0, %v10922_v44  ;;  %v3042_v49 = vshll.u32 %v10864_v6, 16  ;;  %v4453_v0 = vpop.permute.xlu0 %4452 }
 0x1eb   :  { %v2678_v18 = vrot.slane %v2676_v52, 5  ;;  %v3048_v46 = vrot.slane %v3046_v22, 4  ;;  %v3052_v37 = vshll.u32 %v10934_v45, 16  ;;  %v2655_v10 = vor.u32 %v2654_v36, %v2651_v51  ;;  %v10960_v51 = vld [vmem:[%s12344_s0 + $0x134] sm:$0x1]  ;;  %v12842_v52 = vld [vmem:[#allocation21_spill] sm:$0xff] }
 0x1ec   :  { %v3040_v20 = vrot.slane %v3039_v32, 4  ;;  %v2658_v13 = vshll.u32 %v10886_v17, 16  ;;  %v10953_v57 = vsel %vm5371_vm9, %v10412_v35, %v4455_v40  ;;  %v3044_v12 = vrot.slane %v3042_v49, 5 }
 0x1ed   :  { %v2664_v47 = vrot.slane %v2662_v50, 4  ;;  %v2668_v38 = vshll.u32 %v10943_v5, 16  ;;  %4768 = vrot.lane.b32.xlu0 %v6842_v62, %s7312_s7  ;;  %v3054_v7 = vrot.slane %v3052_v37, 5  ;;  %v2656_v22 = vrot.slane %v2655_v10, 4  ;;  %4802 = vrot.lane.b32.xlu1 %v6859_v2, %s7312_s7  ;;  %v4459_v49 = vpop.permute.xlu1 %4458 }
 0x1ee   :  { %v2660_v41 = vrot.slane %v2658_v13, 5  ;;  %v3063_v36 = vor.u32 %v3062_v39, %v3059_v54  ;;  %v10964_v35 = vsel %vm5371_vm9, %v12842_v52, %v4453_v0  ;;  %v3045_v50 = vsel %vm7360_vm2, %v3040_v20, %v3044_v12  ;;  %v12843_v54 = vld [vmem:[#allocation58_spill] sm:$0xff] }
 0x1ef   :  { %v3049_v62 = vor.u32 %v3048_v46, %v3044_v12  ;;  %v2670_v32 = vrot.slane %v2668_v38, 5  ;;  %v3066_v13 = vshll.u32 %v10913_v48, 16  ;;  %v10974_v39 = vsel %vm5371_vm9, %v12843_v54, %v4459_v49  ;;  %v4457_v46 = vpop.permute.xlu0 %4456 }
 0x1f0   :  { %v2661_v40 = vsel %vm7360_vm2, %v2656_v22, %v2660_v41  ;;  %v2665_v37 = vor.u32 %v2664_v47, %v2660_v41  ;;  %v3064_v10 = vrot.slane %v3063_v36, 4  ;;  %v3072_v52 = vrot.slane %v3070_v25, 4  ;;  %v10988_v25 = vld [vmem:[%s12344_s0 + $0x5c] sm:$0x1] }
 0x1f1   :  { %v3050_v0 = vrot.slane %v3049_v62, 4  ;;  %v3076_v2 = vshll.u32 %v10960_v51, 16  ;;  %4770 = vrot.lane.b32.xlu0 %v6843_v56, %s7312_s7  ;;  %v3068_v12 = vrot.slane %v3066_v13, 5  ;;  %v2679_v38 = vor.u32 %v2678_v18, %v2675_v19  ;;  %v6602_v19 = vld [vmem:[%s12344_s0 + $0x120] sm:$0xe] }
 0x1f2   :  { %v2666_v20 = vrot.slane %v2665_v37, 4  ;;  %v2682_v22 = vshll.u32 %v10922_v44, 16  ;;  %v10981_v47 = vsel %vm5371_vm9, %v10561_v9, %v4457_v46  ;;  %v2688_v56 = vrot.slane %v2686_v61, 4  ;;  %v4463_v9 = vpop.permute.xlu1 %4462 }
 0x1f3   :  { %v3055_v41 = vsel %vm7360_vm2, %v3050_v0, %v3054_v7  ;;  %v3078_v36 = vrot.slane %v3076_v2, 5  ;;  %v3069_v49 = vsel %vm7360_vm2, %v3064_v10, %v3068_v12  ;;  %v3073_v7 = vor.u32 %v3072_v52, %v3068_v12  ;;  %v4461_v0 = vpop.permute.xlu0 %4460  ;;  %v6586_v10 = vld [vmem:[%s12344_s0 + $0x48] sm:$0xe] }
 0x1f4   :  { %v6890_v18 = vcombine.low %v3045_v50, %v3055_v41  ;;  %v2671_v62 = vsel %vm7360_vm2, %v2666_v20, %v2670_v32  ;;  %v10999_v13 = vsel %vm5371_vm9, %v10569_v60, %v4463_v9  ;;  %v2680_v54 = vrot.slane %v2679_v38, 4 }
 0x1f5   :  { %v6874_v37 = vcombine.low %v2661_v40, %v2671_v62  ;;  %12844 = vst [vmem:[#allocation73_spill] sm:$0xff] %v10999_v13  ;;  %v2684_v61 = vrot.slane %v2682_v22, 5  ;;  %v3074_v2 = vrot.slane %v3073_v7, 4  ;;  %v2692_v50 = vshll.u32 %v10988_v25, 16 }
 0x1f6   :  { %4960 = vrot.lane.b32.xlu1 %v6890_v18, %s7313_s15  ;;  %v6634_v46 = vrot.slane %v6602_v19, 9  ;;  %v3590_v32 = vrot.slane %v10864_v6, 5  ;;  %v11010_v60 = vsel %vm5371_vm9, %v10574_v42, %v4461_v0  ;;  %v3593_v20 = vrot.slane %v10934_v45, 5  ;;  %v6603_v6 = vld [vmem:[%s12344_s0 + $0x12c] sm:$0xe]  ;;  %v4467_v22 = vpop.permute.xlu1 %4466 }
 0x1f7   :  { %4928 = vrot.lane.b32.xlu0 %v6874_v37, %s7313_s15  ;;  %v2685_v40 = vsel %vm7360_vm2, %v2680_v54, %v2684_v61  ;;  %v2689_v52 = vor.u32 %v2688_v56, %v2684_v61  ;;  %v3079_v12 = vsel %vm7360_vm2, %v3074_v2, %v3078_v36  ;;  %v2694_v38 = vrot.slane %v2692_v50, 5  ;;  %v4465_v62 = vpop.permute.xlu0 %4464  ;;  %v6587_v54 = vld [vmem:[%s12344_s0 + $0x54] sm:$0xe] }
 0x1f8   :  { %v3591_v41 = vsel %vm7913_vm5, %v6634_v46, %v3590_v32  ;;  %v3592_v42 = vrot.slane %v3590_v32, 4  ;;  %v6891_v19 = vcombine.low %v3069_v49, %v3079_v12  ;;  %v11024_v56 = vsel %vm5371_vm9, %v10614_v8, %v4467_v22  ;;  %v12846_v49 = vld [vmem:[#allocation63_spill] sm:$0xff] }
 0x1f9   :  { %v2690_v18 = vrot.slane %v2689_v52, 4  ;;  %12845 = vst [vmem:[#allocation69_spill] sm:$0xff] %v11024_v56  ;;  %v6618_v45 = vrot.slane %v6586_v10, 9  ;;  %v3478_v7 = vrot.slane %v10886_v17, 5  ;;  %v3481_v36 = vrot.slane %v10943_v5, 5  ;;  %v12850_v12 = vld [vmem:[#allocation19_spill] sm:$0xff] }
 0x1fa   :  { %v3594_v9 = vsel %vm7913_vm5, %v3592_v42, %v3593_v20  ;;  %v6635_v37 = vrot.slane %v6603_v6, 9  ;;  %4962 = vrot.lane.b32.xlu1 %v6891_v19, %s7313_s15  ;;  %v11038_v61 = vsel %vm5371_vm9, %v12846_v49, %v4465_v62  ;;  %v3597_v2 = vrot.slane %v10913_v48, 5  ;;  %v4471_v46 = vpop.permute.xlu1 %4470  ;;  %v6445_v10 = vld [vmem:[%s12344_s0 + $0x138] sm:$0xe]  ;;  %v12849_v6 = vld [vmem:[#allocation59_spill] sm:$0xff] }
 0x1fb   :  { %v2695_v8 = vsel %vm7360_vm2, %v2690_v18, %v2694_v38  ;;  %12847 = vst [vmem:[#allocation70_spill] sm:$0xff] %v11038_v61  ;;  %v6922_v0 = vcombine.low %v3591_v41, %v3594_v9  ;;  %v3479_v5 = vsel %vm7913_vm5, %v6618_v45, %v3478_v7  ;;  %v3480_v50 = vrot.slane %v3478_v7, 4  ;;  %v4469_v22 = vpop.permute.xlu0 %4468  ;;  %v6444_v42 = vld [vmem:[%s12344_s0 + $0x12c] sm:$0xe]  ;;  %v12855_v49 = vld [vmem:[#allocation48_spill] sm:$0xff] }
 0x1fc   :  { %v6875_v17 = vcombine.low %v2685_v40, %v2695_v8  ;;  %v3600_v32 = vrot.slane %v10960_v51, 5  ;;  %v11049_v52 = vsel %vm5371_vm9, %v10824_v15, %v4471_v46  ;;  %v3598_v20 = vsel %vm7913_vm5, %v6635_v37, %v3597_v2  ;;  %v12852_v37 = vld [vmem:[#allocation86_spill] sm:$0xff] }
 0x1fd   :  { %12848 = vst [vmem:[#allocation77_spill] sm:$0xff] %v11049_v52  ;;  %v3599_v48 = vrot.slane %v3597_v2, 4  ;;  %v6619_v40 = vrot.slane %v6587_v54, 9  ;;  %v11056_v38 = vsel %vm5371_vm9, %v12850_v12, %v12849_v6  ;;  %v3482_v51 = vsel %vm7913_vm5, %v3480_v50, %v3481_v36  ;;  %v7276_v6 = vld [vmem:[%s12344_s0 + $0x134] sm:$0x1] }
 0x1fe   :  { %4930 = vrot.lane.b32.xlu0 %v6875_v17, %s7313_s15  ;;  %v3485_v41 = vrot.slane %v10922_v44, 5  ;;  %v3488_v15 = vrot.slane %v10988_v25, 5  ;;  %5120 = vrot.lane.b32.xlu1 %v6922_v0, %s7314_s27  ;;  %v6906_v19 = vcombine.low %v3479_v5, %v3482_v51  ;;  %v11069_v18 = vsel %vm5371_vm9, %v10852_v14, %v4469_v22  ;;  %v11076_v44 = vld [vmem:[%s12344_s0 + $0x138] sm:$0xf]  ;;  %v4571_v36 = vpop.permute.xlu1 %4570  ;;  %v7275_v5 = vld [vmem:[%s12344_s0 + $0x140] sm:$0x1] }
 0x1ff   :  { %12851 = vst [vmem:[#allocation71_spill] sm:$0xff] %v11069_v18  ;;  %v3601_v45 = vsel %vm7913_vm5, %v3599_v48, %v3600_v32  ;;  %v6477_v62 = vrot.slane %v6445_v10, 9  ;;  %v12853_v54 = vrot.slane %v12852_v37, 5  ;;  %v12854_v14 = vld [vmem:[#allocation60_spill] sm:$0xff]  ;;  %v2397_v50 = vrot.slane %v7275_v5, 5  ;;  %v11097_v10 = vpop.permute.xlu0 %4568  ;;  %v12859_v22 = vld [vmem:[#allocation53_spill] sm:$0xff] }
 0x200   :  { %v6923_v25 = vcombine.low %v3598_v20, %v3601_v45  ;;  %v3486_v9 = vsel %vm7913_vm5, %v6619_v40, %v3485_v41  ;;  %v3487_v7 = vrot.slane %v3485_v41, 4  ;;  %v11085_v0 = vsel %vm5371_vm9, %v12855_v49, %v12854_v14  ;;  %v12857_v20 = vld [vmem:[#allocation92_spill] sm:$0xff]  ;;  %v6532_v14 = vld [vmem:[%s12344_s0 + $0x144] sm:$0xf]  ;;  %v11206_v52 = vld [vmem:[%s12344_s0 + $0x68] sm:$0x1] }
 0x201   :  { %v2396_v8 = vrot.slane %v12853_v54, 4  ;;  %v12856_v2 = vmov %v12853_v54  ;;  %v6476_v46 = vrot.slane %v6444_v42, 9  ;;  %v12858_v48 = vrot.slane %v12857_v20, 5  ;;  %v11132_v54 = vld [vmem:[%s12344_s0 + $0x13c] sm:$0xf] }
 0x202   :  { %v2395_v17 = vsel %vm7913_vm5, %v6477_v62, %v12856_v2  ;;  %5088 = vrot.lane.b32.xlu0 %v6906_v19, %s7314_s27  ;;  %v3489_v32 = vsel %vm7913_vm5, %v3487_v7, %v3488_v15  ;;  %v2390_v12 = vrot.slane %v7276_v6, 5  ;;  %v3081_v51 = vshrl.u32 %v11076_v44, 16  ;;  %5122 = vrot.lane.b32.xlu1 %v6923_v25, %s7314_s27  ;;  %v6498_v62 = vld [vmem:[%s12344_s0 + $0x60] sm:$0xf]  ;;  %v11154_v20 = vld [vmem:[%s12344_s0 + $0x64] sm:$0xf] }
 0x203   :  { %v2389_v40 = vrot.slane %v12858_v48, 4  ;;  %v11108_v41 = vsel %vm5371_vm9, %v12859_v22, %v10826_v33  ;;  %v6907_v15 = vcombine.low %v3486_v9, %v3489_v32  ;;  %v2398_v42 = vsel %vm7913_vm5, %v2396_v8, %v2397_v50  ;;  %v12861_v7 = vld [vmem:[#allocation49_spill] sm:$0xff]  ;;  %v11127_v9 = vpop.permute.xlu1 %4574  ;;  %v12864_v22 = vld [vmem:[#allocation51_spill] sm:$0xff] }
 0x204   :  { %v12860_v19 = vmov %v12858_v48  ;;  %v11123_v33 = vsel %vm5371_vm9, %v12861_v7, %v10840_v28  ;;  %v6829_v37 = vcombine.low %v2395_v17, %v2398_v42  ;;  %v3084_v8 = vshll.u32 %v11076_v44, 16  ;;  %v12862_v28 = vld [vmem:[#allocation50_spill] sm:$0xff]  ;;  %v12863_v2 = vld [vmem:[#allocation57_spill] sm:$0xff] }
 0x205   :  { %v2388_v45 = vsel %vm7913_vm5, %v6476_v46, %v12860_v19  ;;  %v2391_v25 = vsel %vm7913_vm5, %v2389_v40, %v2390_v12  ;;  %v11141_v49 = vsel %vm5371_vm9, %v12862_v28, %v10879_v21  ;;  %v11146_v17 = vsel %vm5371_vm9, %v12863_v2, %v10907_v30  ;;  %v11149_v46 = vpop.permute.xlu0 %4572  ;;  %v12865_v42 = vld [vmem:[#allocation14_spill] sm:$0xff]  ;;  %v11194_v2 = vld [vmem:[%s12344_s0 + $0x140] sm:$0x1] }
 0x206   :  { %v3083_v5 = vrot.slane %v3081_v51, 4  ;;  %5090 = vrot.lane.b32.xlu0 %v6907_v15, %s7314_s27  ;;  %v6828_v50 = vcombine.low %v2388_v45, %v2391_v25  ;;  %v3086_v32 = vrot.slane %v3084_v8, 5  ;;  %v2697_v21 = vshrl.u32 %v6498_v62, 16  ;;  %4614 = vrot.lane.b32.xlu1 %v6829_v37, %s7311_s12  ;;  %v6500_v51 = vld [vmem:[%s12344_s0 + $0x6c] sm:$0xf] }
 0x207   :  { %v2700_v48 = vshll.u32 %v6498_v62, 16  ;;  %v3094_v30 = vshrl.u32 %v11132_v54, 16  ;;  %v6860_v40 = vcombine.low %v11076_v44, %v11132_v54  ;;  %v3105_v6 = vshrl.u32 %v6532_v14, 16  ;;  %v11173_v37 = vpop.permute.xlu1 %4578  ;;  %v11178_v44 = vld [vmem:[%s12344_s0 + $0x148] sm:$0xf] }
 0x208   :  { %v3108_v12 = vshll.u32 %v6532_v14, 16  ;;  %v11166_v15 = vsel %vm5371_vm9, %v12864_v22, %v10924_v55  ;;  %v11171_v19 = vsel %vm5371_vm9, %v12865_v42, %v10937_v43  ;;  %v2699_v45 = vrot.slane %v2697_v21, 4  ;;  %v11189_v43 = vld [vmem:[%s12344_s0 + $0x70] sm:$0xf] }
 0x209   :  { %v2702_v7 = vrot.slane %v2700_v48, 5  ;;  %v11182_v25 = vsel %vm5436_vm10, %v10872_v11, %v4571_v36  ;;  %v2710_v55 = vshrl.u32 %v11154_v20, 16  ;;  %v6844_v8 = vcombine.low %v6498_v62, %v11154_v20  ;;  %v11197_v21 = vpop.permute.xlu0 %4576 }
 0x20a   :  { %v3107_v28 = vrot.slane %v3105_v6, 4  ;;  %4612 = vrot.lane.b32.xlu0 %v6828_v50, %s7311_s12  ;;  %v3110_v11 = vrot.slane %v3108_v12, 5  ;;  %v2721_v36 = vshrl.u32 %v6500_v51, 16  ;;  %v2724_v48 = vshll.u32 %v6500_v51, 16  ;;  %4804 = vrot.lane.b32.xlu1 %v6860_v40, %s7312_s7 }
 0x20b   :  { %v3087_v22 = vor.u32 %v3086_v32, %v3083_v5  ;;  %v3118_v62 = vshrl.u32 %v11178_v44, 16  ;;  %v6861_v6 = vcombine.low %v6532_v14, %v11178_v44  ;;  %v3090_v42 = vshll.u32 %v11132_v54, 16  ;;  %v11209_v12 = vpop.permute.xlu1 %4582 }
 0x20c   :  { %v3096_v1 = vrot.slane %v3094_v30, 4  ;;  %v2734_v50 = vshrl.u32 %v11189_v43, 16  ;;  %v3100_v5 = vshll.u32 %v11194_v2, 16  ;;  %v2703_v32 = vor.u32 %v2702_v7, %v2699_v45 }
 0x20d   :  { %v3088_v23 = vrot.slane %v3087_v22, 4  ;;  %v6845_v40 = vcombine.low %v6500_v51, %v11189_v43  ;;  %v3092_v18 = vrot.slane %v3090_v42, 5  ;;  %v2706_v14 = vshll.u32 %v11154_v20, 16  ;;  %v11215_v27 = vpop.permute.xlu0 %4580  ;;  %v11222_v51 = vld [vmem:[%s12344_s0 + $0x14c] sm:$0x1] }
 0x20e   :  { %v2712_v53 = vrot.slane %v2710_v55, 4  ;;  %4772 = vrot.lane.b32.xlu0 %v6844_v8, %s7312_s7  ;;  %v2723_v30 = vrot.slane %v2721_v36, 4  ;;  %v2726_v56 = vrot.slane %v2724_v48, 5  ;;  %v2716_v61 = vshll.u32 %v11206_v52, 16  ;;  %4806 = vrot.lane.b32.xlu1 %v6861_v6, %s7312_s7 }
 0x20f   :  { %v3111_v63 = vor.u32 %v3110_v11, %v3107_v28  ;;  %v3097_v22 = vor.u32 %v3096_v1, %v3092_v18  ;;  %v3102_v13 = vrot.slane %v3100_v5, 5  ;;  %v2704_v45 = vrot.slane %v2703_v32, 4  ;;  %v11231_v28 = vpop.permute.xlu1 %4586 }
 0x210   :  { %v2708_v7 = vrot.slane %v2706_v14, 5  ;;  %v11227_v55 = vsel %vm5436_vm10, %v10877_v31, %v11097_v10  ;;  %v3093_v8 = vsel %vm7360_vm2, %v3088_v23, %v3092_v18  ;;  %v3114_v1 = vshll.u32 %v11178_v44, 16  ;;  %v11241_v23 = vld [vmem:[%s12344_s0 + $0x74] sm:$0x1] }
 0x211   :  { %v3120_v11 = vrot.slane %v3118_v62, 4  ;;  %v3098_v36 = vrot.slane %v3097_v22, 4  ;;  %v2718_v6 = vrot.slane %v2716_v61, 5  ;;  %v3112_v42 = vrot.slane %v3111_v63, 4  ;;  %v11235_v5 = vpop.permute.xlu0 %4584 }
 0x212   :  { %v2713_v48 = vor.u32 %v2712_v53, %v2708_v7  ;;  %4774 = vrot.lane.b32.xlu0 %v6845_v40, %s7312_s7  ;;  %v3116_v32 = vrot.slane %v3114_v1, 5  ;;  %v3124_v31 = vshll.u32 %v11222_v51, 16  ;;  %v2727_v18 = vor.u32 %v2726_v56, %v2723_v30  ;;  %v6604_v40 = vld [vmem:[%s12344_s0 + $0x138] sm:$0xe] }
 0x213   :  { %v2730_v10 = vshll.u32 %v11189_v43, 16  ;;  %v3103_v53 = vsel %vm7360_vm2, %v3098_v36, %v3102_v13  ;;  %v2709_v63 = vsel %vm7360_vm2, %v2704_v45, %v2708_v7  ;;  %v2736_v62 = vrot.slane %v2734_v50, 4  ;;  %v11256_v1 = vpop.permute.xlu1 %4590  ;;  %v6588_v36 = vld [vmem:[%s12344_s0 + $0x60] sm:$0xe] }
 0x214   :  { %v2714_v61 = vrot.slane %v2713_v48, 4  ;;  %v11254_v14 = vsel %vm5436_vm10, %v10894_v29, %v11127_v9  ;;  %v6892_v56 = vcombine.low %v3093_v8, %v3103_v53  ;;  %v3121_v30 = vor.u32 %v3120_v11, %v3116_v32  ;;  %12866 = vst [vmem:[#allocation34_spill] sm:$0xff] %v11256_v1  ;;  %v6605_v53 = vld [vmem:[%s12344_s0 + $0x144] sm:$0xe] }
 0x215   :  { %v3126_v22 = vrot.slane %v3124_v31, 5  ;;  %v2728_v45 = vrot.slane %v2727_v18, 4  ;;  %v2732_v7 = vrot.slane %v2730_v10, 5  ;;  %v2740_v50 = vshll.u32 %v11241_v23, 16  ;;  %v11267_v11 = vpop.permute.xlu0 %4588 }
 0x216   :  { %v2719_v13 = vsel %vm7360_vm2, %v2714_v61, %v2718_v6  ;;  %4964 = vrot.lane.b32.xlu1 %v6892_v56, %s7313_s15  ;;  %v3117_v9 = vsel %vm7360_vm2, %v3112_v42, %v3116_v32  ;;  %v3122_v8 = vrot.slane %v3121_v30, 4  ;;  %v6636_v48 = vrot.slane %v6604_v40, 9 }
 0x217   :  { %v6876_v29 = vcombine.low %v2709_v63, %v2719_v13  ;;  %v11272_v6 = vsel %vm5436_vm10, %v10899_v3, %v11149_v46  ;;  %v2733_v31 = vsel %vm7360_vm2, %v2728_v45, %v2732_v7  ;;  %v2737_v18 = vor.u32 %v2736_v62, %v2732_v7  ;;  %v11284_v46 = vpop.permute.xlu1 %4594  ;;  %v6589_v45 = vld [vmem:[%s12344_s0 + $0x6c] sm:$0xe] }
 0x218   :  { %v2742_v10 = vrot.slane %v2740_v50, 5  ;;  %v3127_v42 = vsel %vm7360_vm2, %v3122_v8, %v3126_v22  ;;  %v3604_v32 = vrot.slane %v11132_v54, 5  ;;  %v3607_v63 = vrot.slane %v11194_v2, 5  ;;  %12867 = vst [vmem:[#allocation35_spill] sm:$0xff] %v11284_v46 }
 0x219   :  { %4932 = vrot.lane.b32.xlu0 %v6876_v29, %s7313_s15  ;;  %v6620_v3 = vrot.slane %v6588_v36, 9  ;;  %v6893_v61 = vcombine.low %v3117_v9, %v3127_v42  ;;  %v2738_v40 = vrot.slane %v2737_v18, 4  ;;  %v3492_v62 = vrot.slane %v11154_v20, 5  ;;  %v11295_v13 = vpop.permute.xlu0 %4592  ;;  %v6446_v42 = vld [vmem:[%s12344_s0 + $0x144] sm:$0xe] }
 0x21a   :  { %v3495_v56 = vrot.slane %v11206_v52, 5  ;;  %v11291_v30 = vsel %vm5436_vm10, %v11056_v38, %v11173_v37  ;;  %v3605_v22 = vsel %vm7913_vm5, %v6636_v48, %v3604_v32  ;;  %v3606_v54 = vrot.slane %v3604_v32, 4  ;;  %12868 = vst [vmem:[#allocation78_spill] sm:$0xff] %v11295_v13 }
 0x21b   :  { %v6637_v2 = vrot.slane %v6605_v53, 9  ;;  %v11303_v52 = vsel %vm5436_vm10, %v11085_v0, %v11197_v21  ;;  %4966 = vrot.lane.b32.xlu1 %v6893_v61, %s7313_s15  ;;  %v2743_v38 = vsel %vm7360_vm2, %v2738_v40, %v2742_v10  ;;  %v3493_v20 = vsel %vm7913_vm5, %v6620_v3, %v3492_v62  ;;  %v11314_v9 = vpop.permute.xlu1 %4598  ;;  %v12871_v40 = vld [vmem:[#allocation97_spill] sm:$0xff] }
 0x21c   :  { %v3494_v37 = vrot.slane %v3492_v62, 4  ;;  %v6877_v7 = vcombine.low %v2733_v31, %v2743_v38  ;;  %v3608_v50 = vsel %vm7913_vm5, %v3606_v54, %v3607_v63  ;;  %v3611_v36 = vrot.slane %v11178_v44, 5  ;;  %12869 = vst [vmem:[#allocation83_spill] sm:$0xff] %v11314_v9  ;;  %v6447_v31 = vld [vmem:[%s12344_s0 + $0x150] sm:$0xe] }
 0x21d   :  { %v3614_v29 = vrot.slane %v11222_v51, 5  ;;  %v6924_v0 = vcombine.low %v3605_v22, %v3608_v50  ;;  %v6621_v8 = vrot.slane %v6589_v45, 9  ;;  %v3499_v48 = vrot.slane %v11189_v43, 5  ;;  %v11326_v53 = vpop.permute.xlu0 %4596  ;;  %v7177_v9 = vld [vmem:[%s12345_s1 + $0x10] ss:$0 sps:$4 sm:$0x33]  }
 0x21e   :  { %v3496_v21 = vsel %vm7913_vm5, %v3494_v37, %v3495_v56  ;;  %4934 = vrot.lane.b32.xlu0 %v6877_v7, %s7313_s15  ;;  %v3612_v44 = vsel %vm7913_vm5, %v6637_v2, %v3611_v36  ;;  %v3613_v51 = vrot.slane %v3611_v36, 4  ;;  %v3502_v10 = vrot.slane %v11241_v23, 5  ;;  %12870 = vst [vmem:[#allocation79_spill] sm:$0xff] %v11326_v53  ;;  %v12873_v2 = vld [vmem:[#allocation104_spill] sm:$0xff]  ;;  %v11361_v37 = vld [vmem:[%s12344_s0 + $0x154] sm:$0xf]  ;;  %7081 = vmatprep.subr.msk.bf16.mxu0 %vm5788_vm13, %v7177_v9 }
 0x21f   :  { %v6908_v18 = vcombine.low %v3493_v20, %v3496_v21  ;;  %v11334_v43 = vsel %vm5436_vm10, %v10698_v26, %v11209_v12  ;;  %v11339_v32 = vsel %vm5436_vm10, %v10709_v16, %v11215_v27  ;;  %5124 = vrot.lane.b32.xlu1 %v6924_v0, %s7314_s27  ;;  %v3500_v23 = vsel %vm7913_vm5, %v6621_v8, %v3499_v48  ;;  %v7277_v26 = vld [vmem:[%s12344_s0 + $0x158] sm:$0x1]  ;;  %v4603_v16 = vpop.permute.xlu1 %4602  ;;  %v6534_v20 = vld [vmem:[%s12344_s0 + $0x150] sm:$0xf]  ;;  %v7278_v0 = vld [vmem:[%s12344_s0 + $0x14c] sm:$0x1] }
 0x220   :  { %v3501_v63 = vrot.slane %v3499_v48, 4  ;;  %v3615_v3 = vsel %vm7913_vm5, %v3613_v51, %v3614_v29  ;;  %v6479_v61 = vrot.slane %v6447_v31, 9  ;;  %v12872_v62 = vrot.slane %v12871_v40, 5  ;;  %v11376_v48 = vld [vmem:[%s12344_s0 + $0x78] sm:$0xf]  ;;  %7082 = vmatprep.subr.msk.bf16.mxu1 %vm5788_vm13, %v7177_v9 }
 0x221   :  { %v2411_v12 = vrot.slane %v7277_v26, 5  ;;  %v6925_v27 = vcombine.low %v3612_v44, %v3615_v3  ;;  %v6478_v54 = vrot.slane %v6446_v42, 9  ;;  %v12874_v45 = vrot.slane %v12873_v2, 5  ;;  %v4601_v8 = vpop.permute.xlu0 %4600  ;;  %v11392_v42 = vld [vmem:[%s12344_s0 + $0x7c] sm:$0xf] }
 0x222   :  { %v2410_v56 = vrot.slane %v12872_v62, 4  ;;  %v3503_v22 = vsel %vm7913_vm5, %v3501_v63, %v3502_v10  ;;  %5092 = vrot.lane.b32.xlu0 %v6908_v18, %s7314_s27  ;;  %v12875_v50 = vmov %v12872_v62  ;;  %v2404_v21 = vrot.slane %v7278_v0, 5 }
 0x223   :  { %v2403_v38 = vrot.slane %v12874_v45, 4  ;;  %v6909_v7 = vcombine.low %v3500_v23, %v3503_v22  ;;  %v2409_v36 = vsel %vm7913_vm5, %v6479_v61, %v12875_v50  ;;  %5126 = vrot.lane.b32.xlu1 %v6925_v27, %s7314_s27  ;;  %v12876_v18 = vmov %v12874_v45  ;;  %v4761_v40 = vpop.permute.xlu1 %4760 }
 0x224   :  { %v2412_v29 = vsel %vm7913_vm5, %v2410_v56, %v2411_v12  ;;  %v2402_v44 = vsel %vm7913_vm5, %v6478_v54, %v12876_v18  ;;  %v11385_v51 = vsel %vm5436_vm10, %v11108_v41, %v4603_v16  ;;  %v5470_v10 = vsel %vm5436_vm10, %v11123_v33, %v4601_v8  ;;  %v6536_v41 = vld [vmem:[%s12344_s0 + $0x15c] sm:$0xf]  ;;  %v11406_v12 = vld [vmem:[%s12344_s0 + $0x160] sm:$0xf]  ;;  %v11411_v16 = vld [vmem:[%s12344_s0 + $0x84] sm:$0xf] }
 0x225   :  { %v6831_v31 = vcombine.low %v2409_v36, %v2412_v29  ;;  %v2405_v23 = vsel %vm7913_vm5, %v2403_v38, %v2404_v21  ;;  %v3129_v63 = vshrl.u32 %v6534_v20, 16  ;;  %v3132_v3 = vshll.u32 %v6534_v20, 16  ;;  %v4605_v45 = vpop.permute.xlu0 %4604  ;;  %v11420_v38 = vld [vmem:[%s12344_s0 + $0x88] sm:$0xf] }
 0x226   :  { %v3142_v61 = vshrl.u32 %v11361_v37, 16  ;;  %v6830_v62 = vcombine.low %v2402_v44, %v2405_v23  ;;  %v6862_v33 = vcombine.low %v6534_v20, %v11361_v37  ;;  %v2745_v56 = vshrl.u32 %v11376_v48, 16  ;;  %5094 = vrot.lane.b32.xlu0 %v6909_v7, %s7314_s27 }
 0x227   :  { %v2748_v26 = vshll.u32 %v11376_v48, 16  ;;  %v3131_v27 = vrot.slane %v3129_v63, 4  ;;  %v3134_v22 = vrot.slane %v3132_v3, 5  ;;  %v2758_v54 = vshrl.u32 %v11392_v42, 16  ;;  %4618 = vrot.lane.b32.xlu1 %v6831_v31, %s7311_s12  ;;  %v4763_v8 = vpop.permute.xlu1 %4762 }
 0x228   :  { %v6846_v2 = vcombine.low %v11376_v48, %v11392_v42  ;;  %v2747_v20 = vrot.slane %v2745_v56, 4  ;;  %v11425_v7 = vsel %vm5436_vm10, %v11146_v17, %v4605_v45  ;;  %v5503_v36 = vsel %vm5501_vm11, %v11227_v55, %v4761_v40  ;;  %v11437_v17 = vld [vmem:[%s12344_s0 + $0x158] sm:$0x1] }
 0x229   :  { %v2750_v50 = vrot.slane %v2748_v26, 5  ;;  %v3153_v29 = vshrl.u32 %v6536_v41, 16  ;;  %v3156_v0 = vshll.u32 %v6536_v41, 16  ;;  %v3166_v21 = vshrl.u32 %v11406_v12, 16  ;;  %v4793_v40 = vpop.permute.xlu0 %4792 }
 0x22a   :  { %v6863_v48 = vcombine.low %v6536_v41, %v11406_v12  ;;  %v2769_v18 = vshrl.u32 %v11411_v16, 16  ;;  %v2772_v31 = vshll.u32 %v11411_v16, 16  ;;  %v2782_v44 = vshrl.u32 %v11420_v38, 16  ;;  %4616 = vrot.lane.b32.xlu0 %v6830_v62, %s7311_s12  ;;  %v11449_v41 = vld [vmem:[%s12344_s0 + $0x80] sm:$0x1] }
 0x22b   :  { %v3155_v55 = vrot.slane %v3153_v29, 4  ;;  %v3158_v23 = vrot.slane %v3156_v0, 5  ;;  %v6847_v63 = vcombine.low %v11411_v16, %v11420_v38  ;;  %v11444_v3 = vsel %vm5501_vm11, %v11182_v25, %v4763_v8  ;;  %4808 = vrot.lane.b32.xlu1 %v6862_v33, %s7312_s7  ;;  %v4921_v8 = vpop.permute.xlu1 %4920 }
 0x22c   :  { %v2771_v56 = vrot.slane %v2769_v18, 4  ;;  %v2774_v26 = vrot.slane %v2772_v31, 5  ;;  %v11453_v62 = vsel %vm5501_vm11, %v5470_v10, %v4793_v40  ;;  %v3135_v45 = vor.u32 %v3134_v22, %v3131_v27 }
 0x22d   :  { %v3138_v16 = vshll.u32 %v11361_v37, 16  ;;  %v3144_v29 = vrot.slane %v3142_v61, 4  ;;  %v3148_v25 = vshll.u32 %v11437_v17, 16  ;;  %v2751_v0 = vor.u32 %v2750_v50, %v2747_v20  ;;  %v4795_v61 = vpop.permute.xlu0 %4794 }
 0x22e   :  { %v3136_v53 = vrot.slane %v3135_v45, 4  ;;  %v2754_v33 = vshll.u32 %v11392_v42, 16  ;;  %v2760_v18 = vrot.slane %v2758_v54, 4  ;;  %v2764_v31 = vshll.u32 %v11449_v41, 16  ;;  %4776 = vrot.lane.b32.xlu0 %v6846_v2, %s7312_s7  ;;  %v11474_v54 = vld [vmem:[%s12344_s0 + $0x164] sm:$0x1] }
 0x22f   :  { %v3140_v10 = vrot.slane %v3138_v16, 5  ;;  %v3150_v27 = vrot.slane %v3148_v25, 5  ;;  %v2752_v22 = vrot.slane %v2751_v0, 4  ;;  %4810 = vrot.lane.b32.xlu1 %v6863_v48, %s7312_s7  ;;  %v11465_v40 = vsel %vm5566_vm12, %v5503_v36, %v4921_v8  ;;  %v4923_v25 = vpop.permute.xlu1 %4922 }
 0x230   :  { %v2756_v20 = vrot.slane %v2754_v33, 5  ;;  %v2766_v50 = vrot.slane %v2764_v31, 5  ;;  %v11469_v45 = vsel %vm5501_vm11, %v11385_v51, %v4795_v61  ;;  %v3159_v48 = vor.u32 %v3158_v23, %v3155_v55  ;;  %v11485_v33 = vld [vmem:[%s12344_s0 + $0x8c] sm:$0x1] }
 0x231   :  { %v3141_v2 = vsel %vm7360_vm2, %v3136_v53, %v3140_v10  ;;  %v3145_v16 = vor.u32 %v3144_v29, %v3140_v10  ;;  %v3162_v51 = vshll.u32 %v11406_v12, 16  ;;  %v3168_v8 = vrot.slane %v3166_v21, 4 }
 0x232   :  { %v2757_v36 = vsel %vm7360_vm2, %v2752_v22, %v2756_v20  ;;  %v2761_v0 = vor.u32 %v2760_v18, %v2756_v20  ;;  %4778 = vrot.lane.b32.xlu0 %v6847_v63, %s7312_s7  ;;  %v3160_v55 = vrot.slane %v3159_v48, 4  ;;  %v3172_v23 = vshll.u32 %v11474_v54, 16  ;;  %v4953_v18 = vpop.permute.xlu0 %4952  ;;  %v7178_v63 = vld [vmem:[%s12345_s1 + $0x8] sm:$0xff]  }
 0x233   :  { %v3146_v53 = vrot.slane %v3145_v16, 4  ;;  %v2775_v29 = vor.u32 %v2774_v26, %v2771_v56  ;;  %v3164_v10 = vrot.slane %v3162_v51, 5  ;;  %v2778_v22 = vshll.u32 %v11420_v38, 16  ;;  %v6606_v56 = vld [vmem:[%s12344_s0 + $0x150] sm:$0xe]  ;;  %v11500_v26 = vpop.permute.xlu1 %5080 }
 0x234   :  { %v2762_v31 = vrot.slane %v2761_v0, 4  ;;  %v2784_v21 = vrot.slane %v2782_v44, 4  ;;  %v3174_v20 = vrot.slane %v3172_v23, 5  ;;  %v2788_v13 = vshll.u32 %v11485_v33, 16 }
 0x235   :  { %v3151_v61 = vsel %vm7360_vm2, %v3146_v53, %v3150_v27  ;;  %v2776_v46 = vrot.slane %v2775_v29, 4  ;;  %v3165_v27 = vsel %vm7360_vm2, %v3160_v55, %v3164_v10  ;;  %v3169_v48 = vor.u32 %v3168_v8, %v3164_v10  ;;  %v6590_v29 = vld [vmem:[%s12344_s0 + $0x78] sm:$0xe] }
 0x236   :  { %v6894_v16 = vcombine.low %v3141_v2, %v3151_v61  ;;  %v2767_v44 = vsel %vm7360_vm2, %v2762_v31, %v2766_v50  ;;  %v2780_v51 = vrot.slane %v2778_v22, 5  ;;  %v2790_v53 = vrot.slane %v2788_v13, 5  ;;  %v4955_v1 = vpop.permute.xlu0 %4954 }
 0x237   :  { %v6878_v0 = vcombine.low %v2757_v36, %v2767_v44  ;;  %v5790_v23 = vsel %vm5788_vm13, %v7177_v9, 0  ;;  %v3170_v2 = vrot.slane %v3169_v48, 4  ;;  %v11513_v50 = vsel %vm5566_vm12, %v11444_v3, %v4923_v25  ;;  %v7179_v3 = vld [vmem:[%s12345_s1] sm:$0xff]   ;;  %v5083_v25 = vpop.permute.xlu1 %5082 }
 0x238   :  { %4968 = vrot.lane.b32.xlu1 %v6894_v16, %s7313_s15  ;;  %7006 = vmatpush3.bf16.msra.mxu0 %v5790_v23  ;;  %v11517_v36 = vsel %vm5566_vm12, %v11453_v62, %v4953_v18  ;;  %v6638_v13 = vrot.slane %v6606_v56, 9  ;;  %v2781_v9 = vsel %vm7360_vm2, %v2776_v46, %v2780_v51  ;;  %v2785_v8 = vor.u32 %v2784_v21, %v2780_v51  ;;  %v6607_v62 = vld [vmem:[%s12344_s0 + $0x15c] sm:$0xe]  ;;  %v6591_v56 = vld [vmem:[%s12344_s0 + $0x84] sm:$0xe] }
 0x239   :  { %4936 = vrot.lane.b32.xlu0 %v6878_v0, %s7313_s15  ;;  %7007 = vmatprep.subr.bf16.mxu0 %v7178_v63  ;;  %v3618_v55 = vrot.slane %v11361_v37, 5  ;;  %v3621_v31 = vrot.slane %v11437_v17, 5  ;;  %v3175_v18 = vsel %vm7360_vm2, %v3170_v2, %v3174_v20  ;;  %v6622_v10 = vrot.slane %v6590_v29, 9 }
 0x23a   :  { %v3506_v46 = vrot.slane %v11392_v42, 5  ;;  %v3509_v22 = vrot.slane %v11449_v41, 5  ;;  %7078 = vmatpush3.bf16.msra.mxu1 %v5790_v23  ;;  %v6895_v37 = vcombine.low %v3165_v27, %v3175_v18  ;;  %v2786_v17 = vrot.slane %v2785_v8, 4  ;;  %v5113_v16 = vpop.permute.xlu0 %5112  ;;  %v6449_v23 = vld [vmem:[%s12344_s0 + $0x168] sm:$0xe] }
 0x23b   :  { %v3619_v21 = vsel %vm7913_vm5, %v6638_v13, %v3618_v55  ;;  %v3620_v61 = vrot.slane %v3618_v55, 4  ;;  %7076 = vmatprep.subr.bf16.mxu1 %v7178_v63  ;;  %v5602_v42 = vsel %vm5566_vm12, %v11469_v45, %v4955_v1  ;;  %v6639_v41 = vrot.slane %v6607_v62, 9  ;;  %v4607_v29 = vpop.permute.xlu1 %4606 }
 0x23c   :  { %v3507_v20 = vsel %vm7913_vm5, %v6622_v10, %v3506_v46  ;;  %v3508_v44 = vrot.slane %v3506_v46, 4  ;;  %7008 = vmatpush3.bf16.msra.mxu0 %v7178_v63  ;;  %4970 = vrot.lane.b32.xlu1 %v6895_v37, %s7313_s15  ;;  %v2791_v27 = vsel %vm7360_vm2, %v2786_v17, %v2790_v53  ;;  %v3625_v0 = vrot.slane %v11406_v12, 5  ;;  %v12877_v37 = vld [vmem:[#allocation108_spill] sm:$0xff] }
 0x23d   :  { %v3622_v48 = vsel %vm7913_vm5, %v3620_v61, %v3621_v31  ;;  %7009 = vmatprep.subr.bf16.mxu0 %v7179_v3  ;;  %v3628_v51 = vrot.slane %v11474_v54, 5  ;;  %v6879_v1 = vcombine.low %v2781_v9, %v2791_v27  ;;  %v6623_v13 = vrot.slane %v6591_v56, 9 }
 0x23e   :  { %v6926_v45 = vcombine.low %v3619_v21, %v3622_v48  ;;  %v3510_v2 = vsel %vm7913_vm5, %v3508_v44, %v3509_v22  ;;  %7079 = vmatpush3.bf16.msra.mxu1 %v7178_v63  ;;  %v3626_v8 = vsel %vm7913_vm5, %v6639_v41, %v3625_v0  ;;  %v3627_v55 = vrot.slane %v3625_v0, 4  ;;  %v5115_v54 = vpop.permute.xlu0 %5114  ;;  %v6448_v63 = vld [vmem:[%s12344_s0 + $0x15c] sm:$0xe]  ;;  %v12880_v44 = vld [vmem:[#allocation113_spill] sm:$0xff] }
 0x23f   :  { %v6910_v53 = vcombine.low %v3507_v20, %v3510_v2  ;;  %v3513_v12 = vrot.slane %v11420_v38, 5  ;;  %7077 = vmatprep.subr.bf16.mxu1 %v7179_v3  ;;  %4938 = vrot.lane.b32.xlu0 %v6879_v1, %s7313_s15  ;;  %v3516_v31 = vrot.slane %v11485_v33, 5  ;;  %vm5631_vm14 = vcmask 261120   ;;  %v4797_v10 = vpop.permute.xlu1 %4796  ;;  %v11609_v2 = vld [vmem:[%s12344_s0 + $0x90] sm:$0xf] }
 0x240   :  { %vm5723_vm15 = vcmask 293888   ;;  %7010 = vmatpush3.bf16.msra.mxu0 %v7179_v3  ;;  %v6481_v9 = vrot.slane %v6449_v23, 9  ;;  %5128 = vrot.lane.b32.xlu1 %v6926_v45, %s7314_s27  ;;  %v3629_v62 = vsel %vm7913_vm5, %v3627_v55, %v3628_v51  ;;  %v5633_v33 = vsel %vm5631_vm14, %v11465_v40, %v11500_v26  ;;  %v11583_v40 = vld [vmem:[%s12344_s0 + $0x168] sm:$0xf]  ;;  %v7280_v51 = vld [vmem:[%s12344_s0 + $0x164] sm:$0x1] }
 0x241   :  { %v3514_v38 = vsel %vm7913_vm5, %v6623_v13, %v3513_v12  ;;  %v3515_v18 = vrot.slane %v3513_v12, 4  ;;  %v6927_v46 = vcombine.low %v3626_v8, %v3629_v62  ;;  %7011 = vmatprep.mubr.msk.bf16.mxu0 %vm5723_vm15, %v5633_v33  ;;  %v5635_v22 = vsel %vm5631_vm14, %v11513_v50, %v5083_v25  ;;  %v7279_v50 = vld [vmem:[%s12344_s0 + $0x170] sm:$0x1]  ;;  %v11645_v33 = vld [vmem:[%s12344_s0 + $0x9c] sm:$0xf] }
 0x242   :  { %v12878_v17 = vrot.slane %v12877_v37, 5  ;;  %7080 = vmatpush3.bf16.msra.mxu1 %v7179_v3  ;;  %v2425_v25 = vrot.slane %v7279_v50, 5  ;;  %v6480_v20 = vrot.slane %v6448_v63, 9  ;;  %v12881_v41 = vrot.slane %v12880_v44, 5  ;;  %v11596_v3 = vld [vmem:[%s12344_s0 + $0x16c] sm:$0xf]  ;;  %v4765_v48 = vpop.permute.xlu0 %4764 }
 0x243   :  { %v3517_v26 = vsel %vm7913_vm5, %v3515_v18, %v3516_v31  ;;  %7012 = vmatmul.mubr.msk.bf16.vlgmr.msra.gmra.mxu0 %vm5723_vm15, %v5635_v22  ;;  %5096 = vrot.lane.b32.xlu0 %v6910_v53, %s7314_s27  ;;  %v2418_v23 = vrot.slane %v7280_v51, 5  ;;  %v5665_v1 = vsel %vm5631_vm14, %v11517_v36, %v5113_v16  ;;  %v5476_v45 = vsel %vm5436_vm10, %v11141_v49, %v4607_v29  ;;  %v11624_v16 = vld [vmem:[%s12344_s0 + $0x94] sm:$0xf]  ;;  %v4799_v29 = vpop.permute.xlu1 %4798  ;;  %v11640_v18 = vld [vmem:[%s12344_s0 + $0x178] sm:$0xf] }
 0x244   :  { %v2423_v21 = vsel %vm7913_vm5, %v6481_v9, %v12878_v17  ;;  %v12879_v61 = vmov %v12878_v17  ;;  %v2417_v27 = vrot.slane %v12881_v41, 4  ;;  %v6911_v0 = vcombine.low %v3514_v38, %v3517_v26  ;;  %5130 = vrot.lane.b32.xlu1 %v6927_v46, %s7314_s27  ;;  %7043 = vmatprep.mubr.msk.bf16.mxu1 %vm5723_vm15, %v5665_v1 }
 0x245   :  { %v2424_v56 = vrot.slane %v12879_v61, 4  ;;  %v12882_v53 = vmov %v12881_v41  ;;  %v5667_v36 = vsel %vm5631_vm14, %v5602_v42, %v5115_v54  ;;  %v3177_v49 = vshrl.u32 %v11583_v40, 16  ;;  %v6540_v42 = vld [vmem:[%s12344_s0 + $0x174] sm:$0xf]  ;;  %v11655_v61 = vld [vmem:[%s12344_s0 + $0xa0] sm:$0xf] }
 0x246   :  { %v2416_v8 = vsel %vm7913_vm5, %v6480_v20, %v12882_v53  ;;  %v2419_v12 = vsel %vm7913_vm5, %v2417_v27, %v2418_v23  ;;  %v3180_v31 = vshll.u32 %v11583_v40, 16  ;;  %v3190_v9 = vshrl.u32 %v11596_v3, 16  ;;  %7044 = vmatmul.mubr.msk.bf16.vlgmr.msra.gmra.mxu1 %vm5723_vm15, %v5667_v36  ;;  %v4767_v46 = vpop.permute.xlu0 %4766  ;;  %v11681_v53 = vld [vmem:[%s12344_s0 + $0x98] sm:$0x1] }
 0x247   :  { %v2426_v13 = vsel %vm7913_vm5, %v2424_v56, %v2425_v25  ;;  %v6832_v54 = vcombine.low %v2416_v8, %v2419_v12  ;;  %v3179_v63 = vrot.slane %v3177_v49, 4  ;;  %v6864_v62 = vcombine.low %v11583_v40, %v11596_v3  ;;  %5098 = vrot.lane.b32.xlu0 %v6911_v0, %s7314_s27  ;;  %v4957_v25 = vpop.permute.xlu1 %4956 }
 0x248   :  { %v6833_v55 = vcombine.low %v2423_v21, %v2426_v13  ;;  %v2793_v38 = vshrl.u32 %v11609_v2, 16  ;;  %v3182_v22 = vrot.slane %v3180_v31, 5  ;;  %v2796_v37 = vshll.u32 %v11609_v2, 16 }
 0x249   :  { %v2806_v17 = vshrl.u32 %v11624_v16, 16  ;;  %v6848_v21 = vcombine.low %v11609_v2, %v11624_v16  ;;  %v5539_v40 = vsel %vm5501_vm11, %v11425_v7, %v4797_v10  ;;  %v5507_v26 = vsel %vm5501_vm11, %v11272_v6, %v4765_v48  ;;  %v11670_v7 = vld [vmem:[%s12344_s0 + $0x170] sm:$0x1] }
 0x24a   :  { %4622 = vrot.lane.b32.xlu1 %v6833_v55, %s7311_s12  ;;  %v2795_v56 = vrot.slane %v2793_v38, 4  ;;  %v3201_v50 = vshrl.u32 %v6540_v42, 16  ;;  %v2798_v20 = vrot.slane %v2796_v37, 5  ;;  %v3204_v44 = vshll.u32 %v6540_v42, 16  ;;  %v4925_v6 = vpop.permute.xlu0 %4924 }
 0x24b   :  { %v3214_v41 = vshrl.u32 %v11640_v18, 16  ;;  %v6865_v27 = vcombine.low %v6540_v42, %v11640_v18  ;;  %v2817_v51 = vshrl.u32 %v11645_v33, 16  ;;  %v2820_v23 = vshll.u32 %v11645_v33, 16  ;;  %4620 = vrot.lane.b32.xlu0 %v6832_v54, %s7311_s12 }
 0x24c   :  { %v3203_v0 = vrot.slane %v3201_v50, 4  ;;  %v2830_v1 = vshrl.u32 %v11655_v61, 16  ;;  %v3206_v10 = vrot.slane %v3204_v44, 5  ;;  %v6849_v48 = vcombine.low %v11645_v33, %v11655_v61 }
 0x24d   :  { %v5541_v2 = vsel %vm5501_vm11, %v5476_v45, %v4799_v29  ;;  %v5509_v13 = vsel %vm5501_vm11, %v11254_v14, %v4767_v46  ;;  %v2819_v8 = vrot.slane %v2817_v51, 4  ;;  %v2822_v36 = vrot.slane %v2820_v23, 5  ;;  %v4959_v29 = vpop.permute.xlu1 %4958 }
 0x24e   :  { %4812 = vrot.lane.b32.xlu1 %v6864_v62, %s7312_s7  ;;  %v3183_v49 = vor.u32 %v3182_v22, %v3179_v63  ;;  %v3186_v55 = vshll.u32 %v11596_v3, 16  ;;  %v3192_v12 = vrot.slane %v3190_v9, 4  ;;  %v3196_v31 = vshll.u32 %v11670_v7, 16  ;;  %v11695_v9 = vld [vmem:[%s12344_s0 + $0x17c] sm:$0x1] }
 0x24f   :  { %v2799_v42 = vor.u32 %v2798_v20, %v2795_v56  ;;  %v2802_v45 = vshll.u32 %v11624_v16, 16  ;;  %v2808_v38 = vrot.slane %v2806_v17, 4  ;;  %v2812_v33 = vshll.u32 %v11681_v53, 16  ;;  %4780 = vrot.lane.b32.xlu0 %v6848_v21, %s7312_s7  ;;  %v4927_v50 = vpop.permute.xlu0 %4926 }
 0x250   :  { %v3184_v14 = vrot.slane %v3183_v49, 4  ;;  %v3188_v54 = vrot.slane %v3186_v55, 5  ;;  %v3198_v62 = vrot.slane %v3196_v31, 5  ;;  %v11690_v63 = vsel %vm5566_vm12, %v5539_v40, %v4957_v25 }
 0x251   :  { %v2800_v46 = vrot.slane %v2799_v42, 4  ;;  %v2804_v37 = vrot.slane %v2802_v45, 5  ;;  %v2814_v56 = vrot.slane %v2812_v33, 5  ;;  %v5572_v21 = vsel %vm5566_vm12, %v5507_v26, %v4925_v6  ;;  %v5117_v51 = vpop.permute.xlu1 %5116  ;;  %v11709_v26 = vld [vmem:[%s12344_s0 + $0xa4] sm:$0x1] }
 0x252   :  { %4814 = vrot.lane.b32.xlu1 %v6865_v27, %s7312_s7  ;;  %v3189_v22 = vsel %vm7360_vm2, %v3184_v14, %v3188_v54  ;;  %v3193_v17 = vor.u32 %v3192_v12, %v3188_v54  ;;  %v3207_v25 = vor.u32 %v3206_v10, %v3203_v0  ;;  %v3210_v44 = vshll.u32 %v11640_v18, 16 }
 0x253   :  { %v2805_v20 = vsel %vm7360_vm2, %v2800_v46, %v2804_v37  ;;  %v2809_v40 = vor.u32 %v2808_v38, %v2804_v37  ;;  %v3216_v49 = vrot.slane %v3214_v41, 4  ;;  %v3220_v27 = vshll.u32 %v11695_v9, 16  ;;  %4782 = vrot.lane.b32.xlu0 %v6849_v48, %s7312_s7  ;;  %v6608_v48 = vld [vmem:[%s12344_s0 + $0x168] sm:$0xe] }
 0x254   :  { %v3194_v23 = vrot.slane %v3193_v17, 4  ;;  %v2823_v55 = vor.u32 %v2822_v36, %v2819_v8  ;;  %v3208_v31 = vrot.slane %v3207_v25, 4  ;;  %v3212_v42 = vrot.slane %v3210_v44, 5  ;;  %v5085_v8 = vpop.permute.xlu0 %5084  ;;  %v6592_v17 = vld [vmem:[%s12344_s0 + $0x90] sm:$0xe] }
 0x255   :  { %v2810_v12 = vrot.slane %v2809_v40, 4  ;;  %v2826_v0 = vshll.u32 %v11655_v61, 16  ;;  %v3222_v10 = vrot.slane %v3220_v27, 5  ;;  %v2832_v45 = vrot.slane %v2830_v1, 4  ;;  %v5119_v33 = vpop.permute.xlu1 %5118 }
 0x256   :  { %v3199_v6 = vsel %vm7360_vm2, %v3194_v23, %v3198_v62  ;;  %v2824_v41 = vrot.slane %v2823_v55, 4  ;;  %v3213_v54 = vsel %vm7360_vm2, %v3208_v31, %v3212_v42  ;;  %v3217_v38 = vor.u32 %v3216_v49, %v3212_v42 }
 0x257   :  { %v6896_v36 = vcombine.low %v3189_v22, %v3199_v6  ;;  %v2815_v14 = vsel %vm7360_vm2, %v2810_v12, %v2814_v56  ;;  %v2828_v37 = vrot.slane %v2826_v0, 5  ;;  %v2836_v62 = vshll.u32 %v11709_v26, 16  ;;  %v6593_v0 = vld [vmem:[%s12344_s0 + $0x9c] sm:$0xe] }
 0x258   :  { %v6880_v46 = vcombine.low %v2805_v20, %v2815_v14  ;;  %v5606_v1 = vsel %vm5566_vm12, %v5541_v2, %v4959_v29  ;;  %v3218_v22 = vrot.slane %v3217_v38, 4  ;;  %v5574_v56 = vsel %vm5566_vm12, %v5509_v13, %v4927_v50  ;;  %v6609_v29 = vld [vmem:[%s12344_s0 + $0x174] sm:$0xe]  ;;  %v5087_v49 = vpop.permute.xlu0 %5086 }
 0x259   :  { %4972 = vrot.lane.b32.xlu1 %v6896_v36, %s7313_s15  ;;  %v6640_v40 = vrot.slane %v6608_v48, 9  ;;  %v3632_v25 = vrot.slane %v11596_v3, 5  ;;  %v2829_v20 = vsel %vm7360_vm2, %v2824_v41, %v2828_v37  ;;  %v2833_v44 = vor.u32 %v2832_v45, %v2828_v37  ;;  %v4611_v55 = vpop.permute.xlu1 %4610 }
 0x25a   :  { %4940 = vrot.lane.b32.xlu0 %v6880_v46, %s7313_s15  ;;  %v2838_v23 = vrot.slane %v2836_v62, 5  ;;  %v3635_v2 = vrot.slane %v11670_v7, 5  ;;  %v3223_v13 = vsel %vm7360_vm2, %v3218_v22, %v3222_v10  ;;  %v6624_v27 = vrot.slane %v6592_v17, 9 }
 0x25b   :  { %v3633_v3 = vsel %vm7913_vm5, %v6640_v40, %v3632_v25  ;;  %v3634_v50 = vrot.slane %v3632_v25, 4  ;;  %v6897_v12 = vcombine.low %v3213_v54, %v3223_v13  ;;  %v2834_v31 = vrot.slane %v2833_v44, 4  ;;  %v12885_v13 = vld [vmem:[#allocation123_spill] sm:$0xff] }
 0x25c   :  { %v3520_v42 = vrot.slane %v11624_v16, 5  ;;  %v3523_v7 = vrot.slane %v11681_v53, 5  ;;  %v5669_v10 = vsel %vm5631_vm14, %v11690_v63, %v5117_v51  ;;  %v5637_v41 = vsel %vm5631_vm14, %v5572_v21, %v5085_v8  ;;  %v4609_v14 = vpop.permute.xlu0 %4608  ;;  %v6451_v51 = vld [vmem:[%s12344_s0 + $0x180] sm:$0xe] }
 0x25d   :  { %v3636_v6 = vsel %vm7913_vm5, %v3634_v50, %v3635_v2  ;;  %v6641_v45 = vrot.slane %v6609_v29, 9  ;;  %4974 = vrot.lane.b32.xlu1 %v6897_v12, %s7313_s15  ;;  %v2839_v16 = vsel %vm7360_vm2, %v2834_v31, %v2838_v23  ;;  %7015 = vmatprep.mubr.msk.bf16.mxu0 %vm5723_vm15, %v5637_v41  ;;  %v3639_v38 = vrot.slane %v11640_v18, 5  ;;  %v4801_v8 = vpop.permute.xlu1 %4800  ;;  %v6450_v18 = vld [vmem:[%s12344_s0 + $0x174] sm:$0xe] }
 0x25e   :  { %v6928_v48 = vcombine.low %v3633_v3, %v3636_v6  ;;  %v3521_v53 = vsel %vm7913_vm5, %v6624_v27, %v3520_v42  ;;  %v3522_v36 = vrot.slane %v3520_v42, 4  ;;  %v6881_v54 = vcombine.low %v2829_v20, %v2839_v16  ;;  %7047 = vmatprep.mubr.msk.bf16.mxu1 %vm5723_vm15, %v5669_v10  ;;  %v6542_v27 = vld [vmem:[%s12344_s0 + $0x180] sm:$0xf]  ;;  %v11803_v10 = vld [vmem:[%s12344_s0 + $0x184] sm:$0xf] }
 0x25f   :  { %v3642_v63 = vrot.slane %v11695_v9, 5  ;;  %v6625_v21 = vrot.slane %v6593_v0, 9  ;;  %v3527_v37 = vrot.slane %v11655_v61, 5  ;;  %v3530_v62 = vrot.slane %v11709_v26, 5  ;;  %v7282_v0 = vld [vmem:[%s12344_s0 + $0x17c] sm:$0x1] }
 0x260   :  { %v3524_v46 = vsel %vm7913_vm5, %v3522_v36, %v3523_v7  ;;  %v5671_v17 = vsel %vm5631_vm14, %v5606_v1, %v5119_v33  ;;  %4942 = vrot.lane.b32.xlu0 %v6881_v54, %s7313_s15  ;;  %v3640_v22 = vsel %vm7913_vm5, %v6641_v45, %v3639_v38  ;;  %v3641_v40 = vrot.slane %v3639_v38, 4  ;;  %v12883_v1 = vld [vmem:[#allocation119_spill] sm:$0xff]  ;;  %v4769_v23 = vpop.permute.xlu0 %4768  ;;  %v6510_v54 = vld [vmem:[%s12344_s0 + $0xa8] sm:$0xf]  ;;  %v11820_v38 = vld [vmem:[%s12344_s0 + $0xac] sm:$0xf] }
 0x261   :  { %v6912_v9 = vcombine.low %v3521_v53, %v3524_v46  ;;  %v5639_v25 = vsel %vm5631_vm14, %v5574_v56, %v5087_v49  ;;  %7048 = vmatmul.mubr.msk.bf16.gmra.mxu1 %vm5723_vm15, %v5671_v17  ;;  %5132 = vrot.lane.b32.xlu1 %v6928_v48, %s7314_s27  ;;  %v3528_v61 = vsel %vm7913_vm5, %v6625_v21, %v3527_v37  ;;  %v3529_v26 = vrot.slane %v3527_v37, 4  ;;  %v7281_v56 = vld [vmem:[%s12344_s0 + $0x188] sm:$0x1]  ;;  %v4803_v41 = vpop.permute.xlu1 %4802 }
 0x262   :  { %v6483_v33 = vrot.slane %v6451_v51, 9  ;;  %v12884_v20 = vrot.slane %v12883_v1, 5  ;;  %7016 = vmatmul.mubr.msk.bf16.gmra.mxu0 %vm5723_vm15, %v5639_v25  ;;  %v3643_v2 = vsel %vm7913_vm5, %v3641_v40, %v3642_v63  ;;  %v2439_v29 = vrot.slane %v7281_v56, 5  ;;  %v11841_v25 = vld [vmem:[%s12344_s0 + $0xb4] sm:$0xf] }
 0x263   :  { %v6482_v49 = vrot.slane %v6450_v18, 9  ;;  %v12886_v3 = vrot.slane %v12885_v13, 5  ;;  %v6929_v12 = vcombine.low %v3640_v22, %v3643_v2  ;;  %v3531_v31 = vsel %vm7913_vm5, %v3529_v26, %v3530_v62  ;;  %v6544_v18 = vld [vmem:[%s12344_s0 + $0x18c] sm:$0xf] }
 0x264   :  { %v2438_v44 = vrot.slane %v12884_v20, 4  ;;  %v12887_v42 = vmov %v12884_v20  ;;  %v2432_v6 = vrot.slane %v7282_v0, 5  ;;  %5100 = vrot.lane.b32.xlu0 %v6912_v9, %s7314_s27  ;;  %v6913_v45 = vcombine.low %v3528_v61, %v3531_v31  ;;  %v11835_v9 = vld [vmem:[%s12344_s0 + $0x190] sm:$0xf]  ;;  %v11851_v20 = vld [vmem:[%s12344_s0 + $0xb8] sm:$0xf] }
 0x265   :  { %v2431_v50 = vrot.slane %v12886_v3, 4  ;;  %v2437_v7 = vsel %vm7913_vm5, %v6483_v33, %v12887_v42  ;;  %v12888_v48 = vmov %v12886_v3  ;;  %v5480_v36 = vsel %vm5436_vm10, %v11166_v15, %v4611_v55  ;;  %5134 = vrot.lane.b32.xlu1 %v6929_v12, %s7314_s27  ;;  %v4771_v15 = vpop.permute.xlu0 %4770  ;;  %v11869_v42 = vld [vmem:[%s12344_s0 + $0xb0] sm:$0x1] }
 0x266   :  { %v2440_v16 = vsel %vm7913_vm5, %v2438_v44, %v2439_v29  ;;  %v2430_v53 = vsel %vm7913_vm5, %v6482_v49, %v12888_v48  ;;  %v5478_v51 = vsel %vm5436_vm10, %v11171_v19, %v4609_v14  ;;  %v3225_v46 = vshrl.u32 %v6542_v27, 16 }
 0x267   :  { %v6835_v63 = vcombine.low %v2437_v7, %v2440_v16  ;;  %v2433_v21 = vsel %vm7913_vm5, %v2431_v50, %v2432_v6  ;;  %v3228_v37 = vshll.u32 %v6542_v27, 16  ;;  %v3238_v62 = vshrl.u32 %v11803_v10, 16 }
 0x268   :  { %v6834_v55 = vcombine.low %v2430_v53, %v2433_v21  ;;  %v6866_v17 = vcombine.low %v6542_v27, %v11803_v10  ;;  %v3227_v22 = vrot.slane %v3225_v46, 4  ;;  %v2841_v40 = vshrl.u32 %v6510_v54, 16  ;;  %5102 = vrot.lane.b32.xlu0 %v6913_v45, %s7314_s27  ;;  %v4961_v49 = vpop.permute.xlu1 %4960 }
 0x269   :  { %v2844_v19 = vshll.u32 %v6510_v54, 16  ;;  %v2854_v14 = vshrl.u32 %v11820_v38, 16  ;;  %v3230_v61 = vrot.slane %v3228_v37, 5  ;;  %v6850_v26 = vcombine.low %v6510_v54, %v11820_v38  ;;  %4626 = vrot.lane.b32.xlu1 %v6835_v63, %s7311_s12  ;;  %v4929_v7 = vpop.permute.xlu0 %4928 }
 0x26a   :  { %v5543_v33 = vsel %vm5501_vm11, %v5478_v51, %v4801_v8  ;;  %v5511_v1 = vsel %vm5501_vm11, %v11303_v52, %v4769_v23  ;;  %v2843_v44 = vrot.slane %v2841_v40, 4  ;;  %v3249_v56 = vshrl.u32 %v6544_v18, 16  ;;  %v11861_v23 = vld [vmem:[%s12344_s0 + $0x188] sm:$0x1] }
 0x26b   :  { %v2846_v2 = vrot.slane %v2844_v19, 5  ;;  %v3252_v29 = vshll.u32 %v6544_v18, 16  ;;  %v3262_v13 = vshrl.u32 %v11835_v9, 16  ;;  %v6867_v3 = vcombine.low %v6544_v18, %v11835_v9 }
 0x26c   :  { %v2865_v8 = vshrl.u32 %v11841_v25, 16  ;;  %v2868_v52 = vshll.u32 %v11841_v25, 16  ;;  %v3251_v50 = vrot.slane %v3249_v56, 4  ;;  %v2878_v12 = vshrl.u32 %v11851_v20, 16  ;;  %4624 = vrot.lane.b32.xlu0 %v6834_v55, %s7311_s12  ;;  %v4963_v37 = vpop.permute.xlu1 %4962 }
 0x26d   :  { %v3254_v27 = vrot.slane %v3252_v29, 5  ;;  %v6851_v31 = vcombine.low %v11841_v25, %v11851_v20  ;;  %v5545_v45 = vsel %vm5501_vm11, %v5480_v36, %v4803_v41  ;;  %v5513_v16 = vsel %vm5501_vm11, %v11291_v30, %v4771_v15  ;;  %4816 = vrot.lane.b32.xlu1 %v6866_v17, %s7312_s7  ;;  %v11886_v15 = vld [vmem:[%s12344_s0 + $0x194] sm:$0x1] }
 0x26e   :  { %v2867_v0 = vrot.slane %v2865_v8, 4  ;;  %v2870_v6 = vrot.slane %v2868_v52, 5  ;;  %v3231_v48 = vor.u32 %v3230_v61, %v3227_v22  ;;  %v3234_v53 = vshll.u32 %v11803_v10, 16 }
 0x26f   :  { %v3240_v54 = vrot.slane %v3238_v62, 4  ;;  %v3244_v63 = vshll.u32 %v11861_v23, 16  ;;  %v2847_v21 = vor.u32 %v2846_v2, %v2843_v44  ;;  %v2850_v51 = vshll.u32 %v11820_v38, 16 }
 0x270   :  { %v2856_v46 = vrot.slane %v2854_v14, 4  ;;  %v2860_v55 = vshll.u32 %v11869_v42, 16  ;;  %v3232_v18 = vrot.slane %v3231_v48, 4  ;;  %v3236_v41 = vrot.slane %v3234_v53, 5  ;;  %4784 = vrot.lane.b32.xlu0 %v6850_v26, %s7312_s7  ;;  %v5121_v29 = vpop.permute.xlu1 %5120 }
 0x271   :  { %v3246_v36 = vrot.slane %v3244_v63, 5  ;;  %v11881_v30 = vsel %vm5566_vm12, %v5543_v33, %v4961_v49  ;;  %v2848_v62 = vrot.slane %v2847_v21, 4  ;;  %v2852_v17 = vrot.slane %v2850_v51, 5  ;;  %4818 = vrot.lane.b32.xlu1 %v6867_v3, %s7312_s7  ;;  %v4931_v33 = vpop.permute.xlu0 %4930  ;;  %v11900_v3 = vld [vmem:[%s12344_s0 + $0xbc] sm:$0x1] }
 0x272   :  { %v2862_v22 = vrot.slane %v2860_v55, 5  ;;  %v5576_v40 = vsel %vm5566_vm12, %v5511_v1, %v4929_v7  ;;  %v3237_v19 = vsel %vm7360_vm2, %v3232_v18, %v3236_v41  ;;  %v3241_v14 = vor.u32 %v3240_v54, %v3236_v41  ;;  %v6610_v21 = vld [vmem:[%s12344_s0 + $0x180] sm:$0xe] }
 0x273   :  { %v3255_v25 = vor.u32 %v3254_v27, %v3251_v50  ;;  %v3258_v61 = vshll.u32 %v11835_v9, 16  ;;  %v2853_v44 = vsel %vm7360_vm2, %v2848_v62, %v2852_v17  ;;  %v2857_v2 = vor.u32 %v2856_v46, %v2852_v17  ;;  %v6594_v46 = vld [vmem:[%s12344_s0 + $0xa8] sm:$0xe] }
 0x274   :  { %v3264_v26 = vrot.slane %v3262_v13, 4  ;;  %v3268_v56 = vshll.u32 %v11886_v15, 16  ;;  %v3242_v49 = vrot.slane %v3241_v14, 4  ;;  %v2871_v52 = vor.u32 %v2870_v6, %v2867_v0  ;;  %4786 = vrot.lane.b32.xlu0 %v6851_v31, %s7312_s7  ;;  %v5123_v55 = vpop.permute.xlu1 %5122 }
 0x275   :  { %v3256_v1 = vrot.slane %v3255_v25, 4  ;;  %v3260_v8 = vrot.slane %v3258_v61, 5  ;;  %v2858_v50 = vrot.slane %v2857_v2, 4  ;;  %v2874_v7 = vshll.u32 %v11851_v20, 16  ;;  %v5089_v0 = vpop.permute.xlu0 %5088 }
 0x276   :  { %v3270_v27 = vrot.slane %v3268_v56, 5  ;;  %v2880_v48 = vrot.slane %v2878_v12, 4  ;;  %v3247_v13 = vsel %vm7360_vm2, %v3242_v49, %v3246_v36  ;;  %v2872_v63 = vrot.slane %v2871_v52, 4  ;;  %v6595_v52 = vld [vmem:[%s12344_s0 + $0xb4] sm:$0xe] }
 0x277   :  { %v3261_v53 = vsel %vm7360_vm2, %v3256_v1, %v3260_v8  ;;  %v3265_v54 = vor.u32 %v3264_v26, %v3260_v8  ;;  %v6898_v6 = vcombine.low %v3237_v19, %v3247_v13  ;;  %v2863_v31 = vsel %vm7360_vm2, %v2858_v50, %v2862_v22 }
 0x278   :  { %v2876_v51 = vrot.slane %v2874_v7, 5  ;;  %v2884_v12 = vshll.u32 %v11900_v3, 16  ;;  %v6882_v18 = vcombine.low %v2853_v44, %v2863_v31  ;;  %v5610_v36 = vsel %vm5566_vm12, %v5545_v45, %v4963_v37  ;;  %v4615_v49 = vpop.permute.xlu1 %4614 }
 0x279   :  { %v3266_v41 = vrot.slane %v3265_v54, 4  ;;  %v5578_v62 = vsel %vm5566_vm12, %v5513_v16, %v4931_v33  ;;  %4976 = vrot.lane.b32.xlu1 %v6898_v6, %s7313_s15  ;;  %v6642_v14 = vrot.slane %v6610_v21, 9  ;;  %v3646_v61 = vrot.slane %v11803_v10, 5  ;;  %v6611_v16 = vld [vmem:[%s12344_s0 + $0x18c] sm:$0xe]  ;;  %v5091_v37 = vpop.permute.xlu0 %5090 }
 0x27a   :  { %v2877_v17 = vsel %vm7360_vm2, %v2872_v63, %v2876_v51  ;;  %v2881_v22 = vor.u32 %v2880_v48, %v2876_v51  ;;  %v2886_v19 = vrot.slane %v2884_v12, 5  ;;  %4944 = vrot.lane.b32.xlu0 %v6882_v18, %s7313_s15  ;;  %v3649_v44 = vrot.slane %v11861_v23, 5  ;;  %v6453_v21 = vld [vmem:[%s12344_s0 + $0x198] sm:$0xe]  ;;  %v6452_v51 = vld [vmem:[%s12344_s0 + $0x18c] sm:$0xe] }
 0x27b   :  { %v3271_v25 = vsel %vm7360_vm2, %v3266_v41, %v3270_v27  ;;  %v6626_v45 = vrot.slane %v6594_v46, 9  ;;  %v3534_v26 = vrot.slane %v11820_v38, 5  ;;  %v3537_v56 = vrot.slane %v11869_v42, 5 }
 0x27c   :  { %v6899_v33 = vcombine.low %v3261_v53, %v3271_v25  ;;  %v2882_v2 = vrot.slane %v2881_v22, 4  ;;  %v3647_v1 = vsel %vm7913_vm5, %v6642_v14, %v3646_v61  ;;  %v3648_v8 = vrot.slane %v3646_v61, 4  ;;  %v12889_v22 = vld [vmem:[#allocation126_spill] sm:$0xff]  ;;  %v7283_v14 = vld [vmem:[%s12344_s0 + $0x1a0] sm:$0x1] }
 0x27d   :  { %v5673_v10 = vsel %vm5631_vm14, %v11881_v30, %v5121_v29  ;;  %v5641_v23 = vsel %vm5631_vm14, %v5576_v40, %v5089_v0  ;;  %v3535_v42 = vsel %vm7913_vm5, %v6626_v45, %v3534_v26  ;;  %v3536_v50 = vrot.slane %v3534_v26, 4  ;;  %v4613_v48 = vpop.permute.xlu0 %4612  ;;  %v4805_v0 = vpop.permute.xlu1 %4804 }
 0x27e   :  { %4978 = vrot.lane.b32.xlu1 %v6899_v33, %s7313_s15  ;;  %v2887_v38 = vsel %vm7360_vm2, %v2882_v2, %v2886_v19  ;;  %v6643_v27 = vrot.slane %v6611_v16, 9  ;;  %7019 = vmatprep.mubr.msk.bf16.mxu0 %vm5723_vm15, %v5641_v23  ;;  %v3650_v30 = vsel %vm7913_vm5, %v3648_v8, %v3649_v44  ;;  %v3653_v40 = vrot.slane %v11835_v9, 5  ;;  %v12891_v44 = vld [vmem:[#allocation130_spill] sm:$0xff]  ;;  %v11988_v33 = vld [vmem:[%s12344_s0 + $0x19c] sm:$0xf] }
 0x27f   :  { %v6883_v7 = vcombine.low %v2877_v17, %v2887_v38  ;;  %v3656_v29 = vrot.slane %v11886_v15, 5  ;;  %7051 = vmatprep.mubr.msk.bf16.mxu1 %vm5723_vm15, %v5673_v10  ;;  %v6930_v13 = vcombine.low %v3647_v1, %v3650_v30  ;;  %v3538_v53 = vsel %vm7913_vm5, %v3536_v50, %v3537_v56  ;;  %v7284_v8 = vld [vmem:[%s12344_s0 + $0x194] sm:$0x1]  ;;  %v6514_v23 = vld [vmem:[%s12344_s0 + $0xc0] sm:$0xf] }
 0x280   :  { %v6627_v54 = vrot.slane %v6595_v52, 9  ;;  %v3541_v63 = vrot.slane %v11851_v20, 5  ;;  %v6914_v9 = vcombine.low %v3535_v42, %v3538_v53  ;;  %v3654_v15 = vsel %vm7913_vm5, %v6643_v27, %v3653_v40  ;;  %v12015_v30 = vld [vmem:[%s12344_s0 + $0xc4] sm:$0xf] }
 0x281   :  { %4946 = vrot.lane.b32.xlu0 %v6883_v7, %s7313_s15  ;;  %v3655_v6 = vrot.slane %v3653_v40, 4  ;;  %v3544_v31 = vrot.slane %v11900_v3, 5  ;;  %v5675_v46 = vsel %vm5631_vm14, %v5610_v36, %v5123_v55  ;;  %v5643_v18 = vsel %vm5631_vm14, %v5578_v62, %v5091_v37  ;;  %v4773_v61 = vpop.permute.xlu0 %4772  ;;  %v6546_v37 = vld [vmem:[%s12344_s0 + $0x198] sm:$0xf]  ;;  %v4807_v52 = vpop.permute.xlu1 %4806 }
 0x282   :  { %5136 = vrot.lane.b32.xlu1 %v6930_v13, %s7314_s27  ;;  %v3542_v20 = vsel %vm7913_vm5, %v6627_v54, %v3541_v63  ;;  %v3543_v12 = vrot.slane %v3541_v63, 4  ;;  %v6485_v17 = vrot.slane %v6453_v21, 9  ;;  %v12890_v3 = vrot.slane %v12889_v22, 5  ;;  %7020 = vmatmul.mubr.msk.bf16.gmra.mxu0 %vm5723_vm15, %v5643_v18  ;;  %v6548_v54 = vld [vmem:[%s12344_s0 + $0x1a4] sm:$0xf] }
 0x283   :  { %v3657_v41 = vsel %vm7913_vm5, %v3655_v6, %v3656_v29  ;;  %v2453_v25 = vrot.slane %v7283_v14, 5  ;;  %7052 = vmatmul.mubr.msk.bf16.gmra.mxu1 %vm5723_vm15, %v5675_v46  ;;  %v6484_v62 = vrot.slane %v6452_v51, 9  ;;  %v12892_v45 = vrot.slane %v12891_v44, 5  ;;  %v12027_v21 = vld [vmem:[%s12344_s0 + $0x1a8] sm:$0xf] }
 0x284   :  { %v2452_v19 = vrot.slane %v12890_v3, 4  ;;  %v6931_v55 = vcombine.low %v3654_v15, %v3657_v41  ;;  %v3545_v36 = vsel %vm7913_vm5, %v3543_v12, %v3544_v31  ;;  %v12893_v26 = vmov %v12890_v3 }
 0x285   :  { %v2445_v16 = vrot.slane %v12892_v45, 4  ;;  %5104 = vrot.lane.b32.xlu0 %v6914_v9, %s7314_s27  ;;  %v6915_v2 = vcombine.low %v3542_v20, %v3545_v36  ;;  %v2451_v56 = vsel %vm7913_vm5, %v6485_v17, %v12893_v26  ;;  %v2446_v10 = vrot.slane %v7284_v8, 5  ;;  %v12032_v9 = vld [vmem:[%s12344_s0 + $0xcc] sm:$0xf]  ;;  %v12040_v20 = vld [vmem:[%s12344_s0 + $0xd0] sm:$0xf] }
 0x286   :  { %v2454_v1 = vsel %vm7913_vm5, %v2452_v19, %v2453_v25  ;;  %5138 = vrot.lane.b32.xlu1 %v6931_v55, %s7314_s27  ;;  %v12894_v42 = vmov %v12892_v45  ;;  %v5484_v27 = vsel %vm5436_vm10, %v10953_v57, %v4615_v49  ;;  %v5482_v7 = vsel %vm5436_vm10, %v10964_v35, %v4613_v48  ;;  %v4775_v57 = vpop.permute.xlu0 %4774 }
 0x287   :  { %v6837_v38 = vcombine.low %v2451_v56, %v2454_v1  ;;  %v2444_v50 = vsel %vm7913_vm5, %v6484_v62, %v12894_v42  ;;  %v2447_v40 = vsel %vm7913_vm5, %v2445_v16, %v2446_v10  ;;  %v3273_v29 = vshrl.u32 %v6546_v37, 16  ;;  %v12067_v16 = vld [vmem:[%s12344_s0 + $0xc8] sm:$0x1] }
 0x288   :  { %v3276_v13 = vshll.u32 %v6546_v37, 16  ;;  %v3286_v53 = vshrl.u32 %v11988_v33, 16  ;;  %v6836_v49 = vcombine.low %v2444_v50, %v2447_v40  ;;  %v6868_v35 = vcombine.low %v6546_v37, %v11988_v33  ;;  %v4965_v14 = vpop.permute.xlu1 %4964 }
 0x289   :  { %v2889_v48 = vshrl.u32 %v6514_v23, 16  ;;  %v2892_v63 = vshll.u32 %v6514_v23, 16  ;;  %5106 = vrot.lane.b32.xlu0 %v6915_v2, %s7314_s27  ;;  %v3275_v15 = vrot.slane %v3273_v29, 4  ;;  %v2902_v31 = vshrl.u32 %v12015_v30, 16 }
 0x28a   :  { %v3278_v6 = vrot.slane %v3276_v13, 5  ;;  %v6852_v51 = vcombine.low %v6514_v23, %v12015_v30  ;;  %4630 = vrot.lane.b32.xlu1 %v6837_v38, %s7311_s12  ;;  %v5547_v18 = vsel %vm5501_vm11, %v5482_v7, %v4805_v0  ;;  %v5515_v41 = vsel %vm5501_vm11, %v11339_v32, %v4773_v61  ;;  %v12056_v32 = vld [vmem:[%s12344_s0 + $0x1a0] sm:$0x1] }
 0x28b   :  { %v2891_v12 = vrot.slane %v2889_v48, 4  ;;  %v2894_v46 = vrot.slane %v2892_v63, 5  ;;  %v3297_v17 = vshrl.u32 %v6548_v54, 16  ;;  %v3300_v22 = vshll.u32 %v6548_v54, 16  ;;  %v4933_v37 = vpop.permute.xlu0 %4932 }
 0x28c   :  { %v3310_v3 = vshrl.u32 %v12027_v21, 16  ;;  %v6869_v19 = vcombine.low %v6548_v54, %v12027_v21  ;;  %v2913_v25 = vshrl.u32 %v12032_v9, 16  ;;  %v2916_v55 = vshll.u32 %v12032_v9, 16 }
 0x28d   :  { %v2926_v36 = vshrl.u32 %v12040_v20, 16  ;;  %v6853_v62 = vcombine.low %v12032_v9, %v12040_v20  ;;  %4628 = vrot.lane.b32.xlu0 %v6836_v49, %s7311_s12  ;;  %v3299_v0 = vrot.slane %v3297_v17, 4  ;;  %v3302_v61 = vrot.slane %v3300_v22, 5 }
 0x28e   :  { %v5549_v44 = vsel %vm5501_vm11, %v5484_v27, %v4807_v52  ;;  %v12062_v45 = vsel %vm5501_vm11, %v11334_v43, %v4775_v57  ;;  %4820 = vrot.lane.b32.xlu1 %v6868_v35, %s7312_s7  ;;  %v2915_v2 = vrot.slane %v2913_v25, 4  ;;  %v2918_v26 = vrot.slane %v2916_v55, 5  ;;  %v4967_v27 = vpop.permute.xlu1 %4966 }
 0x28f   :  { %v3279_v56 = vor.u32 %v3278_v6, %v3275_v15  ;;  %v3282_v1 = vshll.u32 %v11988_v33, 16  ;;  %v3288_v8 = vrot.slane %v3286_v53, 4  ;;  %v3292_v10 = vshll.u32 %v12056_v32, 16  ;;  %v12081_v53 = vld [vmem:[%s12344_s0 + $0x1ac] sm:$0x1] }
 0x290   :  { %v2895_v23 = vor.u32 %v2894_v46, %v2891_v12  ;;  %v2898_v43 = vshll.u32 %v12015_v30, 16  ;;  %v2904_v42 = vrot.slane %v2902_v31, 4  ;;  %v2908_v50 = vshll.u32 %v12067_v16, 16  ;;  %v4935_v6 = vpop.permute.xlu0 %4934 }
 0x291   :  { %v3280_v52 = vrot.slane %v3279_v56, 4  ;;  %v3284_v38 = vrot.slane %v3282_v1, 5  ;;  %4788 = vrot.lane.b32.xlu0 %v6852_v51, %s7312_s7  ;;  %v3294_v7 = vrot.slane %v3292_v10, 5  ;;  %v12076_v13 = vsel %vm5566_vm12, %v5547_v18, %v4965_v14 }
 0x292   :  { %v2896_v40 = vrot.slane %v2895_v23, 4  ;;  %v2900_v29 = vrot.slane %v2898_v43, 5  ;;  %4822 = vrot.lane.b32.xlu1 %v6869_v19, %s7312_s7  ;;  %v2910_v49 = vrot.slane %v2908_v50, 5  ;;  %v5580_v35 = vsel %vm5566_vm12, %v5515_v41, %v4933_v37  ;;  %v5125_v18 = vpop.permute.xlu1 %5124  ;;  %v12095_v41 = vld [vmem:[%s12344_s0 + $0xd4] sm:$0x1] }
 0x293   :  { %v3285_v54 = vsel %vm7360_vm2, %v3280_v52, %v3284_v38  ;;  %v3289_v57 = vor.u32 %v3288_v8, %v3284_v38  ;;  %v3303_v9 = vor.u32 %v3302_v61, %v3299_v0  ;;  %v3306_v15 = vshll.u32 %v12027_v21, 16 }
 0x294   :  { %v2901_v48 = vsel %vm7360_vm2, %v2896_v40, %v2900_v29  ;;  %v2905_v63 = vor.u32 %v2904_v42, %v2900_v29  ;;  %v3312_v51 = vrot.slane %v3310_v3, 4  ;;  %v3316_v12 = vshll.u32 %v12081_v53, 16  ;;  %v5093_v56 = vpop.permute.xlu0 %5092  ;;  %v6613_v29 = vld [vmem:[%s12344_s0 + $0x1a4] sm:$0xe] }
 0x295   :  { %v3290_v31 = vrot.slane %v3289_v57, 4  ;;  %v2919_v46 = vor.u32 %v2918_v26, %v2915_v2  ;;  %4790 = vrot.lane.b32.xlu0 %v6853_v62, %s7312_s7  ;;  %v3304_v22 = vrot.slane %v3303_v9, 4  ;;  %v3308_v19 = vrot.slane %v3306_v15, 5  ;;  %v6612_v62 = vld [vmem:[%s12344_s0 + $0x198] sm:$0xe] }
 0x296   :  { %v2906_v17 = vrot.slane %v2905_v63, 4  ;;  %v2922_v14 = vshll.u32 %v12040_v20, 16  ;;  %v3318_v3 = vrot.slane %v3316_v12, 5  ;;  %v2928_v0 = vrot.slane %v2926_v36, 4  ;;  %v6596_v36 = vld [vmem:[%s12344_s0 + $0xc0] sm:$0xe]  ;;  %v5127_v43 = vpop.permute.xlu1 %5126 }
 0x297   :  { %v3295_v25 = vsel %vm7360_vm2, %v3290_v31, %v3294_v7  ;;  %v2920_v55 = vrot.slane %v2919_v46, 4  ;;  %v3309_v2 = vsel %vm7360_vm2, %v3304_v22, %v3308_v19  ;;  %v3313_v26 = vor.u32 %v3312_v51, %v3308_v19 }
 0x298   :  { %v6900_v61 = vcombine.low %v3285_v54, %v3295_v25  ;;  %v2911_v37 = vsel %vm7360_vm2, %v2906_v17, %v2910_v49  ;;  %v2924_v8 = vrot.slane %v2922_v14, 5  ;;  %v2932_v10 = vshll.u32 %v12095_v41, 16  ;;  %v5095_v49 = vpop.permute.xlu0 %5094 }
 0x299   :  { %v6884_v1 = vcombine.low %v2901_v48, %v2911_v37  ;;  %v5614_v23 = vsel %vm5566_vm12, %v5549_v44, %v4967_v27  ;;  %v3314_v52 = vrot.slane %v3313_v26, 4  ;;  %v5582_v38 = vsel %vm5566_vm12, %v12062_v45, %v4935_v6 }
 0x29a   :  { %4980 = vrot.lane.b32.xlu1 %v6900_v61, %s7313_s15  ;;  %v6644_v42 = vrot.slane %v6612_v62, 9  ;;  %v3660_v50 = vrot.slane %v11988_v33, 5  ;;  %v2925_v7 = vsel %vm7360_vm2, %v2920_v55, %v2924_v8  ;;  %v2929_v44 = vor.u32 %v2928_v0, %v2924_v8  ;;  %v4619_v6 = vpop.permute.xlu1 %4618 }
 0x29b   :  { %4948 = vrot.lane.b32.xlu0 %v6884_v1, %s7313_s15  ;;  %v2934_v27 = vrot.slane %v2932_v10, 5  ;;  %v3663_v40 = vrot.slane %v12056_v32, 5  ;;  %v3319_v54 = vsel %vm7360_vm2, %v3314_v52, %v3318_v3  ;;  %v6628_v57 = vrot.slane %v6596_v36, 9  ;;  %v6597_v32 = vld [vmem:[%s12344_s0 + $0xcc] sm:$0xe] }
 0x29c   :  { %v3661_v45 = vsel %vm7913_vm5, %v6644_v42, %v3660_v50  ;;  %v3662_v33 = vrot.slane %v3660_v50, 4  ;;  %v6901_v48 = vcombine.low %v3309_v2, %v3319_v54  ;;  %v2930_v63 = vrot.slane %v2929_v44, 4 }
 0x29d   :  { %v3548_v9 = vrot.slane %v12015_v30, 5  ;;  %v3551_v15 = vrot.slane %v12067_v16, 5  ;;  %v5677_v51 = vsel %vm5631_vm14, %v12076_v13, %v5125_v18  ;;  %v5645_v12 = vsel %vm5631_vm14, %v5580_v35, %v5093_v56  ;;  %v4617_v35 = vpop.permute.xlu0 %4616 }
 0x29e   :  { %v3664_v31 = vsel %vm7913_vm5, %v3662_v33, %v3663_v40  ;;  %v6645_v46 = vrot.slane %v6613_v29, 9  ;;  %4982 = vrot.lane.b32.xlu1 %v6901_v48, %s7313_s15  ;;  %v2935_v30 = vsel %vm7360_vm2, %v2930_v63, %v2934_v27  ;;  %7023 = vmatprep.mubr.msk.bf16.mxu0 %vm5723_vm15, %v5645_v12  ;;  %v3667_v14 = vrot.slane %v12027_v21, 5  ;;  %v4809_v0 = vpop.permute.xlu1 %4808 }
 0x29f   :  { %v6932_v16 = vcombine.low %v3661_v45, %v3664_v31  ;;  %v3549_v17 = vsel %vm7913_vm5, %v6628_v57, %v3548_v9  ;;  %v3550_v22 = vrot.slane %v3548_v9, 4  ;;  %v6885_v19 = vcombine.low %v2925_v7, %v2935_v30  ;;  %7055 = vmatprep.mubr.msk.bf16.mxu1 %vm5723_vm15, %v5677_v51 }
 0x2a0   :  { %v3670_v13 = vrot.slane %v12081_v53, 5  ;;  %v6629_v18 = vrot.slane %v6597_v32, 9  ;;  %v3555_v25 = vrot.slane %v12040_v20, 5  ;;  %v3558_v3 = vrot.slane %v12095_v41, 5 }
 0x2a1   :  { %v3552_v34 = vsel %vm7913_vm5, %v3550_v22, %v3551_v15  ;;  %v5679_v55 = vsel %vm5631_vm14, %v5614_v23, %v5127_v43  ;;  %4950 = vrot.lane.b32.xlu0 %v6885_v19, %s7313_s15  ;;  %v3668_v21 = vsel %vm7913_vm5, %v6645_v46, %v3667_v14  ;;  %v3669_v53 = vrot.slane %v3667_v14, 4  ;;  %v4777_v2 = vpop.permute.xlu0 %4776 }
 0x2a2   :  { %v6916_v62 = vcombine.low %v3549_v17, %v3552_v34  ;;  %v5647_v61 = vsel %vm5631_vm14, %v5582_v38, %v5095_v49  ;;  %7056 = vmatmul.mubr.msk.bf16.gmra.mxu1 %vm5723_vm15, %v5679_v55  ;;  %5140 = vrot.lane.b32.xlu1 %v6932_v16, %s7314_s27  ;;  %v3556_v20 = vsel %vm7913_vm5, %v6629_v18, %v3555_v25  ;;  %v3557_v41 = vrot.slane %v3555_v25, 4  ;;  %v4811_v8 = vpop.permute.xlu1 %4810 }
 0x2a3   :  { %7024 = vmatmul.mubr.msk.bf16.gmra.mxu0 %vm5723_vm15, %v5647_v61  ;;  %v3671_v37 = vsel %vm7913_vm5, %v3669_v53, %v3670_v13  ;;  %v5486_v52 = vsel %vm5436_vm10, %v10981_v47, %v4617_v35  ;;  %v5454_v7 = vsel %vm5436_vm10, %v10726_v24, %v11235_v5  ;;  %v5488_v27 = vsel %vm5436_vm10, %v10974_v39, %v4619_v6  ;;  %v12895_v13 = vld [vmem:[#allocation73_spill] sm:$0xff] }
 0x2a4   :  { %v6933_v26 = vcombine.low %v3668_v21, %v3671_v37  ;;  %v3559_v56 = vsel %vm7913_vm5, %v3557_v41, %v3558_v3  ;;  %v5551_v38 = vsel %vm5501_vm11, %v5486_v52, %v4809_v0  ;;  %v5519_v40 = vsel %vm5501_vm11, %v5454_v7, %v4777_v2  ;;  %v12899_v7 = vld [vmem:[#allocation78_spill] sm:$0xff] }
 0x2a5   :  { %5108 = vrot.lane.b32.xlu0 %v6916_v62, %s7314_s27  ;;  %v6917_v1 = vcombine.low %v3556_v20, %v3559_v56  ;;  %v4779_v10 = vpop.permute.xlu0 %4778  ;;  %v5553_v47 = vsel %vm5501_vm11, %v5488_v27, %v4811_v8  ;;  %v5456_v24 = vsel %vm5436_vm10, %v10719_v58, %v11231_v28  ;;  %v5458_v19 = vsel %vm5436_vm10, %v10755_v59, %v11267_v11  ;;  %v12896_v59 = vld [vmem:[#allocation34_spill] sm:$0xff]  ;;  %v12897_v11 = vld [vmem:[#allocation67_spill] sm:$0xff] }
 0x2a6   :  { %5142 = vrot.lane.b32.xlu1 %v6933_v26, %s7314_s27  ;;  %v5521_v5 = vsel %vm5501_vm11, %v5456_v24, %v4779_v10  ;;  %v5460_v62 = vsel %vm5436_vm10, %v12897_v11, %v12896_v59 }
 0x2a9   :  { %5110 = vrot.lane.b32.xlu0 %v6917_v1, %s7314_s27 }
 0x2aa   :  { %v4969_v23 = vpop.permute.xlu1 %4968 }
 0x2ab   :  { %v4937_v36 = vpop.permute.xlu0 %4936  ;;  %v5616_v4 = vsel %vm5566_vm12, %v5551_v38, %v4969_v23 }
 0x2ac   :  { %v5584_v29 = vsel %vm5566_vm12, %v5519_v40, %v4937_v36 }
 0x2ae   :  { %v4971_v43 = vpop.permute.xlu1 %4970 }
 0x2af   :  { %v5618_v45 = vsel %vm5566_vm12, %v5553_v47, %v4971_v43  ;;  %v12898_v43 = vld [vmem:[#allocation70_spill] sm:$0xff]  ;;  %v12901_v47 = vld [vmem:[#allocation69_spill] sm:$0xff] }
 0x2b1   :  { %v4939_v42 = vpop.permute.xlu0 %4938 }
 0x2b2   :  { %v5129_v50 = vpop.permute.xlu1 %5128  ;;  %v5586_v49 = vsel %vm5566_vm12, %v5521_v5, %v4939_v42 }
 0x2b3   :  { %v5681_v44 = vsel %vm5631_vm14, %v5616_v4, %v5129_v50 }
 0x2b4   :  { %7059 = vmatprep.mubr.msk.bf16.mxu1 %vm5723_vm15, %v5681_v44  ;;  %v12900_v44 = vld [vmem:[#allocation24_spill] sm:$0xff] }
 0x2b5   :  { %v5097_v54 = vpop.permute.xlu0 %5096  ;;  %v5462_v27 = vsel %vm5436_vm10, %v12900_v44, %v12899_v7 }
 0x2b6   :  { %v5649_v33 = vsel %vm5631_vm14, %v5584_v29, %v5097_v54  ;;  %v5131_v57 = vpop.permute.xlu1 %5130 }
 0x2b7   :  { %7027 = vmatprep.mubr.msk.bf16.mxu0 %vm5723_vm15, %v5649_v33  ;;  %v5683_v39 = vsel %vm5631_vm14, %v5618_v45, %v5131_v57 }
 0x2b8   :  { %7060 = vmatmul.mubr.msk.bf16.gmra.mxu1 %vm5723_vm15, %v5683_v39 }
 0x2b9   :  { %v5099_v48 = vpop.permute.xlu0 %5098 }
 0x2ba   :  { %v5651_v63 = vsel %vm5631_vm14, %v5586_v49, %v5099_v48  ;;  %v12902_v49 = vld [vmem:[#allocation35_spill] sm:$0xff]  ;;  %v12903_v48 = vld [vmem:[#allocation61_spill] sm:$0xff] }
 0x2bb   :  { %7028 = vmatmul.mubr.msk.bf16.gmra.mxu0 %vm5723_vm15, %v5651_v63  ;;  %v5464_v63 = vsel %vm5436_vm10, %v12903_v48, %v12902_v49 }
 0x2bc   :  { %v4623_v9 = vpop.permute.xlu1 %4622 }
 0x2bd   :  { %v4621_v15 = vpop.permute.xlu0 %4620  ;;  %v5492_v18 = vsel %vm5436_vm10, %v12895_v13, %v4623_v9 }
 0x2be   :  { %v5490_v46 = vsel %vm5436_vm10, %v11010_v60, %v4621_v15 }
 0x2c0   :  { %v4813_v32 = vpop.permute.xlu1 %4812 }
 0x2c1   :  { %v4781_v6 = vpop.permute.xlu0 %4780  ;;  %v5555_v30 = vsel %vm5501_vm11, %v5490_v46, %v4813_v32 }
 0x2c2   :  { %v5523_v35 = vsel %vm5501_vm11, %v5458_v19, %v4781_v6 }
 0x2c4   :  { %v4815_v58 = vpop.permute.xlu1 %4814 }
 0x2c5   :  { %v4783_v28 = vpop.permute.xlu0 %4782  ;;  %v5557_v60 = vsel %vm5501_vm11, %v5492_v18, %v4815_v58 }
 0x2c6   :  { %v5525_v53 = vsel %vm5501_vm11, %v5460_v62, %v4783_v28 }
 0x2cb   :  { %v4973_v31 = vpop.permute.xlu1 %4972 }
 0x2cc   :  { %v4941_v51 = vpop.permute.xlu0 %4940  ;;  %v5620_v17 = vsel %vm5566_vm12, %v5555_v30, %v4973_v31 }
 0x2cd   :  { %v5588_v34 = vsel %vm5566_vm12, %v5523_v35, %v4941_v51 }
 0x2cf   :  { %v4975_v12 = vpop.permute.xlu1 %4974 }
 0x2d0   :  { %v5622_v3 = vsel %vm5566_vm12, %v5557_v60, %v4975_v12 }
 0x2d2   :  { %v4943_v16 = vpop.permute.xlu0 %4942 }
 0x2d3   :  { %v5133_v22 = vpop.permute.xlu1 %5132  ;;  %v5590_v61 = vsel %vm5566_vm12, %v5525_v53, %v4943_v16 }
 0x2d4   :  { %v5685_v14 = vsel %vm5631_vm14, %v5620_v17, %v5133_v22  ;;  %v12248_v17 = vld [vmem:[%s12346_s2] ss:$0 sm:$0xff]  ;;  %s7315_s2 = smov [#allocation2]  }
 0x2d5   :  { %7063 = vmatprep.mubr.msk.bf16.mxu1 %vm5723_vm15, %v5685_v14  ;;  %s6283_s27 = sshll.u32 %s7315_s2, 4  ;;  %s6284_s27 = int_to_ptr.vmem [resolvable:$true] %s6283_s27 }
 0x2d6   :  { %v5101_v25 = vpop.permute.xlu0 %5100  ;;  %s7285_s30 = scalar_lea.vmem %s6284_s27, 512  ;;  %p7290_p1 = scmp.lt.s32.totalorder %s6284_s27, %s6284_s27 }
 0x2d7   :  { %v5653_v55 = vsel %vm5631_vm14, %v5588_v34, %v5101_v25  ;;  %v5135_v0 = vpop.permute.xlu1 %5134  ;;  %p7286_p0 = scmp.ne.s32.totalorder %s6284_s27, %s7285_s30  ;;  %p7291_p2 = scmp.lt.s32.totalorder %s7285_s30, %s7285_s30 }
 0x2d8   :  { %7031 = vmatprep.mubr.msk.bf16.mxu0 %vm5723_vm15, %v5653_v55  ;;  %v5687_v21 = vsel %vm5631_vm14, %v5622_v3, %v5135_v0  ;;  %v12904_v0 = vld [vmem:[#allocation71_spill] sm:$0xff] }
 0x2d9   :  { %7064 = vmatmul.mubr.msk.bf16.gmra.mxu1 %vm5723_vm15, %v5687_v21  ;;  %p7292_p3 = por %p7291_p2, %p7290_p1 }
 0x2da   :  { %v5103_v20 = vpop.permute.xlu0 %5102 }
 0x2db   :  { %v5655_v41 = vsel %vm5631_vm14, %v5590_v61, %v5103_v20  ;;  %v4627_v37 = vpop.permute.xlu1 %4626  ;;  %p7293_p4 = pnand %p7292_p3, %p7286_p0 }
 0x2dc   :  { %7032 = vmatmul.mubr.msk.bf16.gmra.mxu0 %vm5723_vm15, %v5655_v41  ;;  %v5496_v29 = vsel %vm5436_vm10, %v12901_v47, %v4627_v37  ;;  %v12905_v41 = vld [vmem:[#allocation79_spill] sm:$0xff]  ;;  %v12906_v37 = vld [vmem:[#allocation68_spill] sm:$0xff] }
 0x2de   :  { %v4625_v2 = vpop.permute.xlu0 %4624 }
 0x2df   :  { %v4817_v26 = vpop.permute.xlu1 %4816  ;;  %v5494_v52 = vsel %vm5436_vm10, %v12898_v43, %v4625_v2  ;;  %v5466_v2 = vsel %vm5436_vm10, %v12906_v37, %v12905_v41 }
 0x2e0   :  { %v5559_v38 = vsel %vm5501_vm11, %v5494_v52, %v4817_v26 }
 0x2e2   :  { %v4785_v56 = vpop.permute.xlu0 %4784 }
 0x2e3   :  { %v4819_v1 = vpop.permute.xlu1 %4818  ;;  %v5527_v54 = vsel %vm5501_vm11, %v5462_v27, %v4785_v56  ;;  %v12907_v56 = vld [vmem:[#allocation77_spill] sm:$0xff] }
 0x2e4   :  { %v5561_v45 = vsel %vm5501_vm11, %v5496_v29, %v4819_v1 }
 0x2e6   :  { %v4787_v8 = vpop.permute.xlu0 %4786 }
 0x2e7   :  { %v5529_v15 = vsel %vm5501_vm11, %v5464_v63, %v4787_v8 }
 0x2eb   :  { %v4977_v10 = vpop.permute.xlu1 %4976 }
 0x2ec   :  { %v4945_v23 = vpop.permute.xlu0 %4944  ;;  %v5624_v4 = vsel %vm5566_vm12, %v5559_v38, %v4977_v10 }
 0x2ed   :  { %v5592_v33 = vsel %vm5566_vm12, %v5527_v54, %v4945_v23 }
 0x2f0   :  { %v4979_v36 = vpop.permute.xlu1 %4978 }
 0x2f1   :  { %v5626_v24 = vsel %vm5566_vm12, %v5561_v45, %v4979_v36 }
 0x2f3   :  { %v4947_v42 = vpop.permute.xlu0 %4946 }
 0x2f4   :  { %v5137_v50 = vpop.permute.xlu1 %5136  ;;  %v5594_v32 = vsel %vm5566_vm12, %v5529_v15, %v4947_v42 }
 0x2f5   :  { %v5689_v40 = vsel %vm5631_vm14, %v5624_v4, %v5137_v50  ;;  %v12908_v4 = vld [vmem:[#allocation83_spill] sm:$0xff]  ;;  %v12909_v50 = vld [vmem:[#allocation25_spill] sm:$0xff] }
 0x2f6   :  { %7067 = vmatprep.mubr.msk.bf16.mxu1 %vm5723_vm15, %v5689_v40  ;;  %v5468_v7 = vsel %vm5436_vm10, %v12909_v50, %v12908_v4 }
 0x2f7   :  { %v5105_v57 = vpop.permute.xlu0 %5104 }
 0x2f8   :  { %v5657_v39 = vsel %vm5631_vm14, %v5592_v33, %v5105_v57  ;;  %v5139_v5 = vpop.permute.xlu1 %5138 }
 0x2f9   :  { %7035 = vmatprep.mubr.msk.bf16.mxu0 %vm5723_vm15, %v5657_v39  ;;  %v5691_v9 = vsel %vm5631_vm14, %v5626_v24, %v5139_v5 }
 0x2fa   :  { %7068 = vmatmul.mubr.msk.bf16.gmra.mxu1 %vm5723_vm15, %v5691_v9 }
 0x2fb   :  { %v5107_v6 = vpop.permute.xlu0 %5106 }
 0x2fc   :  { %v5659_v58 = vsel %vm5631_vm14, %v5594_v32, %v5107_v6  ;;  %v4631_v28 = vpop.permute.xlu1 %4630 }
 0x2fd   :  { %7036 = vmatmul.mubr.msk.bf16.gmra.mxu0 %vm5723_vm15, %v5659_v58  ;;  %v5500_v1 = vsel %vm5436_vm10, %v12907_v56, %v4631_v28 }
 0x2ff   :  { %v4629_v31 = vpop.permute.xlu0 %4628 }
 0x300   :  { %v4821_v51 = vpop.permute.xlu1 %4820  ;;  %v5498_v59 = vsel %vm5436_vm10, %v12904_v0, %v4629_v31 }
 0x301   :  { %v5563_v21 = vsel %vm5501_vm11, %v5498_v59, %v4821_v51 }
 0x303   :  { %v4789_v12 = vpop.permute.xlu0 %4788  ;;  %v7013_v30 = vpop.f32.mrf.mxu0 }
 0x304   :  { %v4823_v46 = vpop.permute.xlu1 %4822  ;;  %v5835_v25 = vadd.f32 %v7013_v30, %v12248_v17  ;;  %v5531_v8 = vsel %vm5501_vm11, %v5466_v2, %v4789_v12 }
 0x305   :  { %v5826_v22 = vpop.f32.mrf.mxu0  ;;  %v5565_v23 = vsel %vm5501_vm11, %v5500_v1, %v4823_v46 }
 0x306   :  { %v5827_v19 = vadd.f32 %v12248_v17, %v5826_v22  ;;  %v6083_v11 = vmax.f32 %v5835_v25, 0.0 }
 0x307   :  { %v4791_v16 = vpop.permute.xlu0 %4790  ;;  %v7014_v14 = vpop.f32.mrf.mxu0 }
 0x308   :  { %v6081_v13 = vmax.f32 %v5827_v19, 0.0  ;;  %v5838_v62 = vadd.f32 %v7014_v14, %v12248_v17  ;;  %v5533_v27 = vsel %vm5501_vm11, %v5468_v7, %v4791_v16 }
 0x309   :  { %v5829_v35 = vpop.f32.mrf.mxu0 }
 0x30a   :  { %v5830_v60 = vadd.f32 %v12248_v17, %v5829_v35  ;;  %6145 = vxpose.xlu0.b32.start [1/16] (narrow) %v6081_v13, 8  ;;  %v6084_v10 = vmax.f32 %v5838_v62, 0.0 }
 0x30c   :  { %v4981_v18 = vpop.permute.xlu1 %4980  ;;  %v6082_v3 = vmax.f32 %v5830_v60, 0.0 }
 0x30d   :  { %v4949_v34 = vpop.permute.xlu0 %4948  ;;  %v5628_v61 = vsel %vm5566_vm12, %v5563_v21, %v4981_v18 }
 0x30e   :  { %6146 = vxpose.xlu0.b32.cont [2/16] (narrow) %v6082_v3, 8  ;;  %v5596_v36 = vsel %vm5566_vm12, %v5531_v8, %v4949_v34  ;;  %v7045_v34 = vpop.f32.mrf.mxu1 }
 0x310   :  { %v4983_v55 = vpop.permute.xlu1 %4982  ;;  %v5954_v59 = vpop.f32.mrf.mxu1 }
 0x311   :  { %v5630_v52 = vsel %vm5566_vm12, %v5565_v23, %v4983_v55 }
 0x312   :  { %6147 = vxpose.xlu0.b32.cont [3/16] (narrow) %v6083_v11, 8  ;;  %v7046_v21 = vpop.f32.mrf.mxu1 }
 0x313   :  { %v4951_v53 = vpop.permute.xlu0 %4950  ;;  %v5966_v23 = vadd.f32 %v7046_v21, %v12248_v17 }
 0x314   :  { %v5141_v20 = vpop.permute.xlu1 %5140  ;;  %v5598_v40 = vsel %vm5566_vm12, %v5533_v27, %v4951_v53  ;;  %v5955_v53 = vadd.f32 %v12248_v17, %v5954_v59 }
 0x315   :  { %v5693_v26 = vsel %vm5631_vm14, %v5628_v61, %v5141_v20  ;;  %v5957_v20 = vpop.f32.mrf.mxu1 }
 0x316   :  { %7071 = vmatprep.mubr.msk.bf16.mxu1 %vm5723_vm15, %v5693_v26  ;;  %6148 = vxpose.xlu0.b32.cont [4/16] (narrow) %v6084_v10, 8  ;;  %v6113_v41 = vmax.f32 %v5955_v53, 0.0  ;;  %v5958_v37 = vadd.f32 %v12248_v17, %v5957_v20  ;;  %v5963_v26 = vadd.f32 %v7045_v34, %v12248_v17 }
 0x317   :  { %v5109_v43 = vpop.permute.xlu0 %5108 }
 0x318   :  { %v5661_v38 = vsel %vm5631_vm14, %v5596_v36, %v5109_v43  ;;  %v5143_v42 = vpop.permute.xlu1 %5142  ;;  %v6114_v56 = vmax.f32 %v5958_v37, 0.0  ;;  %v6115_v10 = vmax.f32 %v5963_v26, 0.0 }
 0x319   :  { %7039 = vmatprep.mubr.msk.bf16.mxu0 %vm5723_vm15, %v5661_v38  ;;  %v5695_v44 = vsel %vm5631_vm14, %v5630_v52, %v5143_v42  ;;  %v6116_v42 = vmax.f32 %v5966_v23, 0.0 }
 0x31a   :  { %7072 = vmatmul.mubr.msk.bf16.gmra.mxu1 %vm5723_vm15, %v5695_v44 }
 0x31b   :  { %v5111_v47 = vpop.permute.xlu0 %5110 }
 0x31c   :  { %v5663_v29 = vsel %vm5631_vm14, %v5598_v40, %v5111_v47 }
 0x31d   :  { %7040 = vmatmul.mubr.msk.bf16.gmra.mxu0 %vm5723_vm15, %v5663_v29 }
 0x321   :  { %v7049_v2 = vpop.f32.mrf.mxu1 }
 0x322   :  { %v7017_v54 = vpop.f32.mrf.mxu0 }
 0x323   :  { %v5851_v49 = vadd.f32 %v7017_v54, %v12248_v17  ;;  %v5970_v1 = vpop.f32.mrf.mxu1 }
 0x324   :  { %v5842_v45 = vpop.f32.mrf.mxu0  ;;  %v5971_v4 = vadd.f32 %v12248_v17, %v5970_v1 }
 0x325   :  { %v5843_v33 = vadd.f32 %v12248_v17, %v5842_v45  ;;  %v6087_v63 = vmax.f32 %v5851_v49, 0.0  ;;  %v7050_v36 = vpop.f32.mrf.mxu1 }
 0x326   :  { %v7018_v57 = vpop.f32.mrf.mxu0  ;;  %v6117_v40 = vmax.f32 %v5971_v4, 0.0 }
 0x327   :  { %v6085_v24 = vmax.f32 %v5843_v33, 0.0  ;;  %v5854_v9 = vadd.f32 %v7018_v57, %v12248_v17  ;;  %v5973_v7 = vpop.f32.mrf.mxu1  ;;  %v5979_v33 = vadd.f32 %v7049_v2, %v12248_v17 }
 0x328   :  { %v5845_v39 = vpop.f32.mrf.mxu0  ;;  %v5974_v47 = vadd.f32 %v12248_v17, %v5973_v7 }
 0x329   :  { %v5846_v5 = vadd.f32 %v12248_v17, %v5845_v39  ;;  %6149 = vxpose.xlu0.b32.cont [5/16] (narrow) %v6085_v24, 8  ;;  %v6088_v15 = vmax.f32 %v5854_v9, 0.0  ;;  %v6119_v49 = vmax.f32 %v5979_v33, 0.0 }
 0x32a   :  { %v6118_v57 = vmax.f32 %v5974_v47, 0.0 }
 0x32b   :  { %v6086_v48 = vmax.f32 %v5846_v5, 0.0 }
 0x32d   :  { %6150 = vxpose.xlu0.b32.cont [6/16] (narrow) %v6086_v48, 8  ;;  %v5982_v48 = vadd.f32 %v7050_v36, %v12248_v17 }
 0x331   :  { %6151 = vxpose.xlu0.b32.cont [7/16] (narrow) %v6087_v63, 8 }
 0x335   :  { %6152 = vxpose.xlu0.b32.cont [8/16] (narrow) %v6088_v15, 8  ;;  %v6120_v15 = vmax.f32 %v5982_v48, 0.0 }
 0x342   :  { %v7021_v32 = vpop.f32.mrf.mxu0 }
 0x343   :  { %v5867_v46 = vadd.f32 %v7021_v32, %v12248_v17  ;;  %v7053_v45 = vpop.f32.mrf.mxu1 }
 0x344   :  { %v5858_v6 = vpop.f32.mrf.mxu0 }
 0x345   :  { %v5859_v58 = vadd.f32 %v12248_v17, %v5858_v6  ;;  %v6091_v16 = vmax.f32 %v5867_v46, 0.0  ;;  %v5986_v5 = vpop.f32.mrf.mxu1 }
 0x346   :  { %v7022_v28 = vpop.f32.mrf.mxu0  ;;  %v5987_v32 = vadd.f32 %v12248_v17, %v5986_v5 }
 0x347   :  { %v6089_v31 = vmax.f32 %v5859_v58, 0.0  ;;  %v5870_v22 = vadd.f32 %v7022_v28, %v12248_v17  ;;  %v7054_v9 = vpop.f32.mrf.mxu1 }
 0x348   :  { %v5861_v51 = vpop.f32.mrf.mxu0  ;;  %v6121_v58 = vmax.f32 %v5987_v32, 0.0 }
 0x349   :  { %v5862_v12 = vadd.f32 %v12248_v17, %v5861_v51  ;;  %6153 = vxpose.xlu0.b32.cont [9/16] (narrow) %v6089_v31, 8  ;;  %v6092_v19 = vmax.f32 %v5870_v22, 0.0  ;;  %v5989_v6 = vpop.f32.mrf.mxu1  ;;  %v5995_v51 = vadd.f32 %v7053_v45, %v12248_v17  ;;  %v5998_v22 = vadd.f32 %v7054_v9, %v12248_v17 }
 0x34a   :  { %v5990_v28 = vadd.f32 %v12248_v17, %v5989_v6 }
 0x34b   :  { %v6090_v30 = vmax.f32 %v5862_v12, 0.0 }
 0x34c   :  { %v6122_v12 = vmax.f32 %v5990_v28, 0.0 }
 0x34d   :  { %6154 = vxpose.xlu0.b32.cont [10/16] (narrow) %v6090_v30, 8 }
 0x351   :  { %6155 = vxpose.xlu0.b32.cont [11/16] (narrow) %v6091_v16, 8  ;;  %v6123_v16 = vmax.f32 %v5995_v51, 0.0 }
 0x355   :  { %6156 = vxpose.xlu0.b32.cont [12/16] (narrow) %v6092_v19, 8 }
 0x362   :  { %v7057_v31 = vpop.f32.mrf.mxu1 }
 0x363   :  { %v7025_v14 = vpop.f32.mrf.mxu0  ;;  %v6011_v21 = vadd.f32 %v7057_v31, %v12248_v17 }
 0x364   :  { %v5883_v55 = vadd.f32 %v7025_v14, %v12248_v17  ;;  %v6002_v46 = vpop.f32.mrf.mxu1 }
 0x365   :  { %v5874_v13 = vpop.f32.mrf.mxu0 }
 0x366   :  { %v5875_v18 = vadd.f32 %v12248_v17, %v5874_v13  ;;  %v6095_v11 = vmax.f32 %v5883_v55, 0.0  ;;  %v7058_v19 = vpop.f32.mrf.mxu1 }
 0x367   :  { %v7026_v35 = vpop.f32.mrf.mxu0  ;;  %v6014_v37 = vadd.f32 %v7058_v19, %v12248_v17 }
 0x368   :  { %v6093_v60 = vmax.f32 %v5875_v18, 0.0  ;;  %v5886_v62 = vadd.f32 %v7026_v35, %v12248_v17  ;;  %v6124_v35 = vmax.f32 %v5998_v22, 0.0 }
 0x369   :  { %v5877_v25 = vpop.f32.mrf.mxu0  ;;  %v6128_v26 = vmax.f32 %v6014_v37, 0.0 }
 0x36a   :  { %v5878_v3 = vadd.f32 %v12248_v17, %v5877_v25  ;;  %6157 = vxpose.xlu0.b32.cont [13/16] (narrow) %v6093_v60, 8  ;;  %v6096_v61 = vmax.f32 %v5886_v62, 0.0  ;;  %v6003_v60 = vadd.f32 %v12248_v17, %v6002_v46  ;;  %v6005_v25 = vpop.f32.mrf.mxu1 }
 0x36b   :  { %v6006_v59 = vadd.f32 %v12248_v17, %v6005_v25 }
 0x36c   :  { %v6094_v0 = vmax.f32 %v5878_v3, 0.0 }
 0x36d   :  { %v6126_v53 = vmax.f32 %v6006_v59, 0.0 }
 0x36e   :  { %6158 = vxpose.xlu0.b32.cont [14/16] (narrow) %v6094_v0, 8  ;;  %v6125_v0 = vmax.f32 %v6003_v60, 0.0 }
 0x372   :  { %6159 = vxpose.xlu0.b32.cont [15/16] (narrow) %v6095_v11, 8 }
 0x376   :  { %6160 = vxpose.xlu0.b32.end [16/16] (narrow) %v6096_v61, 8 }
 0x37a   :  { %6211 = vxpose.xlu0.b32.start [1/16] (narrow) %v6113_v41, 8  ;;  %v6127_v41 = vmax.f32 %v6011_v21, 0.0 }
 0x37b   :  { %v7029_v8 = vpop.f32.mrf.mxu0 }
 0x37c   :  { %v5899_v29 = vadd.f32 %v7029_v8, %v12248_v17 }
 0x37d   :  { %v5890_v43 = vpop.f32.mrf.mxu0 }
 0x37e   :  { %6212 = vxpose.xlu0.b32.cont [2/16] (narrow) %v6114_v56, 8  ;;  %v5891_v52 = vadd.f32 %v12248_v17, %v5890_v43  ;;  %v6099_v24 = vmax.f32 %v5899_v29, 0.0 }
 0x37f   :  { %v7030_v38 = vpop.f32.mrf.mxu0 }
 0x380   :  { %v6097_v50 = vmax.f32 %v5891_v52, 0.0  ;;  %v5902_v39 = vadd.f32 %v7030_v38, %v12248_v17 }
 0x381   :  { %v5893_v44 = vpop.f32.mrf.mxu0 }
 0x382   :  { %6213 = vxpose.xlu0.b32.cont [3/16] (narrow) %v6115_v10, 8  ;;  %v5894_v27 = vadd.f32 %v12248_v17, %v5893_v44  ;;  %6177 = vxpose.xlu1.b32.start [1/16] (narrow) %v6097_v50, 8  ;;  %v6100_v63 = vmax.f32 %v5902_v39, 0.0 }
 0x384   :  { %v6098_v54 = vmax.f32 %v5894_v27, 0.0 }
 0x386   :  { %6214 = vxpose.xlu0.b32.cont [4/16] (narrow) %v6116_v42, 8  ;;  %6178 = vxpose.xlu1.b32.cont [2/16] (narrow) %v6098_v54, 8  ;;  %v7061_v54 = vpop.f32.mrf.mxu1 }
 0x387   :  { %v6027_v31 = vadd.f32 %v7061_v54, %v12248_v17 }
 0x388   :  { %v6018_v39 = vpop.f32.mrf.mxu1 }
 0x389   :  { %v6131_v46 = vmax.f32 %v6027_v31, 0.0 }
 0x38a   :  { %6215 = vxpose.xlu0.b32.cont [5/16] (narrow) %v6117_v40, 8  ;;  %6179 = vxpose.xlu1.b32.cont [3/16] (narrow) %v6099_v24, 8  ;;  %v7062_v48 = vpop.f32.mrf.mxu1 }
 0x38e   :  { %6216 = vxpose.xlu0.b32.cont [6/16] (narrow) %v6118_v57, 8  ;;  %6180 = vxpose.xlu1.b32.cont [4/16] (narrow) %v6100_v63, 8  ;;  %v6019_v63 = vadd.f32 %v12248_v17, %v6018_v39 }
 0x390   :  { %v6129_v32 = vmax.f32 %v6019_v63, 0.0 }
 0x392   :  { %6217 = vxpose.xlu0.b32.cont [7/16] (narrow) %v6119_v49, 8 }
 0x396   :  { %6218 = vxpose.xlu0.b32.cont [8/16] (narrow) %v6120_v15, 8  ;;  %v6021_v15 = vpop.f32.mrf.mxu1 }
 0x397   :  { %v6022_v6 = vadd.f32 %v12248_v17, %v6021_v15 }
 0x399   :  { %v6130_v51 = vmax.f32 %v6022_v6, 0.0 }
 0x39a   :  { %6219 = vxpose.xlu0.b32.cont [9/16] (narrow) %v6121_v58, 8  ;;  %v7065_v58 = vpop.f32.mrf.mxu1 }
 0x39b   :  { %v6043_v60 = vadd.f32 %v7065_v58, %v12248_v17 }
 0x39c   :  { %v7033_v30 = vpop.f32.mrf.mxu0 }
 0x39d   :  { %v5915_v11 = vadd.f32 %v7033_v30, %v12248_v17  ;;  %v6030_v30 = vadd.f32 %v7062_v48, %v12248_v17 }
 0x39e   :  { %6220 = vxpose.xlu0.b32.cont [10/16] (narrow) %v6122_v12, 8  ;;  %v5906_v14 = vpop.f32.mrf.mxu0  ;;  %v6034_v12 = vpop.f32.mrf.mxu1 }
 0x39f   :  { %v5907_v13 = vadd.f32 %v12248_v17, %v5906_v14  ;;  %v6103_v61 = vmax.f32 %v5915_v11, 0.0  ;;  %v6132_v22 = vmax.f32 %v6030_v30, 0.0  ;;  %v6035_v19 = vadd.f32 %v12248_v17, %v6034_v12 }
 0x3a0   :  { %v7034_v18 = vpop.f32.mrf.mxu0 }
 0x3a1   :  { %v6101_v34 = vmax.f32 %v5907_v13, 0.0  ;;  %v5918_v20 = vadd.f32 %v7034_v18, %v12248_v17  ;;  %v6133_v13 = vmax.f32 %v6035_v19, 0.0 }
 0x3a2   :  { %6221 = vxpose.xlu0.b32.cont [11/16] (narrow) %v6123_v16, 8  ;;  %v5909_v3 = vpop.f32.mrf.mxu0  ;;  %v7066_v16 = vpop.f32.mrf.mxu1 }
 0x3a3   :  { %v5910_v55 = vadd.f32 %v12248_v17, %v5909_v3  ;;  %6181 = vxpose.xlu1.b32.cont [5/16] (narrow) %v6101_v34, 8  ;;  %v6104_v2 = vmax.f32 %v5918_v20, 0.0  ;;  %v6135_v3 = vmax.f32 %v6043_v60, 0.0 }
 0x3a4   :  { %v6037_v14 = vpop.f32.mrf.mxu1 }
 0x3a5   :  { %v6102_v62 = vmax.f32 %v5910_v55, 0.0  ;;  %v6038_v18 = vadd.f32 %v12248_v17, %v6037_v14  ;;  %v6046_v55 = vadd.f32 %v7066_v16, %v12248_v17 }
 0x3a6   :  { %6222 = vxpose.xlu0.b32.cont [12/16] (narrow) %v6124_v35, 8 }
 0x3a7   :  { %6182 = vxpose.xlu1.b32.cont [6/16] (narrow) %v6102_v62, 8  ;;  %v6134_v34 = vmax.f32 %v6038_v18, 0.0  ;;  %v6136_v59 = vmax.f32 %v6046_v55, 0.0 }
 0x3aa   :  { %6223 = vxpose.xlu0.b32.cont [13/16] (narrow) %v6125_v0, 8 }
 0x3ab   :  { %6183 = vxpose.xlu1.b32.cont [7/16] (narrow) %v6103_v61, 8 }
 0x3ae   :  { %6224 = vxpose.xlu0.b32.cont [14/16] (narrow) %v6126_v53, 8 }
 0x3af   :  { %6184 = vxpose.xlu1.b32.cont [8/16] (narrow) %v6104_v2, 8 }
 0x3b2   :  { %6225 = vxpose.xlu0.b32.cont [15/16] (narrow) %v6127_v41, 8 }
 0x3b6   :  { %6226 = vxpose.xlu0.b32.end [16/16] (narrow) %v6128_v26, 8  ;;  %v6161_v56 = vpop.trf.xlu0 }
 0x3b7   :  { %6209 = vst [vmem:[#allocation2] sm:$0xff] %v6161_v56 }
 0x3ba   :  { %v7069_v35 = vpop.f32.mrf.mxu1 }
 0x3bb   :  { %v6059_v20 = vadd.f32 %v7069_v35, %v12248_v17 }
 0x3bc   :  { %v6050_v25 = vpop.f32.mrf.mxu1 }
 0x3bd   :  { %v7037_v1 = vpop.f32.mrf.mxu0  ;;  %v6051_v11 = vadd.f32 %v12248_v17, %v6050_v25  ;;  %v6139_v2 = vmax.f32 %v6059_v20, 0.0 }
 0x3be   :  { %v5931_v38 = vadd.f32 %v7037_v1, %v12248_v17  ;;  %v7070_v0 = vpop.f32.mrf.mxu1 }
 0x3bf   :  { %v5922_v8 = vpop.f32.mrf.mxu0  ;;  %v6137_v21 = vmax.f32 %v6051_v11, 0.0  ;;  %v6062_v26 = vadd.f32 %v7070_v0, %v12248_v17 }
 0x3c0   :  { %v5923_v10 = vadd.f32 %v12248_v17, %v5922_v8  ;;  %v6107_v4 = vmax.f32 %v5931_v38, 0.0  ;;  %v6053_v62 = vpop.f32.mrf.mxu1 }
 0x3c1   :  { %v7038_v23 = vpop.f32.mrf.mxu0  ;;  %v6054_v53 = vadd.f32 %v12248_v17, %v6053_v62  ;;  %v6140_v1 = vmax.f32 %v6062_v26, 0.0 }
 0x3c2   :  { %v6105_v36 = vmax.f32 %v5923_v10, 0.0  ;;  %v5934_v50 = vadd.f32 %v7038_v23, %v12248_v17 }
 0x3c3   :  { %v5925_v43 = vpop.f32.mrf.mxu0  ;;  %v6138_v41 = vmax.f32 %v6054_v53, 0.0 }
 0x3c4   :  { %v5926_v52 = vadd.f32 %v12248_v17, %v5925_v43  ;;  %6185 = vxpose.xlu1.b32.cont [9/16] (narrow) %v6105_v36, 8  ;;  %v6108_v7 = vmax.f32 %v5934_v50, 0.0 }
 0x3c6   :  { %v6106_v42 = vmax.f32 %v5926_v52, 0.0 }
 0x3c8   :  { %6186 = vxpose.xlu1.b32.cont [10/16] (narrow) %v6106_v42, 8 }
 0x3cc   :  { %6187 = vxpose.xlu1.b32.cont [11/16] (narrow) %v6107_v4, 8 }
 0x3d0   :  { %6188 = vxpose.xlu1.b32.cont [12/16] (narrow) %v6108_v7, 8 }
 0x3da   :  { %v7073_v61 = vpop.f32.mrf.mxu1 }
 0x3db   :  { %v6075_v43 = vadd.f32 %v7073_v61, %v12248_v17 }
 0x3dc   :  { %v6066_v37 = vpop.f32.mrf.mxu1 }
 0x3dd   :  { %v7041_v44 = vpop.f32.mrf.mxu0  ;;  %v6067_v8 = vadd.f32 %v12248_v17, %v6066_v37  ;;  %v6143_v38 = vmax.f32 %v6075_v43, 0.0 }
 0x3de   :  { %v5947_v57 = vadd.f32 %v7041_v44, %v12248_v17  ;;  %v7074_v56 = vpop.f32.mrf.mxu1 }
 0x3df   :  { %v5938_v27 = vpop.f32.mrf.mxu0  ;;  %v6141_v23 = vmax.f32 %v6067_v8, 0.0  ;;  %v6078_v42 = vadd.f32 %v7074_v56, %v12248_v17 }
 0x3e0   :  { %v5939_v40 = vadd.f32 %v12248_v17, %v5938_v27  ;;  %v6111_v5 = vmax.f32 %v5947_v57, 0.0  ;;  %v6069_v10 = vpop.f32.mrf.mxu1 }
 0x3e1   :  { %v7042_v47 = vpop.f32.mrf.mxu0  ;;  %v6070_v36 = vadd.f32 %v12248_v17, %v6069_v10  ;;  %v6144_v4 = vmax.f32 %v6078_v42, 0.0 }
 0x3e2   :  { %v6109_v29 = vmax.f32 %v5939_v40, 0.0  ;;  %v5950_v49 = vadd.f32 %v7042_v47, %v12248_v17 }
 0x3e3   :  { %v5941_v45 = vpop.f32.mrf.mxu0  ;;  %v6142_v52 = vmax.f32 %v6070_v36, 0.0 }
 0x3e4   :  { %v5942_v33 = vadd.f32 %v12248_v17, %v5941_v45  ;;  %6189 = vxpose.xlu1.b32.cont [13/16] (narrow) %v6109_v29, 8  ;;  %v6112_v9 = vmax.f32 %v5950_v49, 0.0 }
 0x3e6   :  { %v6110_v24 = vmax.f32 %v5942_v33, 0.0 }
 0x3e8   :  { %6190 = vxpose.xlu1.b32.cont [14/16] (narrow) %v6110_v24, 8 }
 0x3ec   :  { %6191 = vxpose.xlu1.b32.cont [15/16] (narrow) %v6111_v5, 8 }
 0x3f0   :  { %6192 = vxpose.xlu1.b32.end [16/16] (narrow) %v6112_v9, 8 }
 0x3f4   :  { %6243 = vxpose.xlu1.b32.start [1/16] (narrow) %v6129_v32, 8 }
 0x3f6   :  { %v6227_v28 = vpop.trf.xlu0 }
 0x3f7   :  { %6276 = vst [vmem:[#allocation2 + $0x10] sm:$0xff] %v6227_v28 }
 0x3f8   :  { %6244 = vxpose.xlu1.b32.cont [2/16] (narrow) %v6130_v51, 8 }
 0x3fc   :  { %6245 = vxpose.xlu1.b32.cont [3/16] (narrow) %v6131_v46, 8 }
 0x400   :  { %6246 = vxpose.xlu1.b32.cont [4/16] (narrow) %v6132_v22, 8 }
 0x404   :  { %6247 = vxpose.xlu1.b32.cont [5/16] (narrow) %v6133_v13, 8 }
 0x408   :  { %6248 = vxpose.xlu1.b32.cont [6/16] (narrow) %v6134_v34, 8 }
 0x40c   :  { %6249 = vxpose.xlu1.b32.cont [7/16] (narrow) %v6135_v3, 8 }
 0x410   :  { %6250 = vxpose.xlu1.b32.cont [8/16] (narrow) %v6136_v59, 8 }
 0x414   :  { %6251 = vxpose.xlu1.b32.cont [9/16] (narrow) %v6137_v21, 8 }
 0x418   :  { %6252 = vxpose.xlu1.b32.cont [10/16] (narrow) %v6138_v41, 8 }
 0x41c   :  { %6253 = vxpose.xlu1.b32.cont [11/16] (narrow) %v6139_v2, 8 }
 0x420   :  { %6254 = vxpose.xlu1.b32.cont [12/16] (narrow) %v6140_v1, 8 }
 0x424   :  { %6255 = vxpose.xlu1.b32.cont [13/16] (narrow) %v6141_v23, 8 }
 0x428   :  { %6256 = vxpose.xlu1.b32.cont [14/16] (narrow) %v6142_v52, 8 }
 0x42c   :  { %6257 = vxpose.xlu1.b32.cont [15/16] (narrow) %v6143_v38, 8 }
 0x430   :  { %6258 = vxpose.xlu1.b32.end [16/16] (narrow) %v6144_v4, 8  ;;  %v6193_v50 = vpop.trf.xlu1 }
 0x431   :  { %6210 = vst [vmem:[#allocation2 + $0x8] sm:$0xff] %v6193_v50 }
 0x470   :  { %v6259_v7 = vpop.trf.xlu1 }
 0x471   :  { %6277 = vst [vmem:[#allocation2 + $0x18] sm:$0xff] %v6259_v7 }
 0x472   :  { %7296 = shalt.err (!%p7293_p4)
}
 0x473   :  { %s7316_s4 = smov 256  }
 0x474   :  { %6289 = dma.vmem_to_hbm [thread:$0]  %s6284_s27, 512, %s12347_s3, [#allocation3], %s7316_s4, %s7316_s4, %s7310_s23  }
 0x475   :  { %7305 = dma.done.wait [#allocation3], 512  }
 0x476   :  { %7306 = vsyncadd [#allocation3], 4294966784 }
 0x477   :  { %6293 = vsyncpa [#allocation3], 1 }

</bundles_post_ra>
